<compile_context>
chip_gen: v7x
topology: tpu7x:2x2x1
jax: 0.10.0
libtpu: 0.0.40
codegen_flags: <defaults>
</compile_context>

<pallas_src>
import functools

import jax
import jax.numpy as jnp
import numpy as np
from jax.experimental import pallas as pl
from jax.experimental.pallas import tpu as pltpu

GN_EPS = 1e-5   # nn.GroupNorm default eps
WS_EPS = 1e-5   # WeightStandardizedConv2d eps for float32 inputs


# --------------------------- wrapper-side weight prep ----------------------- #

def _ws_taps(w_oihw):
    """Weight-standardize a PyTorch (O, I, 3, 3) conv weight -> (9, I, O) taps."""
    mean = jnp.mean(w_oihw, axis=(1, 2, 3), keepdims=True)
    var = jnp.mean((w_oihw - mean) ** 2, axis=(1, 2, 3), keepdims=True)
    wn = (w_oihw - mean) * jax.lax.rsqrt(var + WS_EPS)
    # (O, I, 3, 3) -> (kh, kw, I, O) -> (9, I, O); tap index t = kh*3 + kw
    return jnp.transpose(wn, (2, 3, 1, 0)).reshape(9, w_oihw.shape[1], w_oihw.shape[0])


# ------------------------------ Pallas kernel ------------------------------- #

def _resnet_block_kernel(x_ref, ss_ref, w1_ref, w2_ref, wres_ref, vecs_ref,
                         gsel_ref, gselT_ref, masks_ref, o_ref,
                         xpad_ref, hpad_ref, *, H, W, Cin, Cout, PAD):
    """Fully fused ResnetBlock for one batch element on an (HW, C) tile."""
    f32 = jnp.float32
    bf16 = jnp.bfloat16
    HW = H * W

    x = x_ref[...]                                           # (HW, Cin) bf16

    # Zero the halo rows of both staging buffers every step (cheap: 2*PAD rows),
    # then place this batch element's activations in the middle.
    xpad_ref[pl.ds(0, PAD), :] = jnp.zeros((PAD, Cin), bf16)
    xpad_ref[pl.ds(PAD + HW, PAD), :] = jnp.zeros((PAD, Cin), bf16)
    hpad_ref[pl.ds(0, PAD), :] = jnp.zeros((PAD, Cout), bf16)
    hpad_ref[pl.ds(PAD + HW, PAD), :] = jnp.zeros((PAD, Cout), bf16)
    xpad_ref[pl.ds(PAD, HW), :] = x

    mask_l = masks_ref[:, 0:1]       # (HW, 1) bf16: valid rows for dw = -1 taps
    mask_r = masks_ref[:, 1:2]       # (HW, 1) bf16: valid rows for dw = +1 taps

    def conv3x3(src_pad_ref, w_taps_ref):
        """3x3 conv (padding=1): 9 sublane-offset tap loads from the zero-padded
        staging buffer; only the left/right column wraps need masking."""
        acc = None
        for kh in range(3):
            for kw in range(3):
                d = (kh - 1) * W + (kw - 1)
                xs = src_pad_ref[pl.ds(PAD + d, HW), :]      # (HW, Csrc) bf16
                if kw == 0:
                    xs = xs * mask_l
                elif kw == 2:
                    xs = xs * mask_r
                part = jnp.dot(xs, w_taps_ref[kh * 3 + kw],
                               preferred_element_type=f32)
                acc = part if acc is None else acc + part
        return acc                                           # (HW, Cout) f32

    def group_norm(h, gamma, beta):
        # Single-pass stats (sum, sum-of-squares) packed as one (2, C) operand
        # -> one small matmul to groups, one small matmul back to channels.
        # TODO(synk): if cancellation shows up at production HW, switch to a
        # shifted / two-pass variance.
        stats = jnp.concatenate(
            [jnp.sum(h, axis=0, keepdims=True),
             jnp.sum(h * h, axis=0, keepdims=True)], axis=0)             # (2, C)
        g = jnp.dot(stats, gsel_ref[...], preferred_element_type=f32)    # (2, G)
        gmean = g[0:1, :]
        gvar = jnp.maximum(g[1:2, :] - gmean * gmean, 0.0)
        gpack = jnp.concatenate(
            [gmean, jax.lax.rsqrt(gvar + GN_EPS)], axis=0)               # (2, G)
        c = jnp.dot(gpack, gselT_ref[...], preferred_element_type=f32)   # (2, C)
        return (h - c[0:1, :]) * c[1:2, :] * gamma + beta

    # packed per-channel vectors
    b1, gn1_w, gn1_b = vecs_ref[0:1, :], vecs_ref[1:2, :], vecs_ref[2:3, :]
    b2, gn2_w, gn2_b = vecs_ref[3:4, :], vecs_ref[4:5, :], vecs_ref[5:6, :]
    res_b = vecs_ref[6:7, :]
    scale, shift = ss_ref[0:1, :], ss_ref[1:2, :]

    # ---- block 1: WS-conv3x3 -> GroupNorm -> scale/shift -> SiLU ----
    h = conv3x3(xpad_ref, w1_ref) + b1
    h = group_norm(h, gn1_w, gn1_b)
    h = h * (scale + 1.0) + shift
    h = h * jax.nn.sigmoid(h)

    # ---- block 2: cast once to bf16 into the staging buffer, conv, GN, SiLU ----
    hpad_ref[pl.ds(PAD, HW), :] = h.astype(bf16)
    h = conv3x3(hpad_ref, w2_ref) + b2
    h = group_norm(h, gn2_w, gn2_b)
    h = h * jax.nn.sigmoid(h)

    # ---- residual 1x1 conv + add ----
    res = jnp.dot(x, wres_ref[...], preferred_element_type=f32) + res_b
    # NOTE: for realistic Cout >= 128 this store is lane-dense; at the small
    # test Cout=16 it lowers to masked stores (see TODO at file top).
    o_ref[...] = h + res


# --------------------------------- wrapper ----------------------------------- #

def resnet_block_forward(x_nchw, time_emb, params, *, groups):
    B, Cin, H, W = x_nchw.shape
    Cout = params["b1"].shape[0]
    HW = H * W
    cg = Cout // groups
    PAD = ((W + 1 + 7) // 8) * 8          # halo rows, rounded to a sublane tile
    PADR = HW + 2 * PAD

    # one-time layout glue: NCHW -> (B, HW, C), bf16 activations for the MXU
    x_flat = jnp.transpose(x_nchw, (0, 2, 3, 1)).reshape(B, HW, Cin)
    x_flat = x_flat.astype(jnp.bfloat16)

    # one-time weight prep: standardize, per-tap layout, bf16 MXU operands
    w1 = _ws_taps(params["w1"]).astype(jnp.bfloat16)          # (9, Cin, Cout)
    w2 = _ws_taps(params["w2"]).astype(jnp.bfloat16)          # (9, Cout, Cout)
    wres = jnp.transpose(params["res_w"][:, :, 0, 0], (1, 0)).astype(jnp.bfloat16)

    vecs = jnp.stack([params["b1"], params["gn1_w"], params["gn1_b"],
                      params["b2"], params["gn2_w"], params["gn2_b"],
                      params["res_b"], jnp.zeros_like(params["b1"])],
                     axis=0).astype(jnp.float32)              # (8, Cout)

    # time MLP in plain JAX (tiny; XLA fuses it, no extra kernel launch)
    te = jax.nn.silu(time_emb)
    ss = jnp.dot(te, params["mlp_w"].T,
                 precision=jax.lax.Precision.HIGHEST) + params["mlp_b"]
    ss = ss.reshape(B, 2, Cout).astype(jnp.float32)           # row0 scale, row1 shift

    # host-side constants: group selectors (1/(HW*cg) folded) and column masks
    ch_group = np.arange(Cout) // cg
    gsel = (np.equal.outer(ch_group, np.arange(groups)).astype(np.float32)
            / float(HW * cg))                                 # (Cout, G)
    gselT = np.equal.outer(np.arange(groups), ch_group).astype(np.float32)  # (G, Cout)
    w_idx = np.arange(HW) % W
    masks = np.stack([(w_idx >= 1), (w_idx <= W - 2)], axis=1).astype(np.float32)
    gsel = jnp.asarray(gsel)
    gselT = jnp.asarray(gselT)
    masks = jnp.asarray(masks, dtype=jnp.bfloat16)            # (HW, 2)

    kern = functools.partial(_resnet_block_kernel, H=H, W=W, Cin=Cin,
                             Cout=Cout, PAD=PAD)
    out = pl.pallas_call(
        kern,
        out_shape=jax.ShapeDtypeStruct((B, HW, Cout), jnp.float32),
        grid=(B,),
        in_specs=[
            pl.BlockSpec((None, HW, Cin), lambda b: (b, 0, 0)),    # x tile (bf16)
            pl.BlockSpec((None, 2, Cout), lambda b: (b, 0, 0)),    # scale/shift rows
            pl.BlockSpec((9, Cin, Cout), lambda b: (0, 0, 0)),     # conv1 taps (bf16)
            pl.BlockSpec((9, Cout, Cout), lambda b: (0, 0, 0)),    # conv2 taps (bf16)
            pl.BlockSpec((Cin, Cout), lambda b: (0, 0)),           # residual 1x1 W (bf16)
            pl.BlockSpec((8, Cout), lambda b: (0, 0)),             # packed per-channel vecs
            pl.BlockSpec((Cout, groups), lambda b: (0, 0)),        # group selector (C->G)
            pl.BlockSpec((groups, Cout), lambda b: (0, 0)),        # group selector (G->C)
            pl.BlockSpec((HW, 2), lambda b: (0, 0)),               # left/right column masks
        ],
        out_specs=pl.BlockSpec((None, HW, Cout), lambda b: (b, 0, 0)),
        scratch_shapes=[
            pltpu.VMEM((PADR, Cin), jnp.bfloat16),                 # zero-padded x staging
            pltpu.VMEM((PADR, Cout), jnp.bfloat16),                # zero-padded h staging
        ],
        compiler_params=pltpu.CompilerParams(
            dimension_semantics=("parallel",),                     # megacore on v7x
            vmem_limit_bytes=48 * 1024 * 1024),
    )(x_flat, ss, w1, w2, wres, vecs, gsel, gselT, masks)

    return jnp.transpose(out.reshape(B, H, W, Cout), (0, 3, 1, 2))  # back to NCHW


# --------------------------- pure-JAX reference ----------------------------- #

def reference_forward(x_nchw, time_emb, params, groups):
    hi = jax.lax.Precision.HIGHEST

    def ws(w):
        mean = jnp.mean(w, axis=(1, 2, 3), keepdims=True)
        var = jnp.mean((w - mean) ** 2, axis=(1, 2, 3), keepdims=True)
        return (w - mean) * jax.lax.rsqrt(var + WS_EPS)

    def conv3x3(x, w_oihw, b):
        w_hwio = jnp.transpose(ws(w_oihw), (2, 3, 1, 0))
        y = jax.lax.conv_general_dilated(
            x, w_hwio, window_strides=(1, 1), padding=((1, 1), (1, 1)),
            dimension_numbers=("NHWC", "HWIO", "NHWC"), precision=hi)
        return y + b[None, None, None, :]

    def group_norm(x, gamma, beta):
        B, H, W, C = x.shape
        cg = C // groups
        xg = x.reshape(B, H, W, groups, cg)
        mean = jnp.mean(xg, axis=(1, 2, 4), keepdims=True)
        var = jnp.mean((xg - mean) ** 2, axis=(1, 2, 4), keepdims=True)
        xn = ((xg - mean) * jax.lax.rsqrt(var + GN_EPS)).reshape(B, H, W, C)
        return xn * gamma[None, None, None, :] + beta[None, None, None, :]

    silu = jax.nn.silu
    x = jnp.transpose(x_nchw, (0, 2, 3, 1))
    t = jnp.dot(silu(time_emb), params["mlp_w"].T, precision=hi) + params["mlp_b"]
    scale, shift = jnp.split(t, 2, axis=1)
    h = conv3x3(x, params["w1"], params["b1"])
    h = group_norm(h, params["gn1_w"], params["gn1_b"])
    h = h * (scale[:, None, None, :] + 1.0) + shift[:, None, None, :]
    h = silu(h)
    h = conv3x3(h, params["w2"], params["b2"])
    h = group_norm(h, params["gn2_w"], params["gn2_b"])
    h = silu(h)
    res = jnp.einsum("bhwc,cd->bhwd", x, params["res_w"][:, :, 0, 0].T,
                     precision=hi) + params["res_b"]
    return jnp.transpose(h + res, (0, 3, 1, 2))


# ----------------------------------- main ----------------------------------- #

if __name__ == "__main__":
    B, Cin, Cout, H, W, T, groups = 2, 4, 16, 16, 16, 32, 8

    key = jax.random.PRNGKey(0)
    ks = jax.random.split(key, 12)
    params = {
        "w1": 0.3 * jax.random.normal(ks[0], (Cout, Cin, 3, 3), jnp.float32),
        "b1": 0.1 * jax.random.normal(ks[1], (Cout,), jnp.float32),
        "gn1_w": 1.0 + 0.1 * jax.random.normal(ks[2], (Cout,), jnp.float32),
        "gn1_b": 0.1 * jax.random.normal(ks[3], (Cout,), jnp.float32),
        "mlp_w": 0.2 * jax.random.normal(ks[4], (2 * Cout, T), jnp.float32),
        "mlp_b": 0.1 * jax.random.normal(ks[5], (2 * Cout,), jnp.float32),
        "w2": 0.3 * jax.random.normal(ks[6], (Cout, Cout, 3, 3), jnp.float32),
        "b2": 0.1 * jax.random.normal(ks[7], (Cout,), jnp.float32),
        "gn2_w": 1.0 + 0.1 * jax.random.normal(ks[8], (Cout,), jnp.float32),
        "gn2_b": 0.1 * jax.random.normal(ks[9], (Cout,), jnp.float32),
        "res_w": 0.3 * jax.random.normal(ks[10], (Cout, Cin, 1, 1), jnp.float32),
        "res_b": 0.1 * jax.random.normal(ks[11], (Cout,), jnp.float32),
    }

    x = jax.random.normal(jax.random.PRNGKey(1), (B, Cin, H, W), jnp.float32)
    t = jax.random.normal(jax.random.PRNGKey(2), (B, T), jnp.float32)

    out = resnet_block_forward(x, t, params, groups=groups)
    out = jax.block_until_ready(out)

    # Tolerance is loosened vs. pure-f32 because conv/residual matmul operands
    # are bf16 on the MXU (f32 accumulation); structural bugs would show errors
    # orders of magnitude larger than this.
    ref = reference_forward(x, t, params, groups)
    np.testing.assert_allclose(np.asarray(out), np.asarray(ref), atol=5e-2, rtol=5e-2)

    print("KERNEL_OK")
</pallas_src>

<mosaic_0001>
module attributes {stable_mosaic.version = 11 : i64} {
  func.func @_resnet_block_kernel(%arg0: i32, %arg1: memref<1x256x4xbf16, #tpu.memory_space<vmem>>, %arg2: memref<1x2x16xf32, #tpu.memory_space<vmem>>, %arg3: memref<9x4x16xbf16, #tpu.memory_space<vmem>>, %arg4: memref<9x16x16xbf16, #tpu.memory_space<vmem>>, %arg5: memref<4x16xbf16, #tpu.memory_space<vmem>>, %arg6: memref<8x16xf32, #tpu.memory_space<vmem>>, %arg7: memref<16x8xf32, #tpu.memory_space<vmem>>, %arg8: memref<8x16xf32, #tpu.memory_space<vmem>>, %arg9: memref<256x2xbf16, #tpu.memory_space<vmem>>, %arg10: memref<1x256x16xf32, #tpu.memory_space<vmem>>, %arg11: memref<304x4xbf16, #tpu.memory_space<vmem>>, %arg12: memref<304x16xbf16, #tpu.memory_space<vmem>>) attributes {dimension_semantics = [#tpu.dimension_semantics<parallel>], iteration_bounds = array<i64: 2>, scalar_prefetch = 0 : i64, scratch_operands = 2 : i64, tpu.core_type = #tpu.core_type<tc>, window_params = [{transform_indices = @transform_0, window_bounds = array<i64: 1, 256, 4>}, {transform_indices = @transform_1, window_bounds = array<i64: 1, 2, 16>}, {pipeline_mode = #tpu.pipeline_mode<synchronous>, transform_indices = @transform_2, window_bounds = array<i64: 9, 4, 16>}, {pipeline_mode = #tpu.pipeline_mode<synchronous>, transform_indices = @transform_3, window_bounds = array<i64: 9, 16, 16>}, {pipeline_mode = #tpu.pipeline_mode<synchronous>, transform_indices = @transform_4, window_bounds = array<i64: 4, 16>}, {pipeline_mode = #tpu.pipeline_mode<synchronous>, transform_indices = @transform_5, window_bounds = array<i64: 8, 16>}, {pipeline_mode = #tpu.pipeline_mode<synchronous>, transform_indices = @transform_6, window_bounds = array<i64: 16, 8>}, {pipeline_mode = #tpu.pipeline_mode<synchronous>, transform_indices = @transform_7, window_bounds = array<i64: 8, 16>}, {pipeline_mode = #tpu.pipeline_mode<synchronous>, transform_indices = @transform_8, window_bounds = array<i64: 256, 2>}, {transform_indices = @transform_9, window_bounds = array<i64: 1, 256, 16>}]} {
    %c0 = arith.constant 0 : index
    %c0_0 = arith.constant 0 : index
    %c0_1 = arith.constant 0 : index
    %0 = vector.load %arg1[%c0, %c0_0, %c0_1] : memref<1x256x4xbf16, #tpu.memory_space<vmem>>, vector<1x256x4xbf16>
    %1 = vector.shape_cast %0 : vector<1x256x4xbf16> to vector<256x4xbf16>
    %cst = arith.constant 0.000000e+00 : bf16
    %2 = vector.broadcast %cst : bf16 to vector<24x4xbf16>
    %c0_2 = arith.constant 0 : index
    %c0_3 = arith.constant 0 : index
    %3 = vector.load %arg11[%c0_2, %c0_3] : memref<304x4xbf16, #tpu.memory_space<vmem>>, vector<24x4xbf16>
    tpu.vector_store %arg11[%c0_2, %c0_3], %2 {strides = array<i32>} : memref<304x4xbf16, #tpu.memory_space<vmem>>, vector<24x4xbf16>,
    %cst_4 = arith.constant 0.000000e+00 : bf16
    %4 = vector.broadcast %cst_4 : bf16 to vector<24x4xbf16>
    %c280 = arith.constant 280 : index
    %c0_5 = arith.constant 0 : index
    %5 = vector.load %arg11[%c280, %c0_5] : memref<304x4xbf16, #tpu.memory_space<vmem>>, vector<24x4xbf16>
    tpu.vector_store %arg11[%c280, %c0_5], %4 {strides = array<i32>} : memref<304x4xbf16, #tpu.memory_space<vmem>>, vector<24x4xbf16>,
    %cst_6 = arith.constant 0.000000e+00 : bf16
    %6 = vector.broadcast %cst_6 : bf16 to vector<24x16xbf16>
    %c0_7 = arith.constant 0 : index
    %c0_8 = arith.constant 0 : index
    %7 = vector.load %arg12[%c0_7, %c0_8] : memref<304x16xbf16, #tpu.memory_space<vmem>>, vector<24x16xbf16>
    tpu.vector_store %arg12[%c0_7, %c0_8], %6 {strides = array<i32>} : memref<304x16xbf16, #tpu.memory_space<vmem>>, vector<24x16xbf16>,
    %cst_9 = arith.constant 0.000000e+00 : bf16
    %8 = vector.broadcast %cst_9 : bf16 to vector<24x16xbf16>
    %c280_10 = arith.constant 280 : index
    %c0_11 = arith.constant 0 : index
    %9 = vector.load %arg12[%c280_10, %c0_11] : memref<304x16xbf16, #tpu.memory_space<vmem>>, vector<24x16xbf16>
    tpu.vector_store %arg12[%c280_10, %c0_11], %8 {strides = array<i32>} : memref<304x16xbf16, #tpu.memory_space<vmem>>, vector<24x16xbf16>,
    %c24 = arith.constant 24 : index
    %c0_12 = arith.constant 0 : index
    %10 = vector.load %arg11[%c24, %c0_12] : memref<304x4xbf16, #tpu.memory_space<vmem>>, vector<256x4xbf16>
    tpu.vector_store %arg11[%c24, %c0_12], %1 {strides = array<i32>} : memref<304x4xbf16, #tpu.memory_space<vmem>>, vector<256x4xbf16>,
    %c0_13 = arith.constant 0 : index
    %c0_14 = arith.constant 0 : index
    %11 = vector.load %arg9[%c0_13, %c0_14] : memref<256x2xbf16, #tpu.memory_space<vmem>>, vector<256x1xbf16>
    %c0_15 = arith.constant 0 : index
    %c1 = arith.constant 1 : index
    %12 = vector.load %arg9[%c0_15, %c1] : memref<256x2xbf16, #tpu.memory_space<vmem>>, vector<256x1xbf16>
    %c0_16 = arith.constant 0 : index
    %c0_17 = arith.constant 0 : index
    %13 = vector.load %arg6[%c0_16, %c0_17] : memref<8x16xf32, #tpu.memory_space<vmem>>, vector<1x16xf32>
    %c1_18 = arith.constant 1 : index
    %c0_19 = arith.constant 0 : index
    %14 = vector.load %arg6[%c1_18, %c0_19] : memref<8x16xf32, #tpu.memory_space<vmem>>, vector<1x16xf32>
    %c2 = arith.constant 2 : index
    %c0_20 = arith.constant 0 : index
    %15 = vector.load %arg6[%c2, %c0_20] : memref<8x16xf32, #tpu.memory_space<vmem>>, vector<1x16xf32>
    %c3 = arith.constant 3 : index
    %c0_21 = arith.constant 0 : index
    %16 = vector.load %arg6[%c3, %c0_21] : memref<8x16xf32, #tpu.memory_space<vmem>>, vector<1x16xf32>
    %c4 = arith.constant 4 : index
    %c0_22 = arith.constant 0 : index
    %17 = vector.load %arg6[%c4, %c0_22] : memref<8x16xf32, #tpu.memory_space<vmem>>, vector<1x16xf32>
    %c5 = arith.constant 5 : index
    %c0_23 = arith.constant 0 : index
    %18 = vector.load %arg6[%c5, %c0_23] : memref<8x16xf32, #tpu.memory_space<vmem>>, vector<1x16xf32>
    %c6 = arith.constant 6 : index
    %c0_24 = arith.constant 0 : index
    %19 = vector.load %arg6[%c6, %c0_24] : memref<8x16xf32, #tpu.memory_space<vmem>>, vector<1x16xf32>
    %c0_25 = arith.constant 0 : index
    %c0_26 = arith.constant 0 : index
    %c0_27 = arith.constant 0 : index
    %20 = vector.load %arg2[%c0_25, %c0_26, %c0_27] : memref<1x2x16xf32, #tpu.memory_space<vmem>>, vector<1x1x16xf32>
    %21 = vector.shape_cast %20 : vector<1x1x16xf32> to vector<1x16xf32>
    %c0_28 = arith.constant 0 : index
    %c1_29 = arith.constant 1 : index
    %c0_30 = arith.constant 0 : index
    %22 = vector.load %arg2[%c0_28, %c1_29, %c0_30] : memref<1x2x16xf32, #tpu.memory_space<vmem>>, vector<1x1x16xf32>
    %23 = vector.shape_cast %22 : vector<1x1x16xf32> to vector<1x16xf32>
    %c7 = arith.constant 7 : index
    %c0_31 = arith.constant 0 : index
    %24 = vector.load %arg11[%c7, %c0_31] : memref<304x4xbf16, #tpu.memory_space<vmem>>, vector<256x4xbf16>
    %25 = vector.broadcast %11 : vector<256x1xbf16> to vector<256x4xbf16>
    %26 = arith.mulf %24, %25 : vector<256x4xbf16>
    %c0_32 = arith.constant 0 : index
    %c0_33 = arith.constant 0 : index
    %c0_34 = arith.constant 0 : index
    %27 = vector.load %arg3[%c0_32, %c0_33, %c0_34] : memref<9x4x16xbf16, #tpu.memory_space<vmem>>, vector<1x4x16xbf16>
    %28 = vector.shape_cast %27 : vector<1x4x16xbf16> to vector<4x16xbf16>
    %cst_35 = arith.constant dense<0.000000e+00> : vector<256x16xf32>
    %29 = tpu.matmul %26, %28, %cst_35 {dimension_numbers = #tpu.dot_dimension_numbers<[1], [0], [0], [1], [0, 0, 1, 1], [], []>} : vector<256x4xbf16>, vector<4x16xbf16>, vector<256x16xf32> -> vector<256x16xf32>
    %c8 = arith.constant 8 : index
    %c0_36 = arith.constant 0 : index
    %30 = vector.load %arg11[%c8, %c0_36] : memref<304x4xbf16, #tpu.memory_space<vmem>>, vector<256x4xbf16>
    %c1_37 = arith.constant 1 : index
    %c0_38 = arith.constant 0 : index
    %c0_39 = arith.constant 0 : index
    %31 = vector.load %arg3[%c1_37, %c0_38, %c0_39] : memref<9x4x16xbf16, #tpu.memory_space<vmem>>, vector<1x4x16xbf16>
    %32 = vector.shape_cast %31 : vector<1x4x16xbf16> to vector<4x16xbf16>
    %cst_40 = arith.constant dense<0.000000e+00> : vector<256x16xf32>
    %33 = tpu.matmul %30, %32, %cst_40 {dimension_numbers = #tpu.dot_dimension_numbers<[1], [0], [0], [1], [0, 0, 1, 1], [], []>} : vector<256x4xbf16>, vector<4x16xbf16>, vector<256x16xf32> -> vector<256x16xf32>
    %34 = arith.addf %29, %33 : vector<256x16xf32>
    %c9 = arith.constant 9 : index
    %c0_41 = arith.constant 0 : index
    %35 = vector.load %arg11[%c9, %c0_41] : memref<304x4xbf16, #tpu.memory_space<vmem>>, vector<256x4xbf16>
    %36 = vector.broadcast %12 : vector<256x1xbf16> to vector<256x4xbf16>
    %37 = arith.mulf %35, %36 : vector<256x4xbf16>
    %c2_42 = arith.constant 2 : index
    %c0_43 = arith.constant 0 : index
    %c0_44 = arith.constant 0 : index
    %38 = vector.load %arg3[%c2_42, %c0_43, %c0_44] : memref<9x4x16xbf16, #tpu.memory_space<vmem>>, vector<1x4x16xbf16>
    %39 = vector.shape_cast %38 : vector<1x4x16xbf16> to vector<4x16xbf16>
    %cst_45 = arith.constant dense<0.000000e+00> : vector<256x16xf32>
    %40 = tpu.matmul %37, %39, %cst_45 {dimension_numbers = #tpu.dot_dimension_numbers<[1], [0], [0], [1], [0, 0, 1, 1], [], []>} : vector<256x4xbf16>, vector<4x16xbf16>, vector<256x16xf32> -> vector<256x16xf32>
    %41 = arith.addf %34, %40 : vector<256x16xf32>
    %c23 = arith.constant 23 : index
    %c0_46 = arith.constant 0 : index
    %42 = vector.load %arg11[%c23, %c0_46] : memref<304x4xbf16, #tpu.memory_space<vmem>>, vector<256x4xbf16>
    %43 = vector.broadcast %11 : vector<256x1xbf16> to vector<256x4xbf16>
    %44 = arith.mulf %42, %43 : vector<256x4xbf16>
    %c3_47 = arith.constant 3 : index
    %c0_48 = arith.constant 0 : index
    %c0_49 = arith.constant 0 : index
    %45 = vector.load %arg3[%c3_47, %c0_48, %c0_49] : memref<9x4x16xbf16, #tpu.memory_space<vmem>>, vector<1x4x16xbf16>
    %46 = vector.shape_cast %45 : vector<1x4x16xbf16> to vector<4x16xbf16>
    %cst_50 = arith.constant dense<0.000000e+00> : vector<256x16xf32>
    %47 = tpu.matmul %44, %46, %cst_50 {dimension_numbers = #tpu.dot_dimension_numbers<[1], [0], [0], [1], [0, 0, 1, 1], [], []>} : vector<256x4xbf16>, vector<4x16xbf16>, vector<256x16xf32> -> vector<256x16xf32>
    %48 = arith.addf %41, %47 : vector<256x16xf32>
    %c24_51 = arith.constant 24 : index
    %c0_52 = arith.constant 0 : index
    %49 = vector.load %arg11[%c24_51, %c0_52] : memref<304x4xbf16, #tpu.memory_space<vmem>>, vector<256x4xbf16>
    %c4_53 = arith.constant 4 : index
    %c0_54 = arith.constant 0 : index
    %c0_55 = arith.constant 0 : index
    %50 = vector.load %arg3[%c4_53, %c0_54, %c0_55] : memref<9x4x16xbf16, #tpu.memory_space<vmem>>, vector<1x4x16xbf16>
    %51 = vector.shape_cast %50 : vector<1x4x16xbf16> to vector<4x16xbf16>
    %cst_56 = arith.constant dense<0.000000e+00> : vector<256x16xf32>
    %52 = tpu.matmul %49, %51, %cst_56 {dimension_numbers = #tpu.dot_dimension_numbers<[1], [0], [0], [1], [0, 0, 1, 1], [], []>} : vector<256x4xbf16>, vector<4x16xbf16>, vector<256x16xf32> -> vector<256x16xf32>
    %53 = arith.addf %48, %52 : vector<256x16xf32>
    %c25 = arith.constant 25 : index
    %c0_57 = arith.constant 0 : index
    %54 = vector.load %arg11[%c25, %c0_57] : memref<304x4xbf16, #tpu.memory_space<vmem>>, vector<256x4xbf16>
    %55 = vector.broadcast %12 : vector<256x1xbf16> to vector<256x4xbf16>
    %56 = arith.mulf %54, %55 : vector<256x4xbf16>
    %c5_58 = arith.constant 5 : index
    %c0_59 = arith.constant 0 : index
    %c0_60 = arith.constant 0 : index
    %57 = vector.load %arg3[%c5_58, %c0_59, %c0_60] : memref<9x4x16xbf16, #tpu.memory_space<vmem>>, vector<1x4x16xbf16>
    %58 = vector.shape_cast %57 : vector<1x4x16xbf16> to vector<4x16xbf16>
    %cst_61 = arith.constant dense<0.000000e+00> : vector<256x16xf32>
    %59 = tpu.matmul %56, %58, %cst_61 {dimension_numbers = #tpu.dot_dimension_numbers<[1], [0], [0], [1], [0, 0, 1, 1], [], []>} : vector<256x4xbf16>, vector<4x16xbf16>, vector<256x16xf32> -> vector<256x16xf32>
    %60 = arith.addf %53, %59 : vector<256x16xf32>
    %c39 = arith.constant 39 : index
    %c0_62 = arith.constant 0 : index
    %61 = vector.load %arg11[%c39, %c0_62] : memref<304x4xbf16, #tpu.memory_space<vmem>>, vector<256x4xbf16>
    %62 = vector.broadcast %11 : vector<256x1xbf16> to vector<256x4xbf16>
    %63 = arith.mulf %61, %62 : vector<256x4xbf16>
    %c6_63 = arith.constant 6 : index
    %c0_64 = arith.constant 0 : index
    %c0_65 = arith.constant 0 : index
    %64 = vector.load %arg3[%c6_63, %c0_64, %c0_65] : memref<9x4x16xbf16, #tpu.memory_space<vmem>>, vector<1x4x16xbf16>
    %65 = vector.shape_cast %64 : vector<1x4x16xbf16> to vector<4x16xbf16>
    %cst_66 = arith.constant dense<0.000000e+00> : vector<256x16xf32>
    %66 = tpu.matmul %63, %65, %cst_66 {dimension_numbers = #tpu.dot_dimension_numbers<[1], [0], [0], [1], [0, 0, 1, 1], [], []>} : vector<256x4xbf16>, vector<4x16xbf16>, vector<256x16xf32> -> vector<256x16xf32>
    %67 = arith.addf %60, %66 : vector<256x16xf32>
    %c40 = arith.constant 40 : index
    %c0_67 = arith.constant 0 : index
    %68 = vector.load %arg11[%c40, %c0_67] : memref<304x4xbf16, #tpu.memory_space<vmem>>, vector<256x4xbf16>
    %c7_68 = arith.constant 7 : index
    %c0_69 = arith.constant 0 : index
    %c0_70 = arith.constant 0 : index
    %69 = vector.load %arg3[%c7_68, %c0_69, %c0_70] : memref<9x4x16xbf16, #tpu.memory_space<vmem>>, vector<1x4x16xbf16>
    %70 = vector.shape_cast %69 : vector<1x4x16xbf16> to vector<4x16xbf16>
    %cst_71 = arith.constant dense<0.000000e+00> : vector<256x16xf32>
    %71 = tpu.matmul %68, %70, %cst_71 {dimension_numbers = #tpu.dot_dimension_numbers<[1], [0], [0], [1], [0, 0, 1, 1], [], []>} : vector<256x4xbf16>, vector<4x16xbf16>, vector<256x16xf32> -> vector<256x16xf32>
    %72 = arith.addf %67, %71 : vector<256x16xf32>
    %c41 = arith.constant 41 : index
    %c0_72 = arith.constant 0 : index
    %73 = vector.load %arg11[%c41, %c0_72] : memref<304x4xbf16, #tpu.memory_space<vmem>>, vector<256x4xbf16>
    %74 = vector.broadcast %12 : vector<256x1xbf16> to vector<256x4xbf16>
    %75 = arith.mulf %73, %74 : vector<256x4xbf16>
    %c8_73 = arith.constant 8 : index
    %c0_74 = arith.constant 0 : index
    %c0_75 = arith.constant 0 : index
    %76 = vector.load %arg3[%c8_73, %c0_74, %c0_75] : memref<9x4x16xbf16, #tpu.memory_space<vmem>>, vector<1x4x16xbf16>
    %77 = vector.shape_cast %76 : vector<1x4x16xbf16> to vector<4x16xbf16>
    %cst_76 = arith.constant dense<0.000000e+00> : vector<256x16xf32>
    %78 = tpu.matmul %75, %77, %cst_76 {dimension_numbers = #tpu.dot_dimension_numbers<[1], [0], [0], [1], [0, 0, 1, 1], [], []>} : vector<256x4xbf16>, vector<4x16xbf16>, vector<256x16xf32> -> vector<256x16xf32>
    %79 = arith.addf %72, %78 : vector<256x16xf32>
    %80 = vector.broadcast %13 : vector<1x16xf32> to vector<256x16xf32>
    %81 = arith.addf %79, %80 : vector<256x16xf32>
    %cst_77 = arith.constant dense<0.000000e+00> : vector<16xf32>
    %82 = vector.multi_reduction <add>, %81, %cst_77 [0] : vector<256x16xf32> to vector<16xf32>
    %83 = vector.shape_cast %82 : vector<16xf32> to vector<1x16xf32>
    %84 = arith.mulf %81, %81 : vector<256x16xf32>
    %cst_78 = arith.constant dense<0.000000e+00> : vector<16xf32>
    %85 = vector.multi_reduction <add>, %84, %cst_78 [0] : vector<256x16xf32> to vector<16xf32>
    %86 = vector.shape_cast %85 : vector<16xf32> to vector<1x16xf32>
    %87 = tpu.concatenate %83, %86 in 0 : vector<1x16xf32>, vector<1x16xf32> -> vector<2x16xf32>
    %c0_79 = arith.constant 0 : index
    %c0_80 = arith.constant 0 : index
    %88 = vector.load %arg7[%c0_79, %c0_80] : memref<16x8xf32, #tpu.memory_space<vmem>>, vector<16x8xf32>
    %cst_81 = arith.constant dense<0.000000e+00> : vector<2x8xf32>
    %89 = tpu.matmul %87, %88, %cst_81 {dimension_numbers = #tpu.dot_dimension_numbers<[1], [0], [0], [1], [0, 0, 1, 1], [], []>} : vector<2x16xf32>, vector<16x8xf32>, vector<2x8xf32> -> vector<2x8xf32>
    %90 = vector.extract_strided_slice %89 {offsets = [0, 0], sizes = [1, 8], strides = [1, 1]} : vector<2x8xf32> to vector<1x8xf32>
    %91 = vector.extract_strided_slice %89 {offsets = [1, 0], sizes = [1, 8], strides = [1, 1]} : vector<2x8xf32> to vector<1x8xf32>
    %92 = arith.mulf %90, %90 : vector<1x8xf32>
    %93 = arith.subf %91, %92 : vector<1x8xf32>
    %cst_82 = arith.constant 0.000000e+00 : f32
    %94 = vector.broadcast %cst_82 : f32 to vector<1x8xf32>
    %95 = arith.maximumf %93, %94 : vector<1x8xf32>
    %cst_83 = arith.constant 9.99999974E-6 : f32
    %96 = vector.broadcast %cst_83 : f32 to vector<1x8xf32>
    %97 = arith.addf %95, %96 : vector<1x8xf32>
    %98 = math.rsqrt %97 : vector<1x8xf32>
    %99 = tpu.concatenate %90, %98 in 0 : vector<1x8xf32>, vector<1x8xf32> -> vector<2x8xf32>
    %c0_84 = arith.constant 0 : index
    %c0_85 = arith.constant 0 : index
    %100 = vector.load %arg8[%c0_84, %c0_85] : memref<8x16xf32, #tpu.memory_space<vmem>>, vector<8x16xf32>
    %cst_86 = arith.constant dense<0.000000e+00> : vector<2x16xf32>
    %101 = tpu.matmul %99, %100, %cst_86 {dimension_numbers = #tpu.dot_dimension_numbers<[1], [0], [0], [1], [0, 0, 1, 1], [], []>} : vector<2x8xf32>, vector<8x16xf32>, vector<2x16xf32> -> vector<2x16xf32>
    %102 = vector.extract_strided_slice %101 {offsets = [0, 0], sizes = [1, 16], strides = [1, 1]} : vector<2x16xf32> to vector<1x16xf32>
    %103 = vector.broadcast %102 : vector<1x16xf32> to vector<256x16xf32>
    %104 = arith.subf %81, %103 : vector<256x16xf32>
    %105 = vector.extract_strided_slice %101 {offsets = [1, 0], sizes = [1, 16], strides = [1, 1]} : vector<2x16xf32> to vector<1x16xf32>
    %106 = vector.broadcast %105 : vector<1x16xf32> to vector<256x16xf32>
    %107 = arith.mulf %104, %106 : vector<256x16xf32>
    %108 = vector.broadcast %14 : vector<1x16xf32> to vector<256x16xf32>
    %109 = arith.mulf %107, %108 : vector<256x16xf32>
    %110 = vector.broadcast %15 : vector<1x16xf32> to vector<256x16xf32>
    %111 = arith.addf %109, %110 : vector<256x16xf32>
    %cst_87 = arith.constant 1.000000e+00 : f32
    %112 = vector.broadcast %cst_87 : f32 to vector<1x16xf32>
    %113 = arith.addf %21, %112 : vector<1x16xf32>
    %114 = vector.broadcast %113 : vector<1x16xf32> to vector<256x16xf32>
    %115 = arith.mulf %111, %114 : vector<256x16xf32>
    %116 = vector.broadcast %23 : vector<1x16xf32> to vector<256x16xf32>
    %117 = arith.addf %115, %116 : vector<256x16xf32>
    %118 = arith.negf %117 : vector<256x16xf32>
    %119 = math.exp %118 : vector<256x16xf32>
    %cst_88 = arith.constant 1.000000e+00 : f32
    %120 = vector.broadcast %cst_88 : f32 to vector<256x16xf32>
    %121 = arith.addf %120, %119 : vector<256x16xf32>
    %122 = arith.divf %120, %121 : vector<256x16xf32>
    %123 = arith.mulf %117, %122 : vector<256x16xf32>
    %124 = arith.truncf %123 : vector<256x16xf32> to vector<256x16xbf16>
    %c24_89 = arith.constant 24 : index
    %c0_90 = arith.constant 0 : index
    %125 = vector.load %arg12[%c24_89, %c0_90] : memref<304x16xbf16, #tpu.memory_space<vmem>>, vector<256x16xbf16>
    tpu.vector_store %arg12[%c24_89, %c0_90], %124 {strides = array<i32>} : memref<304x16xbf16, #tpu.memory_space<vmem>>, vector<256x16xbf16>,
    %c7_91 = arith.constant 7 : index
    %c0_92 = arith.constant 0 : index
    %126 = vector.load %arg12[%c7_91, %c0_92] : memref<304x16xbf16, #tpu.memory_space<vmem>>, vector<256x16xbf16>
    %127 = vector.broadcast %11 : vector<256x1xbf16> to vector<256x16xbf16>
    %128 = arith.mulf %126, %127 : vector<256x16xbf16>
    %c0_93 = arith.constant 0 : index
    %c0_94 = arith.constant 0 : index
    %c0_95 = arith.constant 0 : index
    %129 = vector.load %arg4[%c0_93, %c0_94, %c0_95] : memref<9x16x16xbf16, #tpu.memory_space<vmem>>, vector<1x16x16xbf16>
    %130 = vector.shape_cast %129 : vector<1x16x16xbf16> to vector<16x16xbf16>
    %cst_96 = arith.constant dense<0.000000e+00> : vector<256x16xf32>
    %131 = tpu.matmul %128, %130, %cst_96 {dimension_numbers = #tpu.dot_dimension_numbers<[1], [0], [0], [1], [0, 0, 1, 1], [], []>} : vector<256x16xbf16>, vector<16x16xbf16>, vector<256x16xf32> -> vector<256x16xf32>
    %c8_97 = arith.constant 8 : index
    %c0_98 = arith.constant 0 : index
    %132 = vector.load %arg12[%c8_97, %c0_98] : memref<304x16xbf16, #tpu.memory_space<vmem>>, vector<256x16xbf16>
    %c1_99 = arith.constant 1 : index
    %c0_100 = arith.constant 0 : index
    %c0_101 = arith.constant 0 : index
    %133 = vector.load %arg4[%c1_99, %c0_100, %c0_101] : memref<9x16x16xbf16, #tpu.memory_space<vmem>>, vector<1x16x16xbf16>
    %134 = vector.shape_cast %133 : vector<1x16x16xbf16> to vector<16x16xbf16>
    %cst_102 = arith.constant dense<0.000000e+00> : vector<256x16xf32>
    %135 = tpu.matmul %132, %134, %cst_102 {dimension_numbers = #tpu.dot_dimension_numbers<[1], [0], [0], [1], [0, 0, 1, 1], [], []>} : vector<256x16xbf16>, vector<16x16xbf16>, vector<256x16xf32> -> vector<256x16xf32>
    %136 = arith.addf %131, %135 : vector<256x16xf32>
    %c9_103 = arith.constant 9 : index
    %c0_104 = arith.constant 0 : index
    %137 = vector.load %arg12[%c9_103, %c0_104] : memref<304x16xbf16, #tpu.memory_space<vmem>>, vector<256x16xbf16>
    %138 = vector.broadcast %12 : vector<256x1xbf16> to vector<256x16xbf16>
    %139 = arith.mulf %137, %138 : vector<256x16xbf16>
    %c2_105 = arith.constant 2 : index
    %c0_106 = arith.constant 0 : index
    %c0_107 = arith.constant 0 : index
    %140 = vector.load %arg4[%c2_105, %c0_106, %c0_107] : memref<9x16x16xbf16, #tpu.memory_space<vmem>>, vector<1x16x16xbf16>
    %141 = vector.shape_cast %140 : vector<1x16x16xbf16> to vector<16x16xbf16>
    %cst_108 = arith.constant dense<0.000000e+00> : vector<256x16xf32>
    %142 = tpu.matmul %139, %141, %cst_108 {dimension_numbers = #tpu.dot_dimension_numbers<[1], [0], [0], [1], [0, 0, 1, 1], [], []>} : vector<256x16xbf16>, vector<16x16xbf16>, vector<256x16xf32> -> vector<256x16xf32>
    %143 = arith.addf %136, %142 : vector<256x16xf32>
    %c23_109 = arith.constant 23 : index
    %c0_110 = arith.constant 0 : index
    %144 = vector.load %arg12[%c23_109, %c0_110] : memref<304x16xbf16, #tpu.memory_space<vmem>>, vector<256x16xbf16>
    %145 = vector.broadcast %11 : vector<256x1xbf16> to vector<256x16xbf16>
    %146 = arith.mulf %144, %145 : vector<256x16xbf16>
    %c3_111 = arith.constant 3 : index
    %c0_112 = arith.constant 0 : index
    %c0_113 = arith.constant 0 : index
    %147 = vector.load %arg4[%c3_111, %c0_112, %c0_113] : memref<9x16x16xbf16, #tpu.memory_space<vmem>>, vector<1x16x16xbf16>
    %148 = vector.shape_cast %147 : vector<1x16x16xbf16> to vector<16x16xbf16>
    %cst_114 = arith.constant dense<0.000000e+00> : vector<256x16xf32>
    %149 = tpu.matmul %146, %148, %cst_114 {dimension_numbers = #tpu.dot_dimension_numbers<[1], [0], [0], [1], [0, 0, 1, 1], [], []>} : vector<256x16xbf16>, vector<16x16xbf16>, vector<256x16xf32> -> vector<256x16xf32>
    %150 = arith.addf %143, %149 : vector<256x16xf32>
    %c24_115 = arith.constant 24 : index
    %c0_116 = arith.constant 0 : index
    %151 = vector.load %arg12[%c24_115, %c0_116] : memref<304x16xbf16, #tpu.memory_space<vmem>>, vector<256x16xbf16>
    %c4_117 = arith.constant 4 : index
    %c0_118 = arith.constant 0 : index
    %c0_119 = arith.constant 0 : index
    %152 = vector.load %arg4[%c4_117, %c0_118, %c0_119] : memref<9x16x16xbf16, #tpu.memory_space<vmem>>, vector<1x16x16xbf16>
    %153 = vector.shape_cast %152 : vector<1x16x16xbf16> to vector<16x16xbf16>
    %cst_120 = arith.constant dense<0.000000e+00> : vector<256x16xf32>
    %154 = tpu.matmul %151, %153, %cst_120 {dimension_numbers = #tpu.dot_dimension_numbers<[1], [0], [0], [1], [0, 0, 1, 1], [], []>} : vector<256x16xbf16>, vector<16x16xbf16>, vector<256x16xf32> -> vector<256x16xf32>
    %155 = arith.addf %150, %154 : vector<256x16xf32>
    %c25_121 = arith.constant 25 : index
    %c0_122 = arith.constant 0 : index
    %156 = vector.load %arg12[%c25_121, %c0_122] : memref<304x16xbf16, #tpu.memory_space<vmem>>, vector<256x16xbf16>
    %157 = vector.broadcast %12 : vector<256x1xbf16> to vector<256x16xbf16>
    %158 = arith.mulf %156, %157 : vector<256x16xbf16>
    %c5_123 = arith.constant 5 : index
    %c0_124 = arith.constant 0 : index
    %c0_125 = arith.constant 0 : index
    %159 = vector.load %arg4[%c5_123, %c0_124, %c0_125] : memref<9x16x16xbf16, #tpu.memory_space<vmem>>, vector<1x16x16xbf16>
    %160 = vector.shape_cast %159 : vector<1x16x16xbf16> to vector<16x16xbf16>
    %cst_126 = arith.constant dense<0.000000e+00> : vector<256x16xf32>
    %161 = tpu.matmul %158, %160, %cst_126 {dimension_numbers = #tpu.dot_dimension_numbers<[1], [0], [0], [1], [0, 0, 1, 1], [], []>} : vector<256x16xbf16>, vector<16x16xbf16>, vector<256x16xf32> -> vector<256x16xf32>
    %162 = arith.addf %155, %161 : vector<256x16xf32>
    %c39_127 = arith.constant 39 : index
    %c0_128 = arith.constant 0 : index
    %163 = vector.load %arg12[%c39_127, %c0_128] : memref<304x16xbf16, #tpu.memory_space<vmem>>, vector<256x16xbf16>
    %164 = vector.broadcast %11 : vector<256x1xbf16> to vector<256x16xbf16>
    %165 = arith.mulf %163, %164 : vector<256x16xbf16>
    %c6_129 = arith.constant 6 : index
    %c0_130 = arith.constant 0 : index
    %c0_131 = arith.constant 0 : index
    %166 = vector.load %arg4[%c6_129, %c0_130, %c0_131] : memref<9x16x16xbf16, #tpu.memory_space<vmem>>, vector<1x16x16xbf16>
    %167 = vector.shape_cast %166 : vector<1x16x16xbf16> to vector<16x16xbf16>
    %cst_132 = arith.constant dense<0.000000e+00> : vector<256x16xf32>
    %168 = tpu.matmul %165, %167, %cst_132 {dimension_numbers = #tpu.dot_dimension_numbers<[1], [0], [0], [1], [0, 0, 1, 1], [], []>} : vector<256x16xbf16>, vector<16x16xbf16>, vector<256x16xf32> -> vector<256x16xf32>
    %169 = arith.addf %162, %168 : vector<256x16xf32>
    %c40_133 = arith.constant 40 : index
    %c0_134 = arith.constant 0 : index
    %170 = vector.load %arg12[%c40_133, %c0_134] : memref<304x16xbf16, #tpu.memory_space<vmem>>, vector<256x16xbf16>
    %c7_135 = arith.constant 7 : index
    %c0_136 = arith.constant 0 : index
    %c0_137 = arith.constant 0 : index
    %171 = vector.load %arg4[%c7_135, %c0_136, %c0_137] : memref<9x16x16xbf16, #tpu.memory_space<vmem>>, vector<1x16x16xbf16>
    %172 = vector.shape_cast %171 : vector<1x16x16xbf16> to vector<16x16xbf16>
    %cst_138 = arith.constant dense<0.000000e+00> : vector<256x16xf32>
    %173 = tpu.matmul %170, %172, %cst_138 {dimension_numbers = #tpu.dot_dimension_numbers<[1], [0], [0], [1], [0, 0, 1, 1], [], []>} : vector<256x16xbf16>, vector<16x16xbf16>, vector<256x16xf32> -> vector<256x16xf32>
    %174 = arith.addf %169, %173 : vector<256x16xf32>
    %c41_139 = arith.constant 41 : index
    %c0_140 = arith.constant 0 : index
    %175 = vector.load %arg12[%c41_139, %c0_140] : memref<304x16xbf16, #tpu.memory_space<vmem>>, vector<256x16xbf16>
    %176 = vector.broadcast %12 : vector<256x1xbf16> to vector<256x16xbf16>
    %177 = arith.mulf %175, %176 : vector<256x16xbf16>
    %c8_141 = arith.constant 8 : index
    %c0_142 = arith.constant 0 : index
    %c0_143 = arith.constant 0 : index
    %178 = vector.load %arg4[%c8_141, %c0_142, %c0_143] : memref<9x16x16xbf16, #tpu.memory_space<vmem>>, vector<1x16x16xbf16>
    %179 = vector.shape_cast %178 : vector<1x16x16xbf16> to vector<16x16xbf16>
    %cst_144 = arith.constant dense<0.000000e+00> : vector<256x16xf32>
    %180 = tpu.matmul %177, %179, %cst_144 {dimension_numbers = #tpu.dot_dimension_numbers<[1], [0], [0], [1], [0, 0, 1, 1], [], []>} : vector<256x16xbf16>, vector<16x16xbf16>, vector<256x16xf32> -> vector<256x16xf32>
    %181 = arith.addf %174, %180 : vector<256x16xf32>
    %182 = vector.broadcast %16 : vector<1x16xf32> to vector<256x16xf32>
    %183 = arith.addf %181, %182 : vector<256x16xf32>
    %cst_145 = arith.constant dense<0.000000e+00> : vector<16xf32>
    %184 = vector.multi_reduction <add>, %183, %cst_145 [0] : vector<256x16xf32> to vector<16xf32>
    %185 = vector.shape_cast %184 : vector<16xf32> to vector<1x16xf32>
    %186 = arith.mulf %183, %183 : vector<256x16xf32>
    %cst_146 = arith.constant dense<0.000000e+00> : vector<16xf32>
    %187 = vector.multi_reduction <add>, %186, %cst_146 [0] : vector<256x16xf32> to vector<16xf32>
    %188 = vector.shape_cast %187 : vector<16xf32> to vector<1x16xf32>
    %189 = tpu.concatenate %185, %188 in 0 : vector<1x16xf32>, vector<1x16xf32> -> vector<2x16xf32>
    %c0_147 = arith.constant 0 : index
    %c0_148 = arith.constant 0 : index
    %190 = vector.load %arg7[%c0_147, %c0_148] : memref<16x8xf32, #tpu.memory_space<vmem>>, vector<16x8xf32>
    %cst_149 = arith.constant dense<0.000000e+00> : vector<2x8xf32>
    %191 = tpu.matmul %189, %190, %cst_149 {dimension_numbers = #tpu.dot_dimension_numbers<[1], [0], [0], [1], [0, 0, 1, 1], [], []>} : vector<2x16xf32>, vector<16x8xf32>, vector<2x8xf32> -> vector<2x8xf32>
    %192 = vector.extract_strided_slice %191 {offsets = [0, 0], sizes = [1, 8], strides = [1, 1]} : vector<2x8xf32> to vector<1x8xf32>
    %193 = vector.extract_strided_slice %191 {offsets = [1, 0], sizes = [1, 8], strides = [1, 1]} : vector<2x8xf32> to vector<1x8xf32>
    %194 = arith.mulf %192, %192 : vector<1x8xf32>
    %195 = arith.subf %193, %194 : vector<1x8xf32>
    %cst_150 = arith.constant 0.000000e+00 : f32
    %196 = vector.broadcast %cst_150 : f32 to vector<1x8xf32>
    %197 = arith.maximumf %195, %196 : vector<1x8xf32>
    %cst_151 = arith.constant 9.99999974E-6 : f32
    %198 = vector.broadcast %cst_151 : f32 to vector<1x8xf32>
    %199 = arith.addf %197, %198 : vector<1x8xf32>
    %200 = math.rsqrt %199 : vector<1x8xf32>
    %201 = tpu.concatenate %192, %200 in 0 : vector<1x8xf32>, vector<1x8xf32> -> vector<2x8xf32>
    %c0_152 = arith.constant 0 : index
    %c0_153 = arith.constant 0 : index
    %202 = vector.load %arg8[%c0_152, %c0_153] : memref<8x16xf32, #tpu.memory_space<vmem>>, vector<8x16xf32>
    %cst_154 = arith.constant dense<0.000000e+00> : vector<2x16xf32>
    %203 = tpu.matmul %201, %202, %cst_154 {dimension_numbers = #tpu.dot_dimension_numbers<[1], [0], [0], [1], [0, 0, 1, 1], [], []>} : vector<2x8xf32>, vector<8x16xf32>, vector<2x16xf32> -> vector<2x16xf32>
    %204 = vector.extract_strided_slice %203 {offsets = [0, 0], sizes = [1, 16], strides = [1, 1]} : vector<2x16xf32> to vector<1x16xf32>
    %205 = vector.broadcast %204 : vector<1x16xf32> to vector<256x16xf32>
    %206 = arith.subf %183, %205 : vector<256x16xf32>
    %207 = vector.extract_strided_slice %203 {offsets = [1, 0], sizes = [1, 16], strides = [1, 1]} : vector<2x16xf32> to vector<1x16xf32>
    %208 = vector.broadcast %207 : vector<1x16xf32> to vector<256x16xf32>
    %209 = arith.mulf %206, %208 : vector<256x16xf32>
    %210 = vector.broadcast %17 : vector<1x16xf32> to vector<256x16xf32>
    %211 = arith.mulf %209, %210 : vector<256x16xf32>
    %212 = vector.broadcast %18 : vector<1x16xf32> to vector<256x16xf32>
    %213 = arith.addf %211, %212 : vector<256x16xf32>
    %214 = arith.negf %213 : vector<256x16xf32>
    %215 = math.exp %214 : vector<256x16xf32>
    %cst_155 = arith.constant 1.000000e+00 : f32
    %216 = vector.broadcast %cst_155 : f32 to vector<256x16xf32>
    %217 = arith.addf %216, %215 : vector<256x16xf32>
    %218 = arith.divf %216, %217 : vector<256x16xf32>
    %219 = arith.mulf %213, %218 : vector<256x16xf32>
    %c0_156 = arith.constant 0 : index
    %c0_157 = arith.constant 0 : index
    %220 = vector.load %arg5[%c0_156, %c0_157] : memref<4x16xbf16, #tpu.memory_space<vmem>>, vector<4x16xbf16>
    %cst_158 = arith.constant dense<0.000000e+00> : vector<256x16xf32>
    %221 = tpu.matmul %1, %220, %cst_158 {dimension_numbers = #tpu.dot_dimension_numbers<[1], [0], [0], [1], [0, 0, 1, 1], [], []>} : vector<256x4xbf16>, vector<4x16xbf16>, vector<256x16xf32> -> vector<256x16xf32>
    %222 = vector.broadcast %19 : vector<1x16xf32> to vector<256x16xf32>
    %223 = arith.addf %221, %222 : vector<256x16xf32>
    %224 = arith.addf %219, %223 : vector<256x16xf32>
    %c0_159 = arith.constant 0 : index
    %c0_160 = arith.constant 0 : index
    %c0_161 = arith.constant 0 : index
    %225 = vector.load %arg10[%c0_159, %c0_160, %c0_161] : memref<1x256x16xf32, #tpu.memory_space<vmem>>, vector<1x256x16xf32>
    %226 = vector.shape_cast %225 : vector<1x256x16xf32> to vector<256x16xf32>
    %227 = vector.shape_cast %224 : vector<256x16xf32> to vector<1x256x16xf32>
    tpu.vector_store %arg10[%c0_159, %c0_160, %c0_161], %227 {strides = array<i32>} : memref<1x256x16xf32, #tpu.memory_space<vmem>>, vector<1x256x16xf32>,
    return
  }
  func.func @transform_0(%arg0: i32) -> (i32, i32, i32) {
    %c0_i32 = arith.constant 0 : i32
    %c0_i32_0 = arith.constant 0 : i32
    %c0_i32_1 = arith.constant 0 : i32
    return %arg0, %c0_i32, %c0_i32_0 : i32, i32, i32
  }
  func.func @transform_1(%arg0: i32) -> (i32, i32, i32) {
    %c0_i32 = arith.constant 0 : i32
    %c0_i32_0 = arith.constant 0 : i32
    %c0_i32_1 = arith.constant 0 : i32
    return %arg0, %c0_i32, %c0_i32_0 : i32, i32, i32
  }
  func.func @transform_2(%arg0: i32) -> (i32, i32, i32) {
    %c0_i32 = arith.constant 0 : i32
    %c0_i32_0 = arith.constant 0 : i32
    %c0_i32_1 = arith.constant 0 : i32
    %c0_i32_2 = arith.constant 0 : i32
    return %c0_i32, %c0_i32_0, %c0_i32_1 : i32, i32, i32
  }
  func.func @transform_3(%arg0: i32) -> (i32, i32, i32) {
    %c0_i32 = arith.constant 0 : i32
    %c0_i32_0 = arith.constant 0 : i32
    %c0_i32_1 = arith.constant 0 : i32
    %c0_i32_2 = arith.constant 0 : i32
    return %c0_i32, %c0_i32_0, %c0_i32_1 : i32, i32, i32
  }
  func.func @transform_4(%arg0: i32) -> (i32, i32) {
    %c0_i32 = arith.constant 0 : i32
    %c0_i32_0 = arith.constant 0 : i32
    %c0_i32_1 = arith.constant 0 : i32
    return %c0_i32, %c0_i32_0 : i32, i32
  }
  func.func @transform_5(%arg0: i32) -> (i32, i32) {
    %c0_i32 = arith.constant 0 : i32
    %c0_i32_0 = arith.constant 0 : i32
    %c0_i32_1 = arith.constant 0 : i32
    return %c0_i32, %c0_i32_0 : i32, i32
  }
  func.func @transform_6(%arg0: i32) -> (i32, i32) {
    %c0_i32 = arith.constant 0 : i32
    %c0_i32_0 = arith.constant 0 : i32
    %c0_i32_1 = arith.constant 0 : i32
    return %c0_i32, %c0_i32_0 : i32, i32
  }
  func.func @transform_7(%arg0: i32) -> (i32, i32) {
    %c0_i32 = arith.constant 0 : i32
    %c0_i32_0 = arith.constant 0 : i32
    %c0_i32_1 = arith.constant 0 : i32
    return %c0_i32, %c0_i32_0 : i32, i32
  }
  func.func @transform_8(%arg0: i32) -> (i32, i32) {
    %c0_i32 = arith.constant 0 : i32
    %c0_i32_0 = arith.constant 0 : i32
    %c0_i32_1 = arith.constant 0 : i32
    return %c0_i32, %c0_i32_0 : i32, i32
  }
  func.func @transform_9(%arg0: i32) -> (i32, i32, i32) {
    %c0_i32 = arith.constant 0 : i32
    %c0_i32_0 = arith.constant 0 : i32
    %c0_i32_1 = arith.constant 0 : i32
    return %arg0, %c0_i32, %c0_i32_0 : i32, i32, i32
  }
}

</mosaic_0001>

<bundles_post_ra>
// kernel: tpu_custom_call.1
= control target key start
LH: loop header
LB: loop body
LE: loop exit
PB: predicated region body
PF: predicated region fallthrough
CT: control target
= control target key end

     0   :  { %s13012_s30 = smov 0   ;;  %s16674_s0 = inlined_call_operand.vmem [shape: bf16[2,256,4], index: 0, kind: input, shape index: {}]   ;;  %s16675_s1 = inlined_call_operand.vmem [shape: f32[2,2,16], index: 1, kind: input, shape index: {}]   ;;  %s16676_s2 = inlined_call_operand.vmem [shape: bf16[9,4,16], index: 2, kind: input, shape index: {}]   ;;  %s16677_s3 = inlined_call_operand.vmem [shape: bf16[9,16,16], index: 3, kind: input, shape index: {}]   ;;  %s16678_s4 = inlined_call_operand.vmem [shape: bf16[4,16], index: 4, kind: input, shape index: {}]   ;;  %s16679_s5 = inlined_call_operand.vmem [shape: f32[8,16], index: 5, kind: input, shape index: {}]   ;;  %s16680_s6 = inlined_call_operand.vmem [shape: f32[16,8], index: 6, kind: input, shape index: {}]   ;;  %s16681_s7 = inlined_call_operand.vmem [shape: f32[8,16], index: 7, kind: input, shape index: {}]   ;;  %s16682_s8 = inlined_call_operand.vmem [shape: bf16[256,2], index: 8, kind: input, shape index: {}]   ;;  %s16683_s9 = inlined_call_operand.vmem [shape: f32[2,256,16], index: 9, kind: output, shape index: {}]  }
   0x1 LB: > { %s10551_s10 = sadd.s32 4294967295, %s12954_s30   ;;  %p10555_p0 = scmp.ge.s32.totalorder %s12954_s30, 1  ;;  %s12954_s30 = sphi %s13012_s30, %s19_s30  }
   0x2   : > { %p296_p1 = scmp.lt.s32.totalorder %s12954_s30, 3 }
   0x4   : > { %p297_p2 = pnand %p10555_p0, %p296_p1 }
   0x6   : > { %300 = sbr.rel (%p297_p2) target bundleno = 2840 (0xb18), region = 56 }
   0xd   : > { %v13023_v0 = vld [vmem:[%s16682_s8 + $0x8] sm:$0xf]  ;;  %v13028_v1 = vld [vmem:[%s16682_s8] sm:$0xf]  ;;  %v16685_v2 = vmov 0   ;;  %vm1315_vm0 = vcmask 1041408  }
   0xe   : > { %12592 = vset.pattern.permute.xlu1 %v16685_v2  ;;  %12591 = vset.pattern.permute.xlu0 %v16685_v2  ;;  %v13037_v3 = vld [vmem:[%s16682_s8 + $0xc] sm:$0xf]  ;;  %v13042_v4 = vld [vmem:[%s16682_s8 + $0x4] sm:$0xf]  ;;  %v13049_v5 = vld [vmem:[%s16682_s8 + $0x14] sm:$0xf] }
   0xf   : > { %596 = vperm.xlu1 %12592, %v13023_v0   ;;  %572 = vperm.xlu0 %12591, %v13028_v1   ;;  %v13054_v6 = vld [vmem:[%s16682_s8 + $0x10] sm:$0xf]  ;;  %v13061_v7 = vld [vmem:[%s16682_s8 + $0x1c] sm:$0xf]  ;;  %v13066_v8 = vld [vmem:[%s16682_s8 + $0x18] sm:$0xf] }
  0x10   : > { %v10594_v9 = vld [vmem:[%s16676_s2 + $0x2] sm:$0x3]  ;;  %p336_p3 = scmp.lt.s32.totalorder %s10551_s10, 1  ;;  %vm383_vm1 = vcmask 31744   ;;  %vm385_vm2 = vcmask 27648   ;;  %vm387_vm3 = vcmask 31748  }
  0x11   : > { %12566 = vmatprep.subr.msk.bf16.mxu0 %vm1315_vm0, %v10594_v9  ;;  %v1317_v10 = vsel %vm1315_vm0, %v10594_v9, 0  ;;  %384 = vst.msk [vmem:[#allocation2] sm:$0xff] %vm383_vm1, %v16685_v2  ;;  %389 = vst.msk [vmem:[#allocation2 + $0x90] sm:$0xff] %vm383_vm1, %v16685_v2  ;;  %v13084_v11 = vld [vmem:[%s16676_s2] sm:$0x3]  ;;  %12567 = vmatprep.subr.msk.bf16.mxu1 %vm1315_vm0, %v10594_v9  ;;  %vm1233_vm4 = vcmask 1043456  }
  0x12   : > { %386 = vst.msk [vmem:[#allocation2 + $0x8] sm:$0xf] %vm385_vm2, %v16685_v2  ;;  %v13090_v12 = vld [vmem:[%s16682_s8 + $0x24] sm:$0xf]  ;;  %11377 = vmatpush3.bf16.msra.mxu0 %v1317_v10  ;;  %s17083_s10 = smov (!%p336_p3, %s10551_s10), 1  ;;  %12053 = vmatpush3.bf16.msra.mxu1 %v1317_v10  ;;  %v1682_v54 = vsel %vm1315_vm0, %v13084_v11, 0 }
  0x13   : > { %608 = vperm.xlu1 %12592, %v13037_v3   ;;  %584 = vperm.xlu0 %12591, %v13042_v4   ;;  %388 = vst.msk [vmem:[#allocation2 + $0x88] sm:$0xf0] %vm387_vm3, %v16685_v2  ;;  %v13103_v13 = vld [vmem:[%s16682_s8 + $0x20] sm:$0xf]  ;;  %s11041_s16 = sshll.u32 %s17083_s10, 7  ;;  %vm390_vm7 = vcmask 130048  }
  0x14   : > { %12568 = vmatprep.subr.msk.bf16.mxu0 %vm1315_vm0, %v13084_v11  ;;  %s13111_s19 = scalar_lea.vmem %s16674_s0, %s11041_s16  ;;  %v13116_v14 = vld [vmem:[%s16682_s8 + $0x2c] sm:$0xf]  ;;  %v13129_v23 = vld [vmem:[%s16682_s8 + $0x28] sm:$0xf]  ;;  %v13140_v32 = vld [vmem:[%s16682_s8 + $0x34] sm:$0xf] }
  0x15   : > { %v351_v15 = vld [vmem:[%s13111_s19] sm:$0xf]  ;;  %v382_v16 = vld [vmem:[%s13111_s19 + $0x7c] sm:$0xf]  ;;  %v352_v17 = vld [vmem:[%s13111_s19 + $0x4] sm:$0xf] }
  0x16   : > { %v10561_v18 = vcombine.low %v351_v15, %v351_v15  ;;  %v10577_v19 = vcombine.low %v382_v16, %v382_v16  ;;  %v353_v20 = vld [vmem:[%s13111_s19 + $0x8] sm:$0xf]  ;;  %v354_v21 = vld [vmem:[%s13111_s19 + $0xc] sm:$0xf]  ;;  %v355_v22 = vld [vmem:[%s13111_s19 + $0x10] sm:$0xf] }
  0x17   : > { %632 = vperm.xlu1 %12592, %v13049_v5   ;;  %620 = vperm.xlu0 %12591, %v13054_v6   ;;  %v10562_v24 = vcombine.low %v352_v17, %v353_v20  ;;  %v10563_v25 = vcombine.low %v354_v21, %v355_v22  ;;  %v356_v26 = vld [vmem:[%s13111_s19 + $0x14] sm:$0xf]  ;;  %v357_v27 = vld [vmem:[%s13111_s19 + $0x18] sm:$0xf]  ;;  %v358_v30 = vld [vmem:[%s13111_s19 + $0x1c] sm:$0xf] }
  0x18   : > { %495 = vst.msk [vmem:[#allocation2 + $0x8] sm:$0xf0] %vm387_vm3, %v10561_v18  ;;  %v1213_v28 = vld [vmem:[#allocation2] sm:$0xf0]  ;;  %v10564_v29 = vcombine.low %v356_v26, %v357_v27  ;;  %v359_v31 = vld [vmem:[%s13111_s19 + $0x20] sm:$0xf] }
  0x19   : > { %511 = vst.msk [vmem:[#allocation2 + $0x88] sm:$0xf] %vm385_vm2, %v10577_v19  ;;  %v10565_v33 = vcombine.low %v358_v30, %v359_v31  ;;  %v360_v34 = vld [vmem:[%s13111_s19 + $0x24] sm:$0xf]  ;;  %v361_v35 = vld [vmem:[%s13111_s19 + $0x28] sm:$0xf] }
  0x1a   : > { %496 = vst.msk [vmem:[#allocation2 + $0x10] sm:$0xff] %vm383_vm1, %v10562_v24  ;;  %497 = vst.msk [vmem:[#allocation2 + $0x18] sm:$0xff] %vm383_vm1, %v10563_v25  ;;  %v362_v36 = vld [vmem:[%s13111_s19 + $0x2c] sm:$0xf]  ;;  %v10566_v37 = vcombine.low %v360_v34, %v361_v35  ;;  %v363_v38 = vld [vmem:[%s13111_s19 + $0x30] sm:$0xf] }
  0x1b   : > { %656 = vperm.xlu1 %12592, %v13061_v7   ;;  %644 = vperm.xlu0 %12591, %v13066_v8   ;;  %498 = vst.msk [vmem:[#allocation2 + $0x20] sm:$0xff] %vm383_vm1, %v10564_v29  ;;  %v364_v39 = vld [vmem:[%s13111_s19 + $0x34] sm:$0xf]  ;;  %v365_v40 = vld [vmem:[%s13111_s19 + $0x38] sm:$0xf]  ;;  %499 = vst.msk [vmem:[#allocation2 + $0x28] sm:$0xff] %vm383_vm1, %v10565_v33  ;;  %v10567_v42 = vcombine.low %v362_v36, %v363_v38 }
  0x1c   : > { %v13156_v41 = vld [vmem:[%s16682_s8 + $0x30] sm:$0xf]  ;;  %v10568_v43 = vcombine.low %v364_v39, %v365_v40  ;;  %500 = vst.msk [vmem:[#allocation2 + $0x30] sm:$0xff] %vm383_vm1, %v10566_v37  ;;  %v1234_v44 = vrot.slane %v1213_v28, 4  ;;  %v13167_v45 = vld [vmem:[%s16682_s8 + $0x3c] sm:$0xf] }
  0x1d   : > { %501 = vst.msk [vmem:[#allocation2 + $0x38] sm:$0xff] %vm383_vm1, %v10567_v42  ;;  %v13172_v46 = vld [vmem:[%s16682_s8 + $0x38] sm:$0xf]  ;;  %v13193_v56 = vld [vmem:[%s16682_s8 + $0x44] sm:$0xf]  ;;  %vm394_vm8 = vcmask 130052  }
  0x1e   : > { %502 = vst.msk [vmem:[#allocation2 + $0x40] sm:$0xff] %vm383_vm1, %v10568_v43  ;;  %v13198_v57 = vld [vmem:[%s16682_s8 + $0x40] sm:$0xf]  ;;  %v366_v63 = vld [vmem:[%s13111_s19 + $0x3c] sm:$0xf]  ;;  %vm392_vm9 = vcmask 125952  }
  0x1f   : > { %680 = vperm.xlu1 %12592, %v13090_v12   ;;  %668 = vperm.xlu0 %12591, %v13103_v13   ;;  %v13174_v47 = vld [vmem:[#allocation2 + $0x8] sm:$0xff]  ;;  %v367_v9 = vld [vmem:[%s13111_s19 + $0x40] sm:$0xf]  ;;  %v368_v19 = vld [vmem:[%s13111_s19 + $0x44] sm:$0xf]  ;;  %vm12960_vm10 = vmmov 0  }
  0x20   : > { %v1235_v48 = vrot.slane %v13174_v47, 4  ;;  %v13216_v10 = vld [vmem:[%s16682_s8 + $0x4c] sm:$0xf]  ;;  %v13221_v11 = vld [vmem:[%s16682_s8 + $0x48] sm:$0xf]  ;;  %v10569_v15 = vcombine.low %v366_v63, %v367_v9  ;;  %vm5349_vm11 = vcmask 1040384  }
  0x21   : > { %v13177_v49 = vld [vmem:[#allocation2 + $0x10] sm:$0xff]  ;;  %v13179_v50 = vld [vmem:[#allocation2 + $0x18] sm:$0xff]  ;;  %v369_v20 = vld [vmem:[%s13111_s19 + $0x48] sm:$0xf]  ;;  %vm1034_vm5 = vsmask.f32 3328 }
  0x22   : > { %v1237_v51 = vrot.slane %v13177_v49, 4  ;;  %v1239_v52 = vrot.slane %v13179_v50, 4  ;;  %v1236_v53 = vsel %vm1233_vm4, %v1234_v44, %v1235_v48  ;;  %v13188_v55 = vld [vmem:[#allocation2 + $0x20] sm:$0xff]  ;;  %v13203_v60 = vld [vmem:[#allocation2 + $0x28] sm:$0xff]  ;;  %503 = vst.msk [vmem:[#allocation2 + $0x48] sm:$0xff] %vm383_vm1, %v10569_v15  ;;  %v10570_v25 = vcombine.low %v368_v19, %v369_v20  ;;  %s10558_s15 = sshll.u32 %s17083_s10, 1 }
  0x23   : > { %704 = vperm.xlu1 %12592, %v13116_v14   ;;  %692 = vperm.xlu0 %12591, %v13129_v23   ;;  %v1241_v61 = vrot.slane %v13188_v55, 4  ;;  %v1243_v62 = vrot.slane %v13203_v60, 4  ;;  %v13228_v18 = vld [vmem:[#allocation2 + $0x30] sm:$0xff]  ;;  %v13248_v26 = vld [vmem:[%s16676_s2 + $0x4] sm:$0x3]  ;;  %vm5436_vm12 = vcmask 64512   ;;  %s14531_s18 = scalar_lea.vmem %s16675_s1, %s10558_s15 }
  0x24   : > { %11378 = vmatprep.mubr.msk.bf16.mxu0 %vm383_vm1, %v1236_v53  ;;  %v1238_v58 = vsel %vm1233_vm4, %v1235_v48, %v1237_v51  ;;  %v1240_v59 = vsel %vm1233_vm4, %v1237_v51, %v1239_v52  ;;  %v13235_v21 = vld [vmem:[%s16682_s8 + $0x54] sm:$0xf]  ;;  %v13240_v22 = vld [vmem:[%s16682_s8 + $0x50] sm:$0xf]  ;;  %v13242_v24 = vld [vmem:[#allocation2 + $0x38] sm:$0xff]  ;;  %v1245_v27 = vrot.slane %v13228_v18, 4 }
  0x25   : > { %11379 = vmatmul.mubr.msk.bf16.vlgmr.msra.gmra.mrb[0].mxu0 %vm383_vm1, %v1238_v58  ;;  %v1242_v16 = vsel %vm1233_vm4, %v1239_v52, %v1241_v61  ;;  %v1244_v17 = vsel %vm1233_vm4, %v1241_v61, %v1243_v62  ;;  %504 = vst.msk [vmem:[#allocation2 + $0x50] sm:$0xff] %vm383_vm1, %v10570_v25  ;;  %v1247_v28 = vrot.slane %v13242_v24, 4  ;;  %v370_v29 = vld [vmem:[%s13111_s19 + $0x4c] sm:$0xf]  ;;  %v371_v30 = vld [vmem:[%s13111_s19 + $0x50] sm:$0xf] }
  0x26   : > { %11411 = vmatpush3.bf16.msra.mxu0 %v1682_v54  ;;  %11382 = vmatprep.mubr.msk.bf16.mxu0 %vm383_vm1, %v1240_v59  ;;  %v13263_v31 = vld [vmem:[%s16682_s8 + $0x5c] sm:$0xf]  ;;  %v13268_v33 = vld [vmem:[%s16682_s8 + $0x58] sm:$0xf]  ;;  %v10571_v34 = vcombine.low %v370_v29, %v371_v30  ;;  %v1246_v35 = vsel %vm1233_vm4, %v1243_v62, %v1245_v27  ;;  %v13275_v37 = vld [vmem:[#allocation2 + $0x40] sm:$0xff]  ;;  %v12957_v29 = vmov 1  }
  0x27   : > { %728 = vperm.xlu1 %12592, %v13140_v32   ;;  %716 = vperm.xlu0 %12591, %v13156_v41   ;;  %v1248_v36 = vsel %vm1233_vm4, %v1245_v27, %v1247_v28  ;;  %16824 = vst [vmem:[#allocation4_spill] sm:$0xff] %v13275_v37  ;;  %v372_v38 = vld [vmem:[%s13111_s19 + $0x54] sm:$0xf]  ;;  %v373_v39 = vld [vmem:[%s13111_s19 + $0x58] sm:$0xf]  ;;  %v16684_v44 = vrot.slane %v13275_v37, 4 }
  0x28   : > { %12569 = vmatprep.subr.msk.bf16.mxu0 %vm1315_vm0, %v13248_v26  ;;  %505 = vst.msk [vmem:[#allocation2 + $0x58] sm:$0xff] %vm383_vm1, %v10571_v34  ;;  %v13282_v40 = vld [vmem:[%s16682_s8 + $0x64] sm:$0xf]  ;;  %v13287_v42 = vld [vmem:[%s16682_s8 + $0x60] sm:$0xf]  ;;  %v10572_v43 = vcombine.low %v372_v38, %v373_v39 }
  0x29   : > { %v374_v48 = vld [vmem:[%s13111_s19 + $0x5c] sm:$0xf]  ;;  %v375_v51 = vld [vmem:[%s13111_s19 + $0x60] sm:$0xf]  ;;  %v539_v52 = vld [vmem:[%s16682_s8 + $0x6c] sm:$0xf]  ;;  %v1250_v58 = vsel %vm1233_vm4, %v1247_v28, %v16684_v44 }
  0x2a   : > { %506 = vst.msk [vmem:[#allocation2 + $0x60] sm:$0xff] %vm383_vm1, %v10572_v43  ;;  %v538_v53 = vld [vmem:[%s16682_s8 + $0x68] sm:$0xf]  ;;  %v10573_v54 = vcombine.low %v374_v48, %v375_v51  ;;  %v541_v59 = vld [vmem:[%s16682_s8 + $0x74] sm:$0xf] }
  0x2b   : > { %752 = vperm.xlu1 %12592, %v13167_v45   ;;  %740 = vperm.xlu0 %12591, %v13172_v46   ;;  %v540_v61 = vld [vmem:[%s16682_s8 + $0x70] sm:$0xf]  ;;  %v376_v62 = vld [vmem:[%s13111_s19 + $0x64] sm:$0xf]  ;;  %v377_v63 = vld [vmem:[%s13111_s19 + $0x68] sm:$0xf] }
  0x2c   : > { %507 = vst.msk [vmem:[#allocation2 + $0x68] sm:$0xff] %vm383_vm1, %v10573_v54  ;;  %v10574_v9 = vcombine.low %v376_v62, %v377_v63  ;;  %v543_v15 = vld [vmem:[%s16682_s8 + $0x7c] sm:$0xf]  ;;  %v379_v19 = vld [vmem:[%s13111_s19 + $0x70] sm:$0xf] }
  0x2d   : > { %11383 = vmatmul.mubr.msk.bf16.gmra.mrb[4].mxu0 %vm383_vm1, %v1242_v16  ;;  %v542_v16 = vld [vmem:[%s16682_s8 + $0x78] sm:$0xf]  ;;  %v380_v25 = vld [vmem:[%s13111_s19 + $0x74] sm:$0xf]  ;;  %vm1480_vm6 = vsmask.f32 4352 }
  0x2e   : > { %11386 = vmatprep.mubr.msk.bf16.mxu0 %vm383_vm1, %v1244_v17  ;;  %508 = vst.msk [vmem:[#allocation2 + $0x70] sm:$0xff] %vm383_vm1, %v10574_v9  ;;  %v378_v17 = vld [vmem:[%s13111_s19 + $0x6c] sm:$0xf]  ;;  %v381_v27 = vld [vmem:[%s13111_s19 + $0x78] sm:$0xf] }
  0x2f   : > { %776 = vperm.xlu1 %12592, %v13193_v56   ;;  %764 = vperm.xlu0 %12591, %v13198_v57   ;;  %v10575_v20 = vcombine.low %v378_v17, %v379_v19  ;;  %v10576_v28 = vcombine.low %v380_v25, %v381_v27 }
  0x31   : > { %509 = vst.msk [vmem:[#allocation2 + $0x78] sm:$0xff] %vm383_vm1, %v10575_v20  ;;  %510 = vst.msk [vmem:[#allocation2 + $0x80] sm:$0xff] %vm383_vm1, %v10576_v28 }
  0x33   : > { %800 = vperm.xlu1 %12592, %v13216_v10   ;;  %788 = vperm.xlu0 %12591, %v13221_v11  }
  0x35   : > { %11387 = vmatmul.mubr.msk.bf16.gmra.mrb[8].mxu0 %vm383_vm1, %v1246_v35 }
  0x36   : > { %11390 = vmatprep.mubr.msk.bf16.mxu0 %vm383_vm1, %v1248_v36 }
  0x37   : > { %824 = vperm.xlu1 %12592, %v13235_v21   ;;  %812 = vperm.xlu0 %12591, %v13240_v22  }
  0x3b   : > { %848 = vperm.xlu1 %12592, %v13263_v31   ;;  %836 = vperm.xlu0 %12591, %v13268_v33  }
  0x3d   : > { %11391 = vmatmul.mubr.msk.bf16.gmra.mrb[12].mxu0 %vm383_vm1, %v1250_v58 }
  0x3f   : > { %872 = vperm.xlu1 %12592, %v13282_v40   ;;  %860 = vperm.xlu0 %12591, %v13287_v42  }
  0x43   : > { %896 = vperm.xlu1 %12592, %v539_v52   ;;  %884 = vperm.xlu0 %12591, %v538_v53  }
  0x47   : > { %920 = vperm.xlu1 %12592, %v541_v59   ;;  %908 = vperm.xlu0 %12591, %v540_v61  }
  0x4b   : > { %944 = vperm.xlu1 %12592, %v543_v15   ;;  %932 = vperm.xlu0 %12591, %v542_v16  }
  0x4f   : > { %12594 = vset.pattern.permute.xlu1 %v12957_v29  ;;  %12593 = vset.pattern.permute.xlu0 %v12957_v29 }
  0x50   : > { %1858 = vperm.xlu1 %12594, %v13042_v4   ;;  %1847 = vperm.xlu0 %12593, %v13028_v1  }
  0x54   : > { %1869 = vperm.xlu1 %12594, %v13023_v0   ;;  %1880 = vperm.xlu0 %12593, %v13037_v3   ;;  %v12958_v0 = vmov 839922192   ;;  %v578_v3 = vlaneseq }
  0x55   : > { %v576_v1 = vunpack.c.l.s4 %v12958_v0 }
  0x57   : > { %v577_v4 = vunpack.c.0.s8 %v576_v1 }
  0x58   : > { %1891 = vperm.xlu1 %12594, %v13054_v6   ;;  %1902 = vperm.xlu0 %12593, %v13049_v5   ;;  %v13355_v5 = vshrl.u32 %v578_v3, 7 }
  0x5a   : > { %16825 = vst [vmem:[#allocation5_spill] sm:$0xff] %v13355_v5 }
  0x5c   : > { %1913 = vperm.xlu1 %12594, %v13066_v8   ;;  %1924 = vperm.xlu0 %12593, %v13061_v7   ;;  %v13358_v8 = vsub.s32 %v577_v4, %v13355_v5 }
  0x60   : > { %1935 = vperm.xlu1 %12594, %v13103_v13   ;;  %1946 = vperm.xlu0 %12593, %v13090_v12  }
  0x64   : > { %1957 = vperm.xlu1 %12594, %v13129_v23   ;;  %1968 = vperm.xlu0 %12593, %v13116_v14  }
  0x68   : > { %1979 = vperm.xlu1 %12594, %v13156_v41   ;;  %1990 = vperm.xlu0 %12593, %v13140_v32  }
  0x6c   : > { %2001 = vperm.xlu1 %12594, %v13172_v46   ;;  %2012 = vperm.xlu0 %12593, %v13167_v45  }
  0x70   : > { %2023 = vperm.xlu1 %12594, %v13198_v57   ;;  %2034 = vperm.xlu0 %12593, %v13193_v56  }
  0x74   : > { %2045 = vperm.xlu1 %12594, %v13221_v11   ;;  %2056 = vperm.xlu0 %12593, %v13216_v10  }
  0x78   : > { %2067 = vperm.xlu1 %12594, %v13240_v22   ;;  %2078 = vperm.xlu0 %12593, %v13235_v21  }
  0x7c   : > { %2089 = vperm.xlu1 %12594, %v13268_v33   ;;  %2100 = vperm.xlu0 %12593, %v13263_v31  }
  0x80   : > { %2111 = vperm.xlu1 %12594, %v13287_v42   ;;  %2122 = vperm.xlu0 %12593, %v13282_v40   ;;  %v553_v42 = vld [vmem:[#allocation2] sm:$0xf8] }
  0x84   : > { %2133 = vperm.xlu1 %12594, %v538_v53   ;;  %2144 = vperm.xlu0 %12593, %v539_v52  }
  0x88   : > { %2155 = vperm.xlu1 %12594, %v540_v61   ;;  %2166 = vperm.xlu0 %12593, %v541_v59  }
  0x8c   : > { %2177 = vperm.xlu1 %12594, %v542_v16   ;;  %2188 = vperm.xlu0 %12593, %v543_v15  }
  0x8e   : > { %v597_v6 = vpop.permute.xlu1 %596  ;;  %v573_v7 = vpop.permute.xlu0 %572 }
  0x8f   : > { %v605_v14 = vrot.slane %v597_v6, %v13358_v8  ;;  %v581_v23 = vrot.slane %v573_v7, %v13358_v8 }
  0x92   : > { %v609_v12 = vpop.permute.xlu1 %608  ;;  %v585_v13 = vpop.permute.xlu0 %584 }
  0x93   : > { %v617_v32 = vrot.slane %v609_v12, %v13358_v8  ;;  %v593_v41 = vrot.slane %v585_v13, %v13358_v8 }
  0x95   : > { %v10579_v45 = vcombine.low %v605_v14, %v617_v32  ;;  %v10578_v46 = vcombine.low %v581_v23, %v593_v41 }
  0x96   : > { %v633_v56 = vpop.permute.xlu1 %632  ;;  %v621_v57 = vpop.permute.xlu0 %620 }
  0x97   : > { %v1044_v10 = vshrl.u32 %v10579_v45, 16  ;;  %v1047_v11 = vshll.u32 %v10579_v45, 16  ;;  %v1036_v21 = vshrl.u32 %v10578_v46, 16  ;;  %v1039_v22 = vshll.u32 %v10578_v46, 16 }
  0x98   : > { %v641_v30 = vrot.slane %v633_v56, %v13358_v8  ;;  %v629_v31 = vrot.slane %v621_v57, %v13358_v8 }
  0x99   : > { %v1046_v33 = vrot.slane %v1044_v10, 4  ;;  %v1049_v34 = vrot.slane %v1047_v11, 5  ;;  %v1038_v35 = vrot.slane %v1036_v21, 4  ;;  %v1041_v36 = vrot.slane %v1039_v22, 5 }
  0x9a   : > { %v10580_v38 = vcombine.low %v629_v31, %v641_v30  ;;  %v657_v39 = vpop.permute.xlu1 %656  ;;  %v645_v40 = vpop.permute.xlu0 %644 }
  0x9b   : > { %v1050_v43 = vor.u32 %v1049_v34, %v1046_v33  ;;  %v13366_v48 = vor.u32 %v1041_v36, %v1038_v35  ;;  %v665_v51 = vrot.slane %v657_v39, %v13358_v8  ;;  %v653_v52 = vrot.slane %v645_v40, %v13358_v8 }
  0x9c   : > { %v1053_v53 = vshrl.u32 %v10580_v38, 16  ;;  %v1056_v54 = vshll.u32 %v10580_v38, 16  ;;  %v2658_v33 = vsel %vm1315_vm0, %v13248_v26, 0 }
  0x9d   : > { %16826 = vst [vmem:[#allocation6_spill] sm:$0xff] %v13366_v48  ;;  %v10581_v58 = vcombine.low %v653_v52, %v665_v51  ;;  %v13372_v59 = vsel %vm1034_vm5, %v13366_v48, %v1050_v43  ;;  %v1195_v61 = vmul.bf16 %v13366_v48, %v553_v42 }
  0x9e   : > { %16827 = vst [vmem:[#allocation7_spill] sm:$0xff] %v13372_v59  ;;  %v1055_v62 = vrot.slane %v1053_v53, 4  ;;  %v1058_v63 = vrot.slane %v1056_v54, 5  ;;  %v681_v9 = vpop.permute.xlu1 %680  ;;  %v669_v15 = vpop.permute.xlu0 %668  ;;  %v1196_v16 = vmul.bf16 %v13372_v59, %v13174_v47 }
  0x9f   : > { %v1062_v17 = vshrl.u32 %v10581_v58, 16  ;;  %v1065_v19 = vshll.u32 %v10581_v58, 16  ;;  %v689_v20 = vrot.slane %v681_v9, %v13358_v8  ;;  %v677_v25 = vrot.slane %v669_v15, %v13358_v8 }
  0xa0   : > { %v1059_v27 = vor.u32 %v1058_v63, %v1055_v62  ;;  %v1482_v28 = vshrl.u32 %v1195_v61, 16  ;;  %v1485_v29 = vshll.u32 %v1195_v61, 16  ;;  %v1490_v0 = vshrl.u32 %v1196_v16, 16 }
  0xa1   : > { %v1064_v1 = vrot.slane %v1062_v17, 4  ;;  %v1067_v3 = vrot.slane %v1065_v19, 5  ;;  %v10582_v4 = vcombine.low %v677_v25, %v689_v20  ;;  %v1493_v6 = vshll.u32 %v1196_v16, 16 }
  0xa2   : > { %v13380_v7 = vsel %vm1034_vm5, %v1050_v43, %v1059_v27  ;;  %v705_v12 = vpop.permute.xlu1 %704  ;;  %v693_v13 = vpop.permute.xlu0 %692  ;;  %v1484_v14 = vrot.slane %v1482_v28, 3  ;;  %v1487_v23 = vrot.slane %v1485_v29, 4  ;;  %v1492_v32 = vrot.slane %v1490_v0, 3 }
  0xa3   : > { %16828 = vst [vmem:[#allocation8_spill] sm:$0xff] %v13380_v7  ;;  %v1068_v41 = vor.u32 %v1067_v3, %v1064_v1  ;;  %v1071_v45 = vshrl.u32 %v10582_v4, 16  ;;  %v1074_v46 = vshll.u32 %v10582_v4, 16  ;;  %v713_v56 = vrot.slane %v705_v12, %v13358_v8 }
  0xa4   : > { %v701_v57 = vrot.slane %v693_v13, %v13358_v8  ;;  %v1488_v10 = vor.u32 %v1487_v23, %v1484_v14  ;;  %v1495_v11 = vrot.slane %v1493_v6, 4  ;;  %v1197_v21 = vmul.bf16 %v13380_v7, %v13177_v49 }
  0xa5   : > { %v13387_v22 = vsel %vm1034_vm5, %v1059_v27, %v1068_v41  ;;  %v1073_v30 = vrot.slane %v1071_v45, 4  ;;  %v1076_v31 = vrot.slane %v1074_v46, 5  ;;  %v13411_v46 = vld [vmem:[%s16676_s2 + $0x6] sm:$0x3] }
  0xa6   : > { %16829 = vst [vmem:[#allocation9_spill] sm:$0xff] %v13387_v22  ;;  %v10583_v34 = vcombine.low %v701_v57, %v713_v56  ;;  %v729_v35 = vpop.permute.xlu1 %728  ;;  %v717_v36 = vpop.permute.xlu0 %716  ;;  %v1496_v38 = vor.u32 %v1495_v11, %v1492_v32  ;;  %v1499_v39 = vshrl.u32 %v1197_v21, 16  ;;  %v1502_v40 = vshll.u32 %v1197_v21, 16 }
  0xa7   : > { %v1077_v42 = vor.u32 %v1076_v31, %v1073_v30  ;;  %v737_v43 = vrot.slane %v729_v35, %v13358_v8  ;;  %v725_v51 = vrot.slane %v717_v36, %v13358_v8  ;;  %v1198_v49 = vmul.bf16 %v13387_v22, %v13179_v50 }
  0xa8   : > { %v1080_v52 = vshrl.u32 %v10583_v34, 16  ;;  %v1083_v53 = vshll.u32 %v10583_v34, 16  ;;  %v1497_v54 = vsel %vm1480_vm6, %v1488_v10, %v1496_v38  ;;  %v1501_v58 = vrot.slane %v1499_v39, 3 }
  0xa9   : > { %v13397_v26 = vsel %vm1034_vm5, %v1068_v41, %v1077_v42  ;;  %v10584_v61 = vcombine.low %v725_v51, %v737_v43  ;;  %11412 = vmatprep.mubr.msk.bf16.mxu0 %vm383_vm1, %v1497_v54  ;;  %v1504_v62 = vrot.slane %v1502_v40, 4  ;;  %v1508_v63 = vshrl.u32 %v1198_v49, 16 }
  0xaa   : > { %16830 = vst [vmem:[#allocation10_spill] sm:$0xff] %v13397_v26  ;;  %v1082_v9 = vrot.slane %v1080_v52, 4  ;;  %v1085_v15 = vrot.slane %v1083_v53, 5  ;;  %v753_v16 = vpop.permute.xlu1 %752  ;;  %v741_v17 = vpop.permute.xlu0 %740  ;;  %v1511_v19 = vshll.u32 %v1198_v49, 16  ;;  %v1199_v50 = vmul.bf16 %v13397_v26, %v13188_v55 }
  0xab   : > { %v1089_v20 = vshrl.u32 %v10584_v61, 16  ;;  %v1092_v25 = vshll.u32 %v10584_v61, 16  ;;  %v761_v27 = vrot.slane %v753_v16, %v13358_v8  ;;  %v749_v28 = vrot.slane %v741_v17, %v13358_v8 }
  0xac   : > { %v1086_v29 = vor.u32 %v1085_v15, %v1082_v9  ;;  %v1505_v0 = vor.u32 %v1504_v62, %v1501_v58  ;;  %v1510_v1 = vrot.slane %v1508_v63, 3  ;;  %v1513_v3 = vrot.slane %v1511_v19, 4 }
  0xad   : > { %v1091_v4 = vrot.slane %v1089_v20, 4  ;;  %v1094_v6 = vrot.slane %v1092_v25, 5  ;;  %v10585_v12 = vcombine.low %v749_v28, %v761_v27  ;;  %v1517_v13 = vshrl.u32 %v1199_v50, 16 }
  0xae   : > { %v13405_v14 = vsel %vm1034_vm5, %v1077_v42, %v1086_v29  ;;  %v1506_v23 = vsel %vm1480_vm6, %v1496_v38, %v1505_v0  ;;  %v777_v55 = vpop.permute.xlu1 %776  ;;  %v765_v32 = vpop.permute.xlu0 %764  ;;  %v1514_v41 = vor.u32 %v1513_v3, %v1510_v1  ;;  %v1520_v45 = vshll.u32 %v1199_v50, 16 }
  0xaf   : > { %16831 = vst [vmem:[#allocation11_spill] sm:$0xff] %v13405_v14  ;;  %v1095_v56 = vor.u32 %v1094_v6, %v1091_v4  ;;  %v1098_v57 = vshrl.u32 %v10585_v12, 16  ;;  %v1101_v10 = vshll.u32 %v10585_v12, 16  ;;  %11413 = vmatmul.mubr.msk.bf16.vlgmr.msra.gmra.mrb[0].mxu0 %vm383_vm1, %v1506_v23  ;;  %v785_v11 = vrot.slane %v777_v55, %v13358_v8 }
  0xb0   : > { %11445 = vmatpush3.bf16.msra.mxu0 %v2658_v33  ;;  %v773_v21 = vrot.slane %v765_v32, %v13358_v8  ;;  %v1515_v30 = vsel %vm1480_vm6, %v1505_v0, %v1514_v41  ;;  %v1519_v31 = vrot.slane %v1517_v13, 3  ;;  %v1522_v34 = vrot.slane %v1520_v45, 4 }
  0xb1   : > { %v13418_v35 = vsel %vm1034_vm5, %v1086_v29, %v1095_v56  ;;  %v1100_v36 = vrot.slane %v1098_v57, 4  ;;  %v1103_v38 = vrot.slane %v1101_v10, 5  ;;  %11416 = vmatprep.mubr.msk.bf16.mxu0 %vm383_vm1, %v1515_v30  ;;  %v1200_v39 = vmul.bf16 %v13405_v14, %v13203_v60  ;;  %12570 = vmatprep.subr.msk.bf16.mxu0 %vm1315_vm0, %v13411_v46 }
  0xb2   : > { %16832 = vst [vmem:[#allocation12_spill] sm:$0xff] %v13418_v35  ;;  %v10586_v33 = vcombine.low %v773_v21, %v785_v11  ;;  %v801_v40 = vpop.permute.xlu1 %800  ;;  %v789_v42 = vpop.permute.xlu0 %788  ;;  %v1523_v43 = vor.u32 %v1522_v34, %v1519_v31  ;;  %v1201_v51 = vmul.bf16 %v13418_v35, %v13228_v18 }
  0xb3   : > { %v1104_v49 = vor.u32 %v1103_v38, %v1100_v36  ;;  %v809_v52 = vrot.slane %v801_v40, %v13358_v8  ;;  %v797_v53 = vrot.slane %v789_v42, %v13358_v8  ;;  %v1526_v54 = vshrl.u32 %v1200_v39, 16  ;;  %v13451_v42 = vld [vmem:[#allocation2 + $0x48] sm:$0xff] }
  0xb4   : > { %v1107_v58 = vshrl.u32 %v10586_v33, 16  ;;  %v1110_v61 = vshll.u32 %v10586_v33, 16  ;;  %v1524_v60 = vsel %vm1480_vm6, %v1514_v41, %v1523_v43  ;;  %v1529_v62 = vshll.u32 %v1200_v39, 16 }
  0xb5   : > { %v13431_v63 = vsel %vm1034_vm5, %v1095_v56, %v1104_v49  ;;  %v10587_v9 = vcombine.low %v797_v53, %v809_v52  ;;  %v1528_v15 = vrot.slane %v1526_v54, 3  ;;  %v1535_v16 = vshrl.u32 %v1201_v51, 16 }
  0xb6   : > { %16833 = vst [vmem:[#allocation13_spill] sm:$0xff] %v13431_v63  ;;  %v1109_v17 = vrot.slane %v1107_v58, 4  ;;  %v1112_v19 = vrot.slane %v1110_v61, 5  ;;  %v825_v18 = vpop.permute.xlu1 %824  ;;  %v813_v50 = vpop.permute.xlu0 %812  ;;  %v1531_v20 = vrot.slane %v1529_v62, 4  ;;  %v1538_v25 = vshll.u32 %v1201_v51, 16 }
  0xb7   : > { %v1116_v27 = vshrl.u32 %v10587_v9, 16  ;;  %v1119_v28 = vshll.u32 %v10587_v9, 16  ;;  %11417 = vmatmul.mubr.msk.bf16.gmra.mrb[4].mxu0 %vm383_vm1, %v1524_v60  ;;  %v833_v29 = vrot.slane %v825_v18, %v13358_v8  ;;  %v821_v0 = vrot.slane %v813_v50, %v13358_v8 }
  0xb8   : > { %v1113_v1 = vor.u32 %v1112_v19, %v1109_v17  ;;  %v1532_v3 = vor.u32 %v1531_v20, %v1528_v15  ;;  %v1537_v4 = vrot.slane %v1535_v16, 3  ;;  %v1540_v6 = vrot.slane %v1538_v25, 4 }
  0xb9   : > { %v1118_v12 = vrot.slane %v1116_v27, 4  ;;  %v1121_v13 = vrot.slane %v1119_v28, 5  ;;  %v10588_v23 = vcombine.low %v821_v0, %v833_v29  ;;  %v1202_v55 = vmul.bf16 %v13431_v63, %v13242_v24 }
  0xba   : > { %v13439_v32 = vsel %vm1034_vm5, %v1104_v49, %v1113_v1  ;;  %v1533_v41 = vsel %vm1480_vm6, %v1523_v43, %v1532_v3  ;;  %v849_v45 = vpop.permute.xlu1 %848  ;;  %v837_v56 = vpop.permute.xlu0 %836  ;;  %v1541_v57 = vor.u32 %v1540_v6, %v1537_v4 }
  0xbb   : > { %16834 = vst [vmem:[#allocation14_spill] sm:$0xff] %v13439_v32  ;;  %v1122_v10 = vor.u32 %v1121_v13, %v1118_v12  ;;  %v1125_v11 = vshrl.u32 %v10588_v23, 16  ;;  %v1128_v21 = vshll.u32 %v10588_v23, 16  ;;  %11420 = vmatprep.mubr.msk.bf16.mxu0 %vm383_vm1, %v1533_v41  ;;  %v857_v30 = vrot.slane %v849_v45, %v13358_v8  ;;  %v13465_v45 = vld [vmem:[#allocation2 + $0x50] sm:$0xff] }
  0xbc   : > { %v845_v31 = vrot.slane %v837_v56, %v13358_v8  ;;  %v1542_v34 = vsel %vm1480_vm6, %v1532_v3, %v1541_v57  ;;  %v1544_v24 = vshrl.u32 %v1202_v55, 16  ;;  %v1547_v36 = vshll.u32 %v1202_v55, 16 }
  0xbd   : > { %v13447_v38 = vsel %vm1034_vm5, %v1113_v1, %v1122_v10  ;;  %v1127_v39 = vrot.slane %v1125_v11, 4  ;;  %v1130_v33 = vrot.slane %v1128_v21, 5  ;;  %v1203_v40 = vmul.bf16 %v13439_v32, %v13275_v37 }
  0xbe   : > { %16835 = vst [vmem:[#allocation15_spill] sm:$0xff] %v13447_v38  ;;  %v10589_v43 = vcombine.low %v845_v31, %v857_v30  ;;  %v873_v51 = vpop.permute.xlu1 %872  ;;  %v861_v49 = vpop.permute.xlu0 %860  ;;  %v1546_v52 = vrot.slane %v1544_v24, 3  ;;  %v1549_v53 = vrot.slane %v1547_v36, 4  ;;  %v1204_v54 = vmul.bf16 %v13447_v38, %v13451_v42 }
  0xbf   : > { %v1131_v58 = vor.u32 %v1130_v33, %v1127_v39  ;;  %11421 = vmatmul.mubr.msk.bf16.gmra.mrb[8].mxu0 %vm383_vm1, %v1542_v34  ;;  %v881_v61 = vrot.slane %v873_v51, %v13358_v8  ;;  %v869_v60 = vrot.slane %v861_v49, %v13358_v8  ;;  %v1553_v62 = vshrl.u32 %v1203_v40, 16 }
  0xc0   : > { %v1134_v9 = vshrl.u32 %v10589_v43, 16  ;;  %v1137_v15 = vshll.u32 %v10589_v43, 16  ;;  %v1550_v16 = vor.u32 %v1549_v53, %v1546_v52  ;;  %v1556_v17 = vshll.u32 %v1203_v40, 16  ;;  %v13476_v53 = vld [vmem:[#allocation2 + $0x58] sm:$0xff] }
  0xc1   : > { %v13459_v19 = vsel %vm1034_vm5, %v1122_v10, %v1131_v58  ;;  %v10590_v18 = vcombine.low %v869_v60, %v881_v61  ;;  %v1555_v50 = vrot.slane %v1553_v62, 3  ;;  %v1562_v20 = vshrl.u32 %v1204_v54, 16 }
  0xc2   : > { %16836 = vst [vmem:[#allocation16_spill] sm:$0xff] %v13459_v19  ;;  %v1136_v25 = vrot.slane %v1134_v9, 4  ;;  %v1139_v27 = vrot.slane %v1137_v15, 5  ;;  %v1551_v28 = vsel %vm1480_vm6, %v1541_v57, %v1550_v16  ;;  %v897_v29 = vpop.permute.xlu1 %896  ;;  %v885_v0 = vpop.permute.xlu0 %884  ;;  %v1558_v1 = vrot.slane %v1556_v17, 4 }
  0xc3   : > { %v1143_v3 = vshrl.u32 %v10590_v18, 16  ;;  %v1146_v4 = vshll.u32 %v10590_v18, 16  ;;  %11424 = vmatprep.mubr.msk.bf16.mxu0 %vm383_vm1, %v1551_v28  ;;  %v905_v6 = vrot.slane %v897_v29, %v13358_v8  ;;  %v893_v12 = vrot.slane %v885_v0, %v13358_v8 }
  0xc4   : > { %v1140_v13 = vor.u32 %v1139_v27, %v1136_v25  ;;  %v1559_v23 = vor.u32 %v1558_v1, %v1555_v50  ;;  %v1564_v55 = vrot.slane %v1562_v20, 3  ;;  %v1565_v41 = vshll.u32 %v1204_v54, 16 }
  0xc5   : > { %v1145_v56 = vrot.slane %v1143_v3, 4  ;;  %v1148_v10 = vrot.slane %v1146_v4, 5  ;;  %v10591_v57 = vcombine.low %v893_v12, %v905_v6  ;;  %v1205_v11 = vmul.bf16 %v13459_v19, %v13465_v45  ;;  %v13487_v3 = vld [vmem:[#allocation2 + $0x60] sm:$0xff] }
  0xc6   : > { %v13470_v21 = vsel %vm1034_vm5, %v1131_v58, %v1140_v13  ;;  %v1560_v30 = vsel %vm1480_vm6, %v1550_v16, %v1559_v23  ;;  %v921_v31 = vpop.permute.xlu1 %920  ;;  %v909_v34 = vpop.permute.xlu0 %908  ;;  %v1567_v24 = vrot.slane %v1565_v41, 4 }
  0xc7   : > { %16837 = vst [vmem:[#allocation17_spill] sm:$0xff] %v13470_v21  ;;  %v1149_v36 = vor.u32 %v1148_v10, %v1145_v56  ;;  %v1152_v39 = vshrl.u32 %v10591_v57, 16  ;;  %v1155_v33 = vshll.u32 %v10591_v57, 16  ;;  %11425 = vmatmul.mubr.msk.bf16.gmra.mrb[12].mxu0 %vm383_vm1, %v1560_v30  ;;  %v929_v40 = vrot.slane %v921_v31, %v13358_v8 }
  0xc8   : > { %v917_v43 = vrot.slane %v909_v34, %v13358_v8  ;;  %v1568_v51 = vor.u32 %v1567_v24, %v1564_v55  ;;  %v1571_v49 = vshrl.u32 %v1205_v11, 16  ;;  %v1574_v52 = vshll.u32 %v1205_v11, 16 }
  0xc9   : > { %v13479_v54 = vsel %vm1034_vm5, %v1140_v13, %v1149_v36  ;;  %v1154_v58 = vrot.slane %v1152_v39, 4  ;;  %v1157_v61 = vrot.slane %v1155_v33, 5  ;;  %v1206_v60 = vmul.bf16 %v13470_v21, %v13476_v53 }
  0xca   : > { %16838 = vst [vmem:[#allocation18_spill] sm:$0xff] %v13479_v54  ;;  %v10592_v62 = vcombine.low %v917_v43, %v929_v40  ;;  %v1569_v9 = vsel %vm1480_vm6, %v1559_v23, %v1568_v51  ;;  %v945_v15 = vpop.permute.xlu1 %944  ;;  %v933_v16 = vpop.permute.xlu0 %932  ;;  %v1573_v17 = vrot.slane %v1571_v49, 3  ;;  %v1576_v18 = vrot.slane %v1574_v52, 4 }
  0xcb   : > { %v1158_v50 = vor.u32 %v1157_v61, %v1154_v58  ;;  %11428 = vmatprep.mubr.msk.bf16.mxu0 %vm383_vm1, %v1569_v9  ;;  %v953_v20 = vrot.slane %v945_v15, %v13358_v8  ;;  %v941_v25 = vrot.slane %v933_v16, %v13358_v8  ;;  %v1580_v27 = vshrl.u32 %v1206_v60, 16  ;;  %v13506_v9 = vld [vmem:[#allocation2 + $0x70] sm:$0xff] }
  0xcc   : > { %v1161_v28 = vshrl.u32 %v10592_v62, 16  ;;  %v1164_v29 = vshll.u32 %v10592_v62, 16  ;;  %v1577_v0 = vor.u32 %v1576_v18, %v1573_v17  ;;  %v1583_v1 = vshll.u32 %v1206_v60, 16 }
  0xcd   : > { %v13490_v4 = vsel %vm1034_vm5, %v1149_v36, %v1158_v50  ;;  %v10593_v6 = vcombine.low %v941_v25, %v953_v20  ;;  %v1582_v12 = vrot.slane %v1580_v27, 3  ;;  %v1207_v13 = vmul.bf16 %v13479_v54, %v13487_v3 }
  0xce   : > { %16839 = vst [vmem:[#allocation19_spill] sm:$0xff] %v13490_v4  ;;  %v1163_v23 = vrot.slane %v1161_v28, 4  ;;  %v1166_v55 = vrot.slane %v1164_v29, 5  ;;  %v1578_v41 = vsel %vm1480_vm6, %v1568_v51, %v1577_v0  ;;  %v1585_v56 = vrot.slane %v1583_v1, 4  ;;  %v13498_v51 = vld [vmem:[#allocation2 + $0x68] sm:$0xff] }
  0xcf   : > { %v1170_v10 = vshrl.u32 %v10593_v6, 16  ;;  %v1173_v57 = vshll.u32 %v10593_v6, 16  ;;  %11429 = vmatmul.mubr.msk.bf16.gmra.mrb[16].mxu0 %vm383_vm1, %v1578_v41  ;;  %v1859_v11 = vpop.permute.xlu1 %1858  ;;  %v1848_v30 = vpop.permute.xlu0 %1847  ;;  %v1589_v31 = vshrl.u32 %v1207_v13, 16  ;;  %v1592_v34 = vshll.u32 %v1207_v13, 16 }
  0xd0   : > { %v1167_v24 = vor.u32 %v1166_v55, %v1163_v23  ;;  %v1867_v36 = vrot.slane %v1859_v11, %v13358_v8  ;;  %v1856_v39 = vrot.slane %v1848_v30, %v13358_v8  ;;  %v1586_v33 = vor.u32 %v1585_v56, %v1582_v12 }
  0xd1   : > { %v1172_v40 = vrot.slane %v1170_v10, 4  ;;  %v1175_v43 = vrot.slane %v1173_v57, 5  ;;  %v1591_v49 = vrot.slane %v1589_v31, 3  ;;  %v1594_v52 = vrot.slane %v1592_v34, 4  ;;  %v569_v31 = vld [vmem:[#allocation2 + $0x80] sm:$0xf] }
  0xd2   : > { %v13501_v58 = vsel %vm1034_vm5, %v1158_v50, %v1167_v24  ;;  %v10627_v61 = vcombine.low %v1856_v39, %v1867_v36  ;;  %v1587_v60 = vsel %vm1480_vm6, %v1577_v0, %v1586_v33  ;;  %v1208_v62 = vmul.bf16 %v13490_v4, %v13498_v51 }
  0xd3   : > { %16840 = vst [vmem:[#allocation20_spill] sm:$0xff] %v13501_v58  ;;  %v13508_v15 = vor.u32 %v1175_v43, %v1172_v40  ;;  %11432 = vmatprep.mubr.msk.bf16.mxu0 %vm383_vm1, %v1587_v60  ;;  %v1870_v16 = vpop.permute.xlu1 %1869  ;;  %v1881_v17 = vpop.permute.xlu0 %1880  ;;  %v1595_v18 = vor.u32 %v1594_v52, %v1591_v49  ;;  %v1209_v20 = vmul.bf16 %v13501_v58, %v13506_v9  ;;  %v13515_v50 = vsel %vm1315_vm0, %v13411_v46, 0  ;;  %v13528_v40 = vld [vmem:[#allocation2 + $0x78] sm:$0xff] }
  0xd4   : > { %v2279_v25 = vshrl.u32 %v10627_v61, 16  ;;  %v2282_v27 = vshll.u32 %v10627_v61, 16  ;;  %v1878_v28 = vrot.slane %v1870_v16, %v13358_v8  ;;  %v1889_v29 = vrot.slane %v1881_v17, %v13358_v8  ;;  %v12879_v16 = vld [vmem:[#allocation2] sm:$0xf0] }
  0xd5   : > { %16841 = vst [vmem:[#allocation21_spill] sm:$0xff] %v13508_v15  ;;  %v1596_v0 = vsel %vm1480_vm6, %v1586_v33, %v1595_v18  ;;  %v1598_v1 = vshrl.u32 %v1208_v62, 16  ;;  %v1601_v6 = vshll.u32 %v1208_v62, 16  ;;  %v1607_v12 = vshrl.u32 %v1209_v20, 16 }
  0xd6   : > { %v2281_v13 = vrot.slane %v2279_v25, 3  ;;  %v2284_v23 = vrot.slane %v2282_v27, 4  ;;  %v10628_v55 = vcombine.low %v1878_v28, %v1889_v29  ;;  %v1610_v41 = vshll.u32 %v1209_v20, 16 }
  0xd7   : > { %11433 = vmatmul.mubr.msk.bf16.gmra.mrb[20].mxu0 %vm383_vm1, %v1596_v0  ;;  %v1892_v56 = vpop.permute.xlu1 %1891  ;;  %v1903_v46 = vpop.permute.xlu0 %1902  ;;  %v1600_v10 = vrot.slane %v1598_v1, 3  ;;  %v1603_v57 = vrot.slane %v1601_v6, 4  ;;  %v1609_v11 = vrot.slane %v1607_v12, 3  ;;  %v13523_v30 = vsel %vm1034_vm5, %v1167_v24, %v13508_v15 }
  0xd8   : > { %16842 = vst [vmem:[#allocation22_spill] sm:$0xff] %v13523_v30  ;;  %v13525_v34 = vor.u32 %v2284_v23, %v2281_v13  ;;  %v2287_v36 = vshrl.u32 %v10628_v55, 16  ;;  %v2290_v39 = vshll.u32 %v10628_v55, 16  ;;  %v1900_v33 = vrot.slane %v1892_v56, %v13358_v8 }
  0xd9   : > { %v1911_v43 = vrot.slane %v1903_v46, %v13358_v8  ;;  %v1604_v49 = vor.u32 %v1603_v57, %v1600_v10  ;;  %v1612_v52 = vrot.slane %v1610_v41, 4  ;;  %v1210_v61 = vmul.bf16 %v13523_v30, %v13528_v40 }
  0xda   : > { %16843 = vst [vmem:[#allocation23_spill] sm:$0xff] %v13525_v34  ;;  %v2289_v60 = vrot.slane %v2287_v36, 3  ;;  %v2292_v62 = vrot.slane %v2290_v39, 4  ;;  %v1211_v24 = vmul.bf16 %v13508_v15, %v569_v31  ;;  %v2438_v17 = vmul.bf16 %v12879_v16, %v13525_v34 }
  0xdb   : > { %v10629_v20 = vcombine.low %v1900_v33, %v1911_v43  ;;  %v1605_v25 = vsel %vm1480_vm6, %v1595_v18, %v1604_v49  ;;  %v1914_v27 = vpop.permute.xlu1 %1913  ;;  %v1925_v28 = vpop.permute.xlu0 %1924  ;;  %v1613_v29 = vor.u32 %v1612_v52, %v1609_v11  ;;  %v1616_v0 = vshrl.u32 %v1210_v61, 16 }
  0xdc   : > { %v2293_v1 = vor.u32 %v2292_v62, %v2289_v60  ;;  %11436 = vmatprep.mubr.msk.bf16.mxu0 %vm383_vm1, %v1605_v25  ;;  %v1922_v6 = vrot.slane %v1914_v27, %v13358_v8  ;;  %v1933_v12 = vrot.slane %v1925_v28, %v13358_v8  ;;  %v1619_v13 = vshll.u32 %v1210_v61, 16 }
  0xdd   : > { %v2296_v23 = vshrl.u32 %v10629_v20, 16  ;;  %v2299_v55 = vshll.u32 %v10629_v20, 16  ;;  %v1614_v41 = vsel %vm1480_vm6, %v1604_v49, %v1613_v29  ;;  %v1618_v56 = vrot.slane %v1616_v0, 3 }
  0xde   : > { %v13542_v18 = vsel %vm1480_vm6, %v13525_v34, %v2293_v1  ;;  %v10630_v46 = vcombine.low %v1922_v6, %v1933_v12  ;;  %v1621_v10 = vrot.slane %v1619_v13, 4  ;;  %v1625_v57 = vshrl.u32 %v1211_v24, 16 }
  0xdf   : > { %16844 = vst [vmem:[#allocation24_spill] sm:$0xff] %v13542_v18  ;;  %v2298_v11 = vrot.slane %v2296_v23, 3  ;;  %v2301_v31 = vrot.slane %v2299_v55, 4  ;;  %11437 = vmatmul.mubr.msk.bf16.gmra.mrb[24].mxu0 %vm383_vm1, %v1614_v41  ;;  %v1936_v36 = vpop.permute.xlu1 %1935  ;;  %v1947_v39 = vpop.permute.xlu0 %1946  ;;  %v1628_v33 = vshll.u32 %v1211_v24, 16  ;;  %v2439_v43 = vmul.bf16 %v13542_v18, %v13174_v47 }
  0xe0   : > { %v2305_v52 = vshrl.u32 %v10630_v46, 16  ;;  %v2308_v49 = vshll.u32 %v10630_v46, 16  ;;  %v1944_v61 = vrot.slane %v1936_v36, %v13358_v8  ;;  %v1955_v60 = vrot.slane %v1947_v39, %v13358_v8 }
  0xe1   : > { %v2302_v62 = vor.u32 %v2301_v31, %v2298_v11  ;;  %v1622_v16 = vor.u32 %v1621_v10, %v1618_v56  ;;  %v1627_v20 = vrot.slane %v1625_v57, 3  ;;  %v1630_v25 = vrot.slane %v1628_v33, 4 }
  0xe2   : > { %v2307_v27 = vrot.slane %v2305_v52, 3  ;;  %v2310_v28 = vrot.slane %v2308_v49, 4  ;;  %v10631_v0 = vcombine.low %v1944_v61, %v1955_v60  ;;  %v2458_v6 = vshrl.u32 %v2438_v17, 16 }
  0xe3   : > { %v13550_v12 = vsel %vm1480_vm6, %v2293_v1, %v2302_v62  ;;  %v1623_v24 = vsel %vm1480_vm6, %v1613_v29, %v1622_v16  ;;  %v1958_v47 = vpop.permute.xlu1 %1957  ;;  %v1969_v13 = vpop.permute.xlu0 %1968  ;;  %v1631_v23 = vor.u32 %v1630_v25, %v1627_v20  ;;  %v2461_v55 = vshll.u32 %v2438_v17, 16  ;;  %v12880_v20 = vld [vmem:[#allocation2 + $0x10] sm:$0xff] }
  0xe4   : > { %16845 = vst [vmem:[#allocation25_spill] sm:$0xff] %v13550_v12  ;;  %v2311_v41 = vor.u32 %v2310_v28, %v2307_v27  ;;  %v2314_v46 = vshrl.u32 %v10631_v0, 16  ;;  %v2317_v36 = vshll.u32 %v10631_v0, 16  ;;  %11440 = vmatprep.mubr.msk.bf16.mxu0 %vm383_vm1, %v1623_v24  ;;  %v1966_v56 = vrot.slane %v1958_v47, %v13358_v8 }
  0xe5   : > { %v1977_v10 = vrot.slane %v1969_v13, %v13358_v8  ;;  %v1632_v57 = vsel %vm1480_vm6, %v1622_v16, %v1631_v23  ;;  %v2460_v11 = vrot.slane %v2458_v6, 4  ;;  %v2463_v1 = vrot.slane %v2461_v55, 5 }
  0xe6   : > { %v13558_v31 = vsel %vm1480_vm6, %v2302_v62, %v2311_v41  ;;  %v2316_v29 = vrot.slane %v2314_v46, 3  ;;  %v2319_v39 = vrot.slane %v2317_v36, 4  ;;  %v2466_v33 = vshrl.u32 %v2439_v43, 16  ;;  %v12881_v46 = vld [vmem:[#allocation2 + $0x18] sm:$0xff] }
  0xe7   : > { %16846 = vst [vmem:[#allocation26_spill] sm:$0xff] %v13558_v31  ;;  %v10632_v17 = vcombine.low %v1966_v56, %v1977_v10  ;;  %11441 = vmatmul.mubr.msk.bf16.gmra.mrb[28].mxu0 %vm383_vm1, %v1632_v57  ;;  %v1980_v52 = vpop.permute.xlu1 %1979  ;;  %v1991_v49 = vpop.permute.xlu0 %1990  ;;  %v2464_v61 = vor.u32 %v2463_v1, %v2460_v11  ;;  %v2469_v60 = vshll.u32 %v2439_v43, 16  ;;  %v2440_v25 = vmul.bf16 %v12880_v20, %v13550_v12 }
  0xe8   : > { %v2320_v27 = vor.u32 %v2319_v39, %v2316_v29  ;;  %v1988_v16 = vrot.slane %v1980_v52, %v13358_v8  ;;  %v1999_v28 = vrot.slane %v1991_v49, %v13358_v8  ;;  %v2468_v62 = vrot.slane %v2466_v33, 4 }
  0xe9   : > { %v2323_v0 = vshrl.u32 %v10632_v17, 16  ;;  %v2326_v6 = vshll.u32 %v10632_v17, 16  ;;  %v2471_v24 = vrot.slane %v2469_v60, 5  ;;  %v2475_v47 = vshrl.u32 %v2440_v25, 16 }
  0xea   : > { %v13565_v13 = vsel %vm1480_vm6, %v2311_v41, %v2320_v27  ;;  %v10633_v23 = vcombine.low %v1988_v16, %v1999_v28  ;;  %v2478_v55 = vshll.u32 %v2440_v25, 16  ;;  %v2441_v43 = vmul.bf16 %v12881_v46, %v13558_v31 }
  0xeb   : > { %16847 = vst [vmem:[#allocation27_spill] sm:$0xff] %v13565_v13  ;;  %v2325_v36 = vrot.slane %v2323_v0, 3  ;;  %v2328_v56 = vrot.slane %v2326_v6, 4  ;;  %v2472_v10 = vor.u32 %v2471_v24, %v2468_v62  ;;  %v2002_v57 = vpop.permute.xlu1 %2001  ;;  %v2013_v11 = vpop.permute.xlu0 %2012  ;;  %v2477_v1 = vrot.slane %v2475_v47, 4 }
  0xec   : > { %v2332_v29 = vshrl.u32 %v10633_v23, 16  ;;  %v2335_v39 = vshll.u32 %v10633_v23, 16  ;;  %v2010_v33 = vrot.slane %v2002_v57, %v13358_v8  ;;  %v2021_v17 = vrot.slane %v2013_v11, %v13358_v8  ;;  %v12882_v23 = vld [vmem:[#allocation2 + $0x20] sm:$0xff] }
  0xed   : > { %v2329_v52 = vor.u32 %v2328_v56, %v2325_v36  ;;  %v2473_v41 = vsel %vm1034_vm5, %v2464_v61, %v2472_v10  ;;  %v2480_v49 = vrot.slane %v2478_v55, 5  ;;  %v2484_v60 = vshrl.u32 %v2441_v43, 16 }
  0xee   : > { %v2334_v20 = vrot.slane %v2332_v29, 3  ;;  %v2337_v25 = vrot.slane %v2335_v39, 4  ;;  %11446 = vmatprep.mubr.msk.bf16.mxu0 %vm383_vm1, %v2473_v41  ;;  %v10634_v16 = vcombine.low %v2010_v33, %v2021_v17  ;;  %v2487_v28 = vshll.u32 %v2441_v43, 16 }
  0xef   : > { %v13573_v62 = vsel %vm1480_vm6, %v2320_v27, %v2329_v52  ;;  %v2481_v0 = vor.u32 %v2480_v49, %v2477_v1  ;;  %v2024_v6 = vpop.permute.xlu1 %2023  ;;  %v2035_v24 = vpop.permute.xlu0 %2034  ;;  %v2486_v47 = vrot.slane %v2484_v60, 4  ;;  %v2442_v46 = vmul.bf16 %v12882_v23, %v13565_v13  ;;  %v13582_v27 = vld [vmem:[%s16676_s2 + $0x8] sm:$0x3] }
  0xf0   : > { %16848 = vst [vmem:[#allocation28_spill] sm:$0xff] %v13573_v62  ;;  %v2338_v36 = vor.u32 %v2337_v25, %v2334_v20  ;;  %v2341_v61 = vshrl.u32 %v10634_v16, 16  ;;  %v2344_v55 = vshll.u32 %v10634_v16, 16  ;;  %v2032_v56 = vrot.slane %v2024_v6, %v13358_v8  ;;  %v12883_v25 = vld [vmem:[#allocation2 + $0x28] sm:$0xff] }
  0xf1   : > { %v2482_v57 = vsel %vm1034_vm5, %v2472_v10, %v2481_v0  ;;  %v2043_v11 = vrot.slane %v2035_v24, %v13358_v8  ;;  %v2489_v43 = vrot.slane %v2487_v28, 5  ;;  %v2493_v29 = vshrl.u32 %v2442_v46, 16 }
  0xf2   : > { %v13585_v1 = vsel %vm1480_vm6, %v2329_v52, %v2338_v36  ;;  %v2343_v39 = vrot.slane %v2341_v61, 3  ;;  %v2346_v33 = vrot.slane %v2344_v55, 4  ;;  %11447 = vmatmul.mubr.msk.bf16.vlgmr.msra.gmra.mrb[0].mxu0 %vm383_vm1, %v2482_v57  ;;  %v2496_v17 = vshll.u32 %v2442_v46, 16 }
  0xf3   : > { %16849 = vst [vmem:[#allocation29_spill] sm:$0xff] %v13585_v1  ;;  %11479 = vmatpush3.bf16.msra.mxu0 %v13515_v50  ;;  %v10635_v10 = vcombine.low %v2032_v56, %v2043_v11  ;;  %v2490_v41 = vor.u32 %v2489_v43, %v2486_v47  ;;  %v2046_v49 = vpop.permute.xlu1 %2045  ;;  %v2057_v60 = vpop.permute.xlu0 %2056  ;;  %v2495_v20 = vrot.slane %v2493_v29, 4  ;;  %v2443_v16 = vmul.bf16 %v12883_v25, %v13573_v62 }
  0xf4   : > { %v2347_v28 = vor.u32 %v2346_v33, %v2343_v39  ;;  %v2054_v6 = vrot.slane %v2046_v49, %v13358_v8  ;;  %v2065_v52 = vrot.slane %v2057_v60, %v13358_v8  ;;  %v2498_v24 = vrot.slane %v2496_v17, 5  ;;  %12571 = vmatprep.subr.msk.bf16.mxu0 %vm1315_vm0, %v13582_v27  ;;  %v12884_v17 = vld [vmem:[#allocation2 + $0x30] sm:$0xff] }
  0xf5   : > { %v2350_v23 = vshrl.u32 %v10635_v10, 16  ;;  %v2353_v46 = vshll.u32 %v10635_v10, 16  ;;  %v2491_v50 = vsel %vm1034_vm5, %v2481_v0, %v2490_v41  ;;  %v2502_v47 = vshrl.u32 %v2443_v16, 16 }
  0xf6   : > { %v13596_v61 = vsel %vm1480_vm6, %v2338_v36, %v2347_v28  ;;  %11450 = vmatprep.mubr.msk.bf16.mxu0 %vm383_vm1, %v2491_v50  ;;  %v10636_v55 = vcombine.low %v2054_v6, %v2065_v52  ;;  %v2499_v56 = vor.u32 %v2498_v24, %v2495_v20  ;;  %v2505_v57 = vshll.u32 %v2443_v16, 16 }
  0xf7   : > { %16850 = vst [vmem:[#allocation30_spill] sm:$0xff] %v13596_v61  ;;  %v2352_v11 = vrot.slane %v2350_v23, 3  ;;  %v2355_v43 = vrot.slane %v2353_v46, 4  ;;  %v2068_v29 = vpop.permute.xlu1 %2067  ;;  %v2079_v39 = vpop.permute.xlu0 %2078  ;;  %v2504_v33 = vrot.slane %v2502_v47, 4  ;;  %v2444_v49 = vmul.bf16 %v12884_v17, %v13585_v1  ;;  %v12885_v23 = vld [vmem:[#allocation2 + $0x38] sm:$0xff] }
  0xf8   : > { %v2359_v10 = vshrl.u32 %v10636_v55, 16  ;;  %v2362_v60 = vshll.u32 %v10636_v55, 16  ;;  %v2500_v0 = vsel %vm1034_vm5, %v2490_v41, %v2499_v56  ;;  %v2076_v36 = vrot.slane %v2068_v29, %v13358_v8 }
  0xf9   : > { %v2356_v25 = vor.u32 %v2355_v43, %v2352_v11  ;;  %v2087_v50 = vrot.slane %v2079_v39, %v13358_v8  ;;  %v2507_v6 = vrot.slane %v2505_v57, 5  ;;  %v2511_v20 = vshrl.u32 %v2444_v49, 16 }
  0xfa   : > { %v2361_v16 = vrot.slane %v2359_v10, 3  ;;  %v2364_v52 = vrot.slane %v2362_v60, 4  ;;  %11451 = vmatmul.mubr.msk.bf16.gmra.mrb[4].mxu0 %vm383_vm1, %v2500_v0  ;;  %v2514_v24 = vshll.u32 %v2444_v49, 16  ;;  %v2445_v46 = vmul.bf16 %v12885_v23, %v13596_v61 }
  0xfb   : > { %v13606_v47 = vsel %vm1480_vm6, %v2347_v28, %v2356_v25  ;;  %v10637_v55 = vcombine.low %v2076_v36, %v2087_v50  ;;  %v2508_v41 = vor.u32 %v2507_v6, %v2504_v33  ;;  %v2090_v17 = vpop.permute.xlu1 %2089  ;;  %v2101_v29 = vpop.permute.xlu0 %2100  ;;  %v2513_v11 = vrot.slane %v2511_v20, 4 }
  0xfc   : > { %16851 = vst [vmem:[#allocation31_spill] sm:$0xff] %v13606_v47  ;;  %v2365_v43 = vor.u32 %v2364_v52, %v2361_v16  ;;  %v2098_v57 = vrot.slane %v2090_v17, %v13358_v8  ;;  %v2109_v39 = vrot.slane %v2101_v29, %v13358_v8  ;;  %v2516_v10 = vrot.slane %v2514_v24, 5  ;;  %v12886_v17 = vld [vmem:[#allocation2 + $0x40] sm:$0xff] }
  0xfd   : > { %v2368_v60 = vshrl.u32 %v10637_v55, 16  ;;  %v2371_v0 = vshll.u32 %v10637_v55, 16  ;;  %v2509_v49 = vsel %vm1034_vm5, %v2499_v56, %v2508_v41  ;;  %v2520_v44 = vshrl.u32 %v2445_v46, 16 }
  0xfe   : > { %v13612_v23 = vsel %vm1480_vm6, %v2356_v25, %v2365_v43  ;;  %11454 = vmatprep.mubr.msk.bf16.mxu0 %vm383_vm1, %v2509_v49  ;;  %v10638_v28 = vcombine.low %v2098_v57, %v2109_v39  ;;  %v2517_v33 = vor.u32 %v2516_v10, %v2513_v11  ;;  %v2523_v36 = vshll.u32 %v2445_v46, 16 }
  0xff   : > { %16852 = vst [vmem:[#allocation32_spill] sm:$0xff] %v13612_v23  ;;  %v2370_v50 = vrot.slane %v2368_v60, 3  ;;  %v2373_v6 = vrot.slane %v2371_v0, 4  ;;  %v2112_v20 = vpop.permute.xlu1 %2111  ;;  %v2123_v16 = vpop.permute.xlu0 %2122  ;;  %v2522_v52 = vrot.slane %v2520_v44, 4  ;;  %v2446_v24 = vmul.bf16 %v12886_v17, %v13606_v47 }
 0x100   : > { %v2377_v55 = vshrl.u32 %v10638_v28, 16  ;;  %v2380_v29 = vshll.u32 %v10638_v28, 16  ;;  %v2518_v56 = vsel %vm1034_vm5, %v2508_v41, %v2517_v33  ;;  %v2120_v25 = vrot.slane %v2112_v20, %v13358_v8 }
 0x101   : > { %v2374_v2 = vor.u32 %v2373_v6, %v2370_v50  ;;  %v2131_v49 = vrot.slane %v2123_v16, %v13358_v8  ;;  %v2525_v57 = vrot.slane %v2523_v36, 5  ;;  %v2529_v11 = vshrl.u32 %v2446_v24, 16 }
 0x102   : > { %v2379_v46 = vrot.slane %v2377_v55, 3  ;;  %v2382_v39 = vrot.slane %v2380_v29, 4  ;;  %11455 = vmatmul.mubr.msk.bf16.gmra.mrb[8].mxu0 %vm383_vm1, %v2518_v56  ;;  %v2532_v10 = vshll.u32 %v2446_v24, 16  ;;  %v2447_v44 = vmul.bf16 %v13612_v23, %v13451_v42 }
 0x103   : > { %v13623_v60 = vsel %vm1480_vm6, %v2365_v43, %v2374_v2  ;;  %v10639_v0 = vcombine.low %v2120_v25, %v2131_v49  ;;  %v2526_v41 = vor.u32 %v2525_v57, %v2522_v52  ;;  %v2134_v28 = vpop.permute.xlu1 %2133  ;;  %v2145_v20 = vpop.permute.xlu0 %2144  ;;  %v2531_v50 = vrot.slane %v2529_v11, 4 }
 0x104   : > { %16853 = vst [vmem:[#allocation33_spill] sm:$0xff] %v13623_v60  ;;  %v2383_v6 = vor.u32 %v2382_v39, %v2379_v46  ;;  %v2142_v36 = vrot.slane %v2134_v28, %v13358_v8  ;;  %v2153_v16 = vrot.slane %v2145_v20, %v13358_v8  ;;  %v2534_v17 = vrot.slane %v2532_v10, 5 }
 0x105   : > { %v2386_v55 = vshrl.u32 %v10639_v0, 16  ;;  %v2389_v29 = vshll.u32 %v10639_v0, 16  ;;  %v2527_v24 = vsel %vm1034_vm5, %v2517_v33, %v2526_v41  ;;  %v2538_v56 = vshrl.u32 %v2447_v44, 16 }
 0x106   : > { %v13629_v42 = vsel %vm1480_vm6, %v2374_v2, %v2383_v6  ;;  %11458 = vmatprep.mubr.msk.bf16.mxu0 %vm383_vm1, %v2527_v24  ;;  %v10640_v43 = vcombine.low %v2142_v36, %v2153_v16  ;;  %v2535_v52 = vor.u32 %v2534_v17, %v2531_v50  ;;  %v2541_v25 = vshll.u32 %v2447_v44, 16 }
 0x107   : > { %16854 = vst [vmem:[#allocation34_spill] sm:$0xff] %v13629_v42  ;;  %v2388_v49 = vrot.slane %v2386_v55, 3  ;;  %v2391_v57 = vrot.slane %v2389_v29, 4  ;;  %v2156_v11 = vpop.permute.xlu1 %2155  ;;  %v2167_v46 = vpop.permute.xlu0 %2166  ;;  %v2540_v39 = vrot.slane %v2538_v56, 4  ;;  %v2448_v10 = vmul.bf16 %v13623_v60, %v13465_v45 }
 0x108   : > { %v2395_v0 = vshrl.u32 %v10640_v43, 16  ;;  %v2398_v28 = vshll.u32 %v10640_v43, 16  ;;  %v2536_v33 = vsel %vm1034_vm5, %v2526_v41, %v2535_v52  ;;  %v2164_v2 = vrot.slane %v2156_v11, %v13358_v8 }
 0x109   : > { %v2392_v20 = vor.u32 %v2391_v57, %v2388_v49  ;;  %v2175_v24 = vrot.slane %v2167_v46, %v13358_v8  ;;  %v2543_v36 = vrot.slane %v2541_v25, 5  ;;  %v2547_v50 = vshrl.u32 %v2448_v10, 16 }
 0x10a   : > { %v2397_v44 = vrot.slane %v2395_v0, 3  ;;  %v2400_v16 = vrot.slane %v2398_v28, 4  ;;  %11459 = vmatmul.mubr.msk.bf16.gmra.mrb[12].mxu0 %vm383_vm1, %v2536_v33  ;;  %v2550_v17 = vshll.u32 %v2448_v10, 16  ;;  %v2449_v55 = vmul.bf16 %v13629_v42, %v13476_v53 }
 0x10b   : > { %v13641_v29 = vsel %vm1480_vm6, %v2383_v6, %v2392_v20  ;;  %v10641_v56 = vcombine.low %v2164_v2, %v2175_v24  ;;  %v2544_v41 = vor.u32 %v2543_v36, %v2540_v39  ;;  %v2178_v43 = vpop.permute.xlu1 %2177  ;;  %v2189_v11 = vpop.permute.xlu0 %2188  ;;  %v2549_v49 = vrot.slane %v2547_v50, 4 }
 0x10c   : > { %16855 = vst [vmem:[#allocation35_spill] sm:$0xff] %v13641_v29  ;;  %v2401_v57 = vor.u32 %v2400_v16, %v2397_v44  ;;  %v2186_v25 = vrot.slane %v2178_v43, %v13358_v8  ;;  %v2197_v46 = vrot.slane %v2189_v11, %v13358_v8  ;;  %v2552_v0 = vrot.slane %v2550_v17, 5 }
 0x10d   : > { %v2404_v28 = vshrl.u32 %v10641_v56, 16  ;;  %v2407_v33 = vshll.u32 %v10641_v56, 16  ;;  %v2545_v10 = vsel %vm1034_vm5, %v2535_v52, %v2544_v41  ;;  %v2556_v5 = vshrl.u32 %v2449_v55, 16 }
 0x10e   : > { %v13647_v37 = vsel %vm1480_vm6, %v2392_v20, %v2401_v57  ;;  %11462 = vmatprep.mubr.msk.bf16.mxu0 %vm383_vm1, %v2545_v10  ;;  %v10642_v6 = vcombine.low %v2186_v25, %v2197_v46  ;;  %v2553_v39 = vor.u32 %v2552_v0, %v2549_v49  ;;  %v2559_v2 = vshll.u32 %v2449_v55, 16 }
 0x10f   : > { %16856 = vst [vmem:[#allocation36_spill] sm:$0xff] %v13647_v37  ;;  %v2406_v24 = vrot.slane %v2404_v28, 3  ;;  %v2409_v36 = vrot.slane %v2407_v33, 4  ;;  %v2558_v50 = vrot.slane %v2556_v5, 4  ;;  %v2450_v8 = vmul.bf16 %v13641_v29, %v13487_v3 }
 0x110   : > { %v2413_v44 = vshrl.u32 %v10642_v6, 16  ;;  %v2416_v16 = vshll.u32 %v10642_v6, 16  ;;  %v2554_v17 = vsel %vm1034_vm5, %v2544_v41, %v2553_v39  ;;  %v2561_v52 = vrot.slane %v2559_v2, 5 }
 0x111   : > { %v2410_v56 = vor.u32 %v2409_v36, %v2406_v24  ;;  %v2565_v43 = vshrl.u32 %v2450_v8, 16  ;;  %v2568_v20 = vshll.u32 %v2450_v8, 16  ;;  %v2451_v11 = vmul.bf16 %v13647_v37, %v13498_v51  ;;  %v2853_v36 = vld [vmem:[#allocation2 + $0x8] sm:$0xf8] }
 0x112   : > { %v2415_v25 = vrot.slane %v2413_v44, 3  ;;  %v2418_v49 = vrot.slane %v2416_v16, 4  ;;  %11463 = vmatmul.mubr.msk.bf16.gmra.mrb[16].mxu0 %vm383_vm1, %v2554_v17  ;;  %v2562_v55 = vor.u32 %v2561_v52, %v2558_v50  ;;  %v1845_v16 = vld [vmem:[#allocation2 + $0x80] sm:$0x1f]  ;;  %v13672_v52 = vld [vmem:[#allocation2 + $0x10] sm:$0xff] }
 0x113   : > { %v13657_v5 = vsel %vm1480_vm6, %v2401_v57, %v2410_v56  ;;  %v2567_v46 = vrot.slane %v2565_v43, 4  ;;  %v2570_v0 = vrot.slane %v2568_v20, 5  ;;  %v2574_v28 = vshrl.u32 %v2451_v11, 16 }
 0x114   : > { %16857 = vst [vmem:[#allocation37_spill] sm:$0xff] %v13657_v5  ;;  %v13659_v33 = vor.u32 %v2418_v49, %v2415_v25  ;;  %v2563_v41 = vsel %vm1034_vm5, %v2553_v39, %v2562_v55  ;;  %v2577_v10 = vshll.u32 %v2451_v11, 16  ;;  %v2452_v6 = vmul.bf16 %v13657_v5, %v13506_v9 }
 0x115   : > { %11466 = vmatprep.mubr.msk.bf16.mxu0 %vm383_vm1, %v2563_v41  ;;  %v2571_v2 = vor.u32 %v2570_v0, %v2567_v46  ;;  %v2576_v24 = vrot.slane %v2574_v28, 4  ;;  %v2870_v0 = vmul.bf16 %v2853_v36, %v13366_v48 }
 0x116   : > { %16858 = vst [vmem:[#allocation38_spill] sm:$0xff] %v13659_v33  ;;  %v2579_v50 = vrot.slane %v2577_v10, 5  ;;  %v2583_v8 = vshrl.u32 %v2452_v6, 16  ;;  %v2586_v57 = vshll.u32 %v2452_v6, 16  ;;  %v13667_v44 = vsel %vm1480_vm6, %v2410_v56, %v13659_v33 }
 0x117   : > { %16859 = vst [vmem:[#allocation39_spill] sm:$0xff] %v13667_v44  ;;  %v2572_v17 = vsel %vm1034_vm5, %v2562_v55, %v2571_v2  ;;  %v2453_v39 = vmul.bf16 %v13667_v44, %v13528_v40  ;;  %v2454_v46 = vmul.bf16 %v13659_v33, %v1845_v16  ;;  %v2871_v55 = vmul.bf16 %v13672_v52, %v13372_v59 }
 0x118   : > { %v2580_v43 = vor.u32 %v2579_v50, %v2576_v24  ;;  %v2585_v20 = vrot.slane %v2583_v8, 4  ;;  %v2588_v11 = vrot.slane %v2586_v57, 5  ;;  %v2890_v8 = vshrl.u32 %v2870_v0, 16 }
 0x119   : > { %v2592_v25 = vshrl.u32 %v2453_v39, 16  ;;  %v2595_v49 = vshll.u32 %v2453_v39, 16  ;;  %v2601_v24 = vshrl.u32 %v2454_v46, 16  ;;  %v2604_v50 = vshll.u32 %v2454_v46, 16 }
 0x11a   : > { %11467 = vmatmul.mubr.msk.bf16.gmra.mrb[20].mxu0 %vm383_vm1, %v2572_v17  ;;  %v2581_v56 = vsel %vm1034_vm5, %v2571_v2, %v2580_v43  ;;  %v2589_v28 = vor.u32 %v2588_v11, %v2585_v20  ;;  %v2893_v57 = vshll.u32 %v2870_v0, 16  ;;  %v2898_v16 = vshrl.u32 %v2871_v55, 16  ;;  %v13683_v2 = vld [vmem:[#allocation2 + $0x18] sm:$0xff]  ;;  %v13687_v11 = vld [vmem:[#allocation2 + $0x20] sm:$0xff] }
 0x11b   : > { %11470 = vmatprep.mubr.msk.bf16.mxu0 %vm383_vm1, %v2581_v56  ;;  %v2594_v41 = vrot.slane %v2592_v25, 4  ;;  %v2597_v10 = vrot.slane %v2595_v49, 5  ;;  %v2901_v39 = vshll.u32 %v2871_v55, 16  ;;  %v2603_v48 = vrot.slane %v2601_v24, 4 }
 0x11c   : > { %v2590_v36 = vsel %vm1034_vm5, %v2580_v43, %v2589_v28  ;;  %v2606_v59 = vrot.slane %v2604_v50, 5  ;;  %v2892_v33 = vrot.slane %v2890_v8, 3  ;;  %v2872_v20 = vmul.bf16 %v13683_v2, %v13380_v7  ;;  %v13693_v50 = vld [vmem:[#allocation2 + $0x28] sm:$0xff] }
 0x11d   : > { %v2598_v6 = vor.u32 %v2597_v10, %v2594_v41  ;;  %v2895_v25 = vrot.slane %v2893_v57, 4  ;;  %v2900_v49 = vrot.slane %v2898_v16, 3  ;;  %v2903_v46 = vrot.slane %v2901_v39, 4  ;;  %v13698_v39 = vld [vmem:[#allocation2 + $0x30] sm:$0xff] }
 0x11e   : > { %v2873_v43 = vmul.bf16 %v13687_v11, %v13387_v22  ;;  %v2607_v0 = vor.u32 %v2606_v59, %v2603_v48  ;;  %v2907_v56 = vshrl.u32 %v2872_v20, 16  ;;  %v2910_v55 = vshll.u32 %v2872_v20, 16 }
 0x11f   : > { %v2599_v17 = vsel %vm1034_vm5, %v2589_v28, %v2598_v6  ;;  %v2896_v28 = vor.u32 %v2895_v25, %v2892_v33  ;;  %v2904_v41 = vor.u32 %v2903_v46, %v2900_v49  ;;  %v2874_v16 = vmul.bf16 %v13693_v50, %v13397_v26 }
 0x120   : > { %v2916_v10 = vshrl.u32 %v2873_v43, 16  ;;  %v2919_v24 = vshll.u32 %v2873_v43, 16  ;;  %v2608_v8 = vsel %vm1034_vm5, %v2598_v6, %v2607_v0  ;;  %v2912_v57 = vrot.slane %v2910_v55, 4 }
 0x121   : > { %v2905_v48 = vsel %vm1480_vm6, %v2896_v28, %v2904_v41  ;;  %v2925_v6 = vshrl.u32 %v2874_v16, 16  ;;  %v2928_v25 = vshll.u32 %v2874_v16, 16  ;;  %v3387_v0 = vsel %vm1315_vm0, %v13582_v27, 0 }
 0x122   : > { %11471 = vmatmul.mubr.msk.bf16.gmra.mrb[24].mxu0 %vm383_vm1, %v2590_v36  ;;  %v2909_v36 = vrot.slane %v2907_v56, 3  ;;  %v2918_v59 = vrot.slane %v2916_v10, 3  ;;  %v2921_v33 = vrot.slane %v2919_v24, 4  ;;  %v13707_v56 = vld [vmem:[#allocation2 + $0x38] sm:$0xff] }
 0x123   : > { %11474 = vmatprep.mubr.msk.bf16.mxu0 %vm383_vm1, %v2599_v17  ;;  %v2875_v17 = vmul.bf16 %v13698_v39, %v13405_v14  ;;  %v2927_v28 = vrot.slane %v2925_v6, 3  ;;  %v2930_v10 = vrot.slane %v2928_v25, 4  ;;  %v2876_v24 = vmul.bf16 %v13707_v56, %v13418_v35 }
 0x124   : > { %v2913_v20 = vor.u32 %v2912_v57, %v2909_v36  ;;  %v2922_v49 = vor.u32 %v2921_v33, %v2918_v59  ;;  %v13717_v36 = vld [vmem:[%s16676_s2 + $0xa] sm:$0x3] }
 0x125   : > { %v2934_v46 = vshrl.u32 %v2875_v17, 16  ;;  %v2937_v43 = vshll.u32 %v2875_v17, 16  ;;  %v2943_v59 = vshrl.u32 %v2876_v24, 16  ;;  %v2946_v33 = vshll.u32 %v2876_v24, 16 }
 0x126   : > { %v2914_v55 = vsel %vm1480_vm6, %v2904_v41, %v2913_v20  ;;  %v2923_v27 = vsel %vm1480_vm6, %v2913_v20, %v2922_v49 }
 0x127   : > { %v2936_v57 = vrot.slane %v2934_v46, 3  ;;  %v2939_v16 = vrot.slane %v2937_v43, 4  ;;  %v2945_v20 = vrot.slane %v2943_v59, 3  ;;  %v2948_v46 = vrot.slane %v2946_v33, 4  ;;  %v13727_v43 = vld [vmem:[#allocation2 + $0x48] sm:$0xff] }
 0x129   : > { %v2940_v17 = vor.u32 %v2939_v16, %v2936_v57  ;;  %v2949_v24 = vor.u32 %v2948_v46, %v2945_v20 }
 0x12a   : > { %11475 = vmatmul.mubr.msk.bf16.gmra.mrb[28].mxu0 %vm383_vm1, %v2608_v8  ;;  %v13712_v8 = vld [vmem:[#allocation2 + $0x40] sm:$0xff] }
 0x12b   : > { %11480 = vmatprep.mubr.msk.bf16.mxu0 %vm383_vm1, %v2905_v48  ;;  %v2877_v41 = vmul.bf16 %v13712_v8, %v13431_v63  ;;  %v2931_v48 = vor.u32 %v2930_v10, %v2927_v28  ;;  %v2879_v10 = vmul.bf16 %v13447_v38, %v13465_v45  ;;  %v2950_v33 = vsel %vm1480_vm6, %v2940_v17, %v2949_v24 }
 0x12d   : > { %v2952_v6 = vshrl.u32 %v2877_v41, 16  ;;  %v2955_v25 = vshll.u32 %v2877_v41, 16  ;;  %v2970_v41 = vshrl.u32 %v2879_v10, 16  ;;  %v2973_v59 = vshll.u32 %v2879_v10, 16 }
 0x12f   : > { %v2954_v63 = vrot.slane %v2952_v6, 3  ;;  %v2957_v28 = vrot.slane %v2955_v25, 4  ;;  %v2972_v45 = vrot.slane %v2970_v41, 3  ;;  %v2975_v25 = vrot.slane %v2973_v59, 4 }
 0x131   : > { %v2958_v16 = vor.u32 %v2957_v28, %v2954_v63 }
 0x132   : > { %11481 = vmatmul.mubr.msk.bf16.vlgmr.msra.gmra.mrb[0].mxu0 %vm383_vm1, %v2914_v55  ;;  %v2932_v55 = vsel %vm1480_vm6, %v2922_v49, %v2931_v48 }
 0x133   : > { %11513 = vmatpush3.bf16.msra.mxu0 %v3387_v0  ;;  %11484 = vmatprep.mubr.msk.bf16.mxu0 %vm383_vm1, %v2923_v27  ;;  %v2878_v0 = vmul.bf16 %v13727_v43, %v13439_v32  ;;  %v2941_v27 = vsel %vm1480_vm6, %v2931_v48, %v2940_v17  ;;  %v2880_v48 = vmul.bf16 %v13459_v19, %v13476_v53 }
 0x134   : > { %12572 = vmatprep.subr.msk.bf16.mxu0 %vm1315_vm0, %v13717_v36  ;;  %v2959_v6 = vsel %vm1480_vm6, %v2949_v24, %v2958_v16  ;;  %v2976_v17 = vor.u32 %v2975_v25, %v2972_v45  ;;  %v2882_v24 = vmul.bf16 %v13479_v54, %v13498_v51  ;;  %v2884_v25 = vmul.bf16 %v13501_v58, %v13528_v40  ;;  %v13762_v40 = vld [vmem:[#allocation2 + $0x88] sm:$0xf] }
 0x135   : > { %v2961_v49 = vshrl.u32 %v2878_v0, 16  ;;  %v2964_v57 = vshll.u32 %v2878_v0, 16  ;;  %v2979_v20 = vshrl.u32 %v2880_v48, 16  ;;  %v2982_v46 = vshll.u32 %v2880_v48, 16 }
 0x136   : > { %v2997_v41 = vshrl.u32 %v2882_v24, 16  ;;  %v3000_v59 = vshll.u32 %v2882_v24, 16 }
 0x137   : > { %v2963_v32 = vrot.slane %v2961_v49, 3  ;;  %v2966_v35 = vrot.slane %v2964_v57, 4  ;;  %v2981_v53 = vrot.slane %v2979_v20, 3  ;;  %v2984_v10 = vrot.slane %v2982_v46, 4 }
 0x138   : > { %v2999_v51 = vrot.slane %v2997_v41, 3  ;;  %v3002_v45 = vrot.slane %v3000_v59, 4 }
 0x139   : > { %v2967_v63 = vor.u32 %v2966_v35, %v2963_v32  ;;  %v2883_v35 = vmul.bf16 %v13490_v4, %v13506_v9  ;;  %v2985_v32 = vor.u32 %v2984_v10, %v2981_v53 }
 0x13a   : > { %11485 = vmatmul.mubr.msk.bf16.gmra.mrb[4].mxu0 %vm383_vm1, %v2932_v55  ;;  %v2881_v55 = vmul.bf16 %v13470_v21, %v13487_v3 }
 0x13b   : > { %11488 = vmatprep.mubr.msk.bf16.mxu0 %vm383_vm1, %v2941_v27  ;;  %v2968_v28 = vsel %vm1480_vm6, %v2958_v16, %v2967_v63  ;;  %v2977_v49 = vsel %vm1480_vm6, %v2967_v63, %v2976_v17  ;;  %v3009_v48 = vshll.u32 %v2883_v35, 16 }
 0x13c   : > { %v2988_v0 = vshrl.u32 %v2881_v55, 16  ;;  %v2991_v27 = vshll.u32 %v2881_v55, 16  ;;  %v13755_v55 = vld [vmem:[#allocation2 + $0x80] sm:$0xff] }
 0x13d   : > { %v3011_v20 = vrot.slane %v3009_v48, 4  ;;  %v2885_v46 = vmul.bf16 %v13755_v55, %v13523_v30 }
 0x13e   : > { %v2990_v3 = vrot.slane %v2988_v0, 3  ;;  %v2993_v57 = vrot.slane %v2991_v27, 4  ;;  %v3003_v0 = vor.u32 %v3002_v45, %v2999_v51  ;;  %v3018_v27 = vshll.u32 %v2884_v25, 16 }
 0x13f   : > { %v3024_v53 = vshrl.u32 %v2885_v46, 16  ;;  %v3027_v10 = vshll.u32 %v2885_v46, 16 }
 0x140   : > { %v2994_v16 = vor.u32 %v2993_v57, %v2990_v3  ;;  %v3020_v3 = vrot.slane %v3018_v27, 4  ;;  %v2886_v57 = vmul.bf16 %v13762_v40, %v13508_v15  ;;  %v13780_v27 = vrot.slane %v13683_v2, 4 }
 0x141   : > { %v3029_v41 = vrot.slane %v3027_v10, 4  ;;  %v3803_v10 = vsel %vm1315_vm0, %v13717_v36, 0 }
 0x142   : > { %11489 = vmatmul.mubr.msk.bf16.gmra.mrb[8].mxu0 %vm383_vm1, %v2950_v33  ;;  %v3006_v33 = vshrl.u32 %v2883_v35, 16  ;;  %v2995_v9 = vsel %vm1480_vm6, %v2985_v32, %v2994_v16  ;;  %v3004_v24 = vsel %vm1480_vm6, %v2994_v16, %v3003_v0  ;;  %v3036_v48 = vshll.u32 %v2886_v57, 16  ;;  %16860 = vst [vmem:[#allocation40_spill] sm:$0xff] %v13780_v27 }
 0x143   : > { %11492 = vmatprep.mubr.msk.bf16.mxu0 %vm383_vm1, %v2959_v6  ;;  %v2986_v6 = vsel %vm1480_vm6, %v2976_v17, %v2985_v32  ;;  %v3015_v17 = vshrl.u32 %v2884_v25, 16  ;;  %v3026_v32 = vrot.slane %v3024_v53, 3 }
 0x144   : > { %v3008_v63 = vrot.slane %v3006_v33, 3  ;;  %v3033_v33 = vshrl.u32 %v2886_v57, 16  ;;  %v3038_v45 = vrot.slane %v3036_v48, 4  ;;  %v3314_v57 = vrot.slane %v13698_v39, 4 }
 0x145   : > { %v13829_v48 = vrot.slane %v13727_v43, 4 }
 0x146   : > { %v3035_v16 = vrot.slane %v3033_v33, 3 }
 0x148   : > { %v3039_v46 = vor.u32 %v3038_v45, %v3035_v16 }
 0x14a   : > { %11493 = vmatmul.mubr.msk.bf16.gmra.mrb[12].mxu0 %vm383_vm1, %v2968_v28  ;;  %v3012_v28 = vor.u32 %v3011_v20, %v3008_v63  ;;  %v3306_v20 = vrot.slane %v13672_v52, 4 }
 0x14b   : > { %11496 = vmatprep.mubr.msk.bf16.mxu0 %vm383_vm1, %v2977_v49  ;;  %v3017_v49 = vrot.slane %v3015_v17, 3 }
 0x14c   : > { %v3013_v35 = vsel %vm1480_vm6, %v3003_v0, %v3012_v28  ;;  %v3309_v53 = vsel %vm1233_vm4, %v3306_v20, %v13780_v27 }
 0x14d   : > { %v3021_v59 = vor.u32 %v3020_v3, %v3017_v49  ;;  %v13794_v49 = vld [vmem:[%s16676_s2 + $0xc] sm:$0x3]  ;;  %v3312_v3 = vrot.slane %v13693_v50, 4 }
 0x14f   : > { %v3022_v51 = vsel %vm1480_vm6, %v3012_v28, %v3021_v59  ;;  %v3310_v28 = vrot.slane %v13687_v11, 4 }
 0x151   : > { %v13804_v36 = vsel %vm1233_vm4, %v3310_v28, %v3312_v3 }
 0x152   : > { %11497 = vmatmul.mubr.msk.bf16.gmra.mrb[16].mxu0 %vm383_vm1, %v2986_v6  ;;  %v3030_v6 = vor.u32 %v3029_v41, %v3026_v32  ;;  %16862 = vst [vmem:[#allocation42_spill] sm:$0xff] %v13804_v36  ;;  %v3316_v32 = vrot.slane %v13707_v56, 4  ;;  %v13815_v41 = vrot.slane %v13712_v8, 4 }
 0x153   : > { %11500 = vmatprep.mubr.msk.bf16.mxu0 %vm383_vm1, %v2995_v9  ;;  %v3285_v9 = vld [vmem:[#allocation2 + $0x8] sm:$0xf0] }
 0x154   : > { %v3031_v25 = vsel %vm1480_vm6, %v3021_v59, %v3030_v6  ;;  %v3305_v63 = vrot.slane %v3285_v9, 4  ;;  %v3040_v17 = vsel %vm1480_vm6, %v3030_v6, %v3039_v46  ;;  %16864 = vst [vmem:[#allocation44_spill] sm:$0xff] %v13815_v41  ;;  %v13818_v59 = vsel %vm1233_vm4, %v3314_v57, %v3316_v32  ;;  %v13831_v6 = vld [vmem:[#allocation2 + $0x50] sm:$0xff] }
 0x155   : > { %16865 = vst [vmem:[#allocation45_spill] sm:$0xff] %v13818_v59  ;;  %v13822_v33 = vsel %vm1233_vm4, %v3316_v32, %v13815_v41  ;;  %v3321_v16 = vsel %vm1233_vm4, %v13815_v41, %v13829_v48 }
 0x156   : > { %v3307_v0 = vsel %vm1233_vm4, %v3305_v63, %v3306_v20  ;;  %16866 = vst [vmem:[#allocation46_spill] sm:$0xff] %v13822_v33  ;;  %v13847_v20 = vld [vmem:[#allocation2 + $0x60] sm:$0xff] }
 0x157   : > { %v3326_v46 = vrot.slane %v13847_v20, 4 }
 0x15a   : > { %11501 = vmatmul.mubr.msk.bf16.gmra.mrb[20].mxu0 %vm383_vm1, %v3004_v24  ;;  %v13789_v24 = vsel %vm1233_vm4, %v13780_v27, %v3310_v28  ;;  %v13860_v28 = vld [vmem:[#allocation2 + $0x68] sm:$0xff] }
 0x15b   : > { %11504 = vmatprep.mubr.msk.bf16.mxu0 %vm383_vm1, %v3013_v35  ;;  %16861 = vst [vmem:[#allocation41_spill] sm:$0xff] %v13789_v24  ;;  %v13807_v35 = vsel %vm1233_vm4, %v3312_v3, %v3314_v57  ;;  %v16867_v57 = vmov 0  }
 0x15c   : > { %16863 = vst [vmem:[#allocation43_spill] sm:$0xff] %v13807_v35  ;;  %391 = vst.msk [vmem:[#allocation3] sm:$0xff] %vm390_vm7, %v16867_v57 }
 0x15d   : > { %396 = vst.msk [vmem:[#allocation3 + $0x90] sm:$0xff] %vm390_vm7, %v16867_v57  ;;  %v13889_v57 = vrot.slane %v13755_v55, 4 }
 0x162   : > { %11505 = vmatmul.mubr.msk.bf16.gmra.mrb[24].mxu0 %vm383_vm1, %v3022_v51  ;;  %v3322_v51 = vrot.slane %v13831_v6, 4 }
 0x163   : > { %11508 = vmatprep.mubr.msk.bf16.mxu0 %vm383_vm1, %v3031_v25  ;;  %v13844_v25 = vld [vmem:[#allocation2 + $0x58] sm:$0xff] }
 0x164   : > { %v13839_v45 = vsel %vm1233_vm4, %v13829_v48, %v3322_v51  ;;  %v3324_v63 = vrot.slane %v13844_v25, 4 }
 0x16a   : > { %11509 = vmatmul.mubr.msk.bf16.gmra.mrb[28].mxu0 %vm383_vm1, %v3040_v17  ;;  %v13854_v17 = vsel %vm1233_vm4, %v3324_v63, %v3326_v46 }
 0x16b   : > { %11514 = vmatprep.mubr.msk.bf16.mxu0 %vm383_vm1, %v3307_v0  ;;  %v13851_v0 = vsel %vm1233_vm4, %v3322_v51, %v3324_v63  ;;  %v13882_v63 = vld [vmem:[#allocation2 + $0x78] sm:$0xff] }
 0x172   : > { %11515 = vmatmul.mubr.msk.bf16.vlgmr.msra.gmra.mrb[0].mxu0 %vm383_vm1, %v3309_v53  ;;  %v3328_v53 = vrot.slane %v13860_v28, 4 }
 0x173   : > { %11547 = vmatpush3.bf16.msra.mxu0 %v3803_v10  ;;  %11518 = vmatprep.mubr.msk.bf16.mxu0 %vm383_vm1, %v13789_v24  ;;  %v13863_v10 = vld [vmem:[#allocation2 + $0x70] sm:$0xff] }
 0x174   : > { %12573 = vmatprep.subr.msk.bf16.mxu0 %vm1315_vm0, %v13794_v49  ;;  %v3330_v3 = vrot.slane %v13863_v10, 4  ;;  %v13871_v32 = vsel %vm1233_vm4, %v3326_v46, %v3328_v53  ;;  %v3583_v46 = vmul.bf16 %v3285_v9, %v13525_v34 }
 0x175   : > { %16868 = vst [vmem:[#allocation47_spill] sm:$0xff] %v13871_v32 }
 0x176   : > { %v13874_v51 = vsel %vm1233_vm4, %v3328_v53, %v3330_v3 }
 0x177   : > { %16869 = vst [vmem:[#allocation48_spill] sm:$0xff] %v13874_v51 }
 0x17a   : > { %11519 = vmatmul.mubr.msk.bf16.gmra.mrb[4].mxu0 %vm383_vm1, %v13804_v36  ;;  %v3585_v36 = vmul.bf16 %v13683_v2, %v13550_v12 }
 0x17b   : > { %11522 = vmatprep.mubr.msk.bf16.mxu0 %vm383_vm1, %v13807_v35  ;;  %v3606_v35 = vshll.u32 %v3583_v46, 16 }
 0x17d   : > { %v3608_v27 = vrot.slane %v3606_v35, 5 }
 0x182   : > { %11523 = vmatmul.mubr.msk.bf16.gmra.mrb[8].mxu0 %vm383_vm1, %v13818_v59 }
 0x183   : > { %11526 = vmatprep.mubr.msk.bf16.mxu0 %vm383_vm1, %v13822_v33  ;;  %v13885_v33 = vrot.slane %v13882_v63, 4 }
 0x185   : > { %16870 = vst [vmem:[#allocation49_spill] sm:$0xff] %v13885_v33  ;;  %v13893_v59 = vsel %vm1233_vm4, %v3330_v3, %v13885_v33  ;;  %v3336_v3 = vrot.slane %v13762_v40, 4 }
 0x186   : > { %16871 = vst [vmem:[#allocation50_spill] sm:$0xff] %v13893_v59 }
 0x187   : > { %v3337_v12 = vsel %vm1233_vm4, %v13889_v57, %v3336_v3 }
 0x18a   : > { %11527 = vmatmul.mubr.msk.bf16.gmra.mrb[12].mxu0 %vm383_vm1, %v3321_v16  ;;  %v3584_v16 = vmul.bf16 %v13672_v52, %v13542_v18  ;;  %v3335_v52 = vsel %vm1233_vm4, %v13885_v33, %v13889_v57  ;;  %v3603_v18 = vshrl.u32 %v3583_v46, 16  ;;  %v3620_v33 = vshrl.u32 %v3585_v36, 16 }
 0x18b   : > { %11530 = vmatprep.mubr.msk.bf16.mxu0 %vm383_vm1, %v13839_v45 }
 0x18c   : > { %v3611_v53 = vshrl.u32 %v3584_v16, 16  ;;  %v3614_v41 = vshll.u32 %v3584_v16, 16  ;;  %v3586_v16 = vmul.bf16 %v13687_v11, %v13558_v31  ;;  %v3605_v24 = vrot.slane %v3603_v18, 4 }
 0x18d   : > { %v3587_v31 = vmul.bf16 %v13693_v50, %v13565_v13 }
 0x18e   : > { %v3613_v9 = vrot.slane %v3611_v53, 4  ;;  %v3616_v34 = vrot.slane %v3614_v41, 5  ;;  %v3629_v15 = vshrl.u32 %v3586_v16, 16  ;;  %v3622_v53 = vrot.slane %v3620_v33, 4 }
 0x190   : > { %v3617_v46 = vor.u32 %v3616_v34, %v3613_v9  ;;  %v3631_v18 = vrot.slane %v3629_v15, 4  ;;  %v3588_v34 = vmul.bf16 %v13698_v39, %v13573_v62  ;;  %v3641_v9 = vshll.u32 %v3587_v31, 16 }
 0x191   : > { %v3589_v15 = vmul.bf16 %v13707_v56, %v13585_v1 }
 0x192   : > { %11531 = vmatmul.mubr.msk.bf16.gmra.mrb[16].mxu0 %vm383_vm1, %v13851_v0  ;;  %v3650_v33 = vshll.u32 %v3588_v34, 16 }
 0x193   : > { %11534 = vmatprep.mubr.msk.bf16.mxu0 %vm383_vm1, %v13854_v17 }
 0x19a   : > { %11535 = vmatmul.mubr.msk.bf16.gmra.mrb[20].mxu0 %vm383_vm1, %v13871_v32  ;;  %v3632_v32 = vshll.u32 %v3586_v16, 16 }
 0x19b   : > { %11538 = vmatprep.mubr.msk.bf16.mxu0 %vm383_vm1, %v13874_v51  ;;  %v3623_v51 = vshll.u32 %v3585_v36, 16 }
 0x19c   : > { %v3634_v35 = vrot.slane %v3632_v32, 5  ;;  %v13923_v32 = vld [vmem:[%s16676_s2 + $0xe] sm:$0x3] }
 0x19d   : > { %v3625_v41 = vrot.slane %v3623_v51, 5  ;;  %v4235_v51 = vsel %vm1315_vm0, %v13794_v49, 0  ;;  %v3590_v49 = vmul.bf16 %v13712_v8, %v13596_v61 }
 0x19f   : > { %v3626_v36 = vor.u32 %v3625_v41, %v3622_v53  ;;  %v3652_v53 = vrot.slane %v3650_v33, 5  ;;  %v3656_v41 = vshrl.u32 %v3589_v15, 16 }
 0x1a2   : > { %11539 = vmatmul.mubr.msk.bf16.gmra.mrb[24].mxu0 %vm383_vm1, %v13893_v59  ;;  %v3609_v59 = vor.u32 %v3608_v27, %v3605_v24  ;;  %v3635_v27 = vor.u32 %v3634_v35, %v3631_v18  ;;  %v3647_v24 = vshrl.u32 %v3588_v34, 16  ;;  %v3665_v35 = vshrl.u32 %v3590_v49, 16 }
 0x1a3   : > { %11542 = vmatprep.mubr.msk.bf16.mxu0 %vm383_vm1, %v3335_v52  ;;  %v3638_v52 = vshrl.u32 %v3587_v31, 16  ;;  %v3668_v34 = vshll.u32 %v3590_v49, 16 }
 0x1a4   : > { %v3618_v40 = vsel %vm1034_vm5, %v3609_v59, %v3617_v46  ;;  %v3643_v59 = vrot.slane %v3641_v9, 5  ;;  %v3636_v31 = vsel %vm1034_vm5, %v3626_v36, %v3635_v27  ;;  %v3649_v3 = vrot.slane %v3647_v24, 4 }
 0x1a5   : > { %v3640_v16 = vrot.slane %v3638_v52, 4  ;;  %v3591_v24 = vmul.bf16 %v13727_v43, %v13606_v47 }
 0x1a6   : > { %v3653_v18 = vor.u32 %v3652_v53, %v3649_v3 }
 0x1aa   : > { %11543 = vmatmul.mubr.msk.bf16.gmra.mrb[28].mxu0 %vm383_vm1, %v3337_v12  ;;  %v3627_v12 = vsel %vm1034_vm5, %v3617_v46, %v3626_v36  ;;  %v3644_v46 = vor.u32 %v3643_v59, %v3640_v16  ;;  %v3658_v36 = vrot.slane %v3656_v41, 4  ;;  %v3592_v16 = vmul.bf16 %v13831_v6, %v13612_v23 }
 0x1ab   : > { %11548 = vmatprep.mubr.msk.bf16.mxu0 %vm383_vm1, %v3618_v40  ;;  %v3659_v40 = vshll.u32 %v3589_v15, 16  ;;  %v3674_v15 = vshrl.u32 %v3591_v24, 16 }
 0x1ac   : > { %v3645_v52 = vsel %vm1034_vm5, %v3635_v27, %v3644_v46  ;;  %v3654_v33 = vsel %vm1034_vm5, %v3644_v46, %v3653_v18  ;;  %v3683_v3 = vshrl.u32 %v3592_v16, 16  ;;  %v3686_v53 = vshll.u32 %v3592_v16, 16 }
 0x1ad   : > { %v3661_v9 = vrot.slane %v3659_v40, 5  ;;  %v3676_v43 = vrot.slane %v3674_v15, 4  ;;  %v3593_v46 = vmul.bf16 %v13844_v25, %v13623_v60  ;;  %v3595_v16 = vmul.bf16 %v13860_v28, %v13641_v29 }
 0x1ae   : > { %v3685_v6 = vrot.slane %v3683_v3, 4 }
 0x1af   : > { %v3662_v59 = vor.u32 %v3661_v9, %v3658_v36  ;;  %v3692_v36 = vshrl.u32 %v3593_v46, 16  ;;  %v3695_v9 = vshll.u32 %v3593_v46, 16 }
 0x1b1   : > { %v3663_v49 = vsel %vm1034_vm5, %v3653_v18, %v3662_v59  ;;  %v3694_v25 = vrot.slane %v3692_v36, 4 }
 0x1b2   : > { %11549 = vmatmul.mubr.msk.bf16.vlgmr.msra.gmra.mrb[0].mxu0 %vm383_vm1, %v3627_v12  ;;  %v3670_v12 = vrot.slane %v3668_v34, 5  ;;  %v3594_v34 = vmul.bf16 %v13847_v20, %v13629_v42 }
 0x1b3   : > { %11581 = vmatpush3.bf16.msra.mxu0 %v4235_v51  ;;  %11552 = vmatprep.mubr.msk.bf16.mxu0 %vm383_vm1, %v3636_v31  ;;  %v3667_v51 = vrot.slane %v3665_v35, 4  ;;  %v3677_v31 = vshll.u32 %v3591_v24, 16  ;;  %v3688_v35 = vrot.slane %v3686_v53, 5  ;;  %v3710_v53 = vshrl.u32 %v3595_v16, 16 }
 0x1b4   : > { %12574 = vmatprep.subr.msk.bf16.mxu0 %vm1315_vm0, %v13923_v32  ;;  %v3701_v24 = vshrl.u32 %v3594_v34, 16 }
 0x1b5   : > { %v3671_v27 = vor.u32 %v3670_v12, %v3667_v51  ;;  %v3679_v41 = vrot.slane %v3677_v31, 5  ;;  %v3689_v18 = vor.u32 %v3688_v35, %v3685_v6  ;;  %v3697_v12 = vrot.slane %v3695_v9, 5 }
 0x1b6   : > { %v3703_v20 = vrot.slane %v3701_v24, 4  ;;  %v3596_v31 = vmul.bf16 %v13863_v10, %v13647_v37  ;;  %v3712_v28 = vrot.slane %v3710_v53, 4  ;;  %v3597_v6 = vmul.bf16 %v13882_v63, %v13657_v5  ;;  %v16872_v63 = vld [vmem:[#allocation38_spill] sm:$0xff] }
 0x1b7   : > { %v3672_v40 = vsel %vm1034_vm5, %v3662_v59, %v3671_v27  ;;  %v3698_v3 = vor.u32 %v3697_v12, %v3694_v25  ;;  %v3998_v12 = vld [vmem:[#allocation2 + $0x10] sm:$0xf8] }
 0x1b8   : > { %v3728_v9 = vshrl.u32 %v3597_v6, 16  ;;  %v3731_v24 = vshll.u32 %v3597_v6, 16 }
 0x1b9   : > { %v3699_v46 = vsel %vm1034_vm5, %v3689_v18, %v3698_v3 }
 0x1ba   : > { %11553 = vmatmul.mubr.msk.bf16.gmra.mrb[4].mxu0 %vm383_vm1, %v3645_v52  ;;  %v3680_v52 = vor.u32 %v3679_v41, %v3676_v43  ;;  %v3719_v43 = vshrl.u32 %v3596_v31, 16  ;;  %v3722_v41 = vshll.u32 %v3596_v31, 16  ;;  %v16873_v31 = vld [vmem:[#allocation6_spill] sm:$0xff] }
 0x1bb   : > { %11556 = vmatprep.mubr.msk.bf16.mxu0 %vm383_vm1, %v3654_v33  ;;  %v3704_v33 = vshll.u32 %v3594_v34, 16 }
 0x1bc   : > { %v3681_v51 = vsel %vm1034_vm5, %v3671_v27, %v3680_v52  ;;  %v3690_v59 = vsel %vm1034_vm5, %v3680_v52, %v3689_v18  ;;  %v3721_v10 = vrot.slane %v3719_v43, 4  ;;  %v3724_v34 = vrot.slane %v3722_v41, 5  ;;  %v3582_v18 = vld [vmem:[#allocation2 + $0x88] sm:$0x1f] }
 0x1bd   : > { %v3706_v15 = vrot.slane %v3704_v33, 5  ;;  %v3598_v52 = vmul.bf16 %v13755_v55, %v13667_v44  ;;  %v16874_v41 = vld [vmem:[#allocation7_spill] sm:$0xff] }
 0x1be   : > { %v3725_v33 = vor.u32 %v3724_v34, %v3721_v10 }
 0x1bf   : > { %v3707_v27 = vor.u32 %v3706_v15, %v3703_v20  ;;  %v3740_v25 = vshll.u32 %v3598_v52, 16  ;;  %v3730_v20 = vrot.slane %v3728_v9, 4  ;;  %v3733_v15 = vrot.slane %v3731_v24, 5 }
 0x1c1   : > { %v3708_v35 = vsel %vm1034_vm5, %v3698_v3, %v3707_v27  ;;  %v4015_v3 = vmul.bf16 %v3998_v12, %v16873_v31  ;;  %v3742_v43 = vrot.slane %v3740_v25, 5  ;;  %v3734_v6 = vor.u32 %v3733_v15, %v3730_v20 }
 0x1c2   : > { %11557 = vmatmul.mubr.msk.bf16.gmra.mrb[8].mxu0 %vm383_vm1, %v3663_v49  ;;  %v3713_v49 = vshll.u32 %v3595_v16, 16  ;;  %v3599_v16 = vmul.bf16 %v3582_v18, %v16872_v63  ;;  %v4017_v25 = vmul.bf16 %v13687_v11, %v13380_v7 }
 0x1c3   : > { %11560 = vmatprep.mubr.msk.bf16.mxu0 %vm383_vm1, %v3672_v40  ;;  %v3735_v18 = vsel %vm1034_vm5, %v3725_v33, %v3734_v6 }
 0x1c4   : > { %v3715_v40 = vrot.slane %v3713_v49, 5  ;;  %v4052_v15 = vshrl.u32 %v4017_v25, 16 }
 0x1c6   : > { %v3716_v36 = vor.u32 %v3715_v40, %v3712_v28  ;;  %v3746_v28 = vshrl.u32 %v3599_v16, 16  ;;  %v3749_v40 = vshll.u32 %v3599_v16, 16 }
 0x1c8   : > { %v3726_v53 = vsel %vm1034_vm5, %v3716_v36, %v3725_v33  ;;  %v3748_v9 = vrot.slane %v3746_v28, 4  ;;  %v3751_v24 = vrot.slane %v3749_v40, 5  ;;  %v4019_v40 = vmul.bf16 %v13698_v39, %v13397_v26 }
 0x1c9   : > { %v4532_v39 = vsel %vm1315_vm0, %v13923_v32, 0 }
 0x1ca   : > { %11561 = vmatmul.mubr.msk.bf16.gmra.mrb[12].mxu0 %vm383_vm1, %v3681_v51  ;;  %v3737_v51 = vshrl.u32 %v3598_v52, 16  ;;  %v3752_v20 = vor.u32 %v3751_v24, %v3748_v9  ;;  %v4073_v9 = vshll.u32 %v4019_v40, 16 }
 0x1cb   : > { %11564 = vmatprep.mubr.msk.bf16.mxu0 %vm383_vm1, %v3690_v59  ;;  %v3717_v59 = vsel %vm1034_vm5, %v3707_v27, %v3716_v36  ;;  %v4038_v27 = vshll.u32 %v4015_v3, 16 }
 0x1cc   : > { %v3739_v49 = vrot.slane %v3737_v51, 4 }
 0x1cd   : > { %v4040_v51 = vrot.slane %v4038_v27, 4  ;;  %v4020_v27 = vmul.bf16 %v13707_v56, %v13405_v14 }
 0x1ce   : > { %v3743_v10 = vor.u32 %v3742_v43, %v3739_v49 }
 0x1cf   : > { %v4079_v24 = vshrl.u32 %v4020_v27, 16 }
 0x1d0   : > { %v3753_v11 = vsel %vm1034_vm5, %v3743_v10, %v3752_v20 }
 0x1d1   : > { %v4081_v20 = vrot.slane %v4079_v24, 3 }
 0x1d2   : > { %11565 = vmatmul.mubr.msk.bf16.gmra.mrb[16].mxu0 %vm383_vm1, %v3699_v46  ;;  %v4016_v46 = vmul.bf16 %v13683_v2, %v16874_v41  ;;  %v3744_v2 = vsel %vm1034_vm5, %v3734_v6, %v3743_v10 }
 0x1d3   : > { %11568 = vmatprep.mubr.msk.bf16.mxu0 %vm383_vm1, %v3708_v35  ;;  %v4035_v35 = vshrl.u32 %v4015_v3, 16  ;;  %v4055_v3 = vshll.u32 %v4017_v25, 16 }
 0x1d4   : > { %v4043_v34 = vshrl.u32 %v4016_v46, 16  ;;  %v4046_v52 = vshll.u32 %v4016_v46, 16  ;;  %v4054_v46 = vrot.slane %v4052_v15, 3 }
 0x1d5   : > { %v4037_v36 = vrot.slane %v4035_v35, 3  ;;  %v4057_v28 = vrot.slane %v4055_v3, 4  ;;  %v16876_v3 = vld [vmem:[#allocation13_spill] sm:$0xff] }
 0x1d6   : > { %v4045_v12 = vrot.slane %v4043_v34, 3  ;;  %v4048_v16 = vrot.slane %v4046_v52, 4  ;;  %v4070_v52 = vshrl.u32 %v4019_v40, 16 }
 0x1d7   : > { %v4041_v33 = vor.u32 %v4040_v51, %v4037_v36  ;;  %v4058_v34 = vor.u32 %v4057_v28, %v4054_v46  ;;  %v13988_v36 = vld [vmem:[#allocation2 + $0x48] sm:$0xff]  ;;  %v14007_v46 = vld [vmem:[#allocation2 + $0x50] sm:$0xff]  ;;  %v14009_v28 = vld [vmem:[#allocation2 + $0x58] sm:$0xff] }
 0x1d8   : > { %v4072_v25 = vrot.slane %v4070_v52, 3  ;;  %v4022_v32 = vmul.bf16 %v13988_v36, %v16876_v3  ;;  %v4024_v24 = vmul.bf16 %v14009_v28, %v13447_v38 }
 0x1da   : > { %11569 = vmatmul.mubr.msk.bf16.gmra.mrb[20].mxu0 %vm383_vm1, %v3717_v59  ;;  %v4018_v59 = vmul.bf16 %v13693_v50, %v13387_v22 }
 0x1db   : > { %11572 = vmatprep.mubr.msk.bf16.mxu0 %vm383_vm1, %v3726_v53  ;;  %v4049_v53 = vor.u32 %v4048_v16, %v4045_v12  ;;  %v16875_v12 = vld [vmem:[#allocation12_spill] sm:$0xff] }
 0x1dc   : > { %v4061_v49 = vshrl.u32 %v4018_v59, 16  ;;  %v4064_v43 = vshll.u32 %v4018_v59, 16  ;;  %v4021_v56 = vmul.bf16 %v13712_v8, %v16875_v12  ;;  %v13998_v16 = vld [vmem:[%s16676_s2 + $0x10] sm:$0x3] }
 0x1dd   : > { %v4050_v50 = vsel %vm1480_vm6, %v4041_v33, %v4049_v53  ;;  %v4059_v51 = vsel %vm1480_vm6, %v4049_v53, %v4058_v34 }
 0x1de   : > { %v4063_v6 = vrot.slane %v4061_v49, 3  ;;  %v4066_v35 = vrot.slane %v4064_v43, 4  ;;  %v4088_v33 = vshrl.u32 %v4021_v56, 16  ;;  %v4091_v53 = vshll.u32 %v4021_v56, 16  ;;  %v14019_v56 = vld [vmem:[#allocation2 + $0x60] sm:$0xff] }
 0x1df   : > { %v4097_v43 = vshrl.u32 %v4022_v32, 16 }
 0x1e0   : > { %v4067_v10 = vor.u32 %v4066_v35, %v4063_v6  ;;  %v4093_v6 = vrot.slane %v4091_v53, 4  ;;  %v16877_v35 = vld [vmem:[#allocation14_spill] sm:$0xff] }
 0x1e1   : > { %v4099_v52 = vrot.slane %v4097_v43, 3 }
 0x1e2   : > { %11573 = vmatmul.mubr.msk.bf16.gmra.mrb[24].mxu0 %vm383_vm1, %v3735_v18  ;;  %v4082_v18 = vshll.u32 %v4020_v27, 16  ;;  %v4068_v59 = vsel %vm1480_vm6, %v4058_v34, %v4067_v10  ;;  %v4023_v27 = vmul.bf16 %v14007_v46, %v16877_v35 }
 0x1e3   : > { %11576 = vmatprep.mubr.msk.bf16.mxu0 %vm383_vm1, %v3744_v2  ;;  %v4075_v2 = vrot.slane %v4073_v9, 4 }
 0x1e4   : > { %v4084_v15 = vrot.slane %v4082_v18, 4 }
 0x1e5   : > { %v4076_v8 = vor.u32 %v4075_v2, %v4072_v25  ;;  %v4115_v25 = vshrl.u32 %v4024_v24, 16  ;;  %v4118_v2 = vshll.u32 %v4024_v24, 16 }
 0x1e6   : > { %v4085_v49 = vor.u32 %v4084_v15, %v4081_v20 }
 0x1e7   : > { %v4077_v40 = vsel %vm1480_vm6, %v4067_v10, %v4076_v8  ;;  %v4117_v53 = vrot.slane %v4115_v25, 3  ;;  %v4120_v43 = vrot.slane %v4118_v2, 4 }
 0x1e8   : > { %v4086_v34 = vsel %vm1480_vm6, %v4076_v8, %v4085_v49  ;;  %v4025_v8 = vmul.bf16 %v14019_v56, %v13459_v19 }
 0x1ea   : > { %11577 = vmatmul.mubr.msk.bf16.gmra.mrb[28].mxu0 %vm383_vm1, %v3753_v11  ;;  %v4100_v11 = vshll.u32 %v4022_v32, 16 }
 0x1eb   : > { %11582 = vmatprep.mubr.msk.bf16.mxu0 %vm383_vm1, %v4050_v50  ;;  %v4090_v50 = vrot.slane %v4088_v33, 3 }
 0x1ec   : > { %v4102_v9 = vrot.slane %v4100_v11, 4 }
 0x1ed   : > { %v4094_v18 = vor.u32 %v4093_v6, %v4090_v50  ;;  %v4124_v50 = vshrl.u32 %v4025_v8, 16  ;;  %v4127_v6 = vshll.u32 %v4025_v8, 16 }
 0x1ee   : > { %v4103_v10 = vor.u32 %v4102_v9, %v4099_v52  ;;  %v14031_v52 = vld [vmem:[#allocation2 + $0x70] sm:$0xff]  ;;  %v14033_v9 = vld [vmem:[#allocation2 + $0x78] sm:$0xff] }
 0x1ef   : > { %v4095_v20 = vsel %vm1480_vm6, %v4085_v49, %v4094_v18  ;;  %v4121_v49 = vor.u32 %v4120_v43, %v4117_v53 }
 0x1f0   : > { %v4104_v33 = vsel %vm1480_vm6, %v4094_v18, %v4103_v10  ;;  %v4126_v18 = vrot.slane %v4124_v50, 3 }
 0x1f2   : > { %11583 = vmatmul.mubr.msk.bf16.vlgmr.msra.gmra.mrb[0].mxu0 %vm383_vm1, %v4059_v51  ;;  %v4109_v51 = vshll.u32 %v4023_v27, 16 }
 0x1f3   : > { %11615 = vmatpush3.bf16.msra.mxu0 %v4532_v39  ;;  %11586 = vmatprep.mubr.msk.bf16.mxu0 %vm383_vm1, %v4068_v59  ;;  %v4106_v39 = vshrl.u32 %v4023_v27, 16  ;;  %v14021_v59 = vld [vmem:[#allocation2 + $0x68] sm:$0xff] }
 0x1f4   : > { %12575 = vmatprep.subr.msk.bf16.mxu0 %vm1315_vm0, %v13998_v16  ;;  %v4111_v32 = vrot.slane %v4109_v51, 4  ;;  %v4026_v11 = vmul.bf16 %v14021_v59, %v13470_v21  ;;  %v4027_v51 = vmul.bf16 %v14031_v52, %v13479_v54 }
 0x1f5   : > { %v4108_v15 = vrot.slane %v4106_v39, 3  ;;  %v4129_v39 = vrot.slane %v4127_v6, 4  ;;  %v14052_v6 = vld [vmem:[#allocation2 + $0x88] sm:$0xff] }
 0x1f6   : > { %v4133_v27 = vshrl.u32 %v4026_v11, 16  ;;  %v4142_v53 = vshrl.u32 %v4027_v51, 16  ;;  %v4145_v43 = vshll.u32 %v4027_v51, 16  ;;  %v4030_v51 = vmul.bf16 %v14052_v6, %v13523_v30 }
 0x1f8   : > { %v4135_v2 = vrot.slane %v4133_v27, 3 }
 0x1fa   : > { %11587 = vmatmul.mubr.msk.bf16.gmra.mrb[4].mxu0 %vm383_vm1, %v4077_v40  ;;  %v4112_v40 = vor.u32 %v4111_v32, %v4108_v15  ;;  %v4028_v15 = vmul.bf16 %v14033_v9, %v13490_v4  ;;  %v16878_v32 = vld [vmem:[#allocation4_spill] sm:$0xff] }
 0x1fb   : > { %11590 = vmatprep.mubr.msk.bf16.mxu0 %vm383_vm1, %v4086_v34  ;;  %v4136_v34 = vshll.u32 %v4026_v11, 16  ;;  %v16879_v8 = vrot.slane %v16878_v32, 4  ;;  %v16880_v32 = vld [vmem:[#allocation47_spill] sm:$0xff] }
 0x1fc   : > { %v4113_v24 = vsel %vm1480_vm6, %v4103_v10, %v4112_v40  ;;  %v4122_v25 = vsel %vm1480_vm6, %v4112_v40, %v4121_v49  ;;  %v4151_v40 = vshrl.u32 %v4028_v15, 16  ;;  %v4154_v50 = vshll.u32 %v4028_v15, 16  ;;  %v14064_v15 = vld [vmem:[#allocation2 + $0x90] sm:$0xf] }
 0x1fd   : > { %v1252_v10 = vsel %vm1233_vm4, %v16879_v8, %v13829_v48  ;;  %v4147_v48 = vrot.slane %v4145_v43, 4 }
 0x1fe   : > { %11394 = vmatprep.mubr.msk.bf16.mxu1 %vm383_vm1, %v1252_v10 }
 0x1ff   : > { %11395 = vmatmul.mubr.msk.bf16.vlgmr.msra.gmra.mrb[0].mxu1 %vm383_vm1, %v13839_v45  ;;  %v4153_v45 = vrot.slane %v4151_v40, 3 }
 0x200   : > { %11398 = vmatprep.mubr.msk.bf16.mxu1 %vm383_vm1, %v13851_v0 }
 0x202   : > { %11591 = vmatmul.mubr.msk.bf16.gmra.mrb[8].mxu0 %vm383_vm1, %v4095_v20  ;;  %v4138_v20 = vrot.slane %v4136_v34, 4  ;;  %v4144_v34 = vrot.slane %v4142_v53, 3  ;;  %v16881_v53 = vld [vmem:[#allocation21_spill] sm:$0xff] }
 0x203   : > { %11594 = vmatprep.mubr.msk.bf16.mxu0 %vm383_vm1, %v4104_v33  ;;  %v4130_v33 = vor.u32 %v4129_v39, %v4126_v18  ;;  %v4156_v39 = vrot.slane %v4154_v50, 4  ;;  %v4031_v43 = vmul.bf16 %v14064_v15, %v16881_v53 }
 0x204   : > { %v4139_v11 = vor.u32 %v4138_v20, %v4135_v2  ;;  %v4148_v0 = vor.u32 %v4147_v48, %v4144_v34  ;;  %v4169_v20 = vshrl.u32 %v4030_v51, 16 }
 0x205   : > { %v4131_v27 = vsel %vm1480_vm6, %v4121_v49, %v4130_v33  ;;  %v4157_v49 = vor.u32 %v4156_v39, %v4153_v45  ;;  %v4178_v34 = vshrl.u32 %v4031_v43, 16  ;;  %v4181_v48 = vshll.u32 %v4031_v43, 16 }
 0x206   : > { %v4140_v18 = vsel %vm1480_vm6, %v4130_v33, %v4139_v11  ;;  %v4149_v8 = vsel %vm1480_vm6, %v4139_v11, %v4148_v0 }
 0x207   : > { %11399 = vmatmul.mubr.msk.bf16.gmra.mrb[4].mxu1 %vm383_vm1, %v13854_v17  ;;  %v4158_v40 = vsel %vm1480_vm6, %v4148_v0, %v4157_v49  ;;  %v4171_v17 = vrot.slane %v4169_v20, 3  ;;  %v4180_v39 = vrot.slane %v4178_v34, 3  ;;  %v16889_v34 = vld [vmem:[#allocation45_spill] sm:$0xff] }
 0x208   : > { %11402 = vmatprep.mubr.msk.bf16.mxu1 %vm383_vm1, %v16880_v32 }
 0x20a   : > { %11595 = vmatmul.mubr.msk.bf16.gmra.mrb[12].mxu0 %vm383_vm1, %v4113_v24  ;;  %v4029_v24 = vmul.bf16 %v13755_v55, %v13501_v58  ;;  %v4172_v55 = vshll.u32 %v4030_v51, 16  ;;  %v4183_v51 = vrot.slane %v4181_v48, 4  ;;  %v4463_v48 = vrot.slane %v13988_v36, 4 }
 0x20b   : > { %11598 = vmatprep.mubr.msk.bf16.mxu0 %vm383_vm1, %v4122_v25 }
 0x20c   : > { %v4160_v25 = vshrl.u32 %v4029_v24, 16  ;;  %v4163_v2 = vshll.u32 %v4029_v24, 16  ;;  %v4174_v50 = vrot.slane %v4172_v55, 4  ;;  %v16882_v24 = vld [vmem:[#allocation48_spill] sm:$0xff]  ;;  %v4184_v32 = vor.u32 %v4183_v51, %v4180_v39 }
 0x20e   : > { %v4162_v10 = vrot.slane %v4160_v25, 3  ;;  %v4165_v33 = vrot.slane %v4163_v2, 4  ;;  %v4175_v11 = vor.u32 %v4174_v50, %v4171_v17  ;;  %v4430_v25 = vld [vmem:[#allocation2 + $0x10] sm:$0xf0]  ;;  %v12894_v2 = vld [vmem:[#allocation2 + $0x80] sm:$0xf] }
 0x20f   : > { %11403 = vmatmul.mubr.msk.bf16.gmra.mrb[8].mxu1 %vm383_vm1, %v16882_v24  ;;  %v1265_v20 = vrot.slane %v12894_v2, 4  ;;  %v4450_v55 = vrot.slane %v4430_v25, 4  ;;  %v16886_v17 = vld [vmem:[#allocation41_spill] sm:$0xff]  ;;  %v16887_v50 = vld [vmem:[#allocation42_spill] sm:$0xff]  ;;  %v16890_v24 = vld [vmem:[#allocation44_spill] sm:$0xff]  ;;  %v4471_v2 = vrot.slane %v14021_v59, 4 }
 0x210   : > { %v4185_v43 = vsel %vm1480_vm6, %v4175_v11, %v4184_v32  ;;  %v4473_v32 = vrot.slane %v14031_v52, 4 }
 0x212   : > { %11599 = vmatmul.mubr.msk.bf16.gmra.mrb[16].mxu0 %vm383_vm1, %v4131_v27  ;;  %v4166_v27 = vor.u32 %v4165_v33, %v4162_v10  ;;  %v16885_v33 = vld [vmem:[#allocation40_spill] sm:$0xff] }
 0x213   : > { %11602 = vmatprep.mubr.msk.bf16.mxu0 %vm383_vm1, %v4140_v18  ;;  %v16883_v18 = vld [vmem:[#allocation50_spill] sm:$0xff] }
 0x214   : > { %11406 = vmatprep.mubr.msk.bf16.mxu1 %vm383_vm1, %v16883_v18  ;;  %v4167_v45 = vsel %vm1480_vm6, %v4157_v49, %v4166_v27  ;;  %v4176_v0 = vsel %vm1480_vm6, %v4166_v27, %v4175_v11  ;;  %v4452_v49 = vsel %vm1233_vm4, %v4450_v55, %v16885_v33  ;;  %v16888_v27 = vld [vmem:[#allocation43_spill] sm:$0xff]  ;;  %v4464_v11 = vsel %vm1233_vm4, %v16890_v24, %v4463_v48  ;;  %v16891_v18 = vld [vmem:[#allocation46_spill] sm:$0xff] }
 0x21a   : > { %11603 = vmatmul.mubr.msk.bf16.gmra.mrb[20].mxu0 %vm383_vm1, %v4149_v8  ;;  %v16884_v8 = vld [vmem:[#allocation49_spill] sm:$0xff] }
 0x21b   : > { %11606 = vmatprep.mubr.msk.bf16.mxu0 %vm383_vm1, %v4158_v40  ;;  %v1266_v10 = vsel %vm1233_vm4, %v16884_v8, %v1265_v20  ;;  %v4948_v40 = vsel %vm1315_vm0, %v13998_v16, 0  ;;  %v4465_v16 = vrot.slane %v14007_v46, 4  ;;  %v4475_v8 = vrot.slane %v14033_v9, 4 }
 0x21c   : > { %11407 = vmatmul.mubr.msk.bf16.gmra.mrb[12].mxu1 %vm383_vm1, %v1266_v10  ;;  %v4474_v10 = vsel %vm1233_vm4, %v4471_v2, %v4473_v32 }
 0x21d   : > { %v4466_v39 = vsel %vm1233_vm4, %v4463_v48, %v4465_v16  ;;  %v4476_v33 = vsel %vm1233_vm4, %v4473_v32, %v4475_v8  ;;  %v4478_v24 = vsel %vm1233_vm4, %v4475_v8, %v13889_v57  ;;  %v4481_v32 = vrot.slane %v14064_v15, 4 }
 0x222   : > { %11607 = vmatmul.mubr.msk.bf16.gmra.mrb[24].mxu0 %vm383_vm1, %v4167_v45  ;;  %v4467_v45 = vrot.slane %v14009_v28, 4 }
 0x223   : > { %11610 = vmatprep.mubr.msk.bf16.mxu0 %vm383_vm1, %v4176_v0  ;;  %v4469_v0 = vrot.slane %v14019_v56, 4 }
 0x224   : > { %v4468_v51 = vsel %vm1233_vm4, %v4465_v16, %v4467_v45 }
 0x225   : > { %v4470_v20 = vsel %vm1233_vm4, %v4467_v45, %v4469_v0  ;;  %v4472_v55 = vsel %vm1233_vm4, %v4469_v0, %v4471_v2  ;;  %v12896_v45 = vld [vmem:[#allocation2 + $0x20] sm:$0xff] }
 0x22a   : > { %11611 = vmatmul.mubr.msk.bf16.gmra.mrb[28].mxu0 %vm383_vm1, %v4185_v43  ;;  %v16892_v43 = vld [vmem:[#allocation24_spill] sm:$0xff] }
 0x22b   : > { %11616 = vmatprep.mubr.msk.bf16.mxu0 %vm383_vm1, %v4452_v49  ;;  %v12895_v49 = vld [vmem:[#allocation2 + $0x18] sm:$0xff] }
 0x232   : > { %11617 = vmatmul.mubr.msk.bf16.vlgmr.msra.gmra.mrb[0].mxu0 %vm383_vm1, %v16886_v17  ;;  %v16893_v17 = vld [vmem:[#allocation23_spill] sm:$0xff] }
 0x233   : > { %11649 = vmatpush3.bf16.msra.mxu0 %v4948_v40  ;;  %11620 = vmatprep.mubr.msk.bf16.mxu0 %vm383_vm1, %v16887_v50  ;;  %v4729_v40 = vmul.bf16 %v12895_v49, %v16892_v43  ;;  %v4728_v50 = vmul.bf16 %v4430_v25, %v16893_v17  ;;  %v12897_v25 = vld [vmem:[#allocation2 + $0x28] sm:$0xff] }
 0x235   : > { %v4759_v48 = vshll.u32 %v4729_v40, 16  ;;  %v4751_v16 = vshll.u32 %v4728_v50, 16 }
 0x237   : > { %v4761_v2 = vrot.slane %v4759_v48, 5  ;;  %v12898_v48 = vld [vmem:[#allocation2 + $0x30] sm:$0xff] }
 0x238   : > { %v4732_v17 = vmul.bf16 %v12898_v48, %v13565_v13 }
 0x23a   : > { %11621 = vmatmul.mubr.msk.bf16.gmra.mrb[4].mxu0 %vm383_vm1, %v16888_v27  ;;  %v4479_v27 = vrot.slane %v14052_v6, 4 }
 0x23b   : > { %11624 = vmatprep.mubr.msk.bf16.mxu0 %vm383_vm1, %v16889_v34  ;;  %v4756_v34 = vshrl.u32 %v4729_v40, 16 }
 0x23d   : > { %v4758_v0 = vrot.slane %v4756_v34, 4 }
 0x23f   : > { %v4762_v49 = vor.u32 %v4761_v2, %v4758_v0  ;;  %v4783_v2 = vshrl.u32 %v4732_v17, 16 }
 0x242   : > { %11625 = vmatmul.mubr.msk.bf16.gmra.mrb[8].mxu0 %vm383_vm1, %v16891_v18  ;;  %v4748_v18 = vshrl.u32 %v4728_v50, 16 }
 0x243   : > { %11628 = vmatprep.mubr.msk.bf16.mxu0 %vm383_vm1, %v4464_v11  ;;  %v4480_v11 = vsel %vm1233_vm4, %v13889_v57, %v4479_v27 }
 0x244   : > { %v4750_v8 = vrot.slane %v4748_v18, 4 }
 0x24a   : > { %11629 = vmatmul.mubr.msk.bf16.gmra.mrb[12].mxu0 %vm383_vm1, %v4466_v39  ;;  %v16894_v39 = vld [vmem:[#allocation25_spill] sm:$0xff] }
 0x24b   : > { %11632 = vmatprep.mubr.msk.bf16.mxu0 %vm383_vm1, %v4468_v51  ;;  %v4730_v51 = vmul.bf16 %v12896_v45, %v16894_v39  ;;  %v4482_v45 = vsel %vm1233_vm4, %v4479_v27, %v4481_v32  ;;  %v4786_v27 = vshll.u32 %v4732_v17, 16 }
 0x24d   : > { %v4768_v57 = vshll.u32 %v4730_v51, 16 }
 0x24f   : > { %v4770_v34 = vrot.slane %v4768_v57, 5  ;;  %v12900_v57 = vld [vmem:[#allocation2 + $0x40] sm:$0xff] }
 0x252   : > { %11633 = vmatmul.mubr.msk.bf16.gmra.mrb[16].mxu0 %vm383_vm1, %v4470_v20  ;;  %v16895_v20 = vld [vmem:[#allocation26_spill] sm:$0xff] }
 0x253   : > { %11636 = vmatprep.mubr.msk.bf16.mxu0 %vm383_vm1, %v4472_v55  ;;  %v4731_v55 = vmul.bf16 %v12897_v25, %v16895_v20 }
 0x255   : > { %v4774_v40 = vshrl.u32 %v4731_v55, 16  ;;  %v4777_v50 = vshll.u32 %v4731_v55, 16 }
 0x257   : > { %v4776_v15 = vrot.slane %v4774_v40, 4  ;;  %v4779_v18 = vrot.slane %v4777_v50, 5 }
 0x259   : > { %v4780_v25 = vor.u32 %v4779_v18, %v4776_v15 }
 0x25a   : > { %11637 = vmatmul.mubr.msk.bf16.gmra.mrb[20].mxu0 %vm383_vm1, %v4474_v10  ;;  %v4753_v10 = vrot.slane %v4751_v16, 5  ;;  %v12899_v16 = vld [vmem:[#allocation2 + $0x38] sm:$0xff] }
 0x25b   : > { %11640 = vmatprep.mubr.msk.bf16.mxu0 %vm383_vm1, %v4476_v33  ;;  %v4765_v33 = vshrl.u32 %v4730_v51, 16  ;;  %v4733_v51 = vmul.bf16 %v12899_v16, %v13573_v62 }
 0x25c   : > { %v4754_v39 = vor.u32 %v4753_v10, %v4750_v8  ;;  %v4785_v10 = vrot.slane %v4783_v2, 4 }
 0x25d   : > { %v4792_v55 = vshrl.u32 %v4733_v51, 16  ;;  %v4795_v32 = vshll.u32 %v4733_v51, 16 }
 0x25f   : > { %v4794_v50 = vrot.slane %v4792_v55, 4  ;;  %v4737_v55 = vmul.bf16 %v14009_v28, %v13612_v23 }
 0x262   : > { %11641 = vmatmul.mubr.msk.bf16.gmra.mrb[24].mxu0 %vm383_vm1, %v4478_v24  ;;  %v4767_v24 = vrot.slane %v4765_v33, 4  ;;  %v4788_v33 = vrot.slane %v4786_v27, 5 }
 0x263   : > { %11644 = vmatprep.mubr.msk.bf16.mxu0 %vm383_vm1, %v4480_v11  ;;  %v4763_v11 = vsel %vm1034_vm5, %v4754_v39, %v4762_v49  ;;  %v4734_v39 = vmul.bf16 %v12900_v57, %v13585_v1  ;;  %v4831_v57 = vshll.u32 %v4737_v55, 16 }
 0x264   : > { %v4771_v0 = vor.u32 %v4770_v34, %v4767_v24  ;;  %v4735_v24 = vmul.bf16 %v13988_v36, %v13596_v61  ;;  %v4789_v17 = vor.u32 %v4788_v33, %v4785_v10  ;;  %v4828_v33 = vshrl.u32 %v4737_v55, 16 }
 0x265   : > { %v4801_v34 = vshrl.u32 %v4734_v39, 16  ;;  %v4804_v48 = vshll.u32 %v4734_v39, 16 }
 0x266   : > { %v4772_v8 = vsel %vm1034_vm5, %v4762_v49, %v4771_v0  ;;  %v4781_v40 = vsel %vm1034_vm5, %v4771_v0, %v4780_v25  ;;  %v4813_v15 = vshll.u32 %v4735_v24, 16  ;;  %v4790_v18 = vsel %vm1034_vm5, %v4780_v25, %v4789_v17 }
 0x267   : > { %v4803_v16 = vrot.slane %v4801_v34, 4  ;;  %v4806_v51 = vrot.slane %v4804_v48, 5  ;;  %v4736_v0 = vmul.bf16 %v14007_v46, %v13606_v47  ;;  %v4830_v28 = vrot.slane %v4828_v33, 4 }
 0x268   : > { %v4815_v27 = vrot.slane %v4813_v15, 5 }
 0x269   : > { %v4822_v10 = vshll.u32 %v4736_v0, 16 }
 0x26a   : > { %11645 = vmatmul.mubr.msk.bf16.gmra.mrb[28].mxu0 %vm383_vm1, %v4482_v45  ;;  %v4797_v45 = vrot.slane %v4795_v32, 5  ;;  %v4807_v32 = vor.u32 %v4806_v51, %v4803_v16 }
 0x26b   : > { %11650 = vmatprep.mubr.msk.bf16.mxu0 %vm383_vm1, %v4763_v11  ;;  %v4810_v11 = vshrl.u32 %v4735_v24, 16  ;;  %v4833_v24 = vrot.slane %v4831_v57, 5 }
 0x26c   : > { %v4798_v49 = vor.u32 %v4797_v45, %v4794_v50  ;;  %v4738_v50 = vmul.bf16 %v14019_v56, %v13623_v60 }
 0x26d   : > { %v4812_v36 = vrot.slane %v4810_v11, 4 }
 0x26e   : > { %v4799_v2 = vsel %vm1034_vm5, %v4789_v17, %v4798_v49  ;;  %v4808_v39 = vsel %vm1034_vm5, %v4798_v49, %v4807_v32  ;;  %v4739_v17 = vmul.bf16 %v14021_v59, %v13629_v42  ;;  %v4837_v48 = vshrl.u32 %v4738_v50, 16 }
 0x26f   : > { %v4816_v25 = vor.u32 %v4815_v27, %v4812_v36  ;;  %v4840_v11 = vshll.u32 %v4738_v50, 16  ;;  %v4834_v49 = vor.u32 %v4833_v24, %v4830_v28  ;;  %v4741_v27 = vmul.bf16 %v14033_v9, %v13647_v37 }
 0x270   : > { %v4846_v15 = vshrl.u32 %v4739_v17, 16  ;;  %v4839_v56 = vrot.slane %v4837_v48, 4  ;;  %v4743_v28 = vmul.bf16 %v14052_v6, %v13667_v44 }
 0x271   : > { %v4817_v45 = vsel %vm1034_vm5, %v4807_v32, %v4816_v25  ;;  %v4842_v51 = vrot.slane %v4840_v11, 5  ;;  %v4867_v33 = vshll.u32 %v4741_v27, 16 }
 0x272   : > { %11651 = vmatmul.mubr.msk.bf16.vlgmr.msra.gmra.mrb[0].mxu0 %vm383_vm1, %v4772_v8  ;;  %v4819_v8 = vshrl.u32 %v4736_v0, 16  ;;  %v4740_v0 = vmul.bf16 %v14031_v52, %v13641_v29  ;;  %v4848_v59 = vrot.slane %v4846_v15, 4  ;;  %v4882_v11 = vshrl.u32 %v4743_v28, 16  ;;  %v4727_v15 = vld [vmem:[#allocation2 + $0x90] sm:$0x1f] }
 0x273   : > { %11654 = vmatprep.mubr.msk.bf16.mxu0 %vm383_vm1, %v4781_v40  ;;  %v4824_v40 = vrot.slane %v4822_v10, 5  ;;  %v4843_v55 = vor.u32 %v4842_v51, %v4839_v56  ;;  %v4744_v51 = vmul.bf16 %v4727_v15, %v16872_v63  ;;  %v5351_v15 = vld [vmem:[%s16680_s6] sm:$0xff] }
 0x274   : > { %v4821_v46 = vrot.slane %v4819_v8, 4  ;;  %v4855_v32 = vshrl.u32 %v4740_v0, 16  ;;  %v4858_v8 = vshll.u32 %v4740_v0, 16  ;;  %v4884_v6 = vrot.slane %v4882_v11, 4 }
 0x275   : > { %v4844_v57 = vsel %vm1034_vm5, %v4834_v49, %v4843_v55 }
 0x276   : > { %v4825_v34 = vor.u32 %v4824_v40, %v4821_v46  ;;  %v4857_v52 = vrot.slane %v4855_v32, 4  ;;  %v12901_v46 = vld [vmem:[#allocation2 + $0x80] sm:$0xff] }
 0x277   : > { %v4742_v40 = vmul.bf16 %v12901_v46, %v13657_v5 }
 0x278   : > { %v4826_v16 = vsel %vm1034_vm5, %v4816_v25, %v4825_v34  ;;  %v4864_v25 = vshrl.u32 %v4741_v27, 16  ;;  %v4894_v27 = vshll.u32 %v4744_v51, 16 }
 0x27a   : > { %11655 = vmatmul.mubr.msk.bf16.gmra.mrb[4].mxu0 %vm383_vm1, %v4790_v18  ;;  %v4849_v18 = vshll.u32 %v4739_v17, 16  ;;  %v4866_v9 = vrot.slane %v4864_v25, 4  ;;  %v4873_v17 = vshrl.u32 %v4742_v40, 16 }
 0x27b   : > { %11658 = vmatprep.mubr.msk.bf16.mxu0 %vm383_vm1, %v4799_v2  ;;  %v4835_v2 = vsel %vm1034_vm5, %v4825_v34, %v4834_v49  ;;  %v4876_v34 = vshll.u32 %v4742_v40, 16  ;;  %v4885_v49 = vshll.u32 %v4743_v28, 16 }
 0x27c   : > { %v4851_v36 = vrot.slane %v4849_v18, 5 }
 0x27d   : > { %v4878_v56 = vrot.slane %v4876_v34, 5 }
 0x27e   : > { %v4852_v10 = vor.u32 %v4851_v36, %v4848_v59  ;;  %v4891_v36 = vshrl.u32 %v4744_v51, 16 }
 0x280   : > { %v4853_v50 = vsel %vm1034_vm5, %v4843_v55, %v4852_v10 }
 0x282   : > { %11659 = vmatmul.mubr.msk.bf16.gmra.mrb[8].mxu0 %vm383_vm1, %v4808_v39  ;;  %v4860_v39 = vrot.slane %v4858_v8, 5  ;;  %v4893_v8 = vrot.slane %v4891_v36, 4 }
 0x283   : > { %11662 = vmatprep.mubr.msk.bf16.mxu0 %vm383_vm1, %v4817_v45  ;;  %v4869_v45 = vrot.slane %v4867_v33, 5 }
 0x284   : > { %v4861_v24 = vor.u32 %v4860_v39, %v4857_v52  ;;  %v16896_v52 = vmov 0  }
 0x285   : > { %v4870_v48 = vor.u32 %v4869_v45, %v4866_v9  ;;  %395 = vst.msk [vmem:[#allocation3 + $0x88] sm:$0xf0] %vm394_vm8, %v16896_v52 }
 0x286   : > { %v4862_v18 = vsel %vm1034_vm5, %v4852_v10, %v4861_v24  ;;  %v4896_v10 = vrot.slane %v4894_v27, 5  ;;  %393 = vst.msk [vmem:[#allocation3 + $0x8] sm:$0xf] %vm392_vm9, %v16896_v52 }
 0x287   : > { %v4871_v0 = vsel %vm1034_vm5, %v4861_v24, %v4870_v48 }
 0x288   : > { %v4897_v33 = vor.u32 %v4896_v10, %v4893_v8 }
 0x28a   : > { %11663 = vmatmul.mubr.msk.bf16.gmra.mrb[12].mxu0 %vm383_vm1, %v4826_v16  ;;  %v4875_v16 = vrot.slane %v4873_v17, 4 }
 0x28b   : > { %11666 = vmatprep.mubr.msk.bf16.mxu0 %vm383_vm1, %v4835_v2  ;;  %v4887_v2 = vrot.slane %v4885_v49, 5 }
 0x28c   : > { %v4879_v59 = vor.u32 %v4878_v56, %v4875_v16  ;;  %v12959_v16 = vmov 0.0|0.0  }
 0x28d   : > { %v4888_v55 = vor.u32 %v4887_v2, %v4884_v6  ;;  %12046 = vmatprep.subr.bf16.mxu1 %v12959_v16  ;;  %12049 = vmatprep.subr.bf16.mxu0 %v12959_v16  ;;  %v16724_v2 = vmov 0.0  }
 0x28e   : > { %v4880_v32 = vsel %vm1034_vm5, %v4870_v48, %v4879_v59  ;;  %11686 = vmatprep.mubr.msk.f32.mxu1 %vm12960_vm10, %v16724_v2 }
 0x28f   : > { %v4889_v25 = vsel %vm1034_vm5, %v4879_v59, %v4888_v55  ;;  %v14241_v59 = vld [vmem:[%s16679_s5] ss:$0 sm:$0xff] }
 0x292   : > { %11667 = vmatmul.mubr.msk.bf16.gmra.mrb[16].mxu0 %vm383_vm1, %v4844_v57  ;;  %v4898_v57 = vsel %vm1034_vm5, %v4888_v55, %v4897_v33 }
 0x293   : > { %11670 = vmatprep.mubr.msk.bf16.mxu0 %vm383_vm1, %v4853_v50 }
 0x29a   : > { %11671 = vmatmul.mubr.msk.bf16.gmra.mrb[20].mxu0 %vm383_vm1, %v4862_v18  ;;  %v5352_v18 = vld [vmem:[%s16680_s6 + $0x8] sm:$0xff] }
 0x29b   : > { %11674 = vmatprep.mubr.msk.bf16.mxu0 %vm383_vm1, %v4871_v0  ;;  %v12047_v51 = vpack.c.bf16 %v5352_v18, %v5351_v15 }
 0x29d   : > { %12048 = vmatpush3.bf16.msra.mxu1 %v12047_v51 }
 0x29e   : > { %11689 = vmatprep.subr.mxu1 %v16724_v2 }
 0x2a2   : > { %11675 = vmatmul.mubr.msk.bf16.gmra.mrb[24].mxu0 %vm383_vm1, %v4880_v32 }
 0x2a3   : > { %11678 = vmatprep.mubr.msk.bf16.mxu0 %vm383_vm1, %v4889_v25 }
 0x2aa   : > { %11679 = vmatmul.mubr.msk.bf16.gmra.mrb[28].mxu0 %vm383_vm1, %v4898_v57 }
 0x2ab   : > { %12004 = vmatprep.mubr.msk.f32.mxu0 %vm12960_vm10, %v16724_v2 }
 0x2d2   : > { %v14193_v39 = vpop.f32.mrb[0].mxu1 }
 0x2d3   : > { %v14195_v46 = vpop.f32.mrb[1].mxu1 }
 0x2d4   : > { %v14197_v40 = vpop.f32.mrb[2].mxu1 }
 0x2d5   : > { %v14199_v50 = vpop.f32.mrb[3].mxu1 }
 0x2da   : > { %v14201_v9 = vpop.f32.mrb[4].mxu1 }
 0x2db   : > { %v14203_v45 = vpop.f32.mrb[5].mxu1 }
 0x2dc   : > { %v14205_v28 = vpop.f32.mrb[6].mxu1 }
 0x2dd   : > { %v14207_v24 = vpop.f32.mrb[7].mxu1 }
 0x2e2   : > { %v14209_v17 = vpop.f32.mrb[8].mxu1 }
 0x2e3   : > { %v14211_v34 = vpop.f32.mrb[9].mxu1 }
 0x2e4   : > { %v14213_v48 = vpop.f32.mrb[10].mxu1 }
 0x2e5   : > { %v14215_v11 = vpop.f32.mrb[11].mxu1 }
 0x2ef   : > { %v14217_v49 = vpop.f32.mrb[12].mxu1 }
 0x2f0   : > { %v14225_v56 = vpop.f32.mrb[13].mxu1 }
 0x2f1   : > { %v14227_v0 = vpop.f32.mrb[14].mxu1 }
 0x2f2   : > { %v14229_v6 = vpop.f32.mrb[15].mxu1 }
 0x345   : > { %v11652_v36 = vpop.f32.mrb[0].mxu0 }
 0x346   : > { %v4984_v27 = vpop.f32.mrb[1].mxu0  ;;  %v14244_v55 = vadd.f32 %v11652_v36, %v14241_v59 }
 0x347   : > { %v14247_v32 = vadd.f32 %v14241_v59, %v4984_v27  ;;  %v11653_v8 = vpop.f32.mrb[2].mxu0 }
 0x348   : > { %v4987_v10 = vpop.f32.mrb[3].mxu0  ;;  %v14252_v33 = vadd.f32 %v11653_v8, %v14241_v59  ;;  %v5250_v52 = vmul.f32 %v14244_v55, %v14244_v55  ;;  %v5182_v36 = vsel %vm390_vm7, %v14244_v55, 0.0 }
 0x349   : > { %v5248_v25 = vmul.f32 %v14247_v32, %v14247_v32  ;;  %v14255_v57 = vadd.f32 %v14241_v59, %v4987_v10  ;;  %v5179_v15 = vsel %vm390_vm7, %v14247_v32, 0.0 }
 0x34a   : > { %v5251_v8 = vmul.f32 %v14252_v33, %v14252_v33  ;;  %v5283_v37 = vsel %vm390_vm7, %v5250_v52, 0.0  ;;  %v5184_v29 = vsel %vm390_vm7, %v14252_v33, 0.0 }
 0x34b   : > { %v5180_v18 = vsel %vm390_vm7, %v14255_v57, 0.0  ;;  %v5249_v16 = vmul.f32 %v14255_v57, %v14255_v57  ;;  %v5280_v27 = vsel %vm390_vm7, %v5248_v25, 0.0 }
 0x34c   : > { %v5181_v51 = vadd.f32 %v5180_v18, %v5179_v15 }
 0x34d   : > { %v5281_v10 = vsel %vm390_vm7, %v5249_v16, 0.0  ;;  %v11656_v2 = vpop.f32.mrb[4].mxu0  ;;  %v5285_v16 = vsel %vm390_vm7, %v5251_v8, 0.0 }
 0x34e   : > { %v5183_v63 = vadd.f32 %v5182_v36, %v5181_v51  ;;  %v5282_v44 = vadd.f32 %v5281_v10, %v5280_v27  ;;  %v5000_v5 = vpop.f32.mrb[5].mxu0  ;;  %v14278_v25 = vadd.f32 %v11656_v2, %v14241_v59 }
 0x34f   : > { %v14275_v15 = vadd.f32 %v14241_v59, %v5000_v5  ;;  %v11657_v18 = vpop.f32.mrb[6].mxu0 }
 0x350   : > { %v5284_v42 = vadd.f32 %v5283_v37, %v5282_v44  ;;  %v5185_v60 = vadd.f32 %v5184_v29, %v5183_v63  ;;  %v5003_v23 = vpop.f32.mrb[7].mxu0  ;;  %v14289_v37 = vadd.f32 %v11657_v18, %v14241_v59  ;;  %v5254_v63 = vmul.f32 %v14278_v25, %v14278_v25 }
 0x351   : > { %v5186_v51 = vsel %vm390_vm7, %v14275_v15, 0.0  ;;  %v5252_v52 = vmul.f32 %v14275_v15, %v14275_v15  ;;  %v14286_v36 = vadd.f32 %v14241_v59, %v5003_v23  ;;  %v5190_v23 = vsel %vm390_vm7, %v14278_v25, 0.0 }
 0x352   : > { %v5187_v5 = vadd.f32 %v5186_v51, %v5185_v60  ;;  %v5286_v27 = vadd.f32 %v5285_v16, %v5284_v42  ;;  %v5255_v42 = vmul.f32 %v14289_v37, %v14289_v37 }
 0x353   : > { %v5287_v44 = vsel %vm390_vm7, %v5252_v52, 0.0  ;;  %v5188_v29 = vsel %vm390_vm7, %v14286_v36, 0.0  ;;  %v5253_v10 = vmul.f32 %v14286_v36, %v14286_v36  ;;  %v5192_v52 = vsel %vm390_vm7, %v14289_v37, 0.0 }
 0x354   : > { %v5288_v2 = vadd.f32 %v5287_v44, %v5286_v27  ;;  %v5189_v8 = vadd.f32 %v5188_v29, %v5187_v5  ;;  %v5291_v44 = vsel %vm390_vm7, %v5254_v63, 0.0 }
 0x355   : > { %v11660_v60 = vpop.f32.mrb[8].mxu0  ;;  %v5289_v16 = vsel %vm390_vm7, %v5253_v10, 0.0 }
 0x356   : > { %v5191_v18 = vadd.f32 %v5190_v23, %v5189_v8  ;;  %v5016_v51 = vpop.f32.mrb[9].mxu0  ;;  %v5290_v47 = vadd.f32 %v5289_v16, %v5288_v2  ;;  %v14310_v29 = vadd.f32 %v11660_v60, %v14241_v59  ;;  %v5293_v23 = vsel %vm390_vm7, %v5255_v42, 0.0 }
 0x357   : > { %v14306_v5 = vadd.f32 %v14241_v59, %v5016_v51  ;;  %v11661_v27 = vpop.f32.mrb[10].mxu0 }
 0x358   : > { %v5193_v61 = vadd.f32 %v5192_v52, %v5191_v18  ;;  %v5019_v1 = vpop.f32.mrb[11].mxu0  ;;  %v5292_v62 = vadd.f32 %v5291_v44, %v5290_v47  ;;  %v14321_v63 = vadd.f32 %v11661_v27, %v14241_v59  ;;  %v5258_v52 = vmul.f32 %v14310_v29, %v14310_v29 }
 0x359   : > { %v5194_v8 = vsel %vm390_vm7, %v14306_v5, 0.0  ;;  %v5256_v10 = vmul.f32 %v14306_v5, %v14306_v5  ;;  %v14317_v2 = vadd.f32 %v14241_v59, %v5019_v1  ;;  %v5198_v42 = vsel %vm390_vm7, %v14310_v29, 0.0 }
 0x35a   : > { %v5195_v16 = vadd.f32 %v5194_v8, %v5193_v61  ;;  %v5294_v60 = vadd.f32 %v5293_v23, %v5292_v62  ;;  %v5259_v62 = vmul.f32 %v14321_v63, %v14321_v63  ;;  %v5200_v23 = vsel %vm390_vm7, %v14321_v63, 0.0 }
 0x35b   : > { %v5295_v18 = vsel %vm390_vm7, %v5256_v10, 0.0  ;;  %v5196_v47 = vsel %vm390_vm7, %v14317_v2, 0.0  ;;  %v5257_v51 = vmul.f32 %v14317_v2, %v14317_v2 }
 0x35c   : > { %v5197_v1 = vadd.f32 %v5196_v47, %v5195_v16  ;;  %v5296_v61 = vadd.f32 %v5295_v18, %v5294_v60  ;;  %v5299_v47 = vsel %vm390_vm7, %v5258_v52, 0.0 }
 0x35d   : > { %v5297_v27 = vsel %vm390_vm7, %v5257_v51, 0.0  ;;  %v11664_v44 = vpop.f32.mrb[12].mxu0 }
 0x35e   : > { %v5199_v8 = vadd.f32 %v5198_v42, %v5197_v1  ;;  %v5032_v10 = vpop.f32.mrb[13].mxu0  ;;  %v5298_v13 = vadd.f32 %v5297_v27, %v5296_v61  ;;  %v14342_v60 = vadd.f32 %v11664_v44, %v14241_v59  ;;  %v5301_v27 = vsel %vm390_vm7, %v5259_v62, 0.0 }
 0x35f   : > { %v14338_v20 = vadd.f32 %v14241_v59, %v5032_v10  ;;  %v11665_v16 = vpop.f32.mrb[14].mxu0 }
 0x360   : > { %v5201_v18 = vadd.f32 %v5200_v23, %v5199_v8  ;;  %v5035_v51 = vpop.f32.mrb[15].mxu0  ;;  %v5300_v43 = vadd.f32 %v5299_v47, %v5298_v13  ;;  %v14353_v52 = vadd.f32 %v11665_v16, %v14241_v59  ;;  %v5262_v47 = vmul.f32 %v14342_v60, %v14342_v60 }
 0x361   : > { %v5202_v1 = vsel %vm390_vm7, %v14338_v20, 0.0  ;;  %v5260_v42 = vmul.f32 %v14338_v20, %v14338_v20  ;;  %v14349_v61 = vadd.f32 %v14241_v59, %v5035_v51  ;;  %v5206_v62 = vsel %vm390_vm7, %v14342_v60, 0.0 }
 0x362   : > { %v5203_v10 = vadd.f32 %v5202_v1, %v5201_v18  ;;  %v5302_v44 = vadd.f32 %v5301_v27, %v5300_v43  ;;  %v5263_v43 = vmul.f32 %v14353_v52, %v14353_v52 }
 0x363   : > { %v5303_v8 = vsel %vm390_vm7, %v5260_v42, 0.0  ;;  %v5204_v13 = vsel %vm390_vm7, %v14349_v61, 0.0  ;;  %v5261_v23 = vmul.f32 %v14349_v61, %v14349_v61 }
 0x364   : > { %v5205_v51 = vadd.f32 %v5204_v13, %v5203_v10  ;;  %v5304_v18 = vadd.f32 %v5303_v8, %v5302_v44  ;;  %v5307_v10 = vsel %vm390_vm7, %v5262_v47, 0.0 }
 0x365   : > { %v5305_v16 = vsel %vm390_vm7, %v5261_v23, 0.0  ;;  %v11668_v1 = vpop.f32.mrb[16].mxu0  ;;  %v5208_v23 = vsel %vm390_vm7, %v14353_v52, 0.0 }
 0x366   : > { %v5207_v42 = vadd.f32 %v5206_v62, %v5205_v51  ;;  %v12054_v27 = vadd.f32 %v11668_v1, %v14193_v39  ;;  %v5048_v53 = vpop.f32.mrb[17].mxu0  ;;  %v5306_v30 = vadd.f32 %v5305_v16, %v5304_v18 }
 0x367   : > { %v12055_v58 = vadd.f32 %v5048_v53, %v14195_v46  ;;  %v11669_v4 = vpop.f32.mrb[18].mxu0  ;;  %v5309_v53 = vsel %vm390_vm7, %v5263_v43, 0.0 }
 0x368   : > { %v14371_v13 = vadd.f32 %v12054_v27, %v14241_v59  ;;  %v12056_v44 = vadd.f32 %v11669_v4, %v14197_v40  ;;  %v5051_v8 = vpop.f32.mrb[19].mxu0  ;;  %v5308_v54 = vadd.f32 %v5307_v10, %v5306_v30  ;;  %v5209_v46 = vadd.f32 %v5208_v23, %v5207_v42 }
 0x369   : > { %v14377_v51 = vadd.f32 %v12055_v58, %v14241_v59  ;;  %v12057_v39 = vadd.f32 %v5051_v8, %v14199_v50 }
 0x36a   : > { %v14386_v4 = vadd.f32 %v12056_v44, %v14241_v59  ;;  %v5266_v58 = vmul.f32 %v14371_v13, %v14371_v13  ;;  %v5310_v50 = vadd.f32 %v5309_v53, %v5308_v54  ;;  %v5214_v8 = vsel %vm390_vm7, %v14371_v13, 0.0 }
 0x36b   : > { %v5210_v47 = vsel %vm390_vm7, %v14377_v51, 0.0  ;;  %v5264_v62 = vmul.f32 %v14377_v51, %v14377_v51  ;;  %v14389_v40 = vadd.f32 %v12057_v39, %v14241_v59 }
 0x36c   : > { %v5211_v30 = vadd.f32 %v5210_v47, %v5209_v46  ;;  %v5267_v54 = vmul.f32 %v14386_v4, %v14386_v4  ;;  %v5315_v46 = vsel %vm390_vm7, %v5266_v58, 0.0 }
 0x36d   : > { %v5311_v18 = vsel %vm390_vm7, %v5264_v62, 0.0  ;;  %v5212_v16 = vsel %vm390_vm7, %v14389_v40, 0.0  ;;  %v5265_v1 = vmul.f32 %v14389_v40, %v14389_v40  ;;  %v11672_v43 = vpop.f32.mrb[20].mxu0 }
 0x36e   : > { %v5312_v42 = vadd.f32 %v5311_v18, %v5310_v50  ;;  %v5213_v27 = vadd.f32 %v5212_v16, %v5211_v30  ;;  %v12058_v10 = vadd.f32 %v11672_v43, %v14201_v9  ;;  %v5064_v44 = vpop.f32.mrb[21].mxu0  ;;  %v5216_v9 = vsel %vm390_vm7, %v14386_v4, 0.0 }
 0x36f   : > { %v5313_v23 = vsel %vm390_vm7, %v5265_v1, 0.0  ;;  %v12059_v39 = vadd.f32 %v5064_v44, %v14203_v45  ;;  %v11673_v53 = vpop.f32.mrb[22].mxu0  ;;  %v5317_v58 = vsel %vm390_vm7, %v5267_v54, 0.0 }
 0x370   : > { %v5215_v47 = vadd.f32 %v5214_v8, %v5213_v27  ;;  %v5314_v62 = vadd.f32 %v5313_v23, %v5312_v42  ;;  %v12060_v30 = vadd.f32 %v11673_v53, %v14205_v28  ;;  %v5067_v50 = vpop.f32.mrb[23].mxu0  ;;  %v14410_v18 = vadd.f32 %v12058_v10, %v14241_v59 }
 0x371   : > { %v14413_v16 = vadd.f32 %v12059_v39, %v14241_v59  ;;  %v12061_v1 = vadd.f32 %v5067_v50, %v14207_v24 }
 0x372   : > { %v5316_v45 = vadd.f32 %v5315_v46, %v5314_v62  ;;  %v5217_v43 = vadd.f32 %v5216_v9, %v5215_v47  ;;  %v14425_v8 = vadd.f32 %v12060_v30, %v14241_v59  ;;  %v5270_v24 = vmul.f32 %v14410_v18, %v14410_v18 }
 0x373   : > { %v5218_v42 = vsel %vm390_vm7, %v14413_v16, 0.0  ;;  %v5268_v28 = vmul.f32 %v14413_v16, %v14413_v16  ;;  %v14422_v27 = vadd.f32 %v12061_v1, %v14241_v59  ;;  %v5222_v30 = vsel %vm390_vm7, %v14410_v18, 0.0 }
 0x374   : > { %v5219_v10 = vadd.f32 %v5218_v42, %v5217_v43  ;;  %v5318_v44 = vadd.f32 %v5317_v58, %v5316_v45  ;;  %v5271_v45 = vmul.f32 %v14425_v8, %v14425_v8 }
 0x375   : > { %v5319_v23 = vsel %vm390_vm7, %v5268_v28, 0.0  ;;  %v5220_v54 = vsel %vm390_vm7, %v14422_v27, 0.0  ;;  %v11676_v39 = vpop.f32.mrb[24].mxu0  ;;  %v5269_v47 = vmul.f32 %v14422_v27, %v14422_v27 }
 0x376   : > { %v5320_v53 = vadd.f32 %v5319_v23, %v5318_v44  ;;  %v5221_v46 = vadd.f32 %v5220_v54, %v5219_v10  ;;  %v12062_v62 = vadd.f32 %v11676_v39, %v14209_v17  ;;  %v5080_v50 = vpop.f32.mrb[25].mxu0  ;;  %v5224_v10 = vsel %vm390_vm7, %v14425_v8, 0.0 }
 0x377   : > { %v12063_v9 = vadd.f32 %v5080_v50, %v14211_v34  ;;  %v11677_v1 = vpop.f32.mrb[26].mxu0  ;;  %v5321_v58 = vsel %vm390_vm7, %v5269_v47, 0.0  ;;  %v5323_v34 = vsel %vm390_vm7, %v5270_v24, 0.0  ;;  %v5325_v50 = vsel %vm390_vm7, %v5271_v45, 0.0 }
 0x378   : > { %v5223_v43 = vadd.f32 %v5222_v30, %v5221_v46  ;;  %v12064_v42 = vadd.f32 %v11677_v1, %v14213_v48  ;;  %v5083_v28 = vpop.f32.mrb[27].mxu0  ;;  %v5322_v17 = vadd.f32 %v5321_v58, %v5320_v53  ;;  %v14450_v54 = vadd.f32 %v12062_v62, %v14241_v59 }
 0x379   : > { %v14445_v44 = vadd.f32 %v12063_v9, %v14241_v59  ;;  %v12065_v23 = vadd.f32 %v5083_v28, %v14215_v11 }
 0x37a   : > { %v5225_v39 = vadd.f32 %v5224_v10, %v5223_v43  ;;  %v5324_v46 = vadd.f32 %v5323_v34, %v5322_v17  ;;  %v14461_v11 = vadd.f32 %v12064_v42, %v14241_v59  ;;  %v5274_v58 = vmul.f32 %v14450_v54, %v14450_v54 }
 0x37b   : > { %v5226_v48 = vsel %vm390_vm7, %v14445_v44, 0.0  ;;  %v5272_v47 = vmul.f32 %v14445_v44, %v14445_v44  ;;  %v14457_v53 = vadd.f32 %v12065_v23, %v14241_v59  ;;  %v5230_v42 = vsel %vm390_vm7, %v14450_v54, 0.0 }
 0x37c   : > { %v5227_v30 = vadd.f32 %v5226_v48, %v5225_v39  ;;  %v5326_v24 = vadd.f32 %v5325_v50, %v5324_v46  ;;  %v5275_v46 = vmul.f32 %v14461_v11, %v14461_v11 }
 0x37d   : > { %v5327_v62 = vsel %vm390_vm7, %v5272_v47, 0.0  ;;  %v5228_v9 = vsel %vm390_vm7, %v14457_v53, 0.0  ;;  %v5273_v1 = vmul.f32 %v14457_v53, %v14457_v53  ;;  %v11680_v43 = vpop.f32.mrb[28].mxu0 }
 0x37e   : > { %v5229_v28 = vadd.f32 %v5228_v9, %v5227_v30  ;;  %v12066_v45 = vadd.f32 %v11680_v43, %v14217_v49  ;;  %v5096_v10 = vpop.f32.mrb[29].mxu0  ;;  %v5328_v17 = vadd.f32 %v5327_v62, %v5326_v24  ;;  %v5232_v49 = vsel %vm390_vm7, %v14461_v11, 0.0 }
 0x37f   : > { %v5329_v23 = vsel %vm390_vm7, %v5273_v1, 0.0  ;;  %v12067_v34 = vadd.f32 %v5096_v10, %v14225_v56  ;;  %v11681_v39 = vpop.f32.mrb[30].mxu0  ;;  %v5331_v62 = vsel %vm390_vm7, %v5274_v58, 0.0 }
 0x380   : > { %v5231_v48 = vadd.f32 %v5230_v42, %v5229_v28  ;;  %v12068_v47 = vadd.f32 %v11681_v39, %v14227_v0  ;;  %v5099_v50 = vpop.f32.mrb[31].mxu0  ;;  %v5330_v30 = vadd.f32 %v5329_v23, %v5328_v17  ;;  %v14486_v56 = vadd.f32 %v12066_v45, %v14241_v59 }
 0x381   : > { %v14481_v9 = vadd.f32 %v12067_v34, %v14241_v59  ;;  %v12069_v24 = vadd.f32 %v5099_v50, %v14229_v6  ;;  %v5333_v42 = vsel %vm390_vm7, %v5275_v46, 0.0 }
 0x382   : > { %v5233_v1 = vadd.f32 %v5232_v49, %v5231_v48  ;;  %v5332_v43 = vadd.f32 %v5331_v62, %v5330_v30  ;;  %v14497_v6 = vadd.f32 %v12068_v47, %v14241_v59  ;;  %v5278_v39 = vmul.f32 %v14486_v56, %v14486_v56 }
 0x383   : > { %v5234_v0 = vsel %vm390_vm7, %v14481_v9, 0.0  ;;  %v5276_v28 = vmul.f32 %v14481_v9, %v14481_v9  ;;  %v14493_v10 = vadd.f32 %v12069_v24, %v14241_v59  ;;  %v5238_v46 = vsel %vm390_vm7, %v14486_v56, 0.0 }
 0x384   : > { %v5235_v17 = vadd.f32 %v5234_v0, %v5233_v1  ;;  %v5334_v58 = vadd.f32 %v5333_v42, %v5332_v43  ;;  %v5279_v47 = vmul.f32 %v14497_v6, %v14497_v6  ;;  %v5240_v30 = vsel %vm390_vm7, %v14497_v6, 0.0 }
 0x385   : > { %v5335_v45 = vsel %vm390_vm7, %v5276_v28, 0.0  ;;  %v5236_v23 = vsel %vm390_vm7, %v14493_v10, 0.0  ;;  %v5277_v34 = vmul.f32 %v14493_v10, %v14493_v10  ;;  %v5339_v62 = vsel %vm390_vm7, %v5278_v39, 0.0 }
 0x386   : > { %v5237_v48 = vadd.f32 %v5236_v23, %v5235_v17  ;;  %v5336_v50 = vadd.f32 %v5335_v45, %v5334_v58  ;;  %v5341_v0 = vsel %vm390_vm7, %v5279_v47, 0.0  ;;  %v5435_v47 = vld [vmem:[%s16681_s7] sm:$0xff] }
 0x387   : > { %v5337_v59 = vsel %vm390_vm7, %v5277_v34, 0.0 }
 0x388   : > { %v5239_v49 = vadd.f32 %v5238_v46, %v5237_v48  ;;  %v5338_v24 = vadd.f32 %v5337_v59, %v5336_v50  ;;  %v16897_v59 = vmov 0.0  }
 0x38a   : > { %v5241_v1 = vadd.f32 %v5240_v30, %v5239_v49  ;;  %v5340_v43 = vadd.f32 %v5339_v62, %v5338_v24 }
 0x38c   : > { %v5242_v28 = vrot.slane %v5241_v1, 4  ;;  %v5342_v42 = vadd.f32 %v5341_v0, %v5340_v43  ;;  %v12610_v0 = vld [vmem:[%s16677_s3 + $0x8] sm:$0xff]  }
 0x38e   : > { %v5243_v17 = vadd.f32 %v5242_v28, %v5241_v1  ;;  %v5343_v58 = vrot.slane %v5342_v42, 4 }
 0x390   : > { %v5244_v45 = vrot.slane %v5243_v17, 2  ;;  %v5344_v23 = vadd.f32 %v5343_v58, %v5342_v42  ;;  %v16899_v58 = vld [vmem:[#allocation5_spill] sm:$0xff] }
 0x392   : > { %v5245_v34 = vadd.f32 %v5244_v45, %v5243_v17  ;;  %v5345_v21 = vrot.slane %v5344_v23, 2  ;;  %v14536_v17 = vld [vmem:[%s16677_s3] sm:$0xff]   ;;  %v14539_v45 = vsub.s32 0, %v16899_v58 }
 0x393   : > { %16898 = vst [vmem:[#allocation4_spill] sm:$0xff] %v14536_v17 }
 0x394   : > { %v5246_v19 = vrot.slane %v5245_v34, 1  ;;  %v5346_v48 = vadd.f32 %v5345_v21, %v5344_v23  ;;  %16900 = vst [vmem:[#allocation47_spill] sm:$0xff] %v14539_v45  ;;  %v551_v23 = vld [vmem:[%s14531_s18] sm:$0x1] }
 0x396   : > { %v5347_v46 = vrot.slane %v5346_v48, 1  ;;  %v5247_v38 = vadd.f32 %v5246_v19, %v5245_v34  ;;  %v16765_v34 = vsub.s32 1, %v16899_v58 }
 0x398   : > { %v5348_v50 = vadd.f32 %v5347_v46, %v5346_v48  ;;  %v5654_v48 = vadd.f32 1.0, %v551_v23 }
 0x39a   : > { %v5350_v39 = vsel %vm5349_vm11, %v5247_v38, %v5348_v50 }
 0x39b   : > { %11687 = vmatmul.mubr.msk.f32.vlgmr.msra.gmra.mrb[16].mxu1 %vm390_vm7, %v5350_v39  ;;  %v14552_v39 = vrot.slane %v5654_v48, %v14539_v45 }
 0x39c   : > { %11691 = vmatprep.mubr.msk.f32.mxu1 %vm12960_vm10, %v16897_v59  ;;  %11690 = vmatpush3.msra.mxu1 %v5435_v47 }
 0x39d   : > { %11694 = vmatprep.subr.bf16.mxu1 %v12610_v0 }
 0x46e   : > { %v5422_v49 = vpop.f32.mrb[16].mxu1 }
 0x46f   : > { %v5426_v30 = vmul.f32 %v5422_v49, %v5422_v49  ;;  %v11688_v21 = vpop.f32.mrb[17].mxu1 }
 0x471   : > { %v5428_v24 = vrot.slane %v5426_v30, 7 }
 0x473   : > { %v5430_v62 = vsub.f32 %v5422_v49, %v5428_v24 }
 0x475   : > { %v5431_v19 = vmax.f32 %v5430_v62, 0.0 }
 0x477   : > { %v5432_v1 = vadd.f32 1e-05, %v5431_v19 }
 0x479   : > { %12619 = vrsqrt.f32 %v5432_v1 }
 0x483   : > { %v12620_v38 = vpop.eup %12619 }
 0x484   : > { %v5434_v43 = vsel %vm5349_vm11, %v5422_v49, %v12620_v38 }
 0x485   : > { %11692 = vmatmul.mubr.msk.f32.vlgmr.msra.gmra.mrb[18].mxu1 %vm5436_vm12, %v5434_v43 }
 0x486   : > { %11695 = vmatpush3.bf16.msra.mxu1 %v12610_v0 }
 0x487   : > { %11728 = vmatprep.subr.bf16.mxu1 %v14536_v17 }
 0x558   : > { %v5506_v28 = vpop.f32.mrb[18].mxu1 }
 0x559   : > { %v11693_v42 = vpop.f32.mrb[19].mxu1  ;;  %v14545_v46 = vrot.slane %v5506_v28, %v14539_v45  ;;  %v14549_v50 = vrot.slane %v5506_v28, %v16765_v34 }
 0x55b   : > { %v5514_v47 = vsub.f32 %v14247_v32, %v14545_v46  ;;  %v5515_v49 = vsub.f32 %v14255_v57, %v14545_v46  ;;  %v5516_v30 = vsub.f32 %v14244_v55, %v14545_v46  ;;  %v5517_v21 = vsub.f32 %v14252_v33, %v14545_v46 }
 0x55c   : > { %v5518_v24 = vsub.f32 %v14275_v15, %v14545_v46  ;;  %v5519_v62 = vsub.f32 %v14286_v36, %v14545_v46  ;;  %v5520_v19 = vsub.f32 %v14278_v25, %v14545_v46  ;;  %v5521_v32 = vsub.f32 %v14289_v37, %v14545_v46 }
 0x55d   : > { %v5522_v57 = vsub.f32 %v14306_v5, %v14545_v46  ;;  %v5523_v55 = vsub.f32 %v14317_v2, %v14545_v46  ;;  %v5524_v33 = vsub.f32 %v14310_v29, %v14545_v46  ;;  %v5525_v15 = vsub.f32 %v14321_v63, %v14545_v46 }
 0x55e   : > { %v5526_v36 = vsub.f32 %v14338_v20, %v14545_v46  ;;  %v5527_v25 = vsub.f32 %v14349_v61, %v14545_v46  ;;  %v5528_v37 = vsub.f32 %v14342_v60, %v14545_v46  ;;  %v5529_v5 = vsub.f32 %v14353_v52, %v14545_v46 }
 0x55f   : > { %v5530_v2 = vsub.f32 %v14377_v51, %v14545_v46  ;;  %v5531_v29 = vsub.f32 %v14389_v40, %v14545_v46  ;;  %v5532_v63 = vsub.f32 %v14371_v13, %v14545_v46  ;;  %v5533_v20 = vsub.f32 %v14386_v4, %v14545_v46 }
 0x560   : > { %v5534_v61 = vsub.f32 %v14413_v16, %v14545_v46  ;;  %v5535_v60 = vsub.f32 %v14422_v27, %v14545_v46  ;;  %v5536_v52 = vsub.f32 %v14410_v18, %v14545_v46  ;;  %v5537_v51 = vsub.f32 %v14425_v8, %v14545_v46 }
 0x561   : > { %v5538_v40 = vsub.f32 %v14445_v44, %v14545_v46  ;;  %v5539_v13 = vsub.f32 %v14457_v53, %v14545_v46  ;;  %v5540_v4 = vsub.f32 %v14450_v54, %v14545_v46  ;;  %v5541_v16 = vsub.f32 %v14461_v11, %v14545_v46 }
 0x562   : > { %v5542_v27 = vsub.f32 %v14481_v9, %v14545_v46  ;;  %v5543_v18 = vsub.f32 %v14493_v10, %v14545_v46  ;;  %v5544_v8 = vsub.f32 %v14486_v56, %v14545_v46  ;;  %v5545_v44 = vsub.f32 %v14497_v6, %v14545_v46 }
 0x563   : > { %v5550_v53 = vmul.f32 %v14549_v50, %v5514_v47  ;;  %v5551_v1 = vmul.f32 %v14549_v50, %v5515_v49  ;;  %v5552_v54 = vmul.f32 %v14549_v50, %v5516_v30  ;;  %v5553_v11 = vmul.f32 %v14549_v50, %v5517_v21 }
 0x564   : > { %v5554_v38 = vmul.f32 %v14549_v50, %v5518_v24  ;;  %v5555_v9 = vmul.f32 %v14549_v50, %v5519_v62  ;;  %v5556_v10 = vmul.f32 %v14549_v50, %v5520_v19  ;;  %v5557_v43 = vmul.f32 %v14549_v50, %v5521_v32  ;;  %v10765_v24 = vld [vmem:[%s16679_s5 + $0x1] ss:$0 sm:$0xff] }
 0x565   : > { %v5558_v56 = vmul.f32 %v14549_v50, %v5522_v57  ;;  %v5559_v6 = vmul.f32 %v14549_v50, %v5523_v55  ;;  %v5560_v0 = vmul.f32 %v14549_v50, %v5524_v33  ;;  %v5561_v28 = vmul.f32 %v14549_v50, %v5525_v15 }
 0x566   : > { %v5562_v42 = vmul.f32 %v14549_v50, %v5526_v36  ;;  %v5563_v23 = vmul.f32 %v14549_v50, %v5527_v25  ;;  %v5564_v48 = vmul.f32 %v14549_v50, %v5528_v37  ;;  %v5565_v46 = vmul.f32 %v14549_v50, %v5529_v5 }
 0x567   : > { %v5566_v47 = vmul.f32 %v14549_v50, %v5530_v2  ;;  %v5567_v49 = vmul.f32 %v14549_v50, %v5531_v29  ;;  %v5568_v30 = vmul.f32 %v14549_v50, %v5532_v63  ;;  %v5569_v21 = vmul.f32 %v14549_v50, %v5533_v20 }
 0x568   : > { %v5570_v62 = vmul.f32 %v14549_v50, %v5534_v61  ;;  %v5571_v19 = vmul.f32 %v14549_v50, %v5535_v60  ;;  %v5572_v32 = vmul.f32 %v14549_v50, %v5536_v52  ;;  %v5573_v57 = vmul.f32 %v14549_v50, %v5537_v51 }
 0x569   : > { %v5574_v55 = vmul.f32 %v14549_v50, %v5538_v40  ;;  %v5575_v33 = vmul.f32 %v14549_v50, %v5539_v13  ;;  %v5576_v15 = vmul.f32 %v14549_v50, %v5540_v4  ;;  %v5577_v36 = vmul.f32 %v14549_v50, %v5541_v16 }
 0x56a   : > { %v5578_v25 = vmul.f32 %v14549_v50, %v5542_v27  ;;  %v5579_v37 = vmul.f32 %v14549_v50, %v5543_v18  ;;  %v5580_v5 = vmul.f32 %v14549_v50, %v5544_v8  ;;  %v5581_v2 = vmul.f32 %v14549_v50, %v5545_v44  ;;  %v14656_v44 = vld [vmem:[%s16679_s5 + $0x2] ss:$0 sm:$0xff] }
 0x56b   : > { %v5586_v29 = vmul.f32 %v10765_v24, %v5550_v53  ;;  %v5587_v63 = vmul.f32 %v10765_v24, %v5551_v1  ;;  %v5588_v20 = vmul.f32 %v10765_v24, %v5552_v54  ;;  %v5589_v61 = vmul.f32 %v10765_v24, %v5553_v11 }
 0x56c   : > { %v5590_v60 = vmul.f32 %v10765_v24, %v5554_v38  ;;  %v5591_v52 = vmul.f32 %v10765_v24, %v5555_v9  ;;  %v5592_v51 = vmul.f32 %v10765_v24, %v5556_v10  ;;  %v5593_v40 = vmul.f32 %v10765_v24, %v5557_v43 }
 0x56d   : > { %v5594_v13 = vmul.f32 %v10765_v24, %v5558_v56  ;;  %v5595_v4 = vmul.f32 %v10765_v24, %v5559_v6  ;;  %v5596_v34 = vmul.f32 %v10765_v24, %v5560_v0  ;;  %v5597_v16 = vmul.f32 %v10765_v24, %v5561_v28 }
 0x56e   : > { %v5598_v58 = vmul.f32 %v10765_v24, %v5562_v42  ;;  %v5599_v27 = vmul.f32 %v10765_v24, %v5563_v23  ;;  %v5600_v45 = vmul.f32 %v10765_v24, %v5564_v48  ;;  %v5601_v18 = vmul.f32 %v10765_v24, %v5565_v46 }
 0x56f   : > { %v5602_v59 = vmul.f32 %v10765_v24, %v5566_v47  ;;  %v5603_v8 = vmul.f32 %v10765_v24, %v5567_v49  ;;  %v5604_v35 = vmul.f32 %v10765_v24, %v5568_v30  ;;  %v5605_v50 = vmul.f32 %v10765_v24, %v5569_v21 }
 0x570   : > { %v5606_v53 = vmul.f32 %v10765_v24, %v5570_v62  ;;  %v5607_v1 = vmul.f32 %v10765_v24, %v5571_v19  ;;  %v5608_v54 = vmul.f32 %v10765_v24, %v5572_v32  ;;  %v5609_v11 = vmul.f32 %v10765_v24, %v5573_v57 }
 0x571   : > { %v5610_v38 = vmul.f32 %v10765_v24, %v5574_v55  ;;  %v5611_v9 = vmul.f32 %v10765_v24, %v5575_v33  ;;  %v5612_v10 = vmul.f32 %v10765_v24, %v5576_v15  ;;  %v5613_v43 = vmul.f32 %v10765_v24, %v5577_v36 }
 0x572   : > { %v5614_v56 = vmul.f32 %v10765_v24, %v5578_v25  ;;  %v5615_v6 = vmul.f32 %v10765_v24, %v5579_v37  ;;  %v5616_v0 = vmul.f32 %v10765_v24, %v5580_v5  ;;  %v5617_v28 = vmul.f32 %v10765_v24, %v5581_v2  ;;  %v14679_v2 = vld [vmem:[%s14531_s18 + $0x1] ss:$0 sm:$0xff]  ;;  %s11042_s18 = sshll.u32 %s17083_s10, 8 }
 0x573   : > { %v5622_v42 = vadd.f32 %v14656_v44, %v5586_v29  ;;  %v5623_v23 = vadd.f32 %v14656_v44, %v5587_v63  ;;  %v5624_v48 = vadd.f32 %v14656_v44, %v5588_v20  ;;  %v5625_v46 = vadd.f32 %v14656_v44, %v5589_v61  ;;  %s16364_s21 = scalar_lea.vmem %s16683_s9, %s11042_s18 }
 0x574   : > { %v5626_v47 = vadd.f32 %v14656_v44, %v5590_v60  ;;  %v5627_v49 = vadd.f32 %v14656_v44, %v5591_v52  ;;  %v5628_v30 = vadd.f32 %v14656_v44, %v5592_v51  ;;  %v5629_v21 = vadd.f32 %v14656_v44, %v5593_v40 }
 0x575   : > { %v5630_v62 = vadd.f32 %v14656_v44, %v5594_v13  ;;  %v5631_v24 = vadd.f32 %v14656_v44, %v5595_v4  ;;  %v5632_v19 = vadd.f32 %v14656_v44, %v5596_v34  ;;  %v5633_v32 = vadd.f32 %v14656_v44, %v5597_v16 }
 0x576   : > { %v5634_v57 = vadd.f32 %v14656_v44, %v5598_v58  ;;  %v5635_v55 = vadd.f32 %v14656_v44, %v5599_v27  ;;  %v5636_v33 = vadd.f32 %v14656_v44, %v5600_v45  ;;  %v5637_v15 = vadd.f32 %v14656_v44, %v5601_v18 }
 0x577   : > { %v5638_v36 = vadd.f32 %v14656_v44, %v5602_v59  ;;  %v5659_v25 = vmul.f32 %v14552_v39, %v5622_v42  ;;  %v5660_v37 = vmul.f32 %v14552_v39, %v5623_v23  ;;  %v5661_v5 = vmul.f32 %v14552_v39, %v5624_v48 }
 0x578   : > { %v5639_v34 = vadd.f32 %v14656_v44, %v5603_v8  ;;  %v5640_v58 = vadd.f32 %v14656_v44, %v5604_v35  ;;  %v5641_v29 = vadd.f32 %v14656_v44, %v5605_v50  ;;  %v5662_v45 = vmul.f32 %v14552_v39, %v5625_v46 }
 0x579   : > { %v14686_v63 = vadd.f32 %v14656_v44, %v5606_v53  ;;  %v14689_v59 = vadd.f32 %v14656_v44, %v5607_v1  ;;  %v14692_v20 = vadd.f32 %v14656_v44, %v5608_v54  ;;  %v5663_v61 = vmul.f32 %v14552_v39, %v5626_v47 }
 0x57a   : > { %v14696_v60 = vadd.f32 %v14656_v44, %v5609_v11  ;;  %v14699_v35 = vadd.f32 %v14656_v44, %v5610_v38  ;;  %v14702_v52 = vadd.f32 %v14656_v44, %v5611_v9  ;;  %v5664_v51 = vmul.f32 %v14552_v39, %v5627_v49 }
 0x57b   : > { %v5665_v40 = vmul.f32 %v14552_v39, %v5628_v30  ;;  %v14707_v13 = vadd.f32 %v14679_v2, %v5659_v25  ;;  %v14710_v4 = vadd.f32 %v14679_v2, %v5660_v37  ;;  %v14713_v16 = vadd.f32 %v14679_v2, %v5661_v5 }
 0x57c   : > { %v14716_v27 = vadd.f32 %v14656_v44, %v5612_v10  ;;  %v14719_v18 = vadd.f32 %v14656_v44, %v5613_v43  ;;  %v5666_v8 = vmul.f32 %v14552_v39, %v5629_v21  ;;  %v14723_v50 = vadd.f32 %v14679_v2, %v5662_v45 }
 0x57d   : > { %v14726_v53 = vadd.f32 %v14656_v44, %v5614_v56  ;;  %v14729_v1 = vadd.f32 %v14656_v44, %v5615_v6  ;;  %v5667_v54 = vmul.f32 %v14552_v39, %v5630_v62  ;;  %v14733_v11 = vadd.f32 %v14679_v2, %v5663_v61 }
 0x57e   : > { %v14736_v38 = vadd.f32 %v14656_v44, %v5616_v0  ;;  %v5668_v9 = vmul.f32 %v14552_v39, %v5631_v24  ;;  %v5669_v10 = vmul.f32 %v14552_v39, %v5632_v19  ;;  %v14741_v43 = vadd.f32 %v14679_v2, %v5664_v51 }
 0x57f   : > { %v14744_v56 = vadd.f32 %v14679_v2, %v5665_v40  ;;  %v10768_v6 = vmul.f32 -1.442695, %v14707_v13  ;;  %v10769_v42 = vmul.f32 -1.442695, %v14710_v4  ;;  %v10770_v23 = vmul.f32 -1.442695, %v14713_v16 }
 0x580   : > { %v14750_v48 = vadd.f32 %v14656_v44, %v5617_v28  ;;  %v5670_v0 = vmul.f32 %v14552_v39, %v5633_v32  ;;  %v14754_v46 = vadd.f32 %v14679_v2, %v5666_v8  ;;  %v10771_v47 = vmul.f32 -1.442695, %v14723_v50 }
 0x581   : > { %v5671_v49 = vmul.f32 %v14552_v39, %v5634_v57  ;;  %v14759_v30 = vadd.f32 %v14679_v2, %v5667_v54  ;;  %12621 = vpow2.f32 %v10768_v6  ;;  %v10772_v21 = vmul.f32 -1.442695, %v14733_v11 }
 0x582   : > { %v5672_v62 = vmul.f32 %v14552_v39, %v5635_v55  ;;  %v14764_v44 = vadd.f32 %v14679_v2, %v5668_v9  ;;  %12623 = vpow2.f32 %v10769_v42  ;;  %v10773_v28 = vmul.f32 -1.442695, %v14741_v43 }
 0x583   : > { %v5673_v24 = vmul.f32 %v14552_v39, %v5636_v33  ;;  %v14769_v19 = vadd.f32 %v14679_v2, %v5669_v10  ;;  %12625 = vpow2.f32 %v10770_v23  ;;  %v10774_v32 = vmul.f32 -1.442695, %v14744_v56 }
 0x584   : > { %v5674_v57 = vmul.f32 %v14552_v39, %v5637_v15  ;;  %v14774_v25 = vadd.f32 %v14679_v2, %v5670_v0  ;;  %12627 = vpow2.f32 %v10771_v47  ;;  %v10775_v55 = vmul.f32 -1.442695, %v14754_v46 }
 0x585   : > { %v5675_v37 = vmul.f32 %v14552_v39, %v5638_v36  ;;  %v14779_v5 = vadd.f32 %v14679_v2, %v5671_v49  ;;  %12629 = vpow2.f32 %v10772_v21  ;;  %v10776_v33 = vmul.f32 -1.442695, %v14759_v30 }
 0x586   : > { %v5676_v45 = vmul.f32 %v14552_v39, %v5639_v34  ;;  %v14784_v61 = vadd.f32 %v14679_v2, %v5672_v62  ;;  %12631 = vpow2.f32 %v10773_v28  ;;  %v10777_v15 = vmul.f32 -1.442695, %v14764_v44 }
 0x587   : > { %v5677_v51 = vmul.f32 %v14552_v39, %v5640_v58  ;;  %v14789_v40 = vadd.f32 %v14679_v2, %v5673_v24  ;;  %12633 = vpow2.f32 %v10774_v32  ;;  %v10778_v36 = vmul.f32 -1.442695, %v14769_v19 }
 0x588   : > { %v5678_v8 = vmul.f32 %v14552_v39, %v5641_v29  ;;  %v14794_v54 = vadd.f32 %v14679_v2, %v5674_v57  ;;  %12635 = vpow2.f32 %v10775_v55  ;;  %v10779_v34 = vmul.f32 -1.442695, %v14774_v25 }
 0x589   : > { %v5679_v9 = vmul.f32 %v14552_v39, %v14686_v63  ;;  %v14800_v10 = vadd.f32 %v14679_v2, %v5675_v37  ;;  %12637 = vpow2.f32 %v10776_v33  ;;  %v10780_v58 = vmul.f32 -1.442695, %v14779_v5 }
 0x58a   : > { %v5680_v6 = vmul.f32 %v14552_v39, %v14689_v59  ;;  %v14806_v29 = vadd.f32 %v14679_v2, %v5676_v45  ;;  %12639 = vpow2.f32 %v10777_v15  ;;  %v10781_v42 = vmul.f32 -1.442695, %v14784_v61 }
 0x58b   : > { %v14809_v23 = vpop.eup %12621  ;;  %v5681_v63 = vmul.f32 %v14552_v39, %v14692_v20  ;;  %v14814_v0 = vadd.f32 %v14679_v2, %v5677_v51  ;;  %12641 = vpow2.f32 %v10778_v36  ;;  %v10782_v47 = vmul.f32 -1.442695, %v14789_v40 }
 0x58c   : > { %v14817_v49 = vpop.eup %12623  ;;  %v5682_v59 = vmul.f32 %v14552_v39, %v14696_v60  ;;  %v14822_v21 = vadd.f32 %v14679_v2, %v5678_v8  ;;  %12643 = vpow2.f32 %v10779_v34  ;;  %v10783_v62 = vmul.f32 -1.442695, %v14794_v54 }
 0x58d   : > { %v14825_v28 = vpop.eup %12625  ;;  %v5683_v20 = vmul.f32 %v14552_v39, %v14699_v35  ;;  %v14830_v24 = vadd.f32 %v14679_v2, %v5679_v9  ;;  %12645 = vpow2.f32 %v10780_v58  ;;  %v10784_v32 = vmul.f32 -1.442695, %v14800_v10 }
 0x58e   : > { %v14833_v57 = vpop.eup %12627  ;;  %v5684_v60 = vmul.f32 %v14552_v39, %v14702_v52  ;;  %v14838_v55 = vadd.f32 %v14679_v2, %v5680_v6  ;;  %12647 = vpow2.f32 %v10781_v42  ;;  %v10785_v37 = vmul.f32 -1.442695, %v14806_v29 }
 0x58f   : > { %v14841_v33 = vpop.eup %12629  ;;  %v5685_v35 = vmul.f32 %v14552_v39, %v14716_v27  ;;  %v14846_v45 = vadd.f32 %v14679_v2, %v5681_v63  ;;  %12649 = vpow2.f32 %v10782_v47  ;;  %v10786_v15 = vmul.f32 -1.442695, %v14814_v0 }
 0x590   : > { %v14849_v51 = vpop.eup %12631  ;;  %v5686_v52 = vmul.f32 %v14552_v39, %v14719_v18  ;;  %v14854_v36 = vadd.f32 %v14679_v2, %v5682_v59  ;;  %12651 = vpow2.f32 %v10783_v62  ;;  %v10787_v8 = vmul.f32 -1.442695, %v14822_v21 }
 0x591   : > { %v14857_v34 = vpop.eup %12633  ;;  %v5687_v27 = vmul.f32 %v14552_v39, %v14726_v53  ;;  %v14862_v9 = vadd.f32 %v14679_v2, %v5683_v20  ;;  %12653 = vpow2.f32 %v10784_v32  ;;  %v10788_v58 = vmul.f32 -1.442695, %v14830_v24 }
 0x592   : > { %v14865_v6 = vpop.eup %12635  ;;  %v5688_v18 = vmul.f32 %v14552_v39, %v14729_v1  ;;  %v14870_v42 = vadd.f32 %v14679_v2, %v5684_v60  ;;  %12655 = vpow2.f32 %v10785_v37  ;;  %v10789_v63 = vmul.f32 -1.442695, %v14838_v55 }
 0x593   : > { %v12638_v47 = vpop.eup %12637  ;;  %v5689_v53 = vmul.f32 %v14552_v39, %v14736_v38  ;;  %v14876_v59 = vadd.f32 %v14679_v2, %v5685_v35  ;;  %12657 = vpow2.f32 %v10786_v15  ;;  %v10790_v62 = vmul.f32 -1.442695, %v14846_v45 }
 0x594   : > { %v12640_v20 = vpop.eup %12639  ;;  %v5690_v1 = vmul.f32 %v14552_v39, %v14750_v48  ;;  %v14882_v32 = vadd.f32 %v14679_v2, %v5686_v52  ;;  %12659 = vpow2.f32 %v10787_v8  ;;  %v10791_v60 = vmul.f32 -1.442695, %v14854_v36 }
 0x595   : > { %16901 = vst [vmem:[#allocation48_spill] sm:$0xff] %v14876_v59  ;;  %v12642_v37 = vpop.eup %12641  ;;  %v14886_v3 = vadd.f32 %v14679_v2, %v5687_v27  ;;  %12661 = vpow2.f32 %v10788_v58  ;;  %v10792_v38 = vmul.f32 -1.442695, %v14862_v9  ;;  %v14890_v15 = vadd.f32 %v14679_v2, %v5688_v18 }
 0x596   : > { %16902 = vst [vmem:[#allocation50_spill] sm:$0xff] %v14882_v32  ;;  %v12644_v35 = vpop.eup %12643  ;;  %12663 = vpow2.f32 %v10789_v63  ;;  %v10793_v39 = vmul.f32 -1.442695, %v14870_v42  ;;  %v14894_v52 = vadd.f32 %v14679_v2, %v5689_v53  ;;  %v10794_v8 = vmul.f32 -1.442695, %v14876_v59 }
 0x597   : > { %16903 = vst [vmem:[#allocation49_spill] sm:$0xff] %v14886_v3  ;;  %16904 = vst [vmem:[#allocation40_spill] sm:$0xff] %v14890_v15  ;;  %v12646_v48 = vpop.eup %12645  ;;  %12665 = vpow2.f32 %v10790_v62  ;;  %v14898_v27 = vadd.f32 %v14679_v2, %v5690_v1  ;;  %v10795_v58 = vmul.f32 -1.442695, %v14882_v32  ;;  %v10796_v18 = vmul.f32 -1.442695, %v14886_v3 }
 0x598   : > { %16905 = vst [vmem:[#allocation41_spill] sm:$0xff] %v14894_v52  ;;  %v12648_v12 = vpop.eup %12647  ;;  %12667 = vpow2.f32 %v10791_v60  ;;  %v10797_v26 = vmul.f32 -1.442695, %v14890_v15  ;;  %v10798_v62 = vmul.f32 -1.442695, %v14894_v52  ;;  %v5823_v60 = vadd.f32 1.0, %v14809_v23 }
 0x599   : > { %16906 = vst [vmem:[#allocation42_spill] sm:$0xff] %v14898_v27  ;;  %v12650_v14 = vpop.eup %12649  ;;  %12669 = vpow2.f32 %v10792_v38  ;;  %v10799_v2 = vmul.f32 -1.442695, %v14898_v27  ;;  %v5824_v38 = vadd.f32 1.0, %v14817_v49  ;;  %v5832_v15 = vadd.f32 1.0, %v12640_v20 }
 0x59a   : > { %v12652_v63 = vpop.eup %12651  ;;  %12671 = vpow2.f32 %v10793_v39  ;;  %v5825_v39 = vadd.f32 1.0, %v14825_v28  ;;  %v5837_v20 = vadd.f32 1.0, %v12650_v14 }
 0x59b   : > { %v12654_v53 = vpop.eup %12653  ;;  %12673 = vpow2.f32 %v10794_v8  ;;  %v5826_v8 = vadd.f32 1.0, %v14833_v57 }
 0x59c   : > { %v12656_v22 = vpop.eup %12655  ;;  %12675 = vpow2.f32 %v10795_v58  ;;  %v5827_v58 = vadd.f32 1.0, %v14841_v33 }
 0x59d   : > { %v12658_v1 = vpop.eup %12657  ;;  %12677 = vpow2.f32 %v10796_v18  ;;  %v5828_v18 = vadd.f32 1.0, %v14849_v51  ;;  %v5834_v51 = vadd.f32 1.0, %v12644_v35  ;;  %v5840_v35 = vadd.f32 1.0, %v12656_v22 }
 0x59e   : > { %v12660_v7 = vpop.eup %12659  ;;  %12679 = vpow2.f32 %v10797_v26  ;;  %v5829_v26 = vadd.f32 1.0, %v14857_v34  ;;  %v5835_v34 = vadd.f32 1.0, %v12646_v48 }
 0x59f   : > { %v12662_v31 = vpop.eup %12661  ;;  %12681 = vpow2.f32 %v10798_v62  ;;  %v5830_v62 = vadd.f32 1.0, %v14865_v6  ;;  %v5836_v6 = vadd.f32 1.0, %v12648_v12  ;;  %v5842_v32 = vadd.f32 1.0, %v12660_v7 }
 0x5a0   : > { %v12664_v41 = vpop.eup %12663  ;;  %12683 = vpow2.f32 %v10799_v2  ;;  %v5831_v2 = vadd.f32 1.0, %v12638_v47  ;;  %v14919_v47 = vld [vmem:[#allocation3] sm:$0xf0]  ;;  %v5843_v17 = vadd.f32 1.0, %v12662_v31 }
 0x5a1   : > { %v12666_v52 = vpop.eup %12665  ;;  %12685 = vrcp.f32 %v5823_v60  ;;  %v5833_v60 = vadd.f32 1.0, %v12642_v37  ;;  %v6105_v37 = vrot.slane %v14919_v47, 4  ;;  %v5844_v59 = vadd.f32 1.0, %v12664_v41 }
 0x5a2   : > { %v12668_v27 = vpop.eup %12667  ;;  %12687 = vrcp.f32 %v5824_v38 }
 0x5a3   : > { %v12670_v23 = vpop.eup %12669  ;;  %12689 = vrcp.f32 %v5825_v39 }
 0x5a4   : > { %v12672_v49 = vpop.eup %12671  ;;  %12691 = vrcp.f32 %v5826_v8 }
 0x5a5   : > { %v12674_v28 = vpop.eup %12673  ;;  %12693 = vrcp.f32 %v5827_v58  ;;  %v5838_v58 = vadd.f32 1.0, %v12652_v63 }
 0x5a6   : > { %v12676_v57 = vpop.eup %12675  ;;  %12695 = vrcp.f32 %v5828_v18 }
 0x5a7   : > { %v12678_v33 = vpop.eup %12677  ;;  %12697 = vrcp.f32 %v5829_v26  ;;  %v5839_v26 = vadd.f32 1.0, %v12654_v53 }
 0x5a8   : > { %v14913_v3 = vpop.eup %12679  ;;  %12699 = vrcp.f32 %v5830_v62 }
 0x5a9   : > { %v14915_v38 = vpop.eup %12681  ;;  %12701 = vrcp.f32 %v5831_v2  ;;  %v5841_v2 = vadd.f32 1.0, %v12658_v1 }
 0x5aa   : > { %v14917_v39 = vpop.eup %12683  ;;  %12703 = vrcp.f32 %v5832_v15 }
 0x5ab   : > { %v12686_v8 = vpop.eup %12685  ;;  %12705 = vrcp.f32 %v5833_v60  ;;  %v5845_v60 = vadd.f32 1.0, %v12666_v52 }
 0x5ac   : > { %v12688_v18 = vpop.eup %12687  ;;  %12707 = vrcp.f32 %v5834_v51  ;;  %v5919_v62 = vmul.f32 %v12686_v8, %v14707_v13  ;;  %v5846_v13 = vadd.f32 1.0, %v12668_v27  ;;  %v5847_v8 = vadd.f32 1.0, %v12670_v23 }
 0x5ad   : > { %v12690_v48 = vpop.eup %12689  ;;  %12709 = vrcp.f32 %v5835_v34  ;;  %v5920_v12 = vmul.f32 %v12688_v18, %v14710_v4  ;;  %v5851_v18 = vadd.f32 1.0, %v12678_v33 }
 0x5ae   : > { %v12692_v15 = vpop.eup %12691  ;;  %12711 = vrcp.f32 %v5836_v6  ;;  %v5921_v14 = vmul.f32 %v12690_v48, %v14713_v16  ;;  %v5848_v16 = vadd.f32 1.0, %v12672_v49  ;;  %v5849_v6 = vadd.f32 1.0, %v12674_v28 }
 0x5af   : > { %v12694_v63 = vpop.eup %12693  ;;  %12713 = vrcp.f32 %v5837_v20  ;;  %v5922_v22 = vmul.f32 %v12692_v15, %v14723_v50  ;;  %v5951_v53 = vpack.c.bf16 %v5920_v12, %v5919_v62 }
 0x5b0   : > { %v12696_v51 = vpop.eup %12695  ;;  %12715 = vrcp.f32 %v5838_v58  ;;  %v5923_v7 = vmul.f32 %v12694_v63, %v14733_v11  ;;  %v5850_v58 = vadd.f32 1.0, %v12676_v57 }
 0x5b1   : > { %v12698_v1 = vpop.eup %12697  ;;  %12717 = vrcp.f32 %v5839_v26  ;;  %v5924_v31 = vmul.f32 %v12696_v51, %v14741_v43  ;;  %v5952_v41 = vpack.c.bf16 %v5922_v22, %v5921_v14  ;;  %v5983_v4 = vrot.slane %v5951_v53, 4 }
 0x5b2   : > { %v12700_v34 = vpop.eup %12699  ;;  %12719 = vrcp.f32 %v5840_v35  ;;  %v5925_v52 = vmul.f32 %v12698_v1, %v14744_v56  ;;  %v5854_v14 = vadd.f32 1.0, %v14917_v39 }
 0x5b3   : > { %v12702_v50 = vpop.eup %12701  ;;  %12721 = vrcp.f32 %v5841_v2  ;;  %v5926_v27 = vmul.f32 %v12700_v34, %v14754_v46  ;;  %v5953_v23 = vpack.c.bf16 %v5924_v31, %v5923_v7  ;;  %v5984_v20 = vrot.slane %v5952_v41, 4  ;;  %6031 = vst.msk [vmem:[#allocation3 + $0x8] sm:$0xf0] %vm394_vm8, %v5983_v4 }
 0x5b4   : > { %v12704_v11 = vpop.eup %12703  ;;  %12723 = vrcp.f32 %v5842_v32  ;;  %v5927_v43 = vmul.f32 %v12702_v50, %v14759_v30  ;;  %v5852_v46 = vadd.f32 1.0, %v14913_v3 }
 0x5b5   : > { %v12706_v26 = vpop.eup %12705  ;;  %12725 = vrcp.f32 %v5843_v17  ;;  %v5928_v49 = vmul.f32 %v12704_v11, %v14764_v44  ;;  %v5954_v28 = vpack.c.bf16 %v5926_v27, %v5925_v52  ;;  %v5985_v56 = vsel %vm1233_vm4, %v5983_v4, %v5984_v20 }
 0x5b6   : > { %v12708_v35 = vpop.eup %12707  ;;  %12727 = vrcp.f32 %v5844_v59  ;;  %v5929_v62 = vmul.f32 %v12706_v26, %v14769_v19  ;;  %v5986_v48 = vrot.slane %v5953_v23, 4  ;;  %6032 = vst.msk [vmem:[#allocation3 + $0x10] sm:$0xff] %vm390_vm7, %v5985_v56  ;;  %v5853_v44 = vadd.f32 1.0, %v14915_v38 }
 0x5b7   : > { %v12710_v57 = vpop.eup %12709  ;;  %12729 = vrcp.f32 %v5845_v60  ;;  %v5930_v30 = vmul.f32 %v12708_v35, %v14774_v25  ;;  %v5955_v32 = vpack.c.bf16 %v5928_v49, %v5927_v43  ;;  %v5988_v17 = vrot.slane %v5954_v28, 4 }
 0x5b8   : > { %v12712_v33 = vpop.eup %12711  ;;  %12731 = vrcp.f32 %v5846_v13  ;;  %v5931_v2 = vmul.f32 %v12710_v57, %v14779_v5  ;;  %v5987_v3 = vsel %vm1233_vm4, %v5984_v20, %v5986_v48 }
 0x5b9   : > { %v12714_v59 = vpop.eup %12713  ;;  %12733 = vrcp.f32 %v5847_v8  ;;  %v5932_v19 = vmul.f32 %v12712_v33, %v14784_v61  ;;  %v5956_v12 = vpack.c.bf16 %v5930_v30, %v5929_v62  ;;  %v5989_v15 = vsel %vm1233_vm4, %v5986_v48, %v5988_v17  ;;  %6033 = vst.msk [vmem:[#allocation3 + $0x18] sm:$0xff] %vm390_vm7, %v5987_v3  ;;  %v16909_v3 = vld [vmem:[#allocation48_spill] sm:$0xff] }
 0x5ba   : > { %v12716_v25 = vpop.eup %12715  ;;  %12735 = vrcp.f32 %v5848_v16  ;;  %v5933_v38 = vmul.f32 %v12714_v59, %v14789_v40  ;;  %v5990_v63 = vrot.slane %v5955_v32, 4  ;;  %6034 = vst.msk [vmem:[#allocation3 + $0x20] sm:$0xff] %vm390_vm7, %v5989_v15  ;;  %v14947_v5 = vld [vmem:[#allocation3 + $0x8] sm:$0xff] }
 0x5bb   : > { %v12718_v60 = vpop.eup %12717  ;;  %12737 = vrcp.f32 %v5849_v6  ;;  %v5934_v61 = vmul.f32 %v12716_v25, %v14794_v54  ;;  %v5957_v22 = vpack.c.bf16 %v5932_v19, %v5931_v2  ;;  %v5992_v53 = vrot.slane %v5956_v12, 4  ;;  %v16910_v19 = vld [vmem:[#allocation4_spill] sm:$0xff]  ;;  %v16911_v12 = vld [vmem:[#allocation50_spill] sm:$0xff] }
 0x5bc   : > { %v12720_v51 = vpop.eup %12719  ;;  %12739 = vrcp.f32 %v5850_v58  ;;  %v5935_v13 = vmul.f32 %v12718_v60, %v14800_v10  ;;  %v5991_v39 = vsel %vm1233_vm4, %v5988_v17, %v5990_v63  ;;  %v6106_v8 = vrot.slane %v14947_v5, 4  ;;  %v16912_v60 = vld [vmem:[#allocation49_spill] sm:$0xff] }
 0x5bd   : > { %v12722_v40 = vpop.eup %12721  ;;  %12741 = vrcp.f32 %v5851_v18  ;;  %v5936_v7 = vmul.f32 %v12720_v51, %v14806_v29  ;;  %v5958_v1 = vpack.c.bf16 %v5934_v61, %v5933_v38  ;;  %v5993_v31 = vsel %vm1233_vm4, %v5990_v63, %v5992_v53  ;;  %6035 = vst.msk [vmem:[#allocation3 + $0x28] sm:$0xff] %vm390_vm7, %v5991_v39  ;;  %v14963_v52 = vld [vmem:[#allocation3 + $0x10] sm:$0xff] }
 0x5be   : > { %v12724_v54 = vpop.eup %12723  ;;  %12743 = vrcp.f32 %v5852_v46  ;;  %v5937_v41 = vmul.f32 %v12722_v40, %v14814_v0  ;;  %v5994_v4 = vrot.slane %v5957_v22, 4  ;;  %6036 = vst.msk [vmem:[#allocation3 + $0x30] sm:$0xff] %vm390_vm7, %v5993_v31  ;;  %v6107_v10 = vsel %vm1233_vm4, %v6105_v37, %v6106_v8  ;;  %v14983_v46 = vld [vmem:[%s16677_s3 + $0x10] sm:$0xff]   ;;  %v16914_v31 = vld [vmem:[#allocation41_spill] sm:$0xff] }
 0x5bf   : > { %v12726_v34 = vpop.eup %12725  ;;  %12745 = vrcp.f32 %v5853_v44  ;;  %v5938_v29 = vmul.f32 %v12724_v54, %v14822_v21  ;;  %v5959_v16 = vpack.c.bf16 %v5936_v7, %v5935_v13  ;;  %v5996_v6 = vrot.slane %v5958_v1, 4  ;;  %11696 = vmatprep.mubr.msk.bf16.mxu1 %vm390_vm7, %v6107_v10  ;;  %v16913_v13 = vld [vmem:[#allocation40_spill] sm:$0xff] }
 0x5c0   : > { %v12728_v50 = vpop.eup %12727  ;;  %12747 = vrcp.f32 %v5854_v14  ;;  %v5939_v0 = vmul.f32 %v12726_v34, %v14830_v24  ;;  %v5995_v27 = vsel %vm1233_vm4, %v5992_v53, %v5994_v4  ;;  %v14967_v23 = vld [vmem:[#allocation3 + $0x18] sm:$0xff]  ;;  %v14975_v24 = vrot.slane %v14963_v52, 4 }
 0x5c1   : > { %v12730_v20 = vpop.eup %12729  ;;  %v5940_v37 = vmul.f32 %v12728_v50, %v14838_v55  ;;  %v5960_v11 = vpack.c.bf16 %v5938_v29, %v5937_v41  ;;  %v5997_v21 = vsel %vm1233_vm4, %v5994_v4, %v5996_v6  ;;  %v5998_v58 = vrot.slane %v5959_v16, 4  ;;  %6037 = vst.msk [vmem:[#allocation3 + $0x38] sm:$0xff] %vm390_vm7, %v5995_v27  ;;  %v14996_v44 = vld [vmem:[#allocation3 + $0x20] sm:$0xff]  ;;  %v16915_v41 = vld [vmem:[#allocation42_spill] sm:$0xff] }
 0x5c2   : > { %v12732_v18 = vpop.eup %12731  ;;  %v5941_v43 = vmul.f32 %v12730_v20, %v14846_v45  ;;  %6038 = vst.msk [vmem:[#allocation3 + $0x40] sm:$0xff] %vm390_vm7, %v5997_v21  ;;  %16907 = vst [vmem:[#allocation43_spill] sm:$0xff] %v14975_v24  ;;  %v6110_v26 = vrot.slane %v14967_v23, 4  ;;  %v6109_v48 = vsel %vm1233_vm4, %v6106_v8, %v14975_v24  ;;  %v6112_v22 = vrot.slane %v14996_v44, 4 }
 0x5c3   : > { %v12734_v49 = vpop.eup %12733  ;;  %v5942_v28 = vmul.f32 %v12732_v18, %v14854_v36  ;;  %v5961_v55 = vpack.c.bf16 %v5940_v37, %v5939_v0  ;;  %v5999_v56 = vsel %vm1233_vm4, %v5996_v6, %v5998_v58  ;;  %v6000_v35 = vrot.slane %v5960_v11, 4  ;;  %11697 = vmatmul.mubr.msk.bf16.vlgmr.msra.gmra.mrb[20].mxu1 %vm390_vm7, %v6109_v48 }
 0x5c4   : > { %v12736_v45 = vpop.eup %12735  ;;  %v5943_v62 = vmul.f32 %v12734_v49, %v14862_v9  ;;  %6039 = vst.msk [vmem:[#allocation3 + $0x48] sm:$0xff] %vm390_vm7, %v5999_v56  ;;  %v14991_v36 = vsel %vm1233_vm4, %v14975_v24, %v6110_v26  ;;  %v14998_v9 = vld [vmem:[#allocation3 + $0x28] sm:$0xff]  ;;  %11729 = vmatpush3.bf16.msra.mxu1 %v16910_v19  ;;  %v15020_v16 = vsel %vm1233_vm4, %v6110_v26, %v6112_v22 }
 0x5c5   : > { %16908 = vst [vmem:[#allocation45_spill] sm:$0xff] %v14991_v36  ;;  %v12738_v57 = vpop.eup %12737  ;;  %v5944_v30 = vmul.f32 %v12736_v45, %v14870_v42  ;;  %v5962_v32 = vpack.c.bf16 %v5942_v28, %v5941_v43  ;;  %v6001_v17 = vsel %vm1233_vm4, %v5998_v58, %v6000_v35  ;;  %v6002_v33 = vrot.slane %v5961_v55, 4  ;;  %11700 = vmatprep.mubr.msk.bf16.mxu1 %vm390_vm7, %v14991_v36  ;;  %v15028_v20 = vld [vmem:[#allocation3 + $0x30] sm:$0xff] }
 0x5c6   : > { %v12740_v2 = vpop.eup %12739  ;;  %v5945_v59 = vmul.f32 %v12738_v57, %v16909_v3  ;;  %6040 = vst.msk [vmem:[#allocation3 + $0x50] sm:$0xff] %vm390_vm7, %v6001_v17  ;;  %11762 = vmatprep.subr.bf16.mxu1 %v14983_v46  ;;  %v6114_v53 = vrot.slane %v14998_v9, 4  ;;  %16916 = vst [vmem:[#allocation44_spill] sm:$0xff] %v15020_v16  ;;  %v6116_v58 = vrot.slane %v15028_v20, 4 }
 0x5c7   : > { %v12742_v42 = vpop.eup %12741  ;;  %v5946_v15 = vmul.f32 %v12740_v2, %v16911_v12  ;;  %v5963_v25 = vpack.c.bf16 %v5944_v30, %v5943_v62  ;;  %v6003_v14 = vsel %vm1233_vm4, %v6000_v35, %v6002_v33  ;;  %v6004_v38 = vrot.slane %v5962_v32, 4  ;;  %v6048_v12 = vld [vmem:[#allocation3] sm:$0xf8] }
 0x5c8   : > { %v12744_v63 = vpop.eup %12743  ;;  %v5947_v61 = vmul.f32 %v12742_v42, %v16912_v60  ;;  %6041 = vst.msk [vmem:[#allocation3 + $0x58] sm:$0xff] %vm390_vm7, %v6003_v14  ;;  %v15026_v27 = vsel %vm1233_vm4, %v6112_v22, %v6114_v53  ;;  %v15033_v37 = vld [vmem:[#allocation3 + $0x38] sm:$0xff]  ;;  %v15043_v26 = vsel %vm1233_vm4, %v6114_v53, %v6116_v58  ;;  %v16932_v14 = vld [vmem:[#allocation7_spill] sm:$0xff]  ;;  %v16933_v60 = vld [vmem:[#allocation6_spill] sm:$0xff] }
 0x5c9   : > { %v12746_v51 = vpop.eup %12745  ;;  %v5948_v39 = vmul.f32 %v12744_v63, %v16913_v13  ;;  %v5964_v8 = vpack.c.bf16 %v5946_v15, %v5945_v59  ;;  %v6005_v40 = vsel %vm1233_vm4, %v6002_v33, %v6004_v38  ;;  %v6006_v7 = vrot.slane %v5963_v25, 4  ;;  %16917 = vst [vmem:[#allocation46_spill] sm:$0xff] %v15026_v27  ;;  %16918 = vst [vmem:[#allocation48_spill] sm:$0xff] %v15043_v26  ;;  %v15050_v28 = vld [vmem:[#allocation3 + $0x40] sm:$0xff] }
 0x5ca   : > { %v12748_v1 = vpop.eup %12747  ;;  %v5949_v54 = vmul.f32 %v12746_v51, %v16914_v31  ;;  %6042 = vst.msk [vmem:[#allocation3 + $0x60] sm:$0xff] %vm390_vm7, %v6005_v40  ;;  %v6118_v43 = vrot.slane %v15033_v37, 4  ;;  %v6120_v56 = vrot.slane %v15050_v28, 4  ;;  %v16935_v40 = vld [vmem:[#allocation8_spill] sm:$0xff] }
 0x5cb   : > { %v5950_v4 = vmul.f32 %v12748_v1, %v16915_v41  ;;  %v5965_v10 = vpack.c.bf16 %v5948_v39, %v5947_v61  ;;  %v6007_v34 = vsel %vm1233_vm4, %v6004_v38, %v6006_v7  ;;  %v6008_v29 = vrot.slane %v5964_v8, 4  ;;  %11701 = vmatmul.mubr.msk.bf16.gmra.mrb[24].mxu1 %vm390_vm7, %v15020_v16  ;;  %v15054_v55 = vld [vmem:[#allocation3 + $0x48] sm:$0xff] }
 0x5cc   : > { %6043 = vst.msk [vmem:[#allocation3 + $0x68] sm:$0xff] %vm390_vm7, %v6007_v34  ;;  %11704 = vmatprep.mubr.msk.bf16.mxu1 %vm390_vm7, %v15026_v27  ;;  %v15048_v49 = vsel %vm1233_vm4, %v6116_v58, %v6118_v43  ;;  %16920 = vst [vmem:[#allocation50_spill] sm:$0xff] %v15054_v55  ;;  %v6122_v35 = vrot.slane %v15054_v55, 4  ;;  %v15059_v45 = vsel %vm1233_vm4, %v6118_v43, %v6120_v56 }
 0x5cd   : > { %v5966_v6 = vpack.c.bf16 %v5950_v4, %v5949_v54  ;;  %v6009_v50 = vsel %vm1233_vm4, %v6006_v7, %v6008_v29  ;;  %v6010_v0 = vrot.slane %v5965_v10, 4  ;;  %16919 = vst [vmem:[#allocation4_spill] sm:$0xff] %v15048_v49  ;;  %16921 = vst [vmem:[#allocation49_spill] sm:$0xff] %v15059_v45  ;;  %v15066_v48 = vld [vmem:[#allocation3 + $0x50] sm:$0xff]  ;;  %v6066_v38 = vmul.bf16 %v14947_v5, %v16932_v14  ;;  %v16938_v10 = vld [vmem:[#allocation9_spill] sm:$0xff] }
 0x5ce   : > { %6044 = vst.msk [vmem:[#allocation3 + $0x70] sm:$0xff] %vm390_vm7, %v6009_v50  ;;  %v15064_v62 = vsel %vm1233_vm4, %v6120_v56, %v6122_v35  ;;  %16923 = vst [vmem:[#allocation41_spill] sm:$0xff] %v15066_v48  ;;  %v6124_v30 = vrot.slane %v15066_v48, 4  ;;  %v6065_v61 = vmul.bf16 %v6048_v12, %v16933_v60  ;;  %v6067_v7 = vmul.bf16 %v14963_v52, %v16935_v40 }
 0x5cf   : > { %v6011_v11 = vsel %vm1233_vm4, %v6008_v29, %v6010_v0  ;;  %v6012_v21 = vrot.slane %v5966_v6, 4  ;;  %16922 = vst [vmem:[#allocation40_spill] sm:$0xff] %v15064_v62  ;;  %v15070_v57 = vld [vmem:[#allocation3 + $0x58] sm:$0xff]  ;;  %v6362_v51 = vshrl.u32 %v6066_v38, 16  ;;  %v6365_v13 = vshll.u32 %v6066_v38, 16 }
 0x5d0   : > { %6045 = vst.msk [vmem:[#allocation3 + $0x78] sm:$0xff] %vm390_vm7, %v6011_v11  ;;  %16924 = vst [vmem:[#allocation42_spill] sm:$0xff] %v15070_v57  ;;  %v6126_v32 = vrot.slane %v15070_v57, 4  ;;  %v15075_v17 = vsel %vm1233_vm4, %v6122_v35, %v6124_v30  ;;  %v6354_v39 = vshrl.u32 %v6065_v61, 16  ;;  %v6357_v8 = vshll.u32 %v6065_v61, 16  ;;  %v16940_v61 = vld [vmem:[#allocation11_spill] sm:$0xff] }
 0x5d1   : > { %v6013_v18 = vsel %vm1233_vm4, %v6010_v0, %v6012_v21  ;;  %6047 = vst.msk [vmem:[#allocation3 + $0x88] sm:$0xf] %vm392_vm9, %v6012_v21  ;;  %16925 = vst [vmem:[#allocation51_spill] sm:$0xff] %v15075_v17  ;;  %v15082_v2 = vld [vmem:[#allocation3 + $0x60] sm:$0xff]  ;;  %v6364_v41 = vrot.slane %v6362_v51, 3  ;;  %v6367_v4 = vrot.slane %v6365_v13, 4  ;;  %v6068_v34 = vmul.bf16 %v14967_v23, %v16938_v10 }
 0x5d2   : > { %6046 = vst.msk [vmem:[#allocation3 + $0x80] sm:$0xff] %vm390_vm7, %v6013_v18  ;;  %v15080_v33 = vsel %vm1233_vm4, %v6124_v30, %v6126_v32  ;;  %16927 = vst [vmem:[#allocation53_spill] sm:$0xff] %v15082_v2  ;;  %v6128_v59 = vrot.slane %v15082_v2, 4  ;;  %v6356_v29 = vrot.slane %v6354_v39, 3  ;;  %v6359_v6 = vrot.slane %v6357_v8, 4 }
 0x5d3   : > { %11705 = vmatmul.mubr.msk.bf16.gmra.mrb[28].mxu1 %vm390_vm7, %v15043_v26  ;;  %16926 = vst [vmem:[#allocation52_spill] sm:$0xff] %v15080_v33  ;;  %v15086_v3 = vld [vmem:[#allocation3 + $0x68] sm:$0xff]  ;;  %v6371_v0 = vshrl.u32 %v6067_v7, 16  ;;  %v6374_v11 = vshll.u32 %v6067_v7, 16  ;;  %v6368_v21 = vor.u32 %v6367_v4, %v6364_v41  ;;  %v6380_v58 = vshrl.u32 %v6068_v34, 16  ;;  %v15141_v4 = vld [vmem:[%s16677_s3 + $0x18] sm:$0xff]  }
 0x5d4   : > { %11708 = vmatprep.mubr.msk.bf16.mxu1 %vm390_vm7, %v15048_v49  ;;  %16928 = vst [vmem:[#allocation54_spill] sm:$0xff] %v15086_v3  ;;  %v6130_v19 = vrot.slane %v15086_v3, 4  ;;  %v15091_v42 = vsel %vm1233_vm4, %v6126_v32, %v6128_v59  ;;  %v6383_v18 = vshll.u32 %v6068_v34, 16  ;;  %v6360_v43 = vor.u32 %v6359_v6, %v6356_v29  ;;  %v16939_v32 = vld [vmem:[#allocation10_spill] sm:$0xff] }
 0x5d5   : > { %16929 = vst [vmem:[#allocation55_spill] sm:$0xff] %v15091_v42  ;;  %v15098_v25 = vld [vmem:[#allocation3 + $0x70] sm:$0xff]  ;;  %v6373_v35 = vrot.slane %v6371_v0, 3  ;;  %v6376_v30 = vrot.slane %v6374_v11, 4  ;;  %v6382_v12 = vrot.slane %v6380_v58, 3 }
 0x5d6   : > { %v15096_v15 = vsel %vm1233_vm4, %v6128_v59, %v6130_v19  ;;  %16931 = vst [vmem:[#allocation57_spill] sm:$0xff] %v15098_v25  ;;  %v6132_v22 = vrot.slane %v15098_v25, 4  ;;  %v6069_v59 = vmul.bf16 %v14996_v44, %v16939_v32  ;;  %v6385_v38 = vrot.slane %v6383_v18, 4 }
 0x5d7   : > { %16930 = vst [vmem:[#allocation56_spill] sm:$0xff] %v15096_v15  ;;  %v15104_v63 = vld [vmem:[#allocation3 + $0x78] sm:$0xff]  ;;  %v6377_v51 = vor.u32 %v6376_v30, %v6373_v35 }
 0x5d8   : > { %v15109_v53 = vrot.slane %v15104_v63, 4  ;;  %v15114_v1 = vsel %vm1233_vm4, %v6130_v19, %v6132_v22  ;;  %v6369_v19 = vsel %vm1480_vm6, %v6360_v43, %v6368_v21  ;;  %v6389_v13 = vshrl.u32 %v6069_v59, 16  ;;  %v16942_v43 = vld [vmem:[#allocation13_spill] sm:$0xff] }
 0x5d9   : > { %16936 = vst [vmem:[#allocation6_spill] sm:$0xff] %v15114_v1  ;;  %v15122_v54 = vld [vmem:[#allocation3 + $0x80] sm:$0xf]  ;;  %v6392_v39 = vshll.u32 %v6069_v59, 16  ;;  %v6386_v8 = vor.u32 %v6385_v38, %v6382_v12  ;;  %v6378_v34 = vsel %vm1480_vm6, %v6368_v21, %v6377_v51 }
 0x5da   : > { %16934 = vst [vmem:[#allocation7_spill] sm:$0xff] %v15109_v53  ;;  %v15120_v31 = vsel %vm1233_vm4, %v6132_v22, %v15109_v53  ;;  %v6136_v50 = vrot.slane %v15122_v54, 4  ;;  %v6070_v22 = vmul.bf16 %v14998_v9, %v16940_v61  ;;  %v6391_v29 = vrot.slane %v6389_v13, 3  ;;  %v16943_v13 = vld [vmem:[#allocation14_spill] sm:$0xff] }
 0x5db   : > { %11709 = vmatmul.mubr.msk.bf16.gmra.mrb[32].mxu1 %vm390_vm7, %v15059_v45  ;;  %16937 = vst [vmem:[#allocation58_spill] sm:$0xff] %v15120_v31  ;;  %v6394_v6 = vrot.slane %v6392_v39, 4  ;;  %v6387_v11 = vsel %vm1480_vm6, %v6377_v51, %v6386_v8  ;;  %v6073_v39 = vmul.bf16 %v15050_v28, %v16943_v13 }
 0x5dc   : > { %11712 = vmatprep.mubr.msk.bf16.mxu1 %vm390_vm7, %v15064_v62  ;;  %v6137_v56 = vsel %vm1233_vm4, %v15109_v53, %v6136_v50  ;;  %v6398_v7 = vshrl.u32 %v6070_v22, 16  ;;  %v6401_v41 = vshll.u32 %v6070_v22, 16  ;;  %v16941_v50 = vld [vmem:[#allocation12_spill] sm:$0xff]  ;;  %v16954_v62 = vld [vmem:[#allocation25_spill] sm:$0xff] }
 0x5dd   : > { %v6071_v0 = vmul.bf16 %v15028_v20, %v16941_v50  ;;  %v6395_v21 = vor.u32 %v6394_v6, %v6391_v29 }
 0x5de   : > { %v6400_v58 = vrot.slane %v6398_v7, 3  ;;  %v6403_v18 = vrot.slane %v6401_v41, 4 }
 0x5df   : > { %v6407_v35 = vshrl.u32 %v6071_v0, 16  ;;  %v6410_v30 = vshll.u32 %v6071_v0, 16  ;;  %v6396_v38 = vsel %vm1480_vm6, %v6386_v8, %v6395_v21  ;;  %v6425_v0 = vshrl.u32 %v6073_v39, 16 }
 0x5e0   : > { %v6404_v59 = vor.u32 %v6403_v18, %v6400_v58 }
 0x5e1   : > { %v6409_v22 = vrot.slane %v6407_v35, 3  ;;  %v6412_v51 = vrot.slane %v6410_v30, 4  ;;  %v6427_v35 = vrot.slane %v6425_v0, 3 }
 0x5e3   : > { %11713 = vmatmul.mubr.msk.bf16.gmra.mrb[36].mxu1 %vm390_vm7, %v15075_v17  ;;  %v6413_v6 = vor.u32 %v6412_v51, %v6409_v22 }
 0x5e4   : > { %11716 = vmatprep.mubr.msk.bf16.mxu1 %vm390_vm7, %v15080_v33 }
 0x5eb   : > { %11717 = vmatmul.mubr.msk.bf16.gmra.mrb[40].mxu1 %vm390_vm7, %v15091_v42 }
 0x5ec   : > { %11720 = vmatprep.mubr.msk.bf16.mxu1 %vm390_vm7, %v15096_v15 }
 0x5f3   : > { %11721 = vmatmul.mubr.msk.bf16.gmra.mrb[44].mxu1 %vm390_vm7, %v15114_v1 }
 0x5f4   : > { %11724 = vmatprep.mubr.msk.bf16.mxu1 %vm390_vm7, %v15120_v31 }
 0x5fb   : > { %11725 = vmatmul.mubr.msk.bf16.gmra.mrb[48].mxu1 %vm390_vm7, %v6137_v56  ;;  %v6072_v56 = vmul.bf16 %v15033_v37, %v16942_v43 }
 0x5fc   : > { %11730 = vmatprep.mubr.msk.bf16.mxu1 %vm390_vm7, %v6369_v19 }
 0x5fd   : > { %v6416_v19 = vshrl.u32 %v6072_v56, 16  ;;  %v6419_v12 = vshll.u32 %v6072_v56, 16  ;;  %v6414_v56 = vsel %vm1480_vm6, %v6404_v59, %v6413_v6 }
 0x5ff   : > { %v6418_v7 = vrot.slane %v6416_v19, 3  ;;  %v6421_v41 = vrot.slane %v6419_v12, 4 }
 0x601   : > { %v6422_v8 = vor.u32 %v6421_v41, %v6418_v7 }
 0x603   : > { %11731 = vmatmul.mubr.msk.bf16.vlgmr.msra.gmra.mrb[20].mxu1 %vm390_vm7, %v6378_v34  ;;  %v16944_v34 = vld [vmem:[#allocation15_spill] sm:$0xff]  ;;  %v6423_v19 = vsel %vm1480_vm6, %v6413_v6, %v6422_v8 }
 0x604   : > { %11763 = vmatpush3.bf16.msra.mxu1 %v14983_v46  ;;  %11734 = vmatprep.mubr.msk.bf16.mxu1 %vm390_vm7, %v6387_v11  ;;  %v6405_v46 = vsel %vm1480_vm6, %v6395_v21, %v6404_v59  ;;  %v6074_v29 = vmul.bf16 %v15054_v55, %v16944_v34  ;;  %v6428_v11 = vshll.u32 %v6073_v39, 16 }
 0x605   : > { %11796 = vmatprep.subr.bf16.mxu1 %v15141_v4 }
 0x606   : > { %v6434_v58 = vshrl.u32 %v6074_v29, 16  ;;  %v6437_v18 = vshll.u32 %v6074_v29, 16  ;;  %v6430_v30 = vrot.slane %v6428_v11, 4 }
 0x608   : > { %v6436_v12 = vrot.slane %v6434_v58, 3  ;;  %v6439_v31 = vrot.slane %v6437_v18, 4  ;;  %v6431_v51 = vor.u32 %v6430_v30, %v6427_v35 }
 0x60a   : > { %v6440_v59 = vor.u32 %v6439_v31, %v6436_v12  ;;  %v6432_v0 = vsel %vm1480_vm6, %v6422_v8, %v6431_v51 }
 0x60b   : > { %11735 = vmatmul.mubr.msk.bf16.gmra.mrb[24].mxu1 %vm390_vm7, %v6396_v38  ;;  %v16945_v38 = vld [vmem:[#allocation16_spill] sm:$0xff] }
 0x60c   : > { %11738 = vmatprep.mubr.msk.bf16.mxu1 %vm390_vm7, %v6405_v46  ;;  %v6075_v21 = vmul.bf16 %v15066_v48, %v16945_v38  ;;  %v16946_v46 = vld [vmem:[#allocation17_spill] sm:$0xff]  ;;  %v6441_v58 = vsel %vm1480_vm6, %v6431_v51, %v6440_v59 }
 0x60d   : > { %v6076_v22 = vmul.bf16 %v15070_v57, %v16946_v46  ;;  %v6720_v46 = vld [vmem:[#allocation3 + $0x80] sm:$0x1f] }
 0x60e   : > { %v6443_v39 = vshrl.u32 %v6075_v21, 16  ;;  %v6446_v7 = vshll.u32 %v6075_v21, 16 }
 0x60f   : > { %v6452_v41 = vshrl.u32 %v6076_v22, 16  ;;  %v6455_v29 = vshll.u32 %v6076_v22, 16 }
 0x610   : > { %v6445_v11 = vrot.slane %v6443_v39, 3  ;;  %v6448_v53 = vrot.slane %v6446_v7, 4 }
 0x611   : > { %v6454_v18 = vrot.slane %v6452_v41, 3  ;;  %v6457_v1 = vrot.slane %v6455_v29, 4 }
 0x612   : > { %v6449_v31 = vor.u32 %v6448_v53, %v6445_v11 }
 0x613   : > { %11739 = vmatmul.mubr.msk.bf16.gmra.mrb[28].mxu1 %vm390_vm7, %v6414_v56  ;;  %v16947_v56 = vld [vmem:[#allocation18_spill] sm:$0xff]  ;;  %v6458_v8 = vor.u32 %v6457_v1, %v6454_v18 }
 0x614   : > { %11742 = vmatprep.mubr.msk.bf16.mxu1 %vm390_vm7, %v6423_v19  ;;  %v6077_v6 = vmul.bf16 %v15082_v2, %v16947_v56  ;;  %v16948_v19 = vld [vmem:[#allocation19_spill] sm:$0xff]  ;;  %v6450_v39 = vsel %vm1480_vm6, %v6440_v59, %v6449_v31 }
 0x615   : > { %v6078_v35 = vmul.bf16 %v15086_v3, %v16948_v19  ;;  %v6459_v41 = vsel %vm1480_vm6, %v6449_v31, %v6458_v8 }
 0x616   : > { %v6461_v30 = vshrl.u32 %v6077_v6, 16  ;;  %v6464_v21 = vshll.u32 %v6077_v6, 16 }
 0x617   : > { %v6470_v12 = vshrl.u32 %v6078_v35, 16  ;;  %v6473_v22 = vshll.u32 %v6078_v35, 16 }
 0x618   : > { %v6463_v7 = vrot.slane %v6461_v30, 3  ;;  %v6466_v15 = vrot.slane %v6464_v21, 4  ;;  %v16951_v30 = vld [vmem:[#allocation21_spill] sm:$0xff] }
 0x619   : > { %v6472_v29 = vrot.slane %v6470_v12, 3  ;;  %v6475_v42 = vrot.slane %v6473_v22, 4  ;;  %v6081_v21 = vmul.bf16 %v15122_v54, %v16951_v30  ;;  %v16964_v30 = vld [vmem:[#allocation34_spill] sm:$0xff] }
 0x61a   : > { %v6467_v1 = vor.u32 %v6466_v15, %v6463_v7 }
 0x61b   : > { %11743 = vmatmul.mubr.msk.bf16.gmra.mrb[32].mxu1 %vm390_vm7, %v6432_v0  ;;  %v16949_v0 = vld [vmem:[#allocation20_spill] sm:$0xff]  ;;  %v6476_v59 = vor.u32 %v6475_v42, %v6472_v29  ;;  %v16953_v42 = vld [vmem:[#allocation23_spill] sm:$0xff]  ;;  %v6497_v54 = vshrl.u32 %v6081_v21, 16  ;;  %v6500_v29 = vshll.u32 %v6081_v21, 16 }
 0x61c   : > { %11746 = vmatprep.mubr.msk.bf16.mxu1 %vm390_vm7, %v6441_v58  ;;  %v6079_v51 = vmul.bf16 %v15098_v25, %v16949_v0  ;;  %v16950_v58 = vld [vmem:[#allocation22_spill] sm:$0xff]  ;;  %v6721_v7 = vmul.bf16 %v14919_v47, %v16953_v42 }
 0x61d   : > { %v6080_v53 = vmul.bf16 %v15104_v63, %v16950_v58  ;;  %v6477_v12 = vsel %vm1480_vm6, %v6467_v1, %v6476_v59 }
 0x61e   : > { %v6479_v11 = vshrl.u32 %v6079_v51, 16  ;;  %v6482_v6 = vshll.u32 %v6079_v51, 16 }
 0x61f   : > { %v6488_v18 = vshrl.u32 %v6080_v53, 16  ;;  %v6491_v35 = vshll.u32 %v6080_v53, 16 }
 0x620   : > { %v6481_v33 = vrot.slane %v6479_v11, 3  ;;  %v6484_v31 = vrot.slane %v6482_v6, 4  ;;  %v6742_v6 = vshrl.u32 %v6721_v7, 16 }
 0x621   : > { %v6490_v22 = vrot.slane %v6488_v18, 3  ;;  %v6493_v17 = vrot.slane %v6491_v35, 4  ;;  %v6499_v35 = vrot.slane %v6497_v54, 3 }
 0x622   : > { %v6485_v51 = vor.u32 %v6484_v31, %v6481_v33  ;;  %v16955_v31 = vld [vmem:[#allocation26_spill] sm:$0xff]  ;;  %v6744_v21 = vrot.slane %v6742_v6, 4 }
 0x623   : > { %11747 = vmatmul.mubr.msk.bf16.gmra.mrb[36].mxu1 %vm390_vm7, %v6450_v39  ;;  %v6468_v39 = vsel %vm1480_vm6, %v6458_v8, %v6467_v1  ;;  %v6494_v8 = vor.u32 %v6493_v17, %v6490_v22  ;;  %v6723_v1 = vmul.bf16 %v14963_v52, %v16954_v62  ;;  %v6724_v17 = vmul.bf16 %v14967_v23, %v16955_v31 }
 0x624   : > { %11750 = vmatprep.mubr.msk.bf16.mxu1 %vm390_vm7, %v6459_v41  ;;  %v16952_v41 = vld [vmem:[#allocation24_spill] sm:$0xff]  ;;  %v6486_v18 = vsel %vm1480_vm6, %v6476_v59, %v6485_v51 }
 0x625   : > { %v6722_v15 = vmul.bf16 %v14947_v5, %v16952_v41  ;;  %v6502_v5 = vrot.slane %v6500_v29, 4  ;;  %v6762_v42 = vshll.u32 %v6723_v1, 16  ;;  %v6768_v59 = vshrl.u32 %v6724_v17, 16 }
 0x626   : > { %v6771_v54 = vshll.u32 %v6724_v17, 16 }
 0x627   : > { %v6750_v53 = vshrl.u32 %v6722_v15, 16  ;;  %v6753_v11 = vshll.u32 %v6722_v15, 16  ;;  %v6503_v15 = vor.u32 %v6502_v5, %v6499_v35  ;;  %v6770_v6 = vrot.slane %v6768_v59, 4  ;;  %v16957_v35 = vld [vmem:[#allocation28_spill] sm:$0xff] }
 0x629   : > { %v6752_v47 = vrot.slane %v6750_v53, 4  ;;  %v6755_v33 = vrot.slane %v6753_v11, 5  ;;  %v16956_v53 = vld [vmem:[#allocation27_spill] sm:$0xff] }
 0x62a   : > { %v6725_v11 = vmul.bf16 %v14996_v44, %v16956_v53 }
 0x62b   : > { %11751 = vmatmul.mubr.msk.bf16.gmra.mrb[40].mxu1 %vm390_vm7, %v6468_v39  ;;  %v6745_v39 = vshll.u32 %v6721_v7, 16  ;;  %v6759_v7 = vshrl.u32 %v6723_v1, 16  ;;  %v6756_v45 = vor.u32 %v6755_v33, %v6752_v47  ;;  %v6726_v1 = vmul.bf16 %v14998_v9, %v16957_v35 }
 0x62c   : > { %11754 = vmatprep.mubr.msk.bf16.mxu1 %vm390_vm7, %v6477_v12  ;;  %v6495_v12 = vsel %vm1480_vm6, %v6485_v51, %v6494_v8  ;;  %v6764_v51 = vrot.slane %v6762_v42, 5  ;;  %v6777_v47 = vshrl.u32 %v6725_v11, 16  ;;  %v6780_v33 = vshll.u32 %v6725_v11, 16 }
 0x62d   : > { %v6747_v22 = vrot.slane %v6745_v39, 5  ;;  %v6761_v49 = vrot.slane %v6759_v7, 4  ;;  %v6773_v39 = vrot.slane %v6771_v54, 5  ;;  %v6786_v17 = vshrl.u32 %v6726_v1, 16 }
 0x62e   : > { %v6789_v42 = vshll.u32 %v6726_v1, 16  ;;  %v6779_v59 = vrot.slane %v6777_v47, 4  ;;  %v6782_v54 = vrot.slane %v6780_v33, 5 }
 0x62f   : > { %v6748_v29 = vor.u32 %v6747_v22, %v6744_v21  ;;  %v6765_v5 = vor.u32 %v6764_v51, %v6761_v49  ;;  %v16958_v21 = vld [vmem:[#allocation29_spill] sm:$0xff]  ;;  %v6788_v51 = vrot.slane %v6786_v17, 4 }
 0x630   : > { %v6727_v22 = vmul.bf16 %v15028_v20, %v16958_v21  ;;  %v6791_v11 = vrot.slane %v6789_v42, 5  ;;  %v6783_v1 = vor.u32 %v6782_v54, %v6779_v59  ;;  %v16963_v17 = vld [vmem:[#allocation33_spill] sm:$0xff]  ;;  %v6732_v59 = vmul.bf16 %v15070_v57, %v16964_v30 }
 0x631   : > { %v6766_v7 = vsel %vm1034_vm5, %v6756_v45, %v6765_v5  ;;  %v6731_v42 = vmul.bf16 %v15066_v48, %v16963_v17  ;;  %v16968_v48 = vld [vmem:[#allocation39_spill] sm:$0xff] }
 0x632   : > { %v6792_v26 = vor.u32 %v6791_v11, %v6788_v51  ;;  %v16965_v51 = vld [vmem:[#allocation35_spill] sm:$0xff]  ;;  %v6843_v38 = vshll.u32 %v6732_v59, 16 }
 0x633   : > { %11755 = vmatmul.mubr.msk.bf16.gmra.mrb[44].mxu1 %vm390_vm7, %v6486_v18  ;;  %v6504_v18 = vsel %vm1480_vm6, %v6494_v8, %v6503_v15  ;;  %v6774_v8 = vor.u32 %v6773_v39, %v6770_v6  ;;  %v15216_v15 = vld [vmem:[%s16677_s3 + $0x20] sm:$0xff]   ;;  %v6798_v6 = vshll.u32 %v6727_v22, 16  ;;  %v16961_v39 = vld [vmem:[#allocation31_spill] sm:$0xff]  ;;  %v6733_v11 = vmul.bf16 %v15082_v2, %v16965_v51 }
 0x634   : > { %11758 = vmatprep.mubr.msk.bf16.mxu1 %vm390_vm7, %v6495_v12  ;;  %v6757_v12 = vsel %vm1034_vm5, %v6748_v29, %v6756_v45  ;;  %16959 = vst [vmem:[#allocation12_spill] sm:$0xff] %v15216_v15  ;;  %v16960_v29 = vld [vmem:[#allocation30_spill] sm:$0xff]  ;;  %v6729_v45 = vmul.bf16 %v15050_v28, %v16961_v39  ;;  %v6793_v54 = vsel %vm1034_vm5, %v6783_v1, %v6792_v26  ;;  %v6834_v56 = vshll.u32 %v6731_v42, 16 }
 0x635   : > { %v6728_v49 = vmul.bf16 %v15033_v37, %v16960_v29  ;;  %v6800_v27 = vrot.slane %v6798_v6, 5  ;;  %v6849_v2 = vshrl.u32 %v6733_v11, 16  ;;  %v6852_v34 = vshll.u32 %v6733_v11, 16 }
 0x636   : > { %v6816_v16 = vshll.u32 %v6729_v45, 16 }
 0x637   : > { %v6804_v47 = vshrl.u32 %v6728_v49, 16  ;;  %v6807_v33 = vshll.u32 %v6728_v49, 16 }
 0x638   : > { %v6818_v58 = vrot.slane %v6816_v16, 5 }
 0x639   : > { %v6806_v36 = vrot.slane %v6804_v47, 4  ;;  %v6809_v24 = vrot.slane %v6807_v33, 5 }
 0x63b   : > { %11759 = vmatmul.mubr.msk.bf16.gmra.mrb[48].mxu1 %vm390_vm7, %v6504_v18  ;;  %v6775_v18 = vsel %vm1034_vm5, %v6765_v5, %v6774_v8  ;;  %v6810_v19 = vor.u32 %v6809_v24, %v6806_v36 }
 0x63c   : > { %11764 = vmatprep.mubr.msk.bf16.mxu1 %vm390_vm7, %v6757_v12  ;;  %v6795_v12 = vshrl.u32 %v6727_v22, 16  ;;  %v6784_v22 = vsel %vm1034_vm5, %v6774_v8, %v6783_v1  ;;  %v6840_v1 = vshrl.u32 %v6732_v59, 16  ;;  %v7140_v59 = vld [vmem:[#allocation3 + $0x8] sm:$0xf8] }
 0x643   : > { %11765 = vmatmul.mubr.msk.bf16.vlgmr.msra.gmra.mrb[20].mxu1 %vm390_vm7, %v6766_v7  ;;  %v16962_v7 = vld [vmem:[#allocation32_spill] sm:$0xff] }
 0x644   : > { %11797 = vmatpush3.bf16.msra.mxu1 %v15141_v4  ;;  %11768 = vmatprep.mubr.msk.bf16.mxu1 %vm390_vm7, %v6775_v18  ;;  %v6730_v5 = vmul.bf16 %v15054_v55, %v16962_v7  ;;  %v6797_v4 = vrot.slane %v6795_v12, 4  ;;  %v6813_v18 = vshrl.u32 %v6729_v45, 16  ;;  %v16966_v12 = vld [vmem:[#allocation36_spill] sm:$0xff]  ;;  %v16967_v45 = vld [vmem:[#allocation37_spill] sm:$0xff] }
 0x645   : > { %11830 = vmatprep.subr.bf16.mxu1 %v15216_v15  ;;  %v6734_v6 = vmul.bf16 %v15086_v3, %v16966_v12  ;;  %v6735_v8 = vmul.bf16 %v15098_v25, %v16967_v45  ;;  %v6845_v45 = vrot.slane %v6843_v38, 5 }
 0x646   : > { %v6822_v49 = vshrl.u32 %v6730_v5, 16  ;;  %v6801_v47 = vor.u32 %v6800_v27, %v6797_v4  ;;  %v6815_v33 = vrot.slane %v6813_v18, 4  ;;  %v6825_v0 = vshll.u32 %v6730_v5, 16  ;;  %v16969_v5 = vld [vmem:[#allocation38_spill] sm:$0xff] }
 0x647   : > { %v6858_v3 = vshrl.u32 %v6734_v6, 16  ;;  %v6861_v55 = vshll.u32 %v6734_v6, 16  ;;  %v6867_v13 = vshrl.u32 %v6735_v8, 16  ;;  %v6870_v16 = vshll.u32 %v6735_v8, 16 }
 0x648   : > { %v6824_v57 = vrot.slane %v6822_v49, 4  ;;  %v6802_v27 = vsel %vm1034_vm5, %v6792_v26, %v6801_v47  ;;  %v6827_v4 = vrot.slane %v6825_v0, 5  ;;  %v6737_v24 = vmul.bf16 %v6720_v46, %v16969_v5 }
 0x649   : > { %v6811_v36 = vsel %vm1034_vm5, %v6801_v47, %v6810_v19  ;;  %v6836_v18 = vrot.slane %v6834_v56, 5  ;;  %v6842_v49 = vrot.slane %v6840_v1, 4  ;;  %v6854_v6 = vrot.slane %v6852_v34, 5 }
 0x64a   : > { %v6860_v26 = vrot.slane %v6858_v3, 4  ;;  %v6863_v0 = vrot.slane %v6861_v55, 5  ;;  %v6869_v8 = vrot.slane %v6867_v13, 4  ;;  %v6872_v25 = vrot.slane %v6870_v16, 5  ;;  %v15254_v16 = vld [vmem:[#allocation3 + $0x18] sm:$0xff] }
 0x64b   : > { %11769 = vmatmul.mubr.msk.bf16.gmra.mrb[24].mxu1 %vm390_vm7, %v6784_v22  ;;  %v6831_v22 = vshrl.u32 %v6731_v42, 16  ;;  %v6885_v46 = vshrl.u32 %v6737_v24, 16  ;;  %v6888_v5 = vshll.u32 %v6737_v24, 16  ;;  %v7157_v47 = vmul.bf16 %v7140_v59, %v16933_v60  ;;  %16970 = vst [vmem:[#allocation13_spill] sm:$0xff] %v15254_v16 }
 0x64c   : > { %11772 = vmatprep.mubr.msk.bf16.mxu1 %vm390_vm7, %v6793_v54  ;;  %v6736_v54 = vmul.bf16 %v15104_v63, %v16968_v48  ;;  %v6851_v63 = vrot.slane %v6849_v2, 4  ;;  %v6819_v56 = vor.u32 %v6818_v58, %v6815_v33  ;;  %v7158_v2 = vmul.bf16 %v14963_v52, %v16932_v14  ;;  %v15259_v33 = vld [vmem:[#allocation3 + $0x20] sm:$0xff] }
 0x64d   : > { %v6833_v42 = vrot.slane %v6831_v22, 4  ;;  %v6828_v22 = vor.u32 %v6827_v4, %v6824_v57  ;;  %v6873_v34 = vor.u32 %v6872_v25, %v6869_v8  ;;  %v6887_v3 = vrot.slane %v6885_v46, 4  ;;  %16971 = vst [vmem:[#allocation24_spill] sm:$0xff] %v15259_v33  ;;  %v15288_v8 = vld [vmem:[#allocation3 + $0x40] sm:$0xff]  ;;  %v15290_v46 = vld [vmem:[#allocation3 + $0x48] sm:$0xff] }
 0x64e   : > { %v6876_v11 = vshrl.u32 %v6736_v54, 16  ;;  %v6879_v48 = vshll.u32 %v6736_v54, 16  ;;  %v6846_v54 = vor.u32 %v6845_v45, %v6842_v49  ;;  %v6890_v55 = vrot.slane %v6888_v5, 5  ;;  %16975 = vst [vmem:[#allocation28_spill] sm:$0xff] %v15288_v8 }
 0x64f   : > { %v6837_v38 = vor.u32 %v6836_v18, %v6833_v42  ;;  %v7178_v13 = vshrl.u32 %v7157_v47, 16  ;;  %v6820_v24 = vsel %vm1034_vm5, %v6810_v19, %v6819_v56  ;;  %v7181_v59 = vshll.u32 %v7157_v47, 16  ;;  %v15267_v19 = vld [vmem:[#allocation3 + $0x28] sm:$0xff] }
 0x650   : > { %v6878_v1 = vrot.slane %v6876_v11, 4  ;;  %v6881_v15 = vrot.slane %v6879_v48, 5  ;;  %v6829_v48 = vsel %vm1034_vm5, %v6819_v56, %v6828_v22  ;;  %v7186_v58 = vshrl.u32 %v7158_v2, 16  ;;  %16972 = vst [vmem:[#allocation25_spill] sm:$0xff] %v15267_v19  ;;  %v15280_v11 = vld [vmem:[#allocation3 + $0x38] sm:$0xff] }
 0x651   : > { %v7189_v52 = vshll.u32 %v7158_v2, 16  ;;  %v6838_v25 = vsel %vm1034_vm5, %v6828_v22, %v6837_v38  ;;  %v6847_v45 = vsel %vm1034_vm5, %v6837_v38, %v6846_v54  ;;  %v16805_v5 = vrot.slane %v15254_v16, 4  ;;  %16974 = vst [vmem:[#allocation27_spill] sm:$0xff] %v15280_v11  ;;  %v15296_v2 = vld [vmem:[#allocation3 + $0x50] sm:$0xff]  ;;  %v15298_v38 = vld [vmem:[#allocation3 + $0x58] sm:$0xff] }
 0x652   : > { %v6882_v57 = vor.u32 %v6881_v15, %v6878_v1  ;;  %v6891_v18 = vor.u32 %v6890_v55, %v6887_v3  ;;  %v15276_v49 = vrot.slane %v7178_v13, 3  ;;  %v8757_v47 = vrot.slane %v15259_v33, 4  ;;  %v15315_v3 = vld [vmem:[#allocation3 + $0x60] sm:$0xff]  ;;  %v15317_v55 = vld [vmem:[#allocation3 + $0x68] sm:$0xff] }
 0x653   : > { %11773 = vmatmul.mubr.msk.bf16.gmra.mrb[28].mxu1 %vm390_vm7, %v6802_v27  ;;  %v6855_v27 = vor.u32 %v6854_v6, %v6851_v63  ;;  %v15278_v63 = vld [vmem:[#allocation3 + $0x30] sm:$0xff]  ;;  %v7183_v6 = vrot.slane %v7181_v59, 4  ;;  %v7188_v22 = vrot.slane %v7186_v58, 3  ;;  %v7191_v1 = vrot.slane %v7189_v52, 4 }
 0x654   : > { %11776 = vmatprep.mubr.msk.bf16.mxu1 %vm390_vm7, %v6811_v36  ;;  %v6864_v36 = vor.u32 %v6863_v0, %v6860_v26  ;;  %16973 = vst [vmem:[#allocation26_spill] sm:$0xff] %v15278_v63  ;;  %v7159_v26 = vmul.bf16 %v14967_v23, %v16935_v40  ;;  %v15286_v0 = vmul.bf16 %v14996_v44, %v16938_v10  ;;  %v8759_v23 = vrot.slane %v15267_v19, 4  ;;  %v15324_v59 = vld [vmem:[#allocation3 + $0x70] sm:$0xff] }
 0x655   : > { %v15265_v4 = vsel %vm1034_vm5, %v6846_v54, %v6855_v27  ;;  %v15294_v56 = vsel %vm1034_vm5, %v6873_v34, %v6882_v57  ;;  %v15303_v44 = vmul.bf16 %v14998_v9, %v16939_v32  ;;  %v15308_v54 = vsel %vm1233_vm4, %v16805_v5, %v8757_v47 }
 0x656   : > { %v15271_v42 = vsel %vm1034_vm5, %v6855_v27, %v6864_v36  ;;  %v15274_v15 = vsel %vm1034_vm5, %v6864_v36, %v6873_v34  ;;  %16976 = vst [vmem:[#allocation29_spill] sm:$0xff] %v15308_v54  ;;  %v8761_v27 = vrot.slane %v15278_v63, 4  ;;  %v8763_v36 = vrot.slane %v15280_v11, 4 }
 0x657   : > { %v15313_v34 = vsel %vm1034_vm5, %v6882_v57, %v6891_v18  ;;  %v15320_v13 = vsel %vm1233_vm4, %v8757_v47, %v8759_v23  ;;  %v8765_v9 = vrot.slane %v15288_v8, 4  ;;  %v8769_v52 = vrot.slane %v15296_v2, 4 }
 0x658   : > { %16977 = vst [vmem:[#allocation30_spill] sm:$0xff] %v15320_v13  ;;  %v15329_v58 = vsel %vm1233_vm4, %v8759_v23, %v8761_v27  ;;  %v15332_v57 = vsel %vm1233_vm4, %v8761_v27, %v8763_v36  ;;  %v8771_v18 = vrot.slane %v15298_v38, 4  ;;  %v7195_v47 = vshrl.u32 %v7159_v26, 16 }
 0x659   : > { %16978 = vst [vmem:[#allocation31_spill] sm:$0xff] %v15329_v58  ;;  %16979 = vst [vmem:[#allocation32_spill] sm:$0xff] %v15332_v57  ;;  %v7198_v5 = vshll.u32 %v7159_v26, 16  ;;  %v15338_v13 = vsel %vm1233_vm4, %v8763_v36, %v8765_v9  ;;  %v8773_v57 = vrot.slane %v15315_v3, 4  ;;  %v7184_v26 = vor.u32 %v7183_v6, %v15276_v49 }
 0x65a   : > { %16980 = vst [vmem:[#allocation33_spill] sm:$0xff] %v15338_v13  ;;  %v15348_v27 = vsel %vm1233_vm4, %v8769_v52, %v8771_v18  ;;  %v15353_v58 = vor.u32 %v7191_v1, %v7188_v22  ;;  %v8777_v36 = vrot.slane %v15324_v59, 4  ;;  %v15376_v1 = vrot.slane %v7195_v47, 3 }
 0x65b   : > { %11777 = vmatmul.mubr.msk.bf16.gmra.mrb[32].mxu1 %vm390_vm7, %v6820_v24  ;;  %v8767_v24 = vrot.slane %v15290_v46, 4  ;;  %16983 = vst [vmem:[#allocation36_spill] sm:$0xff] %v15348_v27  ;;  %v9036_v27 = vmul.bf16 %v15254_v16, %v16952_v41  ;;  %v9037_v49 = vmul.bf16 %v15259_v33, %v16954_v62 }
 0x65c   : > { %11780 = vmatprep.mubr.msk.bf16.mxu1 %vm390_vm7, %v6829_v48  ;;  %v15326_v48 = vld [vmem:[#allocation3 + $0x78] sm:$0xff]  ;;  %v15392_v47 = vsel %vm1480_vm6, %v7184_v26, %v15353_v58 }
 0x65d   : > { %v15341_v54 = vsel %vm1233_vm4, %v8765_v9, %v8767_v24  ;;  %v15345_v23 = vsel %vm1233_vm4, %v8767_v24, %v8769_v52  ;;  %v16806_v9 = vrot.slane %v15326_v48, 4  ;;  %v15359_v24 = vsel %vm1233_vm4, %v8771_v18, %v8773_v57 }
 0x65e   : > { %16981 = vst [vmem:[#allocation34_spill] sm:$0xff] %v15341_v54  ;;  %16982 = vst [vmem:[#allocation35_spill] sm:$0xff] %v15345_v23  ;;  %v7207_v23 = vshll.u32 %v15286_v0, 16  ;;  %v15378_v18 = vrot.slane %v7198_v5, 4 }
 0x65f   : > { %16984 = vst [vmem:[#allocation59_spill] sm:$0xff] %v15359_v24  ;;  %v15374_v22 = vsel %vm1233_vm4, %v8777_v36, %v16806_v9 }
 0x660   : > { %16987 = vst [vmem:[#allocation62_spill] sm:$0xff] %v15374_v22  ;;  %v9073_v22 = vshrl.u32 %v9037_v49, 16  ;;  %v15406_v10 = vrot.slane %v7207_v23, 4 }
 0x663   : > { %11781 = vmatmul.mubr.msk.bf16.gmra.mrb[36].mxu1 %vm390_vm7, %v6838_v25  ;;  %v8775_v25 = vrot.slane %v15317_v55, 4 }
 0x664   : > { %11784 = vmatprep.mubr.msk.bf16.mxu1 %vm390_vm7, %v6847_v45  ;;  %v7204_v45 = vshrl.u32 %v15286_v0, 16  ;;  %v9067_v0 = vshll.u32 %v9036_v27, 16 }
 0x665   : > { %v15362_v52 = vsel %vm1233_vm4, %v8773_v57, %v8775_v25  ;;  %v15369_v6 = vsel %vm1233_vm4, %v8775_v25, %v8777_v36  ;;  %v15382_v57 = vmul.bf16 %v15028_v20, %v16940_v61  ;;  %v9038_v25 = vmul.bf16 %v15267_v19, %v16955_v31 }
 0x666   : > { %16985 = vst [vmem:[#allocation60_spill] sm:$0xff] %v15362_v52  ;;  %16986 = vst [vmem:[#allocation61_spill] sm:$0xff] %v15369_v6  ;;  %v9064_v52 = vshrl.u32 %v9036_v27, 16  ;;  %v9039_v36 = vmul.bf16 %v15278_v63, %v16956_v53  ;;  %v9040_v20 = vmul.bf16 %v15280_v11, %v16957_v35  ;;  %v9041_v27 = vmul.bf16 %v15288_v8, %v16958_v21 }
 0x667   : > { %v9069_v9 = vrot.slane %v9067_v0, 5  ;;  %v9076_v6 = vshll.u32 %v9037_v49, 16  ;;  %v9082_v24 = vshrl.u32 %v9038_v25, 16  ;;  %v15402_v54 = vrot.slane %v7204_v45, 3 }
 0x668   : > { %v9066_v5 = vrot.slane %v9064_v52, 4  ;;  %v9085_v26 = vshll.u32 %v9038_v25, 16  ;;  %v9091_v52 = vshrl.u32 %v9039_v36, 16  ;;  %v9094_v13 = vshll.u32 %v9039_v36, 16 }
 0x669   : > { %v9075_v11 = vrot.slane %v9073_v22, 4  ;;  %v9078_v63 = vrot.slane %v9076_v6, 5  ;;  %v9084_v8 = vrot.slane %v9082_v24, 4  ;;  %v9100_v0 = vshrl.u32 %v9040_v20, 16 }
 0x66a   : > { %v15404_v61 = vor.u32 %v9069_v9, %v9066_v5  ;;  %v9087_v32 = vrot.slane %v9085_v26, 5  ;;  %v9093_v19 = vrot.slane %v9091_v52, 4  ;;  %v9103_v33 = vshll.u32 %v9040_v20, 16 }
 0x66b   : > { %11785 = vmatmul.mubr.msk.bf16.gmra.mrb[40].mxu1 %vm390_vm7, %v15265_v4  ;;  %v9096_v4 = vrot.slane %v9094_v13, 5  ;;  %v9079_v49 = vor.u32 %v9078_v63, %v9075_v11  ;;  %v9109_v40 = vshrl.u32 %v9041_v27, 16  ;;  %v9102_v16 = vrot.slane %v9100_v0, 4 }
 0x66c   : > { %11788 = vmatprep.mubr.msk.bf16.mxu1 %vm390_vm7, %v15271_v42  ;;  %v9088_v42 = vor.u32 %v9087_v32, %v9084_v8  ;;  %v9112_v25 = vshll.u32 %v9041_v27, 16  ;;  %v9105_v22 = vrot.slane %v9103_v33, 5  ;;  %v9042_v24 = vmul.bf16 %v15290_v46, %v16960_v29 }
 0x66d   : > { %v9097_v45 = vor.u32 %v9096_v4, %v9093_v19  ;;  %v15410_v9 = vsel %vm1034_vm5, %v15404_v61, %v9079_v49  ;;  %v9111_v6 = vrot.slane %v9109_v40, 4  ;;  %v9043_v32 = vmul.bf16 %v15296_v2, %v16961_v39 }
 0x66e   : > { %v15415_v13 = vsel %vm1034_vm5, %v9079_v49, %v9088_v42  ;;  %v9114_v11 = vrot.slane %v9112_v25, 5  ;;  %v9106_v19 = vor.u32 %v9105_v22, %v9102_v16  ;;  %v9118_v8 = vshrl.u32 %v9042_v24, 16 }
 0x66f   : > { %v15418_v63 = vsel %vm1034_vm5, %v9088_v42, %v9097_v45  ;;  %v9121_v33 = vshll.u32 %v9042_v24, 16  ;;  %v9044_v40 = vmul.bf16 %v15298_v38, %v16962_v7  ;;  %v9127_v36 = vshrl.u32 %v9043_v32, 16 }
 0x670   : > { %v9115_v23 = vor.u32 %v9114_v11, %v9111_v6  ;;  %v9130_v5 = vshll.u32 %v9043_v32, 16  ;;  %v9045_v20 = vmul.bf16 %v15315_v3, %v16963_v17  ;;  %v15431_v27 = vsel %vm1034_vm5, %v9097_v45, %v9106_v19 }
 0x671   : > { %v9120_v26 = vrot.slane %v9118_v8, 4  ;;  %v9136_v16 = vshrl.u32 %v9044_v40, 16  ;;  %v9129_v4 = vrot.slane %v9127_v36, 4  ;;  %v9139_v49 = vshll.u32 %v9044_v40, 16 }
 0x672   : > { %v15434_v52 = vsel %vm1034_vm5, %v9106_v19, %v9115_v23  ;;  %v9132_v0 = vrot.slane %v9130_v5, 5  ;;  %v9145_v25 = vshrl.u32 %v9045_v20, 16  ;;  %v9148_v22 = vshll.u32 %v9045_v20, 16 }
 0x673   : > { %11789 = vmatmul.mubr.msk.bf16.gmra.mrb[44].mxu1 %vm390_vm7, %v15274_v15  ;;  %v9123_v15 = vrot.slane %v9121_v33, 5  ;;  %v9141_v24 = vrot.slane %v9139_v49, 5  ;;  %v9046_v11 = vmul.bf16 %v15317_v55, %v16964_v30  ;;  %v9047_v45 = vmul.bf16 %v15324_v59, %v16965_v51 }
 0x674   : > { %11792 = vmatprep.mubr.msk.bf16.mxu1 %vm390_vm7, %v15294_v56  ;;  %v9138_v56 = vrot.slane %v9136_v16, 4  ;;  %v9133_v6 = vor.u32 %v9132_v0, %v9129_v4  ;;  %v9147_v19 = vrot.slane %v9145_v25, 4  ;;  %v9150_v8 = vrot.slane %v9148_v22, 5 }
 0x675   : > { %v9124_v42 = vor.u32 %v9123_v15, %v9120_v26  ;;  %v9048_v33 = vmul.bf16 %v15326_v48, %v16966_v12  ;;  %v9154_v5 = vshrl.u32 %v9046_v11, 16  ;;  %v9157_v20 = vshll.u32 %v9046_v11, 16 }
 0x676   : > { %v9142_v36 = vor.u32 %v9141_v24, %v9138_v56  ;;  %v9151_v26 = vor.u32 %v9150_v8, %v9147_v19  ;;  %v9163_v15 = vshrl.u32 %v9047_v45, 16  ;;  %v9166_v16 = vshll.u32 %v9047_v45, 16 }
 0x677   : > { %v15441_v32 = vsel %vm1034_vm5, %v9115_v23, %v9124_v42  ;;  %v15446_v40 = vsel %vm1034_vm5, %v9124_v42, %v9133_v6  ;;  %v9172_v4 = vshrl.u32 %v9048_v33, 16  ;;  %v9156_v0 = vrot.slane %v9154_v5, 4 }
 0x678   : > { %16988 = vst [vmem:[#allocation63_spill] sm:$0xff] %v15441_v32  ;;  %16989 = vst [vmem:[#allocation64_spill] sm:$0xff] %v15446_v40  ;;  %v15453_v23 = vsel %vm1034_vm5, %v9133_v6, %v9142_v36  ;;  %v9159_v49 = vrot.slane %v9157_v20, 5  ;;  %v9175_v42 = vshll.u32 %v9048_v33, 16  ;;  %v15456_v56 = vsel %vm1034_vm5, %v9142_v36, %v9151_v26 }
 0x679   : > { %16990 = vst [vmem:[#allocation65_spill] sm:$0xff] %v15453_v23  ;;  %16991 = vst [vmem:[#allocation66_spill] sm:$0xff] %v15456_v56  ;;  %v9165_v25 = vrot.slane %v9163_v15, 4  ;;  %v9168_v22 = vrot.slane %v9166_v16, 5  ;;  %v9174_v24 = vrot.slane %v9172_v4, 4  ;;  %v7216_v11 = vshll.u32 %v15303_v44, 16 }
 0x67a   : > { %v9160_v45 = vor.u32 %v9159_v49, %v9156_v0  ;;  %v9177_v19 = vrot.slane %v9175_v42, 5  ;;  %v7222_v6 = vshrl.u32 %v15382_v57, 16  ;;  %v7225_v8 = vshll.u32 %v15382_v57, 16  ;;  %v16997_v49 = vld [vmem:[#allocation12_spill] sm:$0xff] }
 0x67b   : > { %11793 = vmatmul.mubr.msk.bf16.gmra.mrb[48].mxu1 %vm390_vm7, %v15313_v34  ;;  %v7201_v34 = vor.u32 %v15378_v18, %v15376_v1  ;;  %v9169_v33 = vor.u32 %v9168_v22, %v9165_v25  ;;  %v16994_v20 = vshrl.u32 %v15303_v44, 16  ;;  %v15475_v18 = vld [vmem:[%s16677_s3 + $0x28] sm:$0xff]   ;;  %v7218_v57 = vrot.slane %v7216_v11, 4 }
 0x67c   : > { %11798 = vmatprep.mubr.msk.bf16.mxu1 %vm390_vm7, %v15392_v47  ;;  %v7210_v47 = vor.u32 %v15406_v10, %v15402_v54  ;;  %v15466_v36 = vsel %vm1034_vm5, %v9151_v26, %v9160_v45  ;;  %v15468_v5 = vor.u32 %v9177_v19, %v9174_v24  ;;  %v7163_v26 = vmul.bf16 %v15033_v37, %v16941_v50  ;;  %v16998_v19 = vld [vmem:[#allocation14_spill] sm:$0xff] }
 0x67d   : > { %16992 = vst [vmem:[#allocation67_spill] sm:$0xff] %v15466_v36  ;;  %v7215_v1 = vrot.slane %v16994_v20, 3  ;;  %v15478_v10 = vsel %vm1034_vm5, %v9160_v45, %v9169_v33  ;;  %v7202_v54 = vsel %vm1480_vm6, %v15353_v58, %v7201_v34  ;;  %v7224_v16 = vrot.slane %v7222_v6, 3  ;;  %v16999_v6 = vld [vmem:[#allocation50_spill] sm:$0xff] }
 0x67e   : > { %16993 = vst [vmem:[#allocation68_spill] sm:$0xff] %v15468_v5  ;;  %16995 = vst [vmem:[#allocation69_spill] sm:$0xff] %v15478_v10  ;;  %v15486_v15 = vsel %vm1034_vm5, %v9169_v33, %v15468_v5  ;;  %v7211_v44 = vsel %vm1480_vm6, %v7201_v34, %v7210_v47  ;;  %v7227_v4 = vrot.slane %v7225_v8, 4  ;;  %v7164_v0 = vmul.bf16 %v15050_v28, %v16942_v43  ;;  %v15531_v36 = vld [vmem:[#allocation3 + $0x88] sm:$0xf] }
 0x67f   : > { %16996 = vst [vmem:[#allocation70_spill] sm:$0xff] %v15486_v15  ;;  %v7219_v37 = vor.u32 %v7218_v57, %v7215_v1  ;;  %v7231_v58 = vshrl.u32 %v7163_v26, 16  ;;  %v7234_v42 = vshll.u32 %v7163_v26, 16  ;;  %v7165_v8 = vmul.bf16 %v16999_v6, %v16998_v19  ;;  %v17001_v1 = vld [vmem:[#allocation41_spill] sm:$0xff]  ;;  %v17003_v6 = vld [vmem:[#allocation42_spill] sm:$0xff] }
 0x680   : > { %v7228_v25 = vor.u32 %v7227_v4, %v7224_v16  ;;  %v7240_v22 = vshrl.u32 %v7164_v0, 16  ;;  %v7243_v24 = vshll.u32 %v7164_v0, 16  ;;  %v17007_v15 = vld [vmem:[#allocation54_spill] sm:$0xff] }
 0x681   : > { %v7220_v11 = vsel %vm1480_vm6, %v7210_v47, %v7219_v37  ;;  %v7233_v34 = vrot.slane %v7231_v58, 3  ;;  %v7236_v45 = vrot.slane %v7234_v42, 4  ;;  %v7252_v16 = vshll.u32 %v7165_v8, 16 }
 0x682   : > { %v7229_v28 = vsel %vm1480_vm6, %v7219_v37, %v7228_v25  ;;  %v7242_v33 = vrot.slane %v7240_v22, 3  ;;  %v7245_v20 = vrot.slane %v7243_v24, 4 }
 0x683   : > { %11799 = vmatmul.mubr.msk.bf16.vlgmr.msra.gmra.mrb[20].mxu1 %vm390_vm7, %v7202_v54  ;;  %v17000_v54 = vld [vmem:[#allocation15_spill] sm:$0xff]  ;;  %v7237_v26 = vor.u32 %v7236_v45, %v7233_v34  ;;  %v7254_v42 = vrot.slane %v7252_v16, 4  ;;  %v17005_v34 = vld [vmem:[#allocation53_spill] sm:$0xff] }
 0x684   : > { %11831 = vmatpush3.bf16.msra.mxu1 %v16997_v49  ;;  %11802 = vmatprep.mubr.msk.bf16.mxu1 %vm390_vm7, %v7211_v44  ;;  %v7166_v57 = vmul.bf16 %v17001_v1, %v17000_v54  ;;  %v7249_v44 = vshrl.u32 %v7165_v8, 16  ;;  %v7246_v47 = vor.u32 %v7245_v20, %v7242_v33 }
 0x685   : > { %11864 = vmatprep.subr.bf16.mxu1 %v15475_v18  ;;  %v7238_v49 = vsel %vm1480_vm6, %v7228_v25, %v7237_v26 }
 0x686   : > { %v7258_v4 = vshrl.u32 %v7166_v57, 16  ;;  %v7261_v0 = vshll.u32 %v7166_v57, 16  ;;  %v7251_v58 = vrot.slane %v7249_v44, 3  ;;  %v7247_v22 = vsel %vm1480_vm6, %v7237_v26, %v7246_v47 }
 0x688   : > { %v7260_v24 = vrot.slane %v7258_v4, 3  ;;  %v7263_v1 = vrot.slane %v7261_v0, 4  ;;  %v7255_v8 = vor.u32 %v7254_v42, %v7251_v58  ;;  %v17009_v58 = vld [vmem:[#allocation57_spill] sm:$0xff] }
 0x68a   : > { %v7264_v25 = vor.u32 %v7263_v1, %v7260_v24  ;;  %v7256_v16 = vsel %vm1480_vm6, %v7246_v47, %v7255_v8 }
 0x68b   : > { %11803 = vmatmul.mubr.msk.bf16.gmra.mrb[24].mxu1 %vm390_vm7, %v7220_v11  ;;  %v17002_v11 = vld [vmem:[#allocation16_spill] sm:$0xff] }
 0x68c   : > { %11806 = vmatprep.mubr.msk.bf16.mxu1 %vm390_vm7, %v7229_v28  ;;  %v7167_v37 = vmul.bf16 %v17003_v6, %v17002_v11  ;;  %v17004_v28 = vld [vmem:[#allocation17_spill] sm:$0xff]  ;;  %v7265_v4 = vsel %vm1480_vm6, %v7255_v8, %v7264_v25  ;;  %v15522_v8 = vld [vmem:[#allocation3 + $0x78] sm:$0xff] }
 0x68d   : > { %v7168_v45 = vmul.bf16 %v17005_v34, %v17004_v28 }
 0x68e   : > { %v7267_v33 = vshrl.u32 %v7167_v37, 16  ;;  %v7270_v20 = vshll.u32 %v7167_v37, 16 }
 0x68f   : > { %v7276_v57 = vshrl.u32 %v7168_v45, 16  ;;  %v7279_v44 = vshll.u32 %v7168_v45, 16 }
 0x690   : > { %v7269_v6 = vrot.slane %v7267_v33, 3  ;;  %v7272_v5 = vrot.slane %v7270_v20, 4  ;;  %v15519_v20 = vld [vmem:[#allocation3 + $0x80] sm:$0xff] }
 0x691   : > { %v7278_v0 = vrot.slane %v7276_v57, 3  ;;  %v7281_v34 = vrot.slane %v7279_v44, 4  ;;  %v17010_v57 = vld [vmem:[#allocation20_spill] sm:$0xff] }
 0x692   : > { %v7273_v37 = vor.u32 %v7272_v5, %v7269_v6  ;;  %v7171_v44 = vmul.bf16 %v15522_v8, %v17010_v57 }
 0x693   : > { %11807 = vmatmul.mubr.msk.bf16.gmra.mrb[28].mxu1 %vm390_vm7, %v7238_v49  ;;  %v17006_v49 = vld [vmem:[#allocation18_spill] sm:$0xff]  ;;  %v7282_v47 = vor.u32 %v7281_v34, %v7278_v0 }
 0x694   : > { %11810 = vmatprep.mubr.msk.bf16.mxu1 %vm390_vm7, %v7247_v22  ;;  %v7169_v26 = vmul.bf16 %v17007_v15, %v17006_v49  ;;  %v17008_v22 = vld [vmem:[#allocation19_spill] sm:$0xff]  ;;  %v7274_v15 = vsel %vm1480_vm6, %v7264_v25, %v7273_v37  ;;  %v7303_v25 = vshrl.u32 %v7171_v44, 16 }
 0x695   : > { %v7170_v42 = vmul.bf16 %v17009_v58, %v17008_v22  ;;  %v7283_v5 = vsel %vm1480_vm6, %v7273_v37, %v7282_v47  ;;  %v7306_v58 = vshll.u32 %v7171_v44, 16  ;;  %v17012_v37 = vld [vmem:[#allocation21_spill] sm:$0xff] }
 0x696   : > { %v7285_v24 = vshrl.u32 %v7169_v26, 16  ;;  %v7288_v1 = vshll.u32 %v7169_v26, 16 }
 0x697   : > { %v7294_v45 = vshrl.u32 %v7170_v42, 16  ;;  %v7297_v33 = vshll.u32 %v7170_v42, 16  ;;  %v7308_v23 = vrot.slane %v7306_v58, 4 }
 0x698   : > { %v7290_v10 = vrot.slane %v7288_v1, 4 }
 0x699   : > { %v7296_v6 = vrot.slane %v7294_v45, 3  ;;  %v7299_v26 = vrot.slane %v7297_v33, 4  ;;  %v7173_v45 = vmul.bf16 %v15531_v36, %v17012_v37 }
 0x69b   : > { %11811 = vmatmul.mubr.msk.bf16.gmra.mrb[32].mxu1 %vm390_vm7, %v7256_v16  ;;  %v7287_v16 = vrot.slane %v7285_v24, 3  ;;  %v7300_v42 = vor.u32 %v7299_v26, %v7296_v6  ;;  %v7321_v44 = vshrl.u32 %v7173_v45, 16  ;;  %v7324_v6 = vshll.u32 %v7173_v45, 16  ;;  %v17014_v45 = vld [vmem:[#allocation45_spill] sm:$0xff] }
 0x69c   : > { %11814 = vmatprep.mubr.msk.bf16.mxu1 %vm390_vm7, %v7265_v4  ;;  %v17011_v4 = vld [vmem:[#allocation22_spill] sm:$0xff] }
 0x69d   : > { %v7172_v0 = vmul.bf16 %v15519_v20, %v17011_v4  ;;  %v7291_v34 = vor.u32 %v7290_v10, %v7287_v16 }
 0x69f   : > { %v7312_v24 = vshrl.u32 %v7172_v0, 16  ;;  %v7315_v1 = vshll.u32 %v7172_v0, 16  ;;  %v7292_v56 = vsel %vm1480_vm6, %v7282_v47, %v7291_v34  ;;  %v7301_v33 = vsel %vm1480_vm6, %v7291_v34, %v7300_v42 }
 0x6a0   : > { %v7323_v47 = vrot.slane %v7321_v44, 3  ;;  %v17019_v44 = vld [vmem:[#allocation49_spill] sm:$0xff] }
 0x6a1   : > { %v7317_v10 = vrot.slane %v7315_v1, 4 }
 0x6a3   : > { %11815 = vmatmul.mubr.msk.bf16.gmra.mrb[36].mxu1 %vm390_vm7, %v7274_v15  ;;  %v7305_v15 = vrot.slane %v7303_v25, 3  ;;  %v7326_v25 = vrot.slane %v7324_v6, 4  ;;  %v17020_v6 = vld [vmem:[#allocation40_spill] sm:$0xff] }
 0x6a4   : > { %11818 = vmatprep.mubr.msk.bf16.mxu1 %vm390_vm7, %v7283_v5  ;;  %v7314_v5 = vrot.slane %v7312_v24, 3 }
 0x6a5   : > { %v7309_v16 = vor.u32 %v7308_v23, %v7305_v15  ;;  %v7327_v34 = vor.u32 %v7326_v25, %v7323_v47  ;;  %v17013_v23 = vld [vmem:[#allocation43_spill] sm:$0xff] }
 0x6a6   : > { %v7318_v26 = vor.u32 %v7317_v10, %v7314_v5  ;;  %v17016_v5 = vld [vmem:[#allocation46_spill] sm:$0xff]  ;;  %v17017_v10 = vld [vmem:[#allocation48_spill] sm:$0xff]  ;;  %v17024_v47 = vld [vmem:[#allocation23_spill] sm:$0xff] }
 0x6a7   : > { %v7310_v0 = vsel %vm1480_vm6, %v7300_v42, %v7309_v16  ;;  %v15551_v42 = vld [vmem:[%s16677_s3 + $0x30] sm:$0xff]  }
 0x6a8   : > { %v7319_v58 = vsel %vm1480_vm6, %v7309_v16, %v7318_v26  ;;  %v7328_v1 = vsel %vm1480_vm6, %v7318_v26, %v7327_v34  ;;  %v17018_v16 = vld [vmem:[#allocation4_spill] sm:$0xff]  ;;  %v12903_v34 = vld [vmem:[#allocation3 + $0x10] sm:$0xff] }
 0x6a9   : > { %v17022_v26 = vld [vmem:[#allocation52_spill] sm:$0xff] }
 0x6ab   : > { %11819 = vmatmul.mubr.msk.bf16.gmra.mrb[40].mxu1 %vm390_vm7, %v7292_v56  ;;  %v7576_v56 = vld [vmem:[#allocation3 + $0x8] sm:$0xf0] }
 0x6ac   : > { %11822 = vmatprep.mubr.msk.bf16.mxu1 %vm390_vm7, %v7301_v33  ;;  %v7597_v24 = vrot.slane %v7576_v56, 4  ;;  %v17015_v33 = vld [vmem:[#allocation44_spill] sm:$0xff]  ;;  %v7878_v25 = vmul.bf16 %v7576_v56, %v17024_v47 }
 0x6ae   : > { %v7599_v15 = vsel %vm1233_vm4, %v7597_v24, %v17013_v23  ;;  %v7879_v24 = vmul.bf16 %v12903_v34, %v16952_v41  ;;  %v15582_v23 = vrot.slane %v15519_v20, 4 }
 0x6b3   : > { %11823 = vmatmul.mubr.msk.bf16.gmra.mrb[44].mxu1 %vm390_vm7, %v7310_v0  ;;  %v17023_v0 = vld [vmem:[#allocation55_spill] sm:$0xff] }
 0x6b4   : > { %11826 = vmatprep.mubr.msk.bf16.mxu1 %vm390_vm7, %v7319_v58  ;;  %v17025_v58 = vld [vmem:[#allocation56_spill] sm:$0xff] }
 0x6bb   : > { %11827 = vmatmul.mubr.msk.bf16.gmra.mrb[48].mxu1 %vm390_vm7, %v7328_v1  ;;  %v17026_v1 = vld [vmem:[#allocation6_spill] sm:$0xff] }
 0x6bc   : > { %11832 = vmatprep.mubr.msk.bf16.mxu1 %vm390_vm7, %v7599_v15  ;;  %v7899_v15 = vshrl.u32 %v7878_v25, 16 }
 0x6c3   : > { %11833 = vmatmul.mubr.msk.bf16.vlgmr.msra.gmra.mrb[20].mxu1 %vm390_vm7, %v17014_v45  ;;  %v7902_v45 = vshll.u32 %v7878_v25, 16  ;;  %v7628_v25 = vrot.slane %v15531_v36, 4 }
 0x6c4   : > { %11865 = vmatpush3.bf16.msra.mxu1 %v15475_v18  ;;  %11836 = vmatprep.mubr.msk.bf16.mxu1 %vm390_vm7, %v17015_v33  ;;  %v17021_v18 = vld [vmem:[#allocation51_spill] sm:$0xff]  ;;  %v7907_v33 = vshrl.u32 %v7879_v24, 16 }
 0x6c5   : > { %11898 = vmatprep.subr.bf16.mxu1 %v15551_v42 }
 0x6cb   : > { %11837 = vmatmul.mubr.msk.bf16.gmra.mrb[24].mxu1 %vm390_vm7, %v17016_v5  ;;  %v7910_v5 = vshll.u32 %v7879_v24, 16 }
 0x6cc   : > { %11840 = vmatprep.mubr.msk.bf16.mxu1 %vm390_vm7, %v17017_v10  ;;  %v17027_v10 = vld [vmem:[#allocation7_spill] sm:$0xff] }
 0x6cd   : > { %v7627_v56 = vsel %vm1233_vm4, %v17027_v10, %v15582_v23  ;;  %v7912_v34 = vrot.slane %v7910_v5, 5  ;;  %v12907_v5 = vld [vmem:[#allocation3 + $0x30] sm:$0xff] }
 0x6d3   : > { %11841 = vmatmul.mubr.msk.bf16.gmra.mrb[28].mxu1 %vm390_vm7, %v17018_v16  ;;  %v12904_v16 = vld [vmem:[#allocation3 + $0x18] sm:$0xff] }
 0x6d4   : > { %11844 = vmatprep.mubr.msk.bf16.mxu1 %vm390_vm7, %v17019_v44  ;;  %v7880_v44 = vmul.bf16 %v12904_v16, %v16954_v62 }
 0x6d6   : > { %v7916_v24 = vshrl.u32 %v7880_v44, 16 }
 0x6d8   : > { %v7918_v16 = vrot.slane %v7916_v24, 4 }
 0x6db   : > { %11845 = vmatmul.mubr.msk.bf16.gmra.mrb[32].mxu1 %vm390_vm7, %v17020_v6  ;;  %v12905_v6 = vld [vmem:[#allocation3 + $0x20] sm:$0xff] }
 0x6dc   : > { %11848 = vmatprep.mubr.msk.bf16.mxu1 %vm390_vm7, %v17021_v18  ;;  %v7881_v41 = vmul.bf16 %v12905_v6, %v16955_v31  ;;  %v17028_v18 = vld [vmem:[#allocation58_spill] sm:$0xff]  ;;  %v7629_v31 = vsel %vm1233_vm4, %v15582_v23, %v7628_v25 }
 0x6de   : > { %v7925_v32 = vshrl.u32 %v7881_v41, 16  ;;  %v7928_v62 = vshll.u32 %v7881_v41, 16 }
 0x6e0   : > { %v7930_v36 = vrot.slane %v7928_v62, 5 }
 0x6e3   : > { %11849 = vmatmul.mubr.msk.bf16.gmra.mrb[36].mxu1 %vm390_vm7, %v17022_v26  ;;  %v7901_v26 = vrot.slane %v7899_v15, 4 }
 0x6e4   : > { %11852 = vmatprep.mubr.msk.bf16.mxu1 %vm390_vm7, %v17023_v0  ;;  %v7904_v0 = vrot.slane %v7902_v45, 5 }
 0x6e6   : > { %v7905_v10 = vor.u32 %v7904_v0, %v7901_v26 }
 0x6eb   : > { %11853 = vmatmul.mubr.msk.bf16.gmra.mrb[40].mxu1 %vm390_vm7, %v17025_v58  ;;  %v7909_v58 = vrot.slane %v7907_v33, 4  ;;  %v7927_v33 = vrot.slane %v7925_v32, 4 }
 0x6ec   : > { %11856 = vmatprep.mubr.msk.bf16.mxu1 %vm390_vm7, %v17026_v1  ;;  %v7919_v1 = vshll.u32 %v7880_v44, 16 }
 0x6ed   : > { %v7913_v40 = vor.u32 %v7912_v34, %v7909_v58  ;;  %v7931_v0 = vor.u32 %v7930_v36, %v7927_v33 }
 0x6ee   : > { %v7921_v6 = vrot.slane %v7919_v1, 5  ;;  %v12908_v1 = vld [vmem:[#allocation3 + $0x38] sm:$0xff] }
 0x6ef   : > { %v7914_v45 = vsel %vm1034_vm5, %v7905_v10, %v7913_v40 }
 0x6f0   : > { %v7922_v44 = vor.u32 %v7921_v6, %v7918_v16  ;;  %v12909_v16 = vld [vmem:[#allocation3 + $0x40] sm:$0xff] }
 0x6f1   : > { %v7885_v6 = vmul.bf16 %v12909_v16, %v16960_v29 }
 0x6f2   : > { %v7923_v25 = vsel %vm1034_vm5, %v7913_v40, %v7922_v44  ;;  %v7932_v10 = vsel %vm1034_vm5, %v7922_v44, %v7931_v0  ;;  %v12910_v44 = vld [vmem:[#allocation3 + $0x48] sm:$0xff] }
 0x6f3   : > { %11857 = vmatmul.mubr.msk.bf16.gmra.mrb[44].mxu1 %vm390_vm7, %v17028_v18  ;;  %v12906_v18 = vld [vmem:[#allocation3 + $0x28] sm:$0xff]  ;;  %v7964_v33 = vshll.u32 %v7885_v6, 16 }
 0x6f4   : > { %11860 = vmatprep.mubr.msk.bf16.mxu1 %vm390_vm7, %v7627_v56  ;;  %v7882_v15 = vmul.bf16 %v12906_v18, %v16956_v53  ;;  %v7883_v56 = vmul.bf16 %v12907_v5, %v16957_v35  ;;  %v15603_v53 = vld [vmem:[%s16677_s3 + $0x38] sm:$0xff]   ;;  %v7884_v35 = vmul.bf16 %v12908_v1, %v16958_v21  ;;  %v7961_v21 = vshrl.u32 %v7885_v6, 16 }
 0x6f6   : > { %v7934_v41 = vshrl.u32 %v7882_v15, 16  ;;  %v7937_v26 = vshll.u32 %v7882_v15, 16  ;;  %v7943_v58 = vshrl.u32 %v7883_v56, 16  ;;  %v7946_v34 = vshll.u32 %v7883_v56, 16 }
 0x6f7   : > { %v7952_v18 = vshrl.u32 %v7884_v35, 16  ;;  %v7955_v15 = vshll.u32 %v7884_v35, 16 }
 0x6f8   : > { %v7936_v32 = vrot.slane %v7934_v41, 4  ;;  %v7939_v24 = vrot.slane %v7937_v26, 5  ;;  %v7945_v62 = vrot.slane %v7943_v58, 4  ;;  %v7886_v41 = vmul.bf16 %v12910_v44, %v16961_v39  ;;  %v12911_v58 = vld [vmem:[#allocation3 + $0x50] sm:$0xff]  ;;  %v12914_v44 = vld [vmem:[#allocation3 + $0x68] sm:$0xff] }
 0x6f9   : > { %v7954_v5 = vrot.slane %v7952_v18, 4  ;;  %v7957_v56 = vrot.slane %v7955_v15, 5  ;;  %v7966_v26 = vrot.slane %v7964_v33, 5  ;;  %v12913_v18 = vld [vmem:[#allocation3 + $0x60] sm:$0xff] }
 0x6fa   : > { %v7940_v40 = vor.u32 %v7939_v24, %v7936_v32  ;;  %v7970_v32 = vshrl.u32 %v7886_v41, 16  ;;  %v7973_v24 = vshll.u32 %v7886_v41, 16  ;;  %v7889_v15 = vmul.bf16 %v12913_v18, %v16964_v30 }
 0x6fb   : > { %11861 = vmatmul.mubr.msk.bf16.gmra.mrb[48].mxu1 %vm390_vm7, %v7629_v31  ;;  %v7948_v31 = vrot.slane %v7946_v34, 5  ;;  %v7887_v34 = vmul.bf16 %v12911_v58, %v16962_v7 }
 0x6fc   : > { %11866 = vmatprep.mubr.msk.bf16.mxu1 %vm390_vm7, %v7914_v45  ;;  %v7941_v36 = vsel %vm1034_vm5, %v7931_v0, %v7940_v40  ;;  %v7972_v39 = vrot.slane %v7970_v32, 4 }
 0x6fd   : > { %v7949_v45 = vor.u32 %v7948_v31, %v7945_v62  ;;  %v7979_v1 = vshrl.u32 %v7887_v34, 16  ;;  %v7982_v35 = vshll.u32 %v7887_v34, 16  ;;  %v7975_v62 = vrot.slane %v7973_v24, 5  ;;  %v12912_v31 = vld [vmem:[#allocation3 + $0x58] sm:$0xff]  ;;  %v12915_v34 = vld [vmem:[#allocation3 + $0x70] sm:$0xff] }
 0x6fe   : > { %v7888_v16 = vmul.bf16 %v12912_v31, %v16963_v17  ;;  %v7890_v17 = vmul.bf16 %v12914_v44, %v16965_v51  ;;  %v17029_v31 = vld [vmem:[#allocation37_spill] sm:$0xff]  ;;  %v8297_v44 = vld [vmem:[#allocation3 + $0x10] sm:$0xf8] }
 0x6ff   : > { %v7950_v29 = vsel %vm1034_vm5, %v7940_v40, %v7949_v45  ;;  %v7981_v7 = vrot.slane %v7979_v1, 4  ;;  %v7984_v40 = vrot.slane %v7982_v35, 5 }
 0x700   : > { %v7988_v33 = vshrl.u32 %v7888_v16, 16  ;;  %v8006_v32 = vshrl.u32 %v7890_v17, 16  ;;  %v8009_v24 = vshll.u32 %v7890_v17, 16  ;;  %v17031_v17 = vld [vmem:[#allocation38_spill] sm:$0xff] }
 0x703   : > { %11867 = vmatmul.mubr.msk.bf16.vlgmr.msra.gmra.mrb[20].mxu1 %vm390_vm7, %v7923_v25  ;;  %v7958_v25 = vor.u32 %v7957_v56, %v7954_v5  ;;  %v7997_v5 = vshrl.u32 %v7889_v15, 16  ;;  %v8000_v56 = vshll.u32 %v7889_v15, 16 }
 0x704   : > { %11899 = vmatpush3.bf16.msra.mxu1 %v15551_v42  ;;  %11870 = vmatprep.mubr.msk.bf16.mxu1 %vm390_vm7, %v7932_v10  ;;  %v7963_v42 = vrot.slane %v7961_v21, 4  ;;  %v7976_v21 = vor.u32 %v7975_v62, %v7972_v39  ;;  %v8011_v39 = vrot.slane %v8009_v24, 5 }
 0x705   : > { %11932 = vmatprep.subr.bf16.mxu1 %v15603_v53  ;;  %v7959_v10 = vsel %vm1034_vm5, %v7949_v45, %v7958_v25  ;;  %v7985_v45 = vor.u32 %v7984_v40, %v7981_v7  ;;  %v7999_v30 = vrot.slane %v7997_v5, 4  ;;  %v8002_v58 = vrot.slane %v8000_v56, 5 }
 0x706   : > { %v7967_v0 = vor.u32 %v7966_v26, %v7963_v42 }
 0x707   : > { %v7986_v26 = vsel %vm1034_vm5, %v7976_v21, %v7985_v45  ;;  %v8003_v35 = vor.u32 %v8002_v58, %v7999_v30 }
 0x708   : > { %v7968_v6 = vsel %vm1034_vm5, %v7958_v25, %v7967_v0  ;;  %v7977_v41 = vsel %vm1034_vm5, %v7967_v0, %v7976_v21  ;;  %v7891_v25 = vmul.bf16 %v12915_v34, %v16966_v12  ;;  %v8008_v0 = vrot.slane %v8006_v32, 4 }
 0x709   : > { %v8314_v34 = vmul.bf16 %v8297_v44, %v16933_v60  ;;  %v17033_v60 = vld [vmem:[#allocation8_spill] sm:$0xff] }
 0x70a   : > { %v8015_v51 = vshrl.u32 %v7891_v25, 16  ;;  %v8012_v15 = vor.u32 %v8011_v39, %v8008_v0 }
 0x70b   : > { %11871 = vmatmul.mubr.msk.bf16.gmra.mrb[24].mxu1 %vm390_vm7, %v7941_v36  ;;  %v7991_v36 = vshll.u32 %v7888_v16, 16  ;;  %v7892_v16 = vmul.bf16 %v15522_v8, %v17029_v31  ;;  %v8338_v0 = vshll.u32 %v8314_v34, 16 }
 0x70c   : > { %11874 = vmatprep.mubr.msk.bf16.mxu1 %vm390_vm7, %v7950_v29  ;;  %v7990_v29 = vrot.slane %v7988_v33, 4  ;;  %v8017_v40 = vrot.slane %v8015_v51, 4  ;;  %v8013_v8 = vsel %vm1034_vm5, %v8003_v35, %v8012_v15 }
 0x70d   : > { %v7993_v42 = vrot.slane %v7991_v36, 5  ;;  %v8024_v21 = vshrl.u32 %v7892_v16, 16  ;;  %v8027_v33 = vshll.u32 %v7892_v16, 16 }
 0x70f   : > { %v7994_v1 = vor.u32 %v7993_v42, %v7990_v29  ;;  %v8026_v29 = vrot.slane %v8024_v21, 4  ;;  %v8029_v42 = vrot.slane %v8027_v33, 5  ;;  %v17036_v21 = vld [vmem:[#allocation25_spill] sm:$0xff] }
 0x711   : > { %v7995_v62 = vsel %vm1034_vm5, %v7985_v45, %v7994_v1  ;;  %v8004_v12 = vsel %vm1034_vm5, %v7994_v1, %v8003_v35  ;;  %v7877_v45 = vld [vmem:[#allocation3 + $0x88] sm:$0x1f]  ;;  %v8030_v35 = vor.u32 %v8029_v42, %v8026_v29 }
 0x713   : > { %11875 = vmatmul.mubr.msk.bf16.gmra.mrb[28].mxu1 %vm390_vm7, %v7959_v10  ;;  %v8018_v10 = vshll.u32 %v7891_v25, 16  ;;  %v17032_v25 = vld [vmem:[#allocation13_spill] sm:$0xff] }
 0x714   : > { %11878 = vmatprep.mubr.msk.bf16.mxu1 %vm390_vm7, %v7968_v6  ;;  %v17030_v6 = vld [vmem:[#allocation39_spill] sm:$0xff]  ;;  %v8315_v32 = vmul.bf16 %v17032_v25, %v16932_v14  ;;  %v17035_v14 = vld [vmem:[#allocation9_spill] sm:$0xff] }
 0x715   : > { %v7893_v7 = vmul.bf16 %v15519_v20, %v17030_v6  ;;  %v8020_v18 = vrot.slane %v8018_v10, 5  ;;  %v8335_v10 = vshrl.u32 %v8314_v34, 16  ;;  %v8317_v33 = vmul.bf16 %v17036_v21, %v17035_v14  ;;  %v15666_v14 = vld [vmem:[%s16677_s3 + $0x40] sm:$0xff]  }
 0x716   : > { %v8343_v39 = vshrl.u32 %v8315_v32, 16 }
 0x717   : > { %v8033_v36 = vshrl.u32 %v7893_v7, 16  ;;  %v8036_v5 = vshll.u32 %v7893_v7, 16  ;;  %v8021_v56 = vor.u32 %v8020_v18, %v8017_v40  ;;  %v17034_v18 = vld [vmem:[#allocation24_spill] sm:$0xff] }
 0x719   : > { %v8038_v30 = vrot.slane %v8036_v5, 5  ;;  %v8022_v58 = vsel %vm1034_vm5, %v8012_v15, %v8021_v56  ;;  %v8316_v15 = vmul.bf16 %v17034_v18, %v17033_v60  ;;  %v8340_v5 = vrot.slane %v8338_v0, 4 }
 0x71b   : > { %11879 = vmatmul.mubr.msk.bf16.gmra.mrb[32].mxu1 %vm390_vm7, %v7977_v41  ;;  %v7894_v41 = vmul.bf16 %v7877_v45, %v17031_v17  ;;  %v8345_v45 = vrot.slane %v8343_v39, 3  ;;  %v8355_v29 = vshll.u32 %v8316_v15, 16 }
 0x71c   : > { %11882 = vmatprep.mubr.msk.bf16.mxu1 %vm390_vm7, %v7986_v26  ;;  %v8035_v26 = vrot.slane %v8033_v36, 4  ;;  %v8337_v36 = vrot.slane %v8335_v10, 3 }
 0x71d   : > { %v8042_v24 = vshrl.u32 %v7894_v41, 16  ;;  %v8045_v1 = vshll.u32 %v7894_v41, 16  ;;  %v8352_v41 = vshrl.u32 %v8316_v15, 16 }
 0x71e   : > { %v8039_v51 = vor.u32 %v8038_v30, %v8035_v26  ;;  %v8361_v26 = vshrl.u32 %v8317_v33, 16  ;;  %v8364_v30 = vshll.u32 %v8317_v33, 16 }
 0x71f   : > { %v8044_v16 = vrot.slane %v8042_v24, 4  ;;  %v8047_v7 = vrot.slane %v8045_v1, 5  ;;  %v8354_v34 = vrot.slane %v8352_v41, 3  ;;  %v17037_v24 = vld [vmem:[#allocation10_spill] sm:$0xff] }
 0x720   : > { %v8040_v40 = vsel %vm1034_vm5, %v8030_v35, %v8039_v51  ;;  %v17038_v1 = vld [vmem:[#allocation26_spill] sm:$0xff]  ;;  %v8363_v0 = vrot.slane %v8361_v26, 3  ;;  %v8366_v39 = vrot.slane %v8364_v30, 4 }
 0x723   : > { %11883 = vmatmul.mubr.msk.bf16.gmra.mrb[36].mxu1 %vm390_vm7, %v7995_v62  ;;  %v8346_v62 = vshll.u32 %v8315_v32, 16  ;;  %v8357_v32 = vrot.slane %v8355_v29, 4  ;;  %v8321_v29 = vmul.bf16 %v15290_v46, %v16942_v43 }
 0x724   : > { %11886 = vmatprep.mubr.msk.bf16.mxu1 %vm390_vm7, %v8004_v12  ;;  %v8031_v12 = vsel %vm1034_vm5, %v8021_v56, %v8030_v35  ;;  %v8341_v56 = vor.u32 %v8340_v5, %v8337_v36  ;;  %v8318_v35 = vmul.bf16 %v17038_v1, %v17037_v24  ;;  %v17041_v5 = vld [vmem:[#allocation28_spill] sm:$0xff]  ;;  %v8322_v1 = vmul.bf16 %v15296_v2, %v16998_v19 }
 0x725   : > { %v8348_v44 = vrot.slane %v8346_v62, 4  ;;  %v17039_v62 = vld [vmem:[#allocation11_spill] sm:$0xff] }
 0x726   : > { %v8373_v60 = vshll.u32 %v8318_v35, 16 }
 0x727   : > { %v8349_v42 = vor.u32 %v8348_v44, %v8345_v45  ;;  %v8320_v45 = vmul.bf16 %v17041_v5, %v16941_v50  ;;  %v8397_v50 = vshrl.u32 %v8321_v29, 16 }
 0x728   : > { %v8375_v36 = vrot.slane %v8373_v60, 4 }
 0x729   : > { %v8350_v10 = vsel %vm1480_vm6, %v8341_v56, %v8349_v42  ;;  %v8391_v26 = vshll.u32 %v8320_v45, 16  ;;  %v8399_v46 = vrot.slane %v8397_v50, 3 }
 0x72b   : > { %11887 = vmatmul.mubr.msk.bf16.gmra.mrb[40].mxu1 %vm390_vm7, %v8013_v8  ;;  %v8048_v8 = vor.u32 %v8047_v7, %v8044_v16  ;;  %v17040_v16 = vld [vmem:[#allocation27_spill] sm:$0xff]  ;;  %v8393_v24 = vrot.slane %v8391_v26, 4 }
 0x72c   : > { %11890 = vmatprep.mubr.msk.bf16.mxu1 %vm390_vm7, %v8022_v58  ;;  %v8319_v7 = vmul.bf16 %v17040_v16, %v17039_v62 }
 0x72d   : > { %v8049_v58 = vsel %vm1034_vm5, %v8039_v51, %v8048_v8  ;;  %v8367_v51 = vor.u32 %v8366_v39, %v8363_v0  ;;  %v8406_v0 = vshrl.u32 %v8322_v1, 16  ;;  %v8409_v39 = vshll.u32 %v8322_v1, 16 }
 0x72e   : > { %v8379_v18 = vshrl.u32 %v8319_v7, 16  ;;  %v8382_v15 = vshll.u32 %v8319_v7, 16 }
 0x72f   : > { %v8408_v2 = vrot.slane %v8406_v0, 3  ;;  %v8411_v19 = vrot.slane %v8409_v39, 4 }
 0x730   : > { %v8381_v8 = vrot.slane %v8379_v18, 3  ;;  %v8384_v41 = vrot.slane %v8382_v15, 4 }
 0x731   : > { %v8412_v18 = vor.u32 %v8411_v19, %v8408_v2 }
 0x732   : > { %v8385_v30 = vor.u32 %v8384_v41, %v8381_v8  ;;  %v8327_v41 = vmul.bf16 %v15326_v48, %v17008_v22 }
 0x733   : > { %11891 = vmatmul.mubr.msk.bf16.gmra.mrb[44].mxu1 %vm390_vm7, %v8031_v12  ;;  %v8358_v12 = vor.u32 %v8357_v32, %v8354_v34 }
 0x734   : > { %11894 = vmatprep.mubr.msk.bf16.mxu1 %vm390_vm7, %v8040_v40  ;;  %v8370_v40 = vshrl.u32 %v8318_v35, 16  ;;  %v8323_v35 = vmul.bf16 %v15298_v38, %v17000_v54  ;;  %v8454_v50 = vshll.u32 %v8327_v41, 16 }
 0x735   : > { %v8359_v21 = vsel %vm1480_vm6, %v8349_v42, %v8358_v12  ;;  %v8368_v44 = vsel %vm1480_vm6, %v8358_v12, %v8367_v51  ;;  %v8388_v42 = vshrl.u32 %v8320_v45, 16 }
 0x736   : > { %v8372_v33 = vrot.slane %v8370_v40, 3  ;;  %v8415_v16 = vshrl.u32 %v8323_v35, 16  ;;  %v8418_v7 = vshll.u32 %v8323_v35, 16  ;;  %v8324_v40 = vmul.bf16 %v15315_v3, %v17002_v11 }
 0x737   : > { %v8390_v32 = vrot.slane %v8388_v42, 3  ;;  %v8456_v1 = vrot.slane %v8454_v50, 4 }
 0x738   : > { %v8376_v56 = vor.u32 %v8375_v36, %v8372_v33  ;;  %v8417_v38 = vrot.slane %v8415_v16, 3  ;;  %v8420_v54 = vrot.slane %v8418_v7, 4  ;;  %v8424_v15 = vshrl.u32 %v8324_v40, 16 }
 0x73a   : > { %v8377_v34 = vsel %vm1480_vm6, %v8367_v51, %v8376_v56  ;;  %v8386_v43 = vsel %vm1480_vm6, %v8376_v56, %v8385_v30  ;;  %v8325_v51 = vmul.bf16 %v15317_v55, %v17004_v28  ;;  %v8421_v33 = vor.u32 %v8420_v54, %v8417_v38 }
 0x73b   : > { %11895 = vmatmul.mubr.msk.bf16.gmra.mrb[48].mxu1 %vm390_vm7, %v8049_v58  ;;  %v8400_v58 = vshll.u32 %v8321_v29, 16  ;;  %v8426_v3 = vrot.slane %v8424_v15, 3 }
 0x73c   : > { %11900 = vmatprep.mubr.msk.bf16.mxu1 %vm390_vm7, %v8350_v10  ;;  %v8394_v10 = vor.u32 %v8393_v24, %v8390_v32  ;;  %v8433_v36 = vshrl.u32 %v8325_v51, 16  ;;  %v8436_v5 = vshll.u32 %v8325_v51, 16  ;;  %v8422_v8 = vsel %vm1480_vm6, %v8412_v18, %v8421_v33 }
 0x73d   : > { %v8328_v32 = vmul.bf16 %v15519_v20, %v17010_v57 }
 0x73e   : > { %v8395_v12 = vsel %vm1480_vm6, %v8385_v30, %v8394_v10  ;;  %v8435_v55 = vrot.slane %v8433_v36, 3  ;;  %v8438_v28 = vrot.slane %v8436_v5, 4  ;;  %v8451_v30 = vshrl.u32 %v8327_v41, 16  ;;  %v17049_v41 = vld [vmem:[#allocation35_spill] sm:$0xff] }
 0x73f   : > { %v8463_v35 = vshll.u32 %v8328_v32, 16 }
 0x740   : > { %v8439_v26 = vor.u32 %v8438_v28, %v8435_v55  ;;  %v8453_v24 = vrot.slane %v8451_v30, 3  ;;  %v17046_v55 = vld [vmem:[#allocation32_spill] sm:$0xff]  ;;  %v17047_v28 = vld [vmem:[#allocation33_spill] sm:$0xff]  ;;  %v17054_v30 = vld [vmem:[#allocation62_spill] sm:$0xff] }
 0x741   : > { %v8465_v7 = vrot.slane %v8463_v35, 4 }
 0x743   : > { %11901 = vmatmul.mubr.msk.bf16.vlgmr.msra.gmra.mrb[20].mxu1 %vm390_vm7, %v8359_v21  ;;  %v8427_v21 = vshll.u32 %v8324_v40, 16 }
 0x744   : > { %11933 = vmatpush3.bf16.msra.mxu1 %v15603_v53  ;;  %11904 = vmatprep.mubr.msk.bf16.mxu1 %vm390_vm7, %v8368_v44  ;;  %v8402_v53 = vrot.slane %v8400_v58, 4  ;;  %v8326_v44 = vmul.bf16 %v15324_v59, %v17006_v49  ;;  %v15702_v58 = vld [vmem:[#allocation3 + $0x88] sm:$0xff] }
 0x745   : > { %11966 = vmatprep.subr.bf16.mxu1 %v15666_v14  ;;  %v8429_v11 = vrot.slane %v8427_v21, 4  ;;  %v8783_v50 = vrot.slane %v15702_v58, 4 }
 0x746   : > { %v8403_v62 = vor.u32 %v8402_v53, %v8399_v46  ;;  %v8442_v56 = vshrl.u32 %v8326_v44, 16  ;;  %v8445_v42 = vshll.u32 %v8326_v44, 16  ;;  %v8460_v53 = vshrl.u32 %v8328_v32, 16  ;;  %v17044_v44 = vld [vmem:[#allocation30_spill] sm:$0xff] }
 0x747   : > { %v8430_v29 = vor.u32 %v8429_v11, %v8426_v3  ;;  %v17043_v11 = vld [vmem:[#allocation29_spill] sm:$0xff] }
 0x748   : > { %v8404_v60 = vsel %vm1480_vm6, %v8394_v10, %v8403_v62  ;;  %v8413_v45 = vsel %vm1480_vm6, %v8403_v62, %v8412_v18  ;;  %v8444_v49 = vrot.slane %v8442_v56, 3  ;;  %v8457_v10 = vor.u32 %v8456_v1, %v8453_v24  ;;  %v8313_v62 = vld [vmem:[#allocation3 + $0x90] sm:$0xf]  ;;  %v17052_v56 = vld [vmem:[#allocation60_spill] sm:$0xff] }
 0x749   : > { %v8431_v59 = vsel %vm1480_vm6, %v8421_v33, %v8430_v29  ;;  %v8440_v22 = vsel %vm1480_vm6, %v8430_v29, %v8439_v26  ;;  %v8462_v16 = vrot.slane %v8460_v53, 3  ;;  %v8733_v33 = vld [vmem:[#allocation3 + $0x10] sm:$0xf0]  ;;  %v17050_v29 = vld [vmem:[#allocation36_spill] sm:$0xff]  ;;  %v8785_v1 = vrot.slane %v8313_v62, 4  ;;  %v17058_v53 = vld [vmem:[#allocation65_spill] sm:$0xff] }
 0x74a   : > { %v8754_v36 = vrot.slane %v8733_v33, 4 }
 0x74b   : > { %11905 = vmatmul.mubr.msk.bf16.gmra.mrb[24].mxu1 %vm390_vm7, %v8377_v34  ;;  %v8447_v34 = vrot.slane %v8445_v42, 4  ;;  %v8466_v40 = vor.u32 %v8465_v7, %v8462_v16  ;;  %v9035_v42 = vmul.bf16 %v8733_v33, %v17024_v47  ;;  %v8784_v47 = vsel %vm1233_vm4, %v15582_v23, %v8783_v50  ;;  %v17061_v16 = vld [vmem:[#allocation69_spill] sm:$0xff]  ;;  %v17062_v7 = vld [vmem:[#allocation70_spill] sm:$0xff] }
 0x74c   : > { %11908 = vmatprep.mubr.msk.bf16.mxu1 %vm390_vm7, %v8386_v43  ;;  %v8329_v43 = vmul.bf16 %v15702_v58, %v17011_v4  ;;  %v8330_v4 = vmul.bf16 %v8313_v62, %v17012_v37  ;;  %v17042_v37 = vrot.slane %v17032_v25, 4  ;;  %v17048_v25 = vld [vmem:[#allocation34_spill] sm:$0xff]  ;;  %v17064_v33 = vmov 0.0  }
 0x74d   : > { %v8448_v46 = vor.u32 %v8447_v34, %v8444_v49  ;;  %v8467_v51 = vsel %vm1480_vm6, %v8457_v10, %v8466_v40  ;;  %v9059_v49 = vshll.u32 %v9035_v42, 16  ;;  %v17055_v34 = vrot.slane %v15326_v48, 4 }
 0x74e   : > { %v8469_v0 = vshrl.u32 %v8329_v43, 16  ;;  %v8472_v39 = vshll.u32 %v8329_v43, 16  ;;  %v8478_v38 = vshrl.u32 %v8330_v4, 16  ;;  %v8481_v54 = vshll.u32 %v8330_v4, 16  ;;  %v17063_v4 = vld [vmem:[#allocation68_spill] sm:$0xff] }
 0x74f   : > { %v8449_v57 = vsel %vm1480_vm6, %v8439_v26, %v8448_v46  ;;  %v8756_v3 = vsel %vm1233_vm4, %v8754_v36, %v17042_v37  ;;  %v17053_v26 = vld [vmem:[#allocation61_spill] sm:$0xff]  ;;  %v8782_v32 = vsel %vm1233_vm4, %v17055_v34, %v15582_v23  ;;  %v9061_v24 = vrot.slane %v9059_v49, 5  ;;  %v17056_v23 = vld [vmem:[#allocation63_spill] sm:$0xff]  ;;  %v15813_v36 = vld [vmem:[%s16679_s5 + $0x3] ss:$0 sm:$0xff] }
 0x750   : > { %v8471_v2 = vrot.slane %v8469_v0, 3  ;;  %v8474_v19 = vrot.slane %v8472_v39, 4  ;;  %v8480_v15 = vrot.slane %v8478_v38, 3  ;;  %v8483_v21 = vrot.slane %v8481_v54, 4  ;;  %v9034_v39 = vld [vmem:[#allocation3 + $0x90] sm:$0x1f] }
 0x752   : > { %v8484_v5 = vor.u32 %v8483_v21, %v8480_v15  ;;  %v9662_v15 = vld [vmem:[%s16680_s6 + $0x8] sm:$0xff] }
 0x753   : > { %11909 = vmatmul.mubr.msk.bf16.gmra.mrb[28].mxu1 %vm390_vm7, %v8395_v12  ;;  %v8458_v12 = vsel %vm1480_vm6, %v8448_v46, %v8457_v10  ;;  %v8786_v46 = vsel %vm1233_vm4, %v8783_v50, %v8785_v1 }
 0x754   : > { %11912 = vmatprep.mubr.msk.bf16.mxu1 %vm390_vm7, %v8404_v60  ;;  %v8475_v60 = vor.u32 %v8474_v19, %v8471_v2 }
 0x756   : > { %v8476_v18 = vsel %vm1480_vm6, %v8466_v40, %v8475_v60 }
 0x75b   : > { %11913 = vmatmul.mubr.msk.bf16.gmra.mrb[32].mxu1 %vm390_vm7, %v8413_v45  ;;  %v8485_v45 = vsel %vm1480_vm6, %v8475_v60, %v8484_v5 }
 0x75c   : > { %11916 = vmatprep.mubr.msk.bf16.mxu1 %vm390_vm7, %v8422_v8  ;;  %v17045_v8 = vld [vmem:[#allocation31_spill] sm:$0xff] }
 0x763   : > { %11917 = vmatmul.mubr.msk.bf16.gmra.mrb[36].mxu1 %vm390_vm7, %v8431_v59  ;;  %v9056_v59 = vshrl.u32 %v9035_v42, 16 }
 0x764   : > { %11920 = vmatprep.mubr.msk.bf16.mxu1 %vm390_vm7, %v8440_v22 }
 0x765   : > { %v9058_v22 = vrot.slane %v9056_v59, 4 }
 0x767   : > { %v9062_v43 = vor.u32 %v9061_v24, %v9058_v22 }
 0x769   : > { %v9071_v48 = vsel %vm1034_vm5, %v9062_v43, %v15404_v61  ;;  %v17057_v61 = vld [vmem:[#allocation64_spill] sm:$0xff] }
 0x76b   : > { %11921 = vmatmul.mubr.msk.bf16.gmra.mrb[40].mxu1 %vm390_vm7, %v8449_v57 }
 0x76c   : > { %11924 = vmatprep.mubr.msk.bf16.mxu1 %vm390_vm7, %v8458_v12 }
 0x773   : > { %11925 = vmatmul.mubr.msk.bf16.gmra.mrb[44].mxu1 %vm390_vm7, %v8467_v51 }
 0x774   : > { %11928 = vmatprep.mubr.msk.bf16.mxu1 %vm390_vm7, %v8476_v18 }
 0x77b   : > { %11929 = vmatmul.mubr.msk.bf16.gmra.mrb[48].mxu1 %vm390_vm7, %v8485_v45 }
 0x77c   : > { %11934 = vmatprep.mubr.msk.bf16.mxu1 %vm390_vm7, %v8756_v3 }
 0x783   : > { %11935 = vmatmul.mubr.msk.bf16.vlgmr.msra.gmra.mrb[20].mxu1 %vm390_vm7, %v17043_v11 }
 0x784   : > { %11967 = vmatpush3.bf16.msra.mxu1 %v15666_v14  ;;  %11938 = vmatprep.mubr.msk.bf16.mxu1 %vm390_vm7, %v17044_v44  ;;  %v17051_v14 = vld [vmem:[#allocation59_spill] sm:$0xff] }
 0x78b   : > { %11939 = vmatmul.mubr.msk.bf16.gmra.mrb[24].mxu1 %vm390_vm7, %v17045_v8 }
 0x78c   : > { %11942 = vmatprep.mubr.msk.bf16.mxu1 %vm390_vm7, %v17046_v55 }
 0x793   : > { %11943 = vmatmul.mubr.msk.bf16.gmra.mrb[28].mxu1 %vm390_vm7, %v17047_v28 }
 0x794   : > { %11946 = vmatprep.mubr.msk.bf16.mxu1 %vm390_vm7, %v17048_v25 }
 0x79b   : > { %11947 = vmatmul.mubr.msk.bf16.gmra.mrb[32].mxu1 %vm390_vm7, %v17049_v41 }
 0x79c   : > { %11950 = vmatprep.mubr.msk.bf16.mxu1 %vm390_vm7, %v17050_v29 }
 0x7a3   : > { %11951 = vmatmul.mubr.msk.bf16.gmra.mrb[36].mxu1 %vm390_vm7, %v17051_v14 }
 0x7a4   : > { %11954 = vmatprep.mubr.msk.bf16.mxu1 %vm390_vm7, %v17052_v56 }
 0x7ab   : > { %11955 = vmatmul.mubr.msk.bf16.gmra.mrb[40].mxu1 %vm390_vm7, %v17053_v26 }
 0x7ac   : > { %11958 = vmatprep.mubr.msk.bf16.mxu1 %vm390_vm7, %v17054_v30 }
 0x7b3   : > { %11959 = vmatmul.mubr.msk.bf16.gmra.mrb[44].mxu1 %vm390_vm7, %v8782_v32 }
 0x7b4   : > { %11962 = vmatprep.mubr.msk.bf16.mxu1 %vm390_vm7, %v8784_v47 }
 0x7bb   : > { %11963 = vmatmul.mubr.msk.bf16.gmra.mrb[48].mxu1 %vm390_vm7, %v8786_v46 }
 0x7bc   : > { %11968 = vmatprep.mubr.msk.bf16.mxu1 %vm390_vm7, %v9071_v48 }
 0x7c3   : > { %11969 = vmatmul.mubr.msk.bf16.vlgmr.msra.gmra.mrb[20].mxu1 %vm390_vm7, %v15410_v9  ;;  %v9049_v9 = vmul.bf16 %v15519_v20, %v17029_v31 }
 0x7c4   : > { %11972 = vmatprep.mubr.msk.bf16.mxu1 %vm390_vm7, %v15415_v13  ;;  %v17059_v13 = vld [vmem:[#allocation66_spill] sm:$0xff] }
 0x7c5   : > { %v9184_v35 = vshll.u32 %v9049_v9, 16 }
 0x7c7   : > { %v9186_v57 = vrot.slane %v9184_v35, 5 }
 0x7cb   : > { %11973 = vmatmul.mubr.msk.bf16.gmra.mrb[24].mxu1 %vm390_vm7, %v15418_v63  ;;  %v9050_v63 = vmul.bf16 %v15702_v58, %v17030_v6  ;;  %v9051_v6 = vmul.bf16 %v9034_v39, %v17031_v17  ;;  %v9661_v17 = vld [vmem:[%s16680_s6] sm:$0xff] }
 0x7cc   : > { %11976 = vmatprep.mubr.msk.bf16.mxu1 %vm390_vm7, %v15431_v27  ;;  %v17060_v27 = vld [vmem:[#allocation67_spill] sm:$0xff]  ;;  %v12050_v21 = vpack.c.bf16 %v9662_v15, %v9661_v17 }
 0x7cd   : > { %v9190_v10 = vshrl.u32 %v9050_v63, 16  ;;  %v9193_v0 = vshll.u32 %v9050_v63, 16  ;;  %v9199_v2 = vshrl.u32 %v9051_v6, 16  ;;  %v9202_v19 = vshll.u32 %v9051_v6, 16 }
 0x7ce   : > { %12051 = vmatpush3.bf16.msra.mxu0 %v12050_v21 }
 0x7cf   : > { %v9192_v20 = vrot.slane %v9190_v10, 4  ;;  %v9195_v31 = vrot.slane %v9193_v0, 5  ;;  %v9201_v38 = vrot.slane %v9199_v2, 4  ;;  %v9204_v54 = vrot.slane %v9202_v19, 5  ;;  %12007 = vmatprep.subr.mxu0 %v17064_v33 }
 0x7d1   : > { %v9196_v12 = vor.u32 %v9195_v31, %v9192_v20  ;;  %v9205_v51 = vor.u32 %v9204_v54, %v9201_v38 }
 0x7d3   : > { %11977 = vmatmul.mubr.msk.bf16.gmra.mrb[28].mxu1 %vm390_vm7, %v15434_v52  ;;  %v9181_v52 = vshrl.u32 %v9049_v9, 16  ;;  %v9206_v18 = vsel %vm1034_vm5, %v9196_v12, %v9205_v51 }
 0x7d4   : > { %11980 = vmatprep.mubr.msk.bf16.mxu1 %vm390_vm7, %v17056_v23 }
 0x7d5   : > { %v9183_v62 = vrot.slane %v9181_v52, 4 }
 0x7d7   : > { %v9187_v58 = vor.u32 %v9186_v57, %v9183_v62 }
 0x7d9   : > { %v9188_v40 = vsel %vm1034_vm5, %v17063_v4, %v9187_v58  ;;  %v9197_v60 = vsel %vm1034_vm5, %v9187_v58, %v9196_v12 }
 0x7db   : > { %11981 = vmatmul.mubr.msk.bf16.gmra.mrb[32].mxu1 %vm390_vm7, %v17057_v61 }
 0x7dc   : > { %11984 = vmatprep.mubr.msk.bf16.mxu1 %vm390_vm7, %v17058_v53 }
 0x7e3   : > { %11985 = vmatmul.mubr.msk.bf16.gmra.mrb[36].mxu1 %vm390_vm7, %v17059_v13 }
 0x7e4   : > { %11988 = vmatprep.mubr.msk.bf16.mxu1 %vm390_vm7, %v17060_v27 }
 0x7eb   : > { %11989 = vmatmul.mubr.msk.bf16.gmra.mrb[40].mxu1 %vm390_vm7, %v17061_v16 }
 0x7ec   : > { %11992 = vmatprep.mubr.msk.bf16.mxu1 %vm390_vm7, %v17062_v7 }
 0x7f3   : > { %11993 = vmatmul.mubr.msk.bf16.gmra.mrb[44].mxu1 %vm390_vm7, %v9188_v40 }
 0x7f4   : > { %11996 = vmatprep.mubr.msk.bf16.mxu1 %vm390_vm7, %v9197_v60 }
 0x7fb   : > { %11997 = vmatmul.mubr.msk.bf16.gmra.mrb[48].mxu1 %vm390_vm7, %v9206_v18 }
 0x896   : > { %v11970_v5 = vpop.f32.mrb[20].mxu1 }
 0x897   : > { %v9295_v45 = vpop.f32.mrb[21].mxu1  ;;  %v15816_v37 = vadd.f32 %v11970_v5, %v15813_v36 }
 0x898   : > { %v15819_v3 = vadd.f32 %v15813_v36, %v9295_v45  ;;  %v11971_v11 = vpop.f32.mrb[22].mxu1 }
 0x899   : > { %v9298_v44 = vpop.f32.mrb[23].mxu1  ;;  %v15824_v55 = vadd.f32 %v11971_v11, %v15813_v36  ;;  %v9561_v25 = vmul.f32 %v15816_v37, %v15816_v37  ;;  %v9493_v42 = vsel %vm390_vm7, %v15816_v37, 0.0 }
 0x89a   : > { %v9559_v8 = vmul.f32 %v15819_v3, %v15819_v3  ;;  %v15827_v28 = vadd.f32 %v15813_v36, %v9298_v44  ;;  %v9490_v41 = vsel %vm390_vm7, %v15819_v3, 0.0 }
 0x89b   : > { %v9562_v30 = vmul.f32 %v15824_v55, %v15824_v55  ;;  %v9594_v47 = vsel %vm390_vm7, %v9561_v25, 0.0  ;;  %v9495_v22 = vsel %vm390_vm7, %v15824_v55, 0.0 }
 0x89c   : > { %v9491_v29 = vsel %vm390_vm7, %v15827_v28, 0.0  ;;  %v9560_v14 = vmul.f32 %v15827_v28, %v15827_v28  ;;  %v9591_v26 = vsel %vm390_vm7, %v9559_v8, 0.0 }
 0x89d   : > { %v9492_v56 = vadd.f32 %v9491_v29, %v9490_v41  ;;  %v9596_v61 = vsel %vm390_vm7, %v9562_v30, 0.0 }
 0x89e   : > { %v9592_v50 = vsel %vm390_vm7, %v9560_v14, 0.0  ;;  %v11974_v59 = vpop.f32.mrb[24].mxu1 }
 0x89f   : > { %v9494_v49 = vadd.f32 %v9493_v42, %v9492_v56  ;;  %v9593_v34 = vadd.f32 %v9592_v50, %v9591_v26  ;;  %v9311_v32 = vpop.f32.mrb[25].mxu1  ;;  %v15850_v46 = vadd.f32 %v11974_v59, %v15813_v36 }
 0x8a0   : > { %v15847_v24 = vadd.f32 %v15813_v36, %v9311_v32  ;;  %v11975_v1 = vpop.f32.mrb[26].mxu1 }
 0x8a1   : > { %v9595_v43 = vadd.f32 %v9594_v47, %v9593_v34  ;;  %v9496_v48 = vadd.f32 %v9495_v22, %v9494_v49  ;;  %v9314_v23 = vpop.f32.mrb[27].mxu1  ;;  %v15861_v52 = vadd.f32 %v11975_v1, %v15813_v36  ;;  %v9565_v0 = vmul.f32 %v15850_v46, %v15850_v46 }
 0x8a2   : > { %v9497_v53 = vsel %vm390_vm7, %v15847_v24, 0.0  ;;  %v9563_v9 = vmul.f32 %v15847_v24, %v15847_v24  ;;  %v15858_v13 = vadd.f32 %v15813_v36, %v9314_v23  ;;  %v9501_v16 = vsel %vm390_vm7, %v15850_v46, 0.0 }
 0x8a3   : > { %v9498_v63 = vadd.f32 %v9497_v53, %v9496_v48  ;;  %v9597_v27 = vadd.f32 %v9596_v61, %v9595_v43  ;;  %v9566_v31 = vmul.f32 %v15861_v52, %v15861_v52  ;;  %v9503_v12 = vsel %vm390_vm7, %v15861_v52, 0.0 }
 0x8a4   : > { %v9598_v35 = vsel %vm390_vm7, %v9563_v9, 0.0  ;;  %v9499_v10 = vsel %vm390_vm7, %v15858_v13, 0.0  ;;  %v9564_v57 = vmul.f32 %v15858_v13, %v15858_v13  ;;  %v9602_v40 = vsel %vm390_vm7, %v9565_v0, 0.0 }
 0x8a5   : > { %v9599_v39 = vadd.f32 %v9598_v35, %v9597_v27  ;;  %v9500_v62 = vadd.f32 %v9499_v10, %v9498_v63  ;;  %v9604_v21 = vsel %vm390_vm7, %v9566_v31, 0.0 }
 0x8a6   : > { %v11978_v20 = vpop.f32.mrb[28].mxu1  ;;  %v9600_v6 = vsel %vm390_vm7, %v9564_v57, 0.0 }
 0x8a7   : > { %v9502_v7 = vadd.f32 %v9501_v16, %v9500_v62  ;;  %v9327_v58 = vpop.f32.mrb[29].mxu1  ;;  %v9601_v2 = vadd.f32 %v9600_v6, %v9599_v39  ;;  %v15882_v60 = vadd.f32 %v11978_v20, %v15813_v36 }
 0x8a8   : > { %v15878_v19 = vadd.f32 %v15813_v36, %v9327_v58  ;;  %v11979_v4 = vpop.f32.mrb[30].mxu1 }
 0x8a9   : > { %v9504_v38 = vadd.f32 %v9503_v12, %v9502_v7  ;;  %v9330_v54 = vpop.f32.mrb[31].mxu1  ;;  %v9603_v51 = vadd.f32 %v9602_v40, %v9601_v2  ;;  %v15893_v45 = vadd.f32 %v11979_v4, %v15813_v36  ;;  %v9569_v41 = vmul.f32 %v15882_v60, %v15882_v60 }
 0x8aa   : > { %v9505_v18 = vsel %vm390_vm7, %v15878_v19, 0.0  ;;  %v9567_v17 = vmul.f32 %v15878_v19, %v15878_v19  ;;  %v15889_v15 = vadd.f32 %v15813_v36, %v9330_v54  ;;  %v9509_v14 = vsel %vm390_vm7, %v15882_v60, 0.0 }
 0x8ab   : > { %v9506_v5 = vadd.f32 %v9505_v18, %v9504_v38  ;;  %v9605_v11 = vadd.f32 %v9604_v21, %v9603_v51  ;;  %v9570_v30 = vmul.f32 %v15893_v45, %v15893_v45  ;;  %v9511_v49 = vsel %vm390_vm7, %v15893_v45, 0.0 }
 0x8ac   : > { %v9606_v44 = vsel %vm390_vm7, %v9567_v17, 0.0  ;;  %v9507_v8 = vsel %vm390_vm7, %v15889_v15, 0.0  ;;  %v9568_v25 = vmul.f32 %v15889_v15, %v15889_v15  ;;  %v9610_v22 = vsel %vm390_vm7, %v9569_v41, 0.0 }
 0x8ad   : > { %v9508_v29 = vadd.f32 %v9507_v8, %v9506_v5  ;;  %v9607_v56 = vadd.f32 %v9606_v44, %v9605_v11  ;;  %v9612_v63 = vsel %vm390_vm7, %v9570_v30, 0.0 }
 0x8ae   : > { %v9608_v42 = vsel %vm390_vm7, %v9568_v25, 0.0  ;;  %v11982_v26 = vpop.f32.mrb[32].mxu1 }
 0x8af   : > { %v9510_v50 = vadd.f32 %v9509_v14, %v9508_v29  ;;  %v9343_v59 = vpop.f32.mrb[33].mxu1  ;;  %v9609_v34 = vadd.f32 %v9608_v42, %v9607_v56  ;;  %v15914_v1 = vadd.f32 %v11982_v26, %v15813_v36 }
 0x8b0   : > { %v15910_v32 = vadd.f32 %v15813_v36, %v9343_v59  ;;  %v11983_v47 = vpop.f32.mrb[34].mxu1 }
 0x8b1   : > { %v9512_v43 = vadd.f32 %v9511_v49, %v9510_v50  ;;  %v9346_v48 = vpop.f32.mrb[35].mxu1  ;;  %v9611_v23 = vadd.f32 %v9610_v22, %v9609_v34  ;;  %v15925_v35 = vadd.f32 %v11983_v47, %v15813_v36  ;;  %v9573_v57 = vmul.f32 %v15914_v1, %v15914_v1 }
 0x8b2   : > { %v9513_v61 = vsel %vm390_vm7, %v15910_v32, 0.0  ;;  %v9571_v53 = vmul.f32 %v15910_v32, %v15910_v32  ;;  %v15921_v9 = vadd.f32 %v15813_v36, %v9346_v48  ;;  %v9517_v20 = vsel %vm390_vm7, %v15914_v1, 0.0 }
 0x8b3   : > { %v9514_v27 = vadd.f32 %v9513_v61, %v9512_v43  ;;  %v9613_v10 = vadd.f32 %v9612_v63, %v9611_v23  ;;  %v9574_v58 = vmul.f32 %v15925_v35, %v15925_v35  ;;  %v9519_v4 = vsel %vm390_vm7, %v15925_v35, 0.0 }
 0x8b4   : > { %v9614_v0 = vsel %vm390_vm7, %v9571_v53, 0.0  ;;  %v9515_v39 = vsel %vm390_vm7, %v15921_v9, 0.0  ;;  %v9572_v62 = vmul.f32 %v15921_v9, %v15921_v9  ;;  %v9618_v51 = vsel %vm390_vm7, %v9573_v57, 0.0 }
 0x8b5   : > { %v9516_v16 = vadd.f32 %v9515_v39, %v9514_v27  ;;  %v9615_v31 = vadd.f32 %v9614_v0, %v9613_v10  ;;  %v9620_v25 = vsel %vm390_vm7, %v9574_v58, 0.0 }
 0x8b6   : > { %v9616_v7 = vsel %vm390_vm7, %v9572_v62, 0.0  ;;  %v11986_v6 = vpop.f32.mrb[36].mxu1 }
 0x8b7   : > { %v9518_v12 = vadd.f32 %v9517_v20, %v9516_v16  ;;  %v9359_v2 = vpop.f32.mrb[37].mxu1  ;;  %v9617_v40 = vadd.f32 %v9616_v7, %v9615_v31  ;;  %v15946_v18 = vadd.f32 %v11986_v6, %v15813_v36 }
 0x8b8   : > { %v15942_v38 = vadd.f32 %v15813_v36, %v9359_v2  ;;  %v11987_v54 = vpop.f32.mrb[38].mxu1 }
 0x8b9   : > { %v9520_v17 = vadd.f32 %v9519_v4, %v9518_v12  ;;  %v9362_v21 = vpop.f32.mrb[39].mxu1  ;;  %v9619_v5 = vadd.f32 %v9618_v51, %v9617_v40  ;;  %v15957_v29 = vadd.f32 %v11987_v54, %v15813_v36  ;;  %v9577_v30 = vmul.f32 %v15946_v18, %v15946_v18 }
 0x8ba   : > { %v9521_v11 = vsel %vm390_vm7, %v15942_v38, 0.0  ;;  %v9575_v44 = vmul.f32 %v15942_v38, %v15942_v38  ;;  %v15953_v8 = vadd.f32 %v15813_v36, %v9362_v21  ;;  %v9525_v59 = vsel %vm390_vm7, %v15946_v18, 0.0 }
 0x8bb   : > { %v9522_v41 = vadd.f32 %v9521_v11, %v9520_v17  ;;  %v9621_v14 = vadd.f32 %v9620_v25, %v9619_v5  ;;  %v9578_v22 = vmul.f32 %v15957_v29, %v15957_v29  ;;  %v9527_v23 = vsel %vm390_vm7, %v15957_v29, 0.0 }
 0x8bc   : > { %v9622_v56 = vsel %vm390_vm7, %v9575_v44, 0.0  ;;  %v9523_v42 = vsel %vm390_vm7, %v15953_v8, 0.0  ;;  %v9576_v26 = vmul.f32 %v15953_v8, %v15953_v8  ;;  %v9626_v27 = vsel %vm390_vm7, %v9577_v30, 0.0 }
 0x8bd   : > { %v9524_v50 = vadd.f32 %v9523_v42, %v9522_v41  ;;  %v9623_v49 = vadd.f32 %v9622_v56, %v9621_v14  ;;  %v9628_v31 = vsel %vm390_vm7, %v9578_v22, 0.0 }
 0x8be   : > { %v9624_v34 = vsel %vm390_vm7, %v9576_v26, 0.0  ;;  %v11990_v47 = vpop.f32.mrb[40].mxu1 }
 0x8bf   : > { %v9526_v43 = vadd.f32 %v9525_v59, %v9524_v50  ;;  %v9375_v48 = vpop.f32.mrb[41].mxu1  ;;  %v9625_v61 = vadd.f32 %v9624_v34, %v9623_v49  ;;  %v15978_v10 = vadd.f32 %v11990_v47, %v15813_v36 }
 0x8c0   : > { %v15974_v53 = vadd.f32 %v15813_v36, %v9375_v48  ;;  %v11991_v63 = vpop.f32.mrb[42].mxu1 }
 0x8c1   : > { %v9528_v0 = vadd.f32 %v9527_v23, %v9526_v43  ;;  %v9378_v39 = vpop.f32.mrb[43].mxu1  ;;  %v9627_v62 = vadd.f32 %v9626_v27, %v9625_v61  ;;  %v15989_v6 = vadd.f32 %v11991_v63, %v15813_v36  ;;  %v9581_v40 = vmul.f32 %v15978_v10, %v15978_v10 }
 0x8c2   : > { %v9529_v57 = vsel %vm390_vm7, %v15974_v53, 0.0  ;;  %v9579_v16 = vmul.f32 %v15974_v53, %v15974_v53  ;;  %v15985_v20 = vadd.f32 %v15813_v36, %v9378_v39  ;;  %v9533_v51 = vsel %vm390_vm7, %v15978_v10, 0.0 }
 0x8c3   : > { %v9530_v7 = vadd.f32 %v9529_v57, %v9528_v0  ;;  %v9629_v58 = vadd.f32 %v9628_v31, %v9627_v62  ;;  %v9582_v11 = vmul.f32 %v15989_v6, %v15989_v6  ;;  %v9535_v41 = vsel %vm390_vm7, %v15989_v6, 0.0 }
 0x8c4   : > { %v9630_v12 = vsel %vm390_vm7, %v9579_v16, 0.0  ;;  %v9531_v2 = vsel %vm390_vm7, %v15985_v20, 0.0  ;;  %v9580_v4 = vmul.f32 %v15985_v20, %v15985_v20  ;;  %v9634_v26 = vsel %vm390_vm7, %v9581_v40, 0.0 }
 0x8c5   : > { %v9532_v54 = vadd.f32 %v9531_v2, %v9530_v7  ;;  %v9631_v17 = vadd.f32 %v9630_v12, %v9629_v58  ;;  %v9636_v43 = vsel %vm390_vm7, %v9582_v11, 0.0 }
 0x8c6   : > { %v9632_v21 = vsel %vm390_vm7, %v9580_v4, 0.0  ;;  %v11994_v5 = vpop.f32.mrb[44].mxu1 }
 0x8c7   : > { %v9534_v44 = vadd.f32 %v9533_v51, %v9532_v54  ;;  %v9391_v25 = vpop.f32.mrb[45].mxu1  ;;  %v9633_v14 = vadd.f32 %v9632_v21, %v9631_v17  ;;  %v16010_v30 = vadd.f32 %v11994_v5, %v15813_v36 }
 0x8c8   : > { %v16006_v56 = vadd.f32 %v15813_v36, %v9391_v25  ;;  %v11995_v42 = vpop.f32.mrb[46].mxu1 }
 0x8c9   : > { %v9536_v50 = vadd.f32 %v9535_v41, %v9534_v44  ;;  %v9394_v59 = vpop.f32.mrb[47].mxu1  ;;  %v9635_v49 = vadd.f32 %v9634_v26, %v9633_v14  ;;  %v16021_v23 = vadd.f32 %v11995_v42, %v15813_v36  ;;  %v9585_v39 = vmul.f32 %v16010_v30, %v16010_v30 }
 0x8ca   : > { %v9537_v34 = vsel %vm390_vm7, %v16006_v56, 0.0  ;;  %v9583_v47 = vmul.f32 %v16006_v56, %v16006_v56  ;;  %v16017_v22 = vadd.f32 %v15813_v36, %v9394_v59  ;;  %v9541_v57 = vsel %vm390_vm7, %v16010_v30, 0.0 }
 0x8cb   : > { %v9538_v48 = vadd.f32 %v9537_v34, %v9536_v50  ;;  %v9637_v61 = vadd.f32 %v9636_v43, %v9635_v49  ;;  %v9586_v58 = vmul.f32 %v16021_v23, %v16021_v23  ;;  %v9543_v4 = vsel %vm390_vm7, %v16021_v23, 0.0 }
 0x8cc   : > { %17065 = vst [vmem:[#allocation12_spill] sm:$0xff] %v16017_v22  ;;  %v9638_v63 = vsel %vm390_vm7, %v9583_v47, 0.0  ;;  %v9539_v27 = vsel %vm390_vm7, %v16017_v22, 0.0  ;;  %v9584_v0 = vmul.f32 %v16017_v22, %v16017_v22  ;;  %v9642_v17 = vsel %vm390_vm7, %v9585_v39, 0.0 }
 0x8cd   : > { %v9540_v62 = vadd.f32 %v9539_v27, %v9538_v48  ;;  %v9639_v16 = vadd.f32 %v9638_v63, %v9637_v61  ;;  %v9644_v42 = vsel %vm390_vm7, %v9586_v58, 0.0 }
 0x8ce   : > { %v9640_v31 = vsel %vm390_vm7, %v9584_v0, 0.0  ;;  %v11998_v7 = vpop.f32.mrb[48].mxu1 }
 0x8cf   : > { %v9542_v12 = vadd.f32 %v9541_v57, %v9540_v62  ;;  %v9407_v2 = vpop.f32.mrb[49].mxu1  ;;  %v9641_v40 = vadd.f32 %v9640_v31, %v9639_v16  ;;  %v16042_v21 = vadd.f32 %v11998_v7, %v15813_v36 }
 0x8d0   : > { %v16038_v54 = vadd.f32 %v15813_v36, %v9407_v2  ;;  %v11999_v51 = vpop.f32.mrb[50].mxu1 }
 0x8d1   : > { %17067 = vst [vmem:[#allocation50_spill] sm:$0xff] %v16042_v21  ;;  %v9544_v5 = vadd.f32 %v9543_v4, %v9542_v12  ;;  %v9410_v11 = vpop.f32.mrb[51].mxu1  ;;  %v9643_v44 = vadd.f32 %v9642_v17, %v9641_v40  ;;  %v16053_v50 = vadd.f32 %v11999_v51, %v15813_v36  ;;  %v9589_v43 = vmul.f32 %v16042_v21, %v16042_v21 }
 0x8d2   : > { %17066 = vst [vmem:[#allocation14_spill] sm:$0xff] %v16038_v54  ;;  %v9545_v25 = vsel %vm390_vm7, %v16038_v54, 0.0  ;;  %v9587_v41 = vmul.f32 %v16038_v54, %v16038_v54  ;;  %v16049_v14 = vadd.f32 %v15813_v36, %v9410_v11  ;;  %v9549_v61 = vsel %vm390_vm7, %v16042_v21, 0.0 }
 0x8d3   : > { %v9546_v26 = vadd.f32 %v9545_v25, %v9544_v5  ;;  %17069 = vst [vmem:[#allocation41_spill] sm:$0xff] %v16053_v50  ;;  %v9645_v59 = vadd.f32 %v9644_v42, %v9643_v44  ;;  %v9590_v27 = vmul.f32 %v16053_v50, %v16053_v50  ;;  %v9551_v39 = vsel %vm390_vm7, %v16053_v50, 0.0 }
 0x8d4   : > { %17068 = vst [vmem:[#allocation15_spill] sm:$0xff] %v16049_v14  ;;  %v9646_v49 = vsel %vm390_vm7, %v9587_v41, 0.0  ;;  %v9547_v34 = vsel %vm390_vm7, %v16049_v14, 0.0  ;;  %v9588_v47 = vmul.f32 %v16049_v14, %v16049_v14  ;;  %v9650_v57 = vsel %vm390_vm7, %v9589_v43, 0.0 }
 0x8d5   : > { %v9548_v48 = vadd.f32 %v9547_v34, %v9546_v26  ;;  %v9647_v63 = vadd.f32 %v9646_v49, %v9645_v59  ;;  %v9652_v7 = vsel %vm390_vm7, %v9590_v27, 0.0  ;;  %v9745_v59 = vld [vmem:[%s16681_s7] sm:$0xff] }
 0x8d6   : > { %v9648_v36 = vsel %vm390_vm7, %v9588_v47, 0.0  ;;  %v10187_v49 = vld [vmem:[%s16678_s4] sm:$0x3]  ;;  %v12917_v27 = vld [vmem:[%s13111_s19 + $0x4] sm:$0xf] }
 0x8d7   : > { %v9550_v0 = vadd.f32 %v9549_v61, %v9548_v48  ;;  %v9649_v62 = vadd.f32 %v9648_v36, %v9647_v63  ;;  %v12916_v36 = vld [vmem:[%s13111_s19] sm:$0xf] }
 0x8d9   : > { %v9552_v16 = vadd.f32 %v9551_v39, %v9550_v0  ;;  %v9651_v31 = vadd.f32 %v9650_v57, %v9649_v62  ;;  %v11007_v0 = vcombine.low %v12916_v36, %v12917_v27  ;;  %v10257_v62 = vsel %vm1315_vm0, %v10187_v49, 0  ;;  %v12936_v27 = vld [vmem:[%s13111_s19 + $0x50] sm:$0xf] }
 0x8db   : > { %v9553_v58 = vrot.slane %v9552_v16, 4  ;;  %v9653_v12 = vadd.f32 %v9652_v7, %v9651_v31  ;;  %v12919_v31 = vld [vmem:[%s13111_s19 + $0xc] sm:$0xf] }
 0x8dd   : > { %v9554_v2 = vadd.f32 %v9553_v58, %v9552_v16  ;;  %v9654_v4 = vrot.slane %v9653_v12, 4  ;;  %v12918_v16 = vld [vmem:[%s13111_s19 + $0x8] sm:$0xf]  ;;  %v12920_v58 = vld [vmem:[%s13111_s19 + $0x10] sm:$0xf] }
 0x8de   : > { %v11008_v7 = vcombine.low %v12918_v16, %v12919_v31  ;;  %v12940_v31 = vld [vmem:[%s13111_s19 + $0x60] sm:$0xf] }
 0x8df   : > { %v9555_v40 = vrot.slane %v9554_v2, 2  ;;  %v9655_v51 = vadd.f32 %v9654_v4, %v9653_v12  ;;  %v12921_v12 = vld [vmem:[%s13111_s19 + $0x14] sm:$0xf]  ;;  %v12922_v4 = vld [vmem:[%s13111_s19 + $0x18] sm:$0xf] }
 0x8e1   : > { %v9556_v17 = vadd.f32 %v9555_v40, %v9554_v2  ;;  %v9656_v5 = vrot.slane %v9655_v51, 2  ;;  %v11009_v2 = vcombine.low %v12920_v58, %v12921_v12  ;;  %v12923_v40 = vld [vmem:[%s13111_s19 + $0x1c] sm:$0xf]  ;;  %v12942_v12 = vld [vmem:[%s13111_s19 + $0x68] sm:$0xf] }
 0x8e3   : > { %v9557_v11 = vrot.slane %v9556_v17, 1  ;;  %v9657_v44 = vadd.f32 %v9656_v5, %v9655_v51  ;;  %v11010_v51 = vcombine.low %v12922_v4, %v12923_v40  ;;  %v12925_v5 = vld [vmem:[%s13111_s19 + $0x24] sm:$0xf]  ;;  %v12944_v40 = vld [vmem:[%s13111_s19 + $0x70] sm:$0xf] }
 0x8e5   : > { %v9658_v25 = vrot.slane %v9657_v44, 1  ;;  %v9558_v41 = vadd.f32 %v9557_v11, %v9556_v17  ;;  %v12924_v17 = vld [vmem:[%s13111_s19 + $0x20] sm:$0xf] }
 0x8e6   : > { %v11011_v11 = vcombine.low %v12924_v17, %v12925_v5  ;;  %v12946_v5 = vld [vmem:[%s13111_s19 + $0x7c] sm:$0xf] }
 0x8e7   : > { %v9659_v42 = vadd.f32 %v9658_v25, %v9657_v44  ;;  %v12926_v44 = vld [vmem:[%s13111_s19 + $0x28] sm:$0xf]  ;;  %v12927_v25 = vld [vmem:[%s13111_s19 + $0x2c] sm:$0xf] }
 0x8e9   : > { %v9660_v26 = vsel %vm5349_vm11, %v9558_v41, %v9659_v42  ;;  %v11012_v41 = vcombine.low %v12926_v44, %v12927_v25  ;;  %v12928_v42 = vld [vmem:[%s13111_s19 + $0x30] sm:$0xf] }
 0x8ea   : > { %12005 = vmatmul.mubr.msk.f32.vlgmr.msra.gmra.mrb[32].mxu0 %vm390_vm7, %v9660_v26  ;;  %v12929_v26 = vld [vmem:[%s13111_s19 + $0x34] sm:$0xf] }
 0x8eb   : > { %12009 = vmatprep.mubr.msk.f32.mxu0 %vm12960_vm10, %v17064_v33  ;;  %12008 = vmatpush3.msra.mxu0 %v9745_v59  ;;  %v11013_v59 = vcombine.low %v12928_v42, %v12929_v26 }
 0x8ec   : > { %12576 = vmatprep.subr.msk.bf16.mxu0 %vm1315_vm0, %v10187_v49  ;;  %v12930_v49 = vld [vmem:[%s13111_s19 + $0x38] sm:$0xf] }
 0x9bd   : > { %v9732_v34 = vpop.f32.mrb[32].mxu0 }
 0x9be   : > { %v9736_v47 = vmul.f32 %v9732_v34, %v9732_v34  ;;  %v12006_v43 = vpop.f32.mrb[33].mxu0 }
 0x9bf   : > { %v12932_v43 = vld [vmem:[%s13111_s19 + $0x40] sm:$0xf] }
 0x9c0   : > { %v9738_v48 = vrot.slane %v9736_v47, 7 }
 0x9c2   : > { %v9740_v61 = vsub.f32 %v9732_v34, %v9738_v48  ;;  %v12933_v48 = vld [vmem:[%s13111_s19 + $0x44] sm:$0xf] }
 0x9c4   : > { %v9741_v33 = vmax.f32 %v9740_v61, 0.0  ;;  %v11015_v61 = vcombine.low %v12932_v43, %v12933_v48 }
 0x9c6   : > { %v9742_v63 = vadd.f32 1e-05, %v9741_v33  ;;  %v12934_v33 = vld [vmem:[%s13111_s19 + $0x48] sm:$0xf] }
 0x9c8   : > { %12749 = vrsqrt.f32 %v9742_v63  ;;  %v12935_v63 = vld [vmem:[%s13111_s19 + $0x4c] sm:$0xf] }
 0x9c9   : > { %v11016_v36 = vcombine.low %v12934_v33, %v12935_v63  ;;  %v16151_v33 = vld [vmem:[%s16679_s5 + $0x4] ss:$0 sm:$0xff] }
 0x9d2   : > { %v12750_v39 = vpop.eup %12749 }
 0x9d3   : > { %v9744_v57 = vsel %vm5349_vm11, %v9732_v34, %v12750_v39  ;;  %v12931_v34 = vld [vmem:[%s13111_s19 + $0x3c] sm:$0xf] }
 0x9d4   : > { %12010 = vmatmul.mubr.msk.f32.vlgmr.msra.gmra.mrb[34].mxu0 %vm5436_vm12, %v9744_v57  ;;  %v11014_v47 = vcombine.low %v12930_v49, %v12931_v34  ;;  %v12939_v57 = vld [vmem:[%s13111_s19 + $0x5c] sm:$0xf] }
 0x9d5   : > { %12013 = vmatpush3.bf16.msra.mxu0 %v10257_v62  ;;  %12014 = vmatprep.mubr.msk.bf16.mxu0 %vm383_vm1, %v11007_v0  ;;  %v12937_v0 = vld [vmem:[%s13111_s19 + $0x54] sm:$0xf]  ;;  %v12938_v62 = vld [vmem:[%s13111_s19 + $0x58] sm:$0xf] }
 0x9d6   : > { %v11017_v39 = vcombine.low %v12936_v27, %v12937_v0  ;;  %v11018_v16 = vcombine.low %v12938_v62, %v12939_v57 }
 0x9d8   : > { %12015 = vmatmul.mubr.msk.bf16.vlgmr.msra.gmra.mrb[36].mxu0 %vm383_vm1, %v11008_v7  ;;  %v12941_v7 = vld [vmem:[%s13111_s19 + $0x64] sm:$0xf] }
 0x9d9   : > { %12018 = vmatprep.mubr.msk.bf16.mxu0 %vm383_vm1, %v11009_v2  ;;  %v11019_v58 = vcombine.low %v12940_v31, %v12941_v7  ;;  %v12943_v2 = vld [vmem:[%s13111_s19 + $0x6c] sm:$0xf] }
 0x9da   : > { %v11020_v4 = vcombine.low %v12942_v12, %v12943_v2 }
 0x9e0   : > { %12019 = vmatmul.mubr.msk.bf16.gmra.mrb[40].mxu0 %vm383_vm1, %v11010_v51  ;;  %v12945_v51 = vld [vmem:[%s13111_s19 + $0x74] sm:$0xf] }
 0x9e1   : > { %12022 = vmatprep.mubr.msk.bf16.mxu0 %vm383_vm1, %v11011_v11  ;;  %v11021_v17 = vcombine.low %v12944_v40, %v12945_v51  ;;  %v12947_v11 = vld [vmem:[%s13111_s19 + $0x78] sm:$0xf] }
 0x9e2   : > { %v11022_v44 = vcombine.low %v12947_v11, %v12946_v5 }
 0x9e8   : > { %12023 = vmatmul.mubr.msk.bf16.gmra.mrb[44].mxu0 %vm383_vm1, %v11012_v41  ;;  %v17070_v41 = vld [vmem:[#allocation47_spill] sm:$0xff] }
 0x9e9   : > { %12026 = vmatprep.mubr.msk.bf16.mxu0 %vm383_vm1, %v11013_v59  ;;  %v17071_v59 = vld [vmem:[#allocation5_spill] sm:$0xff] }
 0x9ea   : > { %v17072_v49 = vsub.s32 1, %v17071_v59 }
 0x9f0   : > { %12027 = vmatmul.mubr.msk.bf16.gmra.mrb[48].mxu0 %vm383_vm1, %v11014_v47 }
 0x9f1   : > { %12030 = vmatprep.mubr.msk.bf16.mxu0 %vm383_vm1, %v11015_v61 }
 0x9f8   : > { %12031 = vmatmul.mubr.msk.bf16.gmra.mrb[52].mxu0 %vm383_vm1, %v11016_v36 }
 0x9f9   : > { %12034 = vmatprep.mubr.msk.bf16.mxu0 %vm383_vm1, %v11017_v39  ;;  %v16169_v39 = vld [vmem:[%s16679_s5 + $0x5] ss:$0 sm:$0xff] }
 0xa00   : > { %12035 = vmatmul.mubr.msk.bf16.gmra.mrb[56].mxu0 %vm383_vm1, %v11018_v16 }
 0xa01   : > { %12038 = vmatprep.mubr.msk.bf16.mxu0 %vm383_vm1, %v11019_v58 }
 0xa08   : > { %12039 = vmatmul.mubr.msk.bf16.gmra.mrb[60].mxu0 %vm383_vm1, %v11020_v4 }
 0xa09   : > { %12042 = vmatprep.mubr.msk.bf16.mxu0 %vm383_vm1, %v11021_v17 }
 0xa10   : > { %12043 = vmatmul.mubr.msk.bf16.gmra.mrb[64].mxu0 %vm383_vm1, %v11022_v44 }
 0xaa7   : > { %v9815_v25 = vpop.f32.mrb[34].mxu0 }
 0xaa8   : > { %v16134_v42 = vrot.slane %v9815_v25, %v17070_v41  ;;  %v12011_v26 = vpop.f32.mrb[35].mxu0  ;;  %v16138_v34 = vrot.slane %v9815_v25, %v17072_v49 }
 0xaaa   : > { %v9825_v47 = vsub.f32 %v15816_v37, %v16134_v42  ;;  %v9823_v43 = vsub.f32 %v15819_v3, %v16134_v42  ;;  %v9826_v48 = vsub.f32 %v15824_v55, %v16134_v42  ;;  %v9824_v61 = vsub.f32 %v15827_v28, %v16134_v42 }
 0xaab   : > { %v16153_v63 = vpop.f32.mrb[36].mxu0  ;;  %v9829_v36 = vsub.f32 %v15850_v46, %v16134_v42  ;;  %v9827_v37 = vsub.f32 %v15847_v24, %v16134_v42  ;;  %v9830_v0 = vsub.f32 %v15861_v52, %v16134_v42  ;;  %v9828_v16 = vsub.f32 %v15858_v13, %v16134_v42 }
 0xaac   : > { %v9861_v3 = vmul.f32 %v16138_v34, %v9825_v47  ;;  %v9859_v55 = vmul.f32 %v16138_v34, %v9823_v43  ;;  %v16161_v27 = vpop.f32.mrb[37].mxu0  ;;  %v9862_v28 = vmul.f32 %v16138_v34, %v9826_v48  ;;  %v9860_v24 = vmul.f32 %v16138_v34, %v9824_v61 }
 0xaad   : > { %v16171_v46 = vpop.f32.mrb[38].mxu0  ;;  %v9865_v62 = vmul.f32 %v16138_v34, %v9829_v36  ;;  %v9863_v57 = vmul.f32 %v16138_v34, %v9827_v37  ;;  %v9866_v17 = vmul.f32 %v16138_v34, %v9830_v0  ;;  %v9864_v25 = vmul.f32 %v16138_v34, %v9828_v16 }
 0xaae   : > { %v9897_v31 = vmul.f32 %v16151_v33, %v9861_v3  ;;  %v9895_v52 = vmul.f32 %v16151_v33, %v9859_v55  ;;  %v9898_v7 = vmul.f32 %v16151_v33, %v9862_v28  ;;  %v16181_v58 = vpop.f32.mrb[39].mxu0  ;;  %v9896_v12 = vmul.f32 %v16151_v33, %v9860_v24 }
 0xaaf   : > { %v9901_v2 = vmul.f32 %v16151_v33, %v9865_v62  ;;  %v9899_v4 = vmul.f32 %v16151_v33, %v9863_v57  ;;  %v9902_v49 = vmul.f32 %v16151_v33, %v9866_v17  ;;  %v9900_v48 = vmul.f32 %v16151_v33, %v9864_v25 }
 0xab0   : > { %v16187_v40 = vadd.f32 %v16169_v39, %v9897_v31  ;;  %v16190_v51 = vadd.f32 %v16169_v39, %v9895_v52  ;;  %v16193_v13 = vadd.f32 %v16169_v39, %v9898_v7  ;;  %v16197_v5 = vadd.f32 %v16169_v39, %v9896_v12 }
 0xab1   : > { %v16200_v11 = vadd.f32 %v16169_v39, %v9901_v2  ;;  %v16203_v44 = vadd.f32 %v16169_v39, %v9899_v4  ;;  %v9833_v61 = vsub.f32 %v15882_v60, %v16134_v42  ;;  %v16216_v3 = vadd.f32 %v16169_v39, %v9902_v49  ;;  %v16236_v2 = vld [vmem:[%s16679_s5 + $0x6] ss:$0 sm:$0xff] }
 0xab2   : > { %v10976_v41 = vmul.f32 -1.442695, %v16187_v40  ;;  %v10974_v26 = vmul.f32 -1.442695, %v16190_v51  ;;  %v10977_v59 = vmul.f32 -1.442695, %v16193_v13  ;;  %v16220_v0 = vadd.f32 %v16169_v39, %v9900_v48 }
 0xab3   : > { %v10975_v47 = vmul.f32 -1.442695, %v16197_v5  ;;  %v12020_v43 = vpop.f32.mrb[40].mxu0  ;;  %v10980_v36 = vmul.f32 -1.442695, %v16200_v11  ;;  %v9869_v24 = vmul.f32 %v16138_v34, %v9833_v61  ;;  %v9831_v57 = vsub.f32 %v15878_v19, %v16134_v42 }
 0xab4   : > { %12751 = vpow2.f32 %v10976_v41  ;;  %v10309_v37 = vpop.f32.mrb[41].mxu0  ;;  %v10978_v55 = vmul.f32 -1.442695, %v16203_v44  ;;  %v10981_v62 = vmul.f32 -1.442695, %v16216_v3  ;;  %v9834_v7 = vsub.f32 %v15893_v45, %v16134_v42 }
 0xab5   : > { %12753 = vpow2.f32 %v10974_v26  ;;  %v12021_v28 = vpop.f32.mrb[42].mxu0  ;;  %v10979_v16 = vmul.f32 -1.442695, %v16220_v0  ;;  %v9905_v31 = vmul.f32 %v16151_v33, %v9869_v24  ;;  %v9867_v52 = vmul.f32 %v16138_v34, %v9831_v57 }
 0xab6   : > { %12755 = vpow2.f32 %v10977_v59  ;;  %v10312_v60 = vpop.f32.mrb[43].mxu0  ;;  %v9832_v12 = vsub.f32 %v15889_v15, %v16134_v42  ;;  %v9837_v4 = vsub.f32 %v15914_v1, %v16134_v42  ;;  %v9835_v17 = vsub.f32 %v15910_v32, %v16134_v42 }
 0xab7   : > { %12757 = vpow2.f32 %v10975_v47  ;;  %v16239_v19 = vadd.f32 %v16169_v39, %v9905_v31  ;;  %v9903_v45 = vmul.f32 %v16151_v33, %v9867_v52  ;;  %v9870_v15 = vmul.f32 %v16138_v34, %v9834_v7 }
 0xab8   : > { %12759 = vpow2.f32 %v10980_v36  ;;  %v9868_v25 = vmul.f32 %v16138_v34, %v9832_v12  ;;  %v9873_v59 = vmul.f32 %v16138_v34, %v9837_v4  ;;  %v9871_v49 = vmul.f32 %v16138_v34, %v9835_v17 }
 0xab9   : > { %12761 = vpow2.f32 %v10978_v55  ;;  %v10984_v41 = vmul.f32 -1.442695, %v16239_v19  ;;  %v16255_v1 = vadd.f32 %v16153_v63, %v16236_v2  ;;  %v16258_v32 = vadd.f32 %v16169_v39, %v9903_v45 }
 0xaba   : > { %12763 = vpow2.f32 %v10981_v62  ;;  %v9906_v48 = vmul.f32 %v16151_v33, %v9870_v15  ;;  %v16265_v61 = vadd.f32 %v16236_v2, %v16161_v27  ;;  %v9904_v55 = vmul.f32 %v16151_v33, %v9868_v25 }
 0xabb   : > { %12765 = vpow2.f32 %v10979_v16  ;;  %v16249_v26 = vpop.f32.mrb[44].mxu0  ;;  %v9909_v24 = vmul.f32 %v16151_v33, %v9873_v59  ;;  %v16273_v62 = vadd.f32 %v16171_v46, %v16236_v2  ;;  %v16277_v57 = vadd.f32 %v16236_v2, %v16181_v58 }
 0xabc   : > { %v16260_v47 = vpop.f32.mrb[45].mxu0  ;;  %12767 = vpow2.f32 %v10984_v41  ;;  %v16280_v16 = vadd.f32 %v12020_v43, %v16236_v2  ;;  %v10982_v27 = vmul.f32 -1.442695, %v16258_v32  ;;  %v16286_v12 = vadd.f32 %v16236_v2, %v10309_v37 }
 0xabd   : > { %v16267_v36 = vpop.f32.mrb[46].mxu0  ;;  %v16289_v4 = vadd.f32 %v12021_v28, %v16236_v2  ;;  %v9907_v46 = vmul.f32 %v16151_v33, %v9871_v49  ;;  %v16293_v45 = vadd.f32 %v16236_v2, %v10312_v60  ;;  %v16296_v43 = vadd.f32 %v16169_v39, %v9906_v48 }
 0xabe   : > { %v12752_v63 = vpop.eup %12751  ;;  %v16283_v31 = vpop.f32.mrb[47].mxu0  ;;  %12769 = vpow2.f32 %v10982_v27  ;;  %v16299_v37 = vadd.f32 %v16169_v39, %v9904_v55  ;;  %v16302_v28 = vadd.f32 %v16169_v39, %v9909_v24  ;;  %v9838_v60 = vsub.f32 %v15925_v35, %v16134_v42 }
 0xabf   : > { %v12754_v52 = vpop.eup %12753  ;;  %v10061_v7 = vadd.f32 1.0, %v12752_v63  ;;  %v9836_v49 = vsub.f32 %v15921_v9, %v16134_v42  ;;  %v16311_v55 = vadd.f32 %v16169_v39, %v9907_v46  ;;  %v9841_v24 = vsub.f32 %v15946_v18, %v16134_v42 }
 0xac0   : > { %v12756_v17 = vpop.eup %12755  ;;  %v10059_v58 = vadd.f32 1.0, %v12754_v52  ;;  %v9874_v35 = vmul.f32 %v16138_v34, %v9838_v60  ;;  %v9839_v9 = vsub.f32 %v15942_v38, %v16134_v42  ;;  %v10988_v38 = vmul.f32 -1.442695, %v16302_v28 }
 0xac1   : > { %v12758_v15 = vpop.eup %12757  ;;  %12771 = vrcp.f32 %v10061_v7  ;;  %v10062_v25 = vadd.f32 1.0, %v12756_v17 }
 0xac2   : > { %v12760_v41 = vpop.eup %12759  ;;  %12773 = vrcp.f32 %v10059_v58  ;;  %v10060_v59 = vadd.f32 1.0, %v12758_v15 }
 0xac3   : > { %v12762_v48 = vpop.eup %12761  ;;  %12775 = vrcp.f32 %v10062_v25  ;;  %v10065_v63 = vadd.f32 1.0, %v12760_v41  ;;  %v16308_v27 = vpop.f32.mrb[48].mxu0  ;;  %v10985_v25 = vmul.f32 -1.442695, %v16296_v43  ;;  %v9872_v41 = vmul.f32 %v16138_v34, %v9836_v49 }
 0xac4   : > { %v12764_v52 = vpop.eup %12763  ;;  %12777 = vrcp.f32 %v10060_v59  ;;  %v10063_v7 = vadd.f32 1.0, %v12762_v48  ;;  %v16315_v17 = vpop.f32.mrb[49].mxu0  ;;  %v10983_v59 = vmul.f32 -1.442695, %v16299_v37  ;;  %v9910_v48 = vmul.f32 %v16151_v33, %v9874_v35 }
 0xac5   : > { %v12766_v58 = vpop.eup %12765  ;;  %12779 = vrcp.f32 %v10065_v63  ;;  %v10066_v15 = vadd.f32 1.0, %v12764_v52  ;;  %v16321_v46 = vpop.f32.mrb[50].mxu0  ;;  %v9908_v63 = vmul.f32 %v16151_v33, %v9872_v41  ;;  %v9877_v52 = vmul.f32 %v16138_v34, %v9841_v24 }
 0xac6   : > { %12781 = vrcp.f32 %v10063_v7  ;;  %v10064_v18 = vadd.f32 1.0, %v12766_v58  ;;  %v16326_v60 = vpop.f32.mrb[51].mxu0  ;;  %v12768_v14 = vpop.eup %12767  ;;  %v16332_v49 = vadd.f32 %v16169_v39, %v9910_v48  ;;  %v9875_v7 = vmul.f32 %v16138_v34, %v9839_v9 }
 0xac7   : > { %12783 = vrcp.f32 %v10066_v15  ;;  %v10069_v50 = vadd.f32 1.0, %v12768_v14  ;;  %v16337_v35 = vadd.f32 %v16249_v26, %v16236_v2  ;;  %v16340_v58 = vadd.f32 %v16169_v39, %v9908_v63 }
 0xac8   : > { %12785 = vrcp.f32 %v10064_v18  ;;  %v9913_v15 = vmul.f32 %v16151_v33, %v9877_v52  ;;  %v12770_v41 = vpop.eup %12769  ;;  %v10986_v14 = vmul.f32 -1.442695, %v16311_v55  ;;  %v9911_v24 = vmul.f32 %v16151_v33, %v9875_v7 }
 0xac9   : > { %12787 = vpow2.f32 %v10985_v25  ;;  %v9842_v9 = vsub.f32 %v15957_v29, %v16134_v42  ;;  %v10067_v48 = vadd.f32 1.0, %v12770_v41  ;;  %v10989_v26 = vmul.f32 -1.442695, %v16332_v49 }
 0xaca   : > { %12789 = vrcp.f32 %v10069_v50  ;;  %v16350_v25 = vadd.f32 %v16169_v39, %v9913_v15  ;;  %v10987_v54 = vmul.f32 -1.442695, %v16340_v58  ;;  %v16357_v7 = vadd.f32 %v16169_v39, %v9911_v24 }
 0xacb   : > { %v12772_v18 = vpop.eup %12771  ;;  %12791 = vpow2.f32 %v10983_v59  ;;  %v16352_v63 = vpop.f32.mrb[52].mxu0  ;;  %v9840_v15 = vsub.f32 %v15953_v8, %v16134_v42  ;;  %v9878_v8 = vmul.f32 %v16138_v34, %v9842_v9 }
 0xacc   : > { %v12774_v52 = vpop.eup %12773  ;;  %v10157_v50 = vmul.f32 %v12772_v18, %v16187_v40  ;;  %12793 = vpow2.f32 %v10988_v38  ;;  %v16359_v29 = vpop.f32.mrb[53].mxu0  ;;  %v10992_v40 = vmul.f32 -1.442695, %v16350_v25  ;;  %v10990_v22 = vmul.f32 -1.442695, %v16357_v7 }
 0xacd   : > { %17073 = vst [vmem:[#allocation16_spill] sm:$0xff] %v16359_v29  ;;  %v12776_v41 = vpop.eup %12775  ;;  %v10155_v59 = vmul.f32 %v12774_v52, %v16190_v51  ;;  %12795 = vrcp.f32 %v10067_v48  ;;  %v16368_v38 = vpop.f32.mrb[54].mxu0  ;;  %v9914_v9 = vmul.f32 %v16151_v33, %v9878_v8 }
 0xace   : > { %17074 = vst [vmem:[#allocation42_spill] sm:$0xff] %v16368_v38  ;;  %v12778_v24 = vpop.eup %12777  ;;  %v10422_v18 = vadd.f32 %v16255_v1, %v10157_v50  ;;  %v10158_v21 = vmul.f32 %v12776_v41, %v16193_v13  ;;  %12797 = vpow2.f32 %v10986_v14  ;;  %v16375_v29 = vpop.f32.mrb[55].mxu0  ;;  %v10326_v14 = vadd.f32 %v16236_v2, %v16260_v47 }
 0xacf   : > { %v12780_v51 = vpop.eup %12779  ;;  %v10420_v48 = vadd.f32 %v16265_v61, %v10155_v59  ;;  %v10156_v52 = vmul.f32 %v12778_v24, %v16197_v5  ;;  %12799 = vpow2.f32 %v10989_v26  ;;  %v16405_v41 = vadd.f32 %v16169_v39, %v9914_v9 }
 0xad0   : > { %v12782_v38 = vpop.eup %12781  ;;  %10454 = vst.msk [vmem:[%s16364_s21 + $0x10] sm:$0xff] %vm390_vm7, %v10422_v18  ;;  %v10423_v13 = vadd.f32 %v16273_v62, %v10158_v21  ;;  %v10161_v1 = vmul.f32 %v12780_v51, %v16200_v11  ;;  %12801 = vpow2.f32 %v10987_v54  ;;  %v9876_v54 = vmul.f32 %v16138_v34, %v9840_v15 }
 0xad1   : > { %v12784_v50 = vpop.eup %12783  ;;  %10452 = vst.msk [vmem:[%s16364_s21] sm:$0xff] %vm390_vm7, %v10420_v48  ;;  %v10421_v5 = vadd.f32 %v16277_v57, %v10156_v52  ;;  %v10159_v61 = vmul.f32 %v12782_v38, %v16203_v44  ;;  %12803 = vpow2.f32 %v10992_v40  ;;  %v16402_v57 = vadd.f32 %v16267_v36, %v16236_v2 }
 0xad2   : > { %v12786_v26 = vpop.eup %12785  ;;  %10455 = vst.msk [vmem:[%s16364_s21 + $0x18] sm:$0xff] %vm390_vm7, %v10423_v13  ;;  %v10426_v21 = vadd.f32 %v16280_v16, %v10161_v1  ;;  %v10162_v11 = vmul.f32 %v12784_v50, %v16216_v3  ;;  %12805 = vpow2.f32 %v10990_v22  ;;  %v16423_v24 = vadd.f32 %v16236_v2, %v16283_v31 }
 0xad3   : > { %v12788_v47 = vpop.eup %12787  ;;  %10453 = vst.msk [vmem:[%s16364_s21 + $0x8] sm:$0xff] %vm390_vm7, %v10421_v5  ;;  %v10424_v44 = vadd.f32 %v16286_v12, %v10159_v61  ;;  %v10160_v62 = vmul.f32 %v12786_v26, %v16220_v0  ;;  %v16407_v16 = vpop.f32.mrb[56].mxu0  ;;  %v9912_v12 = vmul.f32 %v16151_v33, %v9876_v54  ;;  %v9845_v0 = vsub.f32 %v15978_v10, %v16134_v42 }
 0xad4   : > { %v12790_v22 = vpop.eup %12789  ;;  %10458 = vst.msk [vmem:[%s16364_s21 + $0x30] sm:$0xff] %vm390_vm7, %v10426_v21  ;;  %v10427_v3 = vadd.f32 %v16289_v4, %v10162_v11  ;;  %v10070_v59 = vadd.f32 1.0, %v12788_v47  ;;  %v16415_v40 = vpop.f32.mrb[57].mxu0  ;;  %v10993_v4 = vmul.f32 -1.442695, %v16405_v41  ;;  %v9843_v13 = vsub.f32 %v15974_v53, %v16134_v42 }
 0xad5   : > { %v12792_v36 = vpop.eup %12791  ;;  %10456 = vst.msk [vmem:[%s16364_s21 + $0x20] sm:$0xff] %vm390_vm7, %v10424_v44  ;;  %v10425_v38 = vadd.f32 %v16293_v45, %v10160_v62  ;;  %v10165_v15 = vmul.f32 %v12790_v22, %v16239_v19  ;;  %v16426_v18 = vpop.f32.mrb[58].mxu0  ;;  %v16431_v48 = vadd.f32 %v16169_v39, %v9912_v12  ;;  %v9881_v45 = vmul.f32 %v16138_v34, %v9845_v0 }
 0xad6   : > { %v12794_v51 = vpop.eup %12793  ;;  %10459 = vst.msk [vmem:[%s16364_s21 + $0x38] sm:$0xff] %vm390_vm7, %v10427_v3  ;;  %12807 = vrcp.f32 %v10070_v59  ;;  %v10068_v10 = vadd.f32 1.0, %v12792_v36  ;;  %v16434_v19 = vpop.f32.mrb[59].mxu0  ;;  %v9879_v53 = vmul.f32 %v16138_v34, %v9843_v13  ;;  %v9846_v22 = vsub.f32 %v15989_v6, %v16134_v42 }
 0xad7   : > { %v12796_v52 = vpop.eup %12795  ;;  %10457 = vst.msk [vmem:[%s16364_s21 + $0x28] sm:$0xff] %vm390_vm7, %v10425_v38  ;;  %v10430_v31 = vadd.f32 %v16337_v35, %v10165_v15  ;;  %v10073_v8 = vadd.f32 1.0, %v12794_v51  ;;  %12809 = vpow2.f32 %v10993_v4  ;;  %v10991_v5 = vmul.f32 -1.442695, %v16431_v48 }
 0xad8   : > { %v12798_v1 = vpop.eup %12797  ;;  %v10163_v50 = vmul.f32 %v12796_v52, %v16258_v32  ;;  %12811 = vrcp.f32 %v10068_v10  ;;  %v9917_v61 = vmul.f32 %v16151_v33, %v9881_v45  ;;  %v16448_v35 = vadd.f32 %v16308_v27, %v16236_v2 }
 0xad9   : > { %v12800_v9 = vpop.eup %12799  ;;  %10462 = vst.msk [vmem:[%s16364_s21 + $0x50] sm:$0xff] %vm390_vm7, %v10430_v31  ;;  %12813 = vrcp.f32 %v10073_v8  ;;  %v10071_v26 = vadd.f32 1.0, %v12798_v1  ;;  %v9915_v62 = vmul.f32 %v16151_v33, %v9879_v53  ;;  %v9882_v6 = vmul.f32 %v16138_v34, %v9846_v22 }
 0xada   : > { %v12802_v21 = vpop.eup %12801  ;;  %v10428_v11 = vadd.f32 %v10326_v14, %v10163_v50  ;;  %v10074_v32 = vadd.f32 1.0, %v12800_v9  ;;  %12815 = vpow2.f32 %v10991_v5  ;;  %v16452_v54 = vadd.f32 %v16169_v39, %v9917_v61 }
 0xadb   : > { %v12804_v47 = vpop.eup %12803  ;;  %12817 = vrcp.f32 %v10071_v26  ;;  %v10072_v44 = vadd.f32 1.0, %v12802_v21  ;;  %v16457_v27 = vpop.f32.mrb[60].mxu0  ;;  %v16463_v14 = vadd.f32 %v16236_v2, %v16315_v17  ;;  %v16469_v38 = vadd.f32 %v16169_v39, %v9915_v62 }
 0xadc   : > { %v12806_v3 = vpop.eup %12805  ;;  %10460 = vst.msk [vmem:[%s16364_s21 + $0x40] sm:$0xff] %vm390_vm7, %v10428_v11  ;;  %12819 = vrcp.f32 %v10074_v32  ;;  %v10077_v59 = vadd.f32 1.0, %v12804_v47  ;;  %v10996_v12 = vmul.f32 -1.442695, %v16452_v54  ;;  %v16466_v0 = vpop.f32.mrb[61].mxu0  ;;  %v10353_v4 = vadd.f32 %v16321_v46, %v16236_v2 }
 0xadd   : > { %12821 = vrcp.f32 %v10072_v44  ;;  %v10075_v36 = vadd.f32 1.0, %v12806_v3  ;;  %v16472_v15 = vpop.f32.mrb[62].mxu0  ;;  %v9844_v17 = vsub.f32 %v15985_v20, %v16134_v42  ;;  %v9849_v51 = vsub.f32 %v16010_v30, %v16134_v42 }
 0xade   : > { %12823 = vrcp.f32 %v10077_v59  ;;  %v16480_v10 = vpop.f32.mrb[63].mxu0  ;;  %v16484_v45 = vadd.f32 %v16236_v2, %v16326_v60  ;;  %v10994_v52 = vmul.f32 -1.442695, %v16469_v38  ;;  %v9918_v31 = vmul.f32 %v16151_v33, %v9882_v6 }
 0xadf   : > { %12825 = vrcp.f32 %v10075_v36  ;;  %v9880_v46 = vmul.f32 %v16138_v34, %v9844_v17  ;;  %v9885_v20 = vmul.f32 %v16138_v34, %v9849_v51  ;;  %v9847_v30 = vsub.f32 %v16006_v56, %v16134_v42 }
 0xae0   : > { %v12808_v8 = vpop.eup %12807  ;;  %12827 = vpow2.f32 %v10996_v12  ;;  %v10366_v60 = vadd.f32 %v16352_v63, %v16236_v2  ;;  %v16496_v50 = vadd.f32 %v16169_v39, %v9918_v31  ;;  %v9850_v11 = vsub.f32 %v16021_v23, %v16134_v42 }
 0xae1   : > { %v12810_v13 = vpop.eup %12809  ;;  %v10166_v1 = vmul.f32 %v12808_v8, %v16296_v43  ;;  %12829 = vpow2.f32 %v10994_v52  ;;  %v9916_v9 = vmul.f32 %v16151_v33, %v9880_v46  ;;  %v9921_v26 = vmul.f32 %v16151_v33, %v9885_v20 }
 0xae2   : > { %v12812_v5 = vpop.eup %12811  ;;  %v10078_v61 = vadd.f32 1.0, %v12810_v13  ;;  %v9883_v53 = vmul.f32 %v16138_v34, %v9847_v30  ;;  %v10997_v63 = vmul.f32 -1.442695, %v16496_v50  ;;  %v17075_v30 = vld [vmem:[#allocation16_spill] sm:$0xff] }
 0xae3   : > { %v12814_v56 = vpop.eup %12813  ;;  %v10431_v21 = vadd.f32 %v16402_v57, %v10166_v1  ;;  %v10164_v43 = vmul.f32 %v12812_v5, %v16299_v37  ;;  %v16506_v32 = vpop.f32.mrb[64].mxu0  ;;  %v16510_v62 = vadd.f32 %v16169_v39, %v9916_v9  ;;  %v16513_v22 = vadd.f32 %v16169_v39, %v9921_v26 }
 0xae4   : > { %v12816_v47 = vpop.eup %12815  ;;  %v10169_v44 = vmul.f32 %v12814_v56, %v16302_v28  ;;  %12831 = vrcp.f32 %v10078_v61  ;;  %v16515_v57 = vpop.f32.mrb[65].mxu0  ;;  %v9919_v28 = vmul.f32 %v16151_v33, %v9883_v53  ;;  %v10358_v13 = vadd.f32 %v16236_v2, %v17075_v30  ;;  %v17076_v53 = vld [vmem:[#allocation12_spill] sm:$0xff] }
 0xae5   : > { %v12818_v37 = vpop.eup %12817  ;;  %10463 = vst.msk [vmem:[%s16364_s21 + $0x58] sm:$0xff] %vm390_vm7, %v10431_v21  ;;  %v10429_v23 = vadd.f32 %v16423_v24, %v10164_v43  ;;  %v10076_v3 = vadd.f32 1.0, %v12816_v47  ;;  %12833 = vpow2.f32 %v10997_v63  ;;  %v16521_v59 = vpop.f32.mrb[66].mxu0  ;;  %v10995_v17 = vmul.f32 -1.442695, %v16510_v62 }
 0xae6   : > { %v12820_v12 = vpop.eup %12819  ;;  %v10434_v36 = vadd.f32 %v16448_v35, %v10169_v44  ;;  %v10167_v6 = vmul.f32 %v12818_v37, %v16311_v55  ;;  %v11000_v51 = vmul.f32 -1.442695, %v16513_v22  ;;  %v16527_v52 = vpop.f32.mrb[67].mxu0  ;;  %v16533_v8 = vadd.f32 %v16169_v39, %v9919_v28  ;;  %v17078_v44 = vld [vmem:[#allocation50_spill] sm:$0xff] }
 0xae7   : > { %v12822_v31 = vpop.eup %12821  ;;  %10461 = vst.msk [vmem:[%s16364_s21 + $0x48] sm:$0xff] %vm390_vm7, %v10429_v23  ;;  %v10170_v24 = vmul.f32 %v12820_v12, %v16332_v49  ;;  %12835 = vrcp.f32 %v10076_v3  ;;  %v9886_v35 = vmul.f32 %v16138_v34, %v9850_v11  ;;  %v9848_v56 = vsub.f32 %v17076_v53, %v16134_v42  ;;  %v17077_v11 = vld [vmem:[#allocation42_spill] sm:$0xff] }
 0xae8   : > { %v12824_v46 = vpop.eup %12823  ;;  %10466 = vst.msk [vmem:[%s16364_s21 + $0x70] sm:$0xff] %vm390_vm7, %v10434_v36  ;;  %v10432_v55 = vadd.f32 %v16463_v14, %v10167_v6  ;;  %v10168_v20 = vmul.f32 %v12822_v31, %v16340_v58  ;;  %12837 = vpow2.f32 %v10995_v17  ;;  %v10998_v61 = vmul.f32 -1.442695, %v16533_v8  ;;  %v17079_v37 = vld [vmem:[#allocation14_spill] sm:$0xff]  ;;  %v17080_v31 = vld [vmem:[#allocation41_spill] sm:$0xff] }
 0xae9   : > { %v12826_v49 = vpop.eup %12825  ;;  %v10435_v1 = vadd.f32 %v10353_v4, %v10170_v24  ;;  %v10173_v5 = vmul.f32 %v12824_v46, %v16350_v25  ;;  %12839 = vpow2.f32 %v11000_v51  ;;  %v9922_v26 = vmul.f32 %v16151_v33, %v9886_v35 }
 0xaea   : > { %v12828_v9 = vpop.eup %12827  ;;  %10464 = vst.msk [vmem:[%s16364_s21 + $0x60] sm:$0xff] %vm390_vm7, %v10432_v55  ;;  %v10433_v14 = vadd.f32 %v16484_v45, %v10168_v20  ;;  %v10171_v58 = vmul.f32 %v12826_v49, %v16357_v7  ;;  %12841 = vpow2.f32 %v10998_v61  ;;  %v9884_v7 = vmul.f32 %v16138_v34, %v9848_v56 }
 0xaeb   : > { %v12830_v21 = vpop.eup %12829  ;;  %10467 = vst.msk [vmem:[%s16364_s21 + $0x78] sm:$0xff] %vm390_vm7, %v10435_v1  ;;  %v10438_v25 = vadd.f32 %v10366_v60, %v10173_v5  ;;  %v10081_v4 = vadd.f32 1.0, %v12828_v9  ;;  %v16556_v45 = vadd.f32 %v16169_v39, %v9922_v26  ;;  %v10369_v47 = vadd.f32 %v17077_v11, %v16236_v2 }
 0xaec   : > { %10465 = vst.msk [vmem:[%s16364_s21 + $0x68] sm:$0xff] %vm390_vm7, %v10433_v14  ;;  %v10436_v43 = vadd.f32 %v10358_v13, %v10171_v58  ;;  %v10079_v63 = vadd.f32 1.0, %v12830_v21  ;;  %v9853_v60 = vsub.f32 %v17078_v44, %v16134_v42  ;;  %v9851_v23 = vsub.f32 %v17079_v37, %v16134_v42 }
 0xaed   : > { %10470 = vst.msk [vmem:[%s16364_s21 + $0x90] sm:$0xff] %vm390_vm7, %v10438_v25  ;;  %12843 = vrcp.f32 %v10081_v4  ;;  %v11001_v28 = vmul.f32 -1.442695, %v16556_v45  ;;  %v9920_v12 = vmul.f32 %v16151_v33, %v9884_v7  ;;  %v9854_v24 = vsub.f32 %v17080_v31, %v16134_v42 }
 0xaee   : > { %v12832_v3 = vpop.eup %12831  ;;  %10468 = vst.msk [vmem:[%s16364_s21 + $0x80] sm:$0xff] %vm390_vm7, %v10436_v43  ;;  %12845 = vrcp.f32 %v10079_v63  ;;  %v9889_v17 = vmul.f32 %v16138_v34, %v9853_v60  ;;  %v9887_v51 = vmul.f32 %v16138_v34, %v9851_v23  ;;  %v10361_v35 = vadd.f32 %v16236_v2, %v16375_v29  ;;  %v17081_v29 = vld [vmem:[#allocation15_spill] sm:$0xff] }
 0xaef   : > { %v12834_v36 = vpop.eup %12833  ;;  %v10174_v6 = vmul.f32 %v12832_v3, %v16405_v41  ;;  %12847 = vpow2.f32 %v11001_v28  ;;  %v16579_v55 = vadd.f32 %v16169_v39, %v9920_v12  ;;  %v9890_v49 = vmul.f32 %v16138_v34, %v9854_v24 }
 0xaf0   : > { %v10082_v46 = vadd.f32 1.0, %v12834_v36  ;;  %v9925_v41 = vmul.f32 %v16151_v33, %v9889_v17  ;;  %v9923_v13 = vmul.f32 %v16151_v33, %v9887_v51  ;;  %v9852_v9 = vsub.f32 %v17081_v29, %v16134_v42 }
 0xaf1   : > { %v12836_v20 = vpop.eup %12835  ;;  %v10439_v30 = vadd.f32 %v10369_v47, %v10174_v6  ;;  %v10999_v61 = vmul.f32 -1.442695, %v16579_v55  ;;  %v9926_v56 = vmul.f32 %v16151_v33, %v9890_v49  ;;  %v10382_v7 = vadd.f32 %v16407_v16, %v16236_v2 }
 0xaf2   : > { %v12838_v1 = vpop.eup %12837  ;;  %v10172_v5 = vmul.f32 %v12836_v20, %v16431_v48  ;;  %12849 = vrcp.f32 %v10082_v46  ;;  %v16591_v26 = vadd.f32 %v16169_v39, %v9925_v41  ;;  %v16594_v53 = vadd.f32 %v16169_v39, %v9923_v13 }
 0xaf3   : > { %v12840_v14 = vpop.eup %12839  ;;  %10471 = vst.msk [vmem:[%s16364_s21 + $0x98] sm:$0xff] %vm390_vm7, %v10439_v30  ;;  %v10080_v58 = vadd.f32 1.0, %v12838_v1  ;;  %12851 = vpow2.f32 %v10999_v61  ;;  %v9888_v25 = vmul.f32 %v16138_v34, %v9852_v9  ;;  %v16601_v63 = vadd.f32 %v16169_v39, %v9926_v56 }
 0xaf4   : > { %v10437_v48 = vadd.f32 %v10361_v35, %v10172_v5  ;;  %v10085_v21 = vadd.f32 1.0, %v12840_v14  ;;  %v12842_v4 = vpop.eup %12841  ;;  %v11004_v42 = vmul.f32 -1.442695, %v16591_v26  ;;  %v11002_v43 = vmul.f32 -1.442695, %v16594_v53 }
 0xaf5   : > { %12853 = vrcp.f32 %v10080_v58  ;;  %v10083_v11 = vadd.f32 1.0, %v12842_v4  ;;  %v9924_v47 = vmul.f32 %v16151_v33, %v9888_v25  ;;  %v10374_v34 = vadd.f32 %v16236_v2, %v16415_v40 }
 0xaf6   : > { %10469 = vst.msk [vmem:[%s16364_s21 + $0x88] sm:$0xff] %vm390_vm7, %v10437_v48  ;;  %12855 = vrcp.f32 %v10085_v21  ;;  %v11005_v60 = vmul.f32 -1.442695, %v16601_v63  ;;  %v10385_v36 = vadd.f32 %v16426_v18, %v16236_v2  ;;  %v10398_v18 = vadd.f32 %v16457_v27, %v16236_v2 }
 0xaf7   : > { %v12844_v44 = vpop.eup %12843  ;;  %12857 = vpow2.f32 %v11004_v42  ;;  %v16613_v3 = vadd.f32 %v16169_v39, %v9924_v47  ;;  %v10390_v30 = vadd.f32 %v16236_v2, %v16466_v0  ;;  %v10401_v29 = vadd.f32 %v16472_v15, %v16236_v2 }
 0xaf8   : > { %v12846_v37 = vpop.eup %12845  ;;  %v10177_v23 = vmul.f32 %v12844_v44, %v16452_v54  ;;  %12859 = vrcp.f32 %v10083_v11  ;;  %v10393_v56 = vadd.f32 %v16236_v2, %v16480_v10  ;;  %v10414_v21 = vadd.f32 %v16506_v32, %v16236_v2 }
 0xaf9   : > { %v10175_v16 = vmul.f32 %v12846_v37, %v16469_v38  ;;  %12861 = vpow2.f32 %v11002_v43  ;;  %v12848_v33 = vpop.eup %12847  ;;  %v11003_v40 = vmul.f32 -1.442695, %v16613_v3  ;;  %v10377_v38 = vadd.f32 %v16236_v2, %v16434_v19 }
 0xafa   : > { %v10442_v28 = vadd.f32 %v10382_v7, %v10177_v23  ;;  %12863 = vpow2.f32 %v11005_v60  ;;  %v10086_v6 = vadd.f32 1.0, %v12848_v33  ;;  %v10417_v10 = vadd.f32 %v16521_v59, %v16236_v2 }
 0xafb   : > { %v10440_v12 = vadd.f32 %v10374_v34, %v10175_v16  ;;  %12865 = vpow2.f32 %v11003_v40 }
 0xafc   : > { %v12850_v17 = vpop.eup %12849  ;;  %10474 = vst.msk [vmem:[%s16364_s21 + $0xb0] sm:$0xff] %vm390_vm7, %v10442_v28  ;;  %12867 = vrcp.f32 %v10086_v6 }
 0xafd   : > { %10472 = vst.msk [vmem:[%s16364_s21 + $0xa0] sm:$0xff] %vm390_vm7, %v10440_v12  ;;  %v10178_v39 = vmul.f32 %v12850_v17, %v16496_v50  ;;  %v12852_v54 = vpop.eup %12851 }
 0xafe   : > { %v10084_v24 = vadd.f32 1.0, %v12852_v54 }
 0xaff   : > { %v12854_v51 = vpop.eup %12853  ;;  %v10443_v31 = vadd.f32 %v10385_v36, %v10178_v39 }
 0xb00   : > { %v12856_v35 = vpop.eup %12855  ;;  %v10176_v46 = vmul.f32 %v12854_v51, %v16510_v62  ;;  %12869 = vrcp.f32 %v10084_v24 }
 0xb01   : > { %v12858_v20 = vpop.eup %12857  ;;  %10475 = vst.msk [vmem:[%s16364_s21 + $0xb8] sm:$0xff] %vm390_vm7, %v10443_v31  ;;  %v10181_v50 = vmul.f32 %v12856_v35, %v16513_v22 }
 0xb02   : > { %v12860_v19 = vpop.eup %12859  ;;  %v10441_v41 = vadd.f32 %v10377_v38, %v10176_v46  ;;  %v10089_v13 = vadd.f32 1.0, %v12858_v20 }
 0xb03   : > { %v12862_v27 = vpop.eup %12861  ;;  %v10446_v49 = vadd.f32 %v10398_v18, %v10181_v50  ;;  %v10179_v1 = vmul.f32 %v12860_v19, %v16533_v8 }
 0xb04   : > { %v12864_v5 = vpop.eup %12863  ;;  %10473 = vst.msk [vmem:[%s16364_s21 + $0xa8] sm:$0xff] %vm390_vm7, %v10441_v41  ;;  %12871 = vrcp.f32 %v10089_v13  ;;  %v10087_v62 = vadd.f32 1.0, %v12862_v27 }
 0xb05   : > { %10478 = vst.msk [vmem:[%s16364_s21 + $0xd0] sm:$0xff] %vm390_vm7, %v10446_v49  ;;  %v10444_v22 = vadd.f32 %v10390_v30, %v10179_v1  ;;  %v10090_v61 = vadd.f32 1.0, %v12864_v5  ;;  %v12866_v0 = vpop.eup %12865 }
 0xb06   : > { %12873 = vrcp.f32 %v10087_v62  ;;  %v12868_v9 = vpop.eup %12867  ;;  %v10088_v8 = vadd.f32 1.0, %v12866_v0 }
 0xb07   : > { %10476 = vst.msk [vmem:[%s16364_s21 + $0xc0] sm:$0xff] %vm390_vm7, %v10444_v22  ;;  %12875 = vrcp.f32 %v10090_v61  ;;  %v10182_v14 = vmul.f32 %v12868_v9, %v16556_v45  ;;  %v10406_v45 = vadd.f32 %v16236_v2, %v16515_v57 }
 0xb08   : > { %12877 = vrcp.f32 %v10088_v8 }
 0xb09   : > { %v10447_v58 = vadd.f32 %v10401_v29, %v10182_v14 }
 0xb0a   : > { %v12870_v48 = vpop.eup %12869 }
 0xb0b   : > { %10479 = vst.msk [vmem:[%s16364_s21 + $0xd8] sm:$0xff] %vm390_vm7, %v10447_v58  ;;  %v10180_v15 = vmul.f32 %v12870_v48, %v16579_v55 }
 0xb0d   : > { %v10445_v4 = vadd.f32 %v10393_v56, %v10180_v15 }
 0xb0e   : > { %v12872_v25 = vpop.eup %12871 }
 0xb0f   : > { %v10185_v42 = vmul.f32 %v12872_v25, %v16591_v26  ;;  %10477 = vst.msk [vmem:[%s16364_s21 + $0xc8] sm:$0xff] %vm390_vm7, %v10445_v4  ;;  %v10409_v26 = vadd.f32 %v16236_v2, %v16527_v52 }
 0xb10   : > { %v12874_v43 = vpop.eup %12873 }
 0xb11   : > { %v12876_v55 = vpop.eup %12875  ;;  %v10450_v7 = vadd.f32 %v10414_v21, %v10185_v42  ;;  %v10183_v32 = vmul.f32 %v12874_v43, %v16594_v53 }
 0xb12   : > { %v10186_v11 = vmul.f32 %v12876_v55, %v16601_v63  ;;  %v12878_v47 = vpop.eup %12877 }
 0xb13   : > { %10482 = vst.msk [vmem:[%s16364_s21 + $0xf0] sm:$0xff] %vm390_vm7, %v10450_v7  ;;  %v10448_v57 = vadd.f32 %v10406_v45, %v10183_v32  ;;  %v10184_v34 = vmul.f32 %v12878_v47, %v16613_v3 }
 0xb14   : > { %v10451_v44 = vadd.f32 %v10417_v10, %v10186_v11 }
 0xb15   : > { %10480 = vst.msk [vmem:[%s16364_s21 + $0xe0] sm:$0xff] %vm390_vm7, %v10448_v57  ;;  %v10449_v59 = vadd.f32 %v10409_v26, %v10184_v34 }
 0xb16   : > { %10483 = vst.msk [vmem:[%s16364_s21 + $0xf8] sm:$0xff] %vm390_vm7, %v10451_v44 }
 0xb17   : > { %10481 = vst.msk [vmem:[%s16364_s21 + $0xe8] sm:$0xff] %vm390_vm7, %v10449_v59 }
 0xb18 PF: > { %s19_s30 = sadd.s32 1, %s12954_s30  }
 0xb19   : > { %p16_p4 = scmp.ge.s32.totalorder %s19_s30, 4  }
 0xb1b   :  { %18 = sbr.rel (!%p16_p4) target bundleno = 1 (0x1), region = 105 }

</bundles_post_ra>
